<compile_context>
chip_gen: v7x
topology: tpu7x:2x2x1
jax: 0.10.0
libtpu: 0.0.40
codegen_flags: <defaults>
</compile_context>

<pallas_src>
import jax
import jax.numpy as jnp
from jax.experimental import pallas as pl
from jax.experimental.pallas import tpu as pltpu

BN_EPS = 1e-5


# ----------------------------------------------------------------------------
# Fused Pallas kernel
# ----------------------------------------------------------------------------
def _deepcnn1d_kernel(x_ref, w1_ref, s1_ref, t1_ref,
                      wb_ref, sb_ref, tb_ref,
                      wf1_ref, bf1_ref, wf2_ref, bf2_ref,
                      o_ref,
                      pad1_ref, pad2_ref, im_ref):
    """Whole-network forward for the full batch in one kernel invocation.

    x_ref    : (N, L, C_in)              f32   input, channels last
    w1_ref   : (K1*C_in, C)              bf16  conv1 weight, im2col row = k*C_in + c
    s1/t1    : (1, C)                    f32   folded BN scale / shift (conv bias folded in)
    wb_ref   : (4, K2*C, C)              bf16  conv2..conv5 weights
    sb/tb    : (4, 1, C)                 f32   folded BN scale / shift per layer
    wf1/bf1  : (C, F), (1, F)            f32   fc1
    wf2/bf2  : (F, NC), (1, NC)          f32   fc2
    o_ref    : (N, NC)                   f32   logits
    pad1_ref : (N, L+K1-1, C_in)         f32   scratch: zero-padded conv1 input
    pad2_ref : (N, L+K2-1, C)            f32   scratch: zero-padded conv2..5 input
    im_ref   : (N, L, max(K1*C_in,K2*C)) bf16  scratch: im2col staging
    """
    N, L, C_in = x_ref.shape
    C = s1_ref.shape[-1]
    K1 = w1_ref.shape[0] // C_in
    K2 = wb_ref.shape[1] // C
    NL = N * L
    p1 = (K1 - 1) // 2
    p2 = (K2 - 1) // 2

    # Zero the scratches once; halos stay zero for every layer (same-padding
    # lives entirely in VMEM, no jnp.pad / HBM copies).
    pad1_ref[...] = jnp.zeros_like(pad1_ref)
    pad2_ref[...] = jnp.zeros_like(pad2_ref)
    im_ref[...] = jnp.zeros_like(im_ref)

    # -------- layer 1: Conv1d(C_in -> C, K=31, same) + BN + ReLU --------------
    pad1_ref[:, p1:p1 + L, :] = x_ref[...]
    for k in range(K1):                       # static unroll: build im2col columns
        im_ref[:, :, k * C_in:(k + 1) * C_in] = (
            pad1_ref[:, k:k + L, :].astype(jnp.bfloat16))
    im1 = im_ref[:, :, :K1 * C_in].reshape(NL, K1 * C_in)
    acc = jnp.dot(im1, w1_ref[...], preferred_element_type=jnp.float32)   # (NL, C)
    act = jnp.maximum(acc * s1_ref[...] + t1_ref[...], 0.0)               # f32 epilogue

    # -------- layers 2..5: Conv1d(C -> C, K=15, same) + BN + ReLU -------------
    for i in range(4):
        pad2_ref[:, p2:p2 + L, :] = act.reshape(N, L, C)
        for k in range(K2):
            im_ref[:, :, k * C:(k + 1) * C] = (
                pad2_ref[:, k:k + L, :].astype(jnp.bfloat16))
        im = im_ref[:, :, :K2 * C].reshape(NL, K2 * C)
        acc = jnp.dot(im, wb_ref[i], preferred_element_type=jnp.float32)  # (NL, C)
        act = jnp.maximum(acc * sb_ref[i] + tb_ref[i], 0.0)

    # -------- global average pool over L + MLP head ---------------------------
    pooled = jnp.mean(act.reshape(N, L, C), axis=1)                       # (N, C)
    h = jnp.dot(pooled, wf1_ref[...], preferred_element_type=jnp.float32) + bf1_ref[...]
    h = jnp.maximum(h, 0.0)
    # Dropout(0.5) is identity at inference time.
    logits = jnp.dot(h, wf2_ref[...], preferred_element_type=jnp.float32) + bf2_ref[...]
    o_ref[...] = logits.astype(o_ref.dtype)


# ----------------------------------------------------------------------------
# Wrapper
# ----------------------------------------------------------------------------
def deepcnn1d_forward(params, x):
    """x: (N, C_in, L) float32 (PyTorch NCL layout). Returns (N, num_classes)."""
    N, C_in, L = x.shape
    C = params["s1"].shape[-1]
    K1 = params["w1"].shape[0] // C_in
    K2 = params["wb"].shape[1] // C
    num_classes = params["wf2"].shape[1]
    im_w = max(K1 * C_in, K2 * C)

    # Channels-last so channels are the lane dim and N*L are the matmul rows.
    x_nlc = jnp.transpose(x, (0, 2, 1))

    return pl.pallas_call(
        _deepcnn1d_kernel,
        out_shape=jax.ShapeDtypeStruct((N, num_classes), jnp.float32),
        in_specs=[pl.BlockSpec(memory_space=pltpu.MemorySpace.VMEM)] * 11,
        out_specs=pl.BlockSpec(memory_space=pltpu.MemorySpace.VMEM),
        scratch_shapes=[
            pltpu.VMEM((N, L + K1 - 1, C_in), jnp.float32),   # padded conv1 input
            pltpu.VMEM((N, L + K2 - 1, C), jnp.float32),      # padded conv2..5 input
            pltpu.VMEM((N, L, im_w), jnp.bfloat16),           # im2col staging
        ],
    )(x_nlc, params["w1"], params["s1"], params["t1"],
      params["wb"], params["sb"], params["tb"],
      params["wf1"], params["bf1"], params["wf2"], params["bf2"])


forward = jax.jit(deepcnn1d_forward)


# ----------------------------------------------------------------------------
# Parameters (deterministic synthetic init, BN folded, im2col weight layout)
# ----------------------------------------------------------------------------
def init_params(key, num_channels=14, num_classes=4, hidden=64, fc_hidden=32,
                k1=31, k2=15):
    ks = iter(jax.random.split(key, 40))

    def conv_bn(K, c_in, c_out):
        std = 1.0 / jnp.sqrt(float(c_in * K))
        w = jax.random.normal(next(ks), (K, c_in, c_out), jnp.float32) * std
        b = 0.05 * jax.random.normal(next(ks), (c_out,), jnp.float32)
        gamma = 1.0 + 0.1 * jax.random.normal(next(ks), (c_out,), jnp.float32)
        beta = 0.1 * jax.random.normal(next(ks), (c_out,), jnp.float32)
        mean = 0.1 * jax.random.normal(next(ks), (c_out,), jnp.float32)
        var = 1.0 + 0.1 * jax.random.uniform(next(ks), (c_out,), jnp.float32)
        scale = gamma / jnp.sqrt(var + BN_EPS)
        shift = beta + scale * (b - mean)
        w_mat = w.reshape(K * c_in, c_out).astype(jnp.bfloat16)   # im2col layout, bf16
        return w_mat, scale.reshape(1, c_out), shift.reshape(1, c_out)

    w1, s1, t1 = conv_bn(k1, num_channels, hidden)                # conv1 + bn1
    wb, sb, tb = [], [], []
    for _ in range(4):                                            # 2 blocks = 4 conv+bn
        w, s, t = conv_bn(k2, hidden, hidden)
        wb.append(w); sb.append(s); tb.append(t)
    wb = jnp.stack(wb); sb = jnp.stack(sb); tb = jnp.stack(tb)

    wf1 = jax.random.normal(next(ks), (hidden, fc_hidden), jnp.float32) / jnp.sqrt(float(hidden))
    bf1 = 0.05 * jax.random.normal(next(ks), (1, fc_hidden), jnp.float32)
    wf2 = jax.random.normal(next(ks), (fc_hidden, num_classes), jnp.float32) / jnp.sqrt(float(fc_hidden))
    bf2 = 0.05 * jax.random.normal(next(ks), (1, num_classes), jnp.float32)
    return dict(w1=w1, s1=s1, t1=t1, wb=wb, sb=sb, tb=tb,
                wf1=wf1, bf1=bf1, wf2=wf2, bf2=bf2)


# ----------------------------------------------------------------------------
# Plain-JAX reference (same math / same bf16 rounding, outside Pallas)
# ----------------------------------------------------------------------------
def _conv_bn_relu_ref(x_nlc, w_mat, scale, shift, K):
    N, L, c_in = x_nlc.shape
    pad = (K - 1) // 2
    xp = jnp.pad(x_nlc, ((0, 0), (pad, pad), (0, 0)))
    cols = [xp[:, k:k + L, :].reshape(N * L, c_in) for k in range(K)]
    im2col = jnp.concatenate(cols, axis=1).astype(jnp.bfloat16)
    y = jnp.dot(im2col, w_mat, preferred_element_type=jnp.float32)
    y = jnp.maximum(y * scale + shift, 0.0)
    return y.reshape(N, L, -1)


def reference_forward(params, x):
    N, C_in, L = x.shape
    C = params["s1"].shape[-1]
    K1 = params["w1"].shape[0] // C_in
    K2 = params["wb"].shape[1] // C
    h = jnp.transpose(x, (0, 2, 1))
    h = _conv_bn_relu_ref(h, params["w1"], params["s1"], params["t1"], K1)
    for i in range(4):
        h = _conv_bn_relu_ref(h, params["wb"][i], params["sb"][i], params["tb"][i], K2)
    pooled = jnp.mean(h, axis=1)
    z = jnp.maximum(pooled @ params["wf1"] + params["bf1"], 0.0)
    return z @ params["wf2"] + params["bf2"]


# ----------------------------------------------------------------------------
if __name__ == "__main__":
    key = jax.random.PRNGKey(0)
    k_x, k_p = jax.random.split(key)

    N, C_in, L = 2, 14, 32          # small shapes consistent with DeepCNN1D(num_channels=14)
    num_classes = 4

    x = jax.random.normal(k_x, (N, C_in, L), jnp.float32)
    params = init_params(k_p, num_channels=C_in, num_classes=num_classes)

    out = jax.block_until_ready(forward(params, x))
    ref = reference_forward(params, x)

    assert out.shape == (N, num_classes), out.shape
    if not jnp.allclose(out, ref, rtol=2e-2, atol=2e-2):
        raise AssertionError("Pallas output mismatch vs JAX reference")

    print("KERNEL_OK")
</pallas_src>

<mosaic_0001>
module attributes {stable_mosaic.version = 11 : i64} {
  func.func @_deepcnn1d_kernel(%arg0: memref<2x32x14xf32, #tpu.memory_space<vmem>>, %arg1: memref<434x64xbf16, #tpu.memory_space<vmem>>, %arg2: memref<1x64xf32, #tpu.memory_space<vmem>>, %arg3: memref<1x64xf32, #tpu.memory_space<vmem>>, %arg4: memref<4x960x64xbf16, #tpu.memory_space<vmem>>, %arg5: memref<4x1x64xf32, #tpu.memory_space<vmem>>, %arg6: memref<4x1x64xf32, #tpu.memory_space<vmem>>, %arg7: memref<64x32xf32, #tpu.memory_space<vmem>>, %arg8: memref<1x32xf32, #tpu.memory_space<vmem>>, %arg9: memref<32x4xf32, #tpu.memory_space<vmem>>, %arg10: memref<1x4xf32, #tpu.memory_space<vmem>>, %arg11: memref<2x4xf32, #tpu.memory_space<vmem>>, %arg12: memref<2x62x14xf32, #tpu.memory_space<vmem>>, %arg13: memref<2x46x64xf32, #tpu.memory_space<vmem>>, %arg14: memref<2x32x960xbf16, #tpu.memory_space<vmem>>) attributes {dimension_semantics = [], scalar_prefetch = 0 : i64, scratch_operands = 3 : i64, tpu.core_type = #tpu.core_type<tc>} {
    %cst = arith.constant 0.000000e+00 : f32
    %0 = vector.broadcast %cst : f32 to vector<2x62x14xf32>
    %c0 = arith.constant 0 : index
    %c0_0 = arith.constant 0 : index
    %c0_1 = arith.constant 0 : index
    %1 = vector.load %arg12[%c0, %c0_0, %c0_1] : memref<2x62x14xf32, #tpu.memory_space<vmem>>, vector<2x62x14xf32>
    tpu.vector_store %arg12[%c0, %c0_0, %c0_1], %0 {strides = array<i32>} : memref<2x62x14xf32, #tpu.memory_space<vmem>>, vector<2x62x14xf32>,
    %cst_2 = arith.constant 0.000000e+00 : f32
    %2 = vector.broadcast %cst_2 : f32 to vector<2x46x64xf32>
    %c0_3 = arith.constant 0 : index
    %c0_4 = arith.constant 0 : index
    %c0_5 = arith.constant 0 : index
    %3 = vector.load %arg13[%c0_3, %c0_4, %c0_5] : memref<2x46x64xf32, #tpu.memory_space<vmem>>, vector<2x46x64xf32>
    tpu.vector_store %arg13[%c0_3, %c0_4, %c0_5], %2 {strides = array<i32>} : memref<2x46x64xf32, #tpu.memory_space<vmem>>, vector<2x46x64xf32>,
    %cst_6 = arith.constant 0.000000e+00 : bf16
    %4 = vector.broadcast %cst_6 : bf16 to vector<2x32x960xbf16>
    %c0_7 = arith.constant 0 : index
    %c0_8 = arith.constant 0 : index
    %c0_9 = arith.constant 0 : index
    %5 = vector.load %arg14[%c0_7, %c0_8, %c0_9] : memref<2x32x960xbf16, #tpu.memory_space<vmem>>, vector<2x32x960xbf16>
    tpu.vector_store %arg14[%c0_7, %c0_8, %c0_9], %4 {strides = array<i32>} : memref<2x32x960xbf16, #tpu.memory_space<vmem>>, vector<2x32x960xbf16>,
    %c0_10 = arith.constant 0 : index
    %c0_11 = arith.constant 0 : index
    %c0_12 = arith.constant 0 : index
    %6 = vector.load %arg0[%c0_10, %c0_11, %c0_12] : memref<2x32x14xf32, #tpu.memory_space<vmem>>, vector<2x32x14xf32>
    %c0_13 = arith.constant 0 : index
    %c15 = arith.constant 15 : index
    %c0_14 = arith.constant 0 : index
    %7 = vector.load %arg12[%c0_13, %c15, %c0_14] : memref<2x62x14xf32, #tpu.memory_space<vmem>>, vector<2x32x14xf32>
    tpu.vector_store %arg12[%c0_13, %c15, %c0_14], %6 {strides = array<i32>} : memref<2x62x14xf32, #tpu.memory_space<vmem>>, vector<2x32x14xf32>,
    %c0_15 = arith.constant 0 : index
    %c0_16 = arith.constant 0 : index
    %c0_17 = arith.constant 0 : index
    %8 = vector.load %arg12[%c0_15, %c0_16, %c0_17] : memref<2x62x14xf32, #tpu.memory_space<vmem>>, vector<2x32x14xf32>
    %9 = arith.truncf %8 : vector<2x32x14xf32> to vector<2x32x14xbf16>
    %c0_18 = arith.constant 0 : index
    %c0_19 = arith.constant 0 : index
    %c0_20 = arith.constant 0 : index
    %10 = vector.load %arg14[%c0_18, %c0_19, %c0_20] : memref<2x32x960xbf16, #tpu.memory_space<vmem>>, vector<2x32x14xbf16>
    tpu.vector_store %arg14[%c0_18, %c0_19, %c0_20], %9 {strides = array<i32>} : memref<2x32x960xbf16, #tpu.memory_space<vmem>>, vector<2x32x14xbf16>,
    %c0_21 = arith.constant 0 : index
    %c1 = arith.constant 1 : index
    %c0_22 = arith.constant 0 : index
    %11 = vector.load %arg12[%c0_21, %c1, %c0_22] : memref<2x62x14xf32, #tpu.memory_space<vmem>>, vector<2x32x14xf32>
    %12 = arith.truncf %11 : vector<2x32x14xf32> to vector<2x32x14xbf16>
    %c0_23 = arith.constant 0 : index
    %c0_24 = arith.constant 0 : index
    %c14 = arith.constant 14 : index
    %13 = vector.load %arg14[%c0_23, %c0_24, %c14] : memref<2x32x960xbf16, #tpu.memory_space<vmem>>, vector<2x32x14xbf16>
    tpu.vector_store %arg14[%c0_23, %c0_24, %c14], %12 {strides = array<i32>} : memref<2x32x960xbf16, #tpu.memory_space<vmem>>, vector<2x32x14xbf16>,
    %c0_25 = arith.constant 0 : index
    %c2 = arith.constant 2 : index
    %c0_26 = arith.constant 0 : index
    %14 = vector.load %arg12[%c0_25, %c2, %c0_26] : memref<2x62x14xf32, #tpu.memory_space<vmem>>, vector<2x32x14xf32>
    %15 = arith.truncf %14 : vector<2x32x14xf32> to vector<2x32x14xbf16>
    %c0_27 = arith.constant 0 : index
    %c0_28 = arith.constant 0 : index
    %c28 = arith.constant 28 : index
    %16 = vector.load %arg14[%c0_27, %c0_28, %c28] : memref<2x32x960xbf16, #tpu.memory_space<vmem>>, vector<2x32x14xbf16>
    tpu.vector_store %arg14[%c0_27, %c0_28, %c28], %15 {strides = array<i32>} : memref<2x32x960xbf16, #tpu.memory_space<vmem>>, vector<2x32x14xbf16>,
    %c0_29 = arith.constant 0 : index
    %c3 = arith.constant 3 : index
    %c0_30 = arith.constant 0 : index
    %17 = vector.load %arg12[%c0_29, %c3, %c0_30] : memref<2x62x14xf32, #tpu.memory_space<vmem>>, vector<2x32x14xf32>
    %18 = arith.truncf %17 : vector<2x32x14xf32> to vector<2x32x14xbf16>
    %c0_31 = arith.constant 0 : index
    %c0_32 = arith.constant 0 : index
    %c42 = arith.constant 42 : index
    %19 = vector.load %arg14[%c0_31, %c0_32, %c42] : memref<2x32x960xbf16, #tpu.memory_space<vmem>>, vector<2x32x14xbf16>
    tpu.vector_store %arg14[%c0_31, %c0_32, %c42], %18 {strides = array<i32>} : memref<2x32x960xbf16, #tpu.memory_space<vmem>>, vector<2x32x14xbf16>,
    %c0_33 = arith.constant 0 : index
    %c4 = arith.constant 4 : index
    %c0_34 = arith.constant 0 : index
    %20 = vector.load %arg12[%c0_33, %c4, %c0_34] : memref<2x62x14xf32, #tpu.memory_space<vmem>>, vector<2x32x14xf32>
    %21 = arith.truncf %20 : vector<2x32x14xf32> to vector<2x32x14xbf16>
    %c0_35 = arith.constant 0 : index
    %c0_36 = arith.constant 0 : index
    %c56 = arith.constant 56 : index
    %22 = vector.load %arg14[%c0_35, %c0_36, %c56] : memref<2x32x960xbf16, #tpu.memory_space<vmem>>, vector<2x32x14xbf16>
    tpu.vector_store %arg14[%c0_35, %c0_36, %c56], %21 {strides = array<i32>} : memref<2x32x960xbf16, #tpu.memory_space<vmem>>, vector<2x32x14xbf16>,
    %c0_37 = arith.constant 0 : index
    %c5 = arith.constant 5 : index
    %c0_38 = arith.constant 0 : index
    %23 = vector.load %arg12[%c0_37, %c5, %c0_38] : memref<2x62x14xf32, #tpu.memory_space<vmem>>, vector<2x32x14xf32>
    %24 = arith.truncf %23 : vector<2x32x14xf32> to vector<2x32x14xbf16>
    %c0_39 = arith.constant 0 : index
    %c0_40 = arith.constant 0 : index
    %c70 = arith.constant 70 : index
    %25 = vector.load %arg14[%c0_39, %c0_40, %c70] : memref<2x32x960xbf16, #tpu.memory_space<vmem>>, vector<2x32x14xbf16>
    tpu.vector_store %arg14[%c0_39, %c0_40, %c70], %24 {strides = array<i32>} : memref<2x32x960xbf16, #tpu.memory_space<vmem>>, vector<2x32x14xbf16>,
    %c0_41 = arith.constant 0 : index
    %c6 = arith.constant 6 : index
    %c0_42 = arith.constant 0 : index
    %26 = vector.load %arg12[%c0_41, %c6, %c0_42] : memref<2x62x14xf32, #tpu.memory_space<vmem>>, vector<2x32x14xf32>
    %27 = arith.truncf %26 : vector<2x32x14xf32> to vector<2x32x14xbf16>
    %c0_43 = arith.constant 0 : index
    %c0_44 = arith.constant 0 : index
    %c84 = arith.constant 84 : index
    %28 = vector.load %arg14[%c0_43, %c0_44, %c84] : memref<2x32x960xbf16, #tpu.memory_space<vmem>>, vector<2x32x14xbf16>
    tpu.vector_store %arg14[%c0_43, %c0_44, %c84], %27 {strides = array<i32>} : memref<2x32x960xbf16, #tpu.memory_space<vmem>>, vector<2x32x14xbf16>,
    %c0_45 = arith.constant 0 : index
    %c7 = arith.constant 7 : index
    %c0_46 = arith.constant 0 : index
    %29 = vector.load %arg12[%c0_45, %c7, %c0_46] : memref<2x62x14xf32, #tpu.memory_space<vmem>>, vector<2x32x14xf32>
    %30 = arith.truncf %29 : vector<2x32x14xf32> to vector<2x32x14xbf16>
    %c0_47 = arith.constant 0 : index
    %c0_48 = arith.constant 0 : index
    %c98 = arith.constant 98 : index
    %31 = vector.load %arg14[%c0_47, %c0_48, %c98] : memref<2x32x960xbf16, #tpu.memory_space<vmem>>, vector<2x32x14xbf16>
    tpu.vector_store %arg14[%c0_47, %c0_48, %c98], %30 {strides = array<i32>} : memref<2x32x960xbf16, #tpu.memory_space<vmem>>, vector<2x32x14xbf16>,
    %c0_49 = arith.constant 0 : index
    %c8 = arith.constant 8 : index
    %c0_50 = arith.constant 0 : index
    %32 = vector.load %arg12[%c0_49, %c8, %c0_50] : memref<2x62x14xf32, #tpu.memory_space<vmem>>, vector<2x32x14xf32>
    %33 = arith.truncf %32 : vector<2x32x14xf32> to vector<2x32x14xbf16>
    %c0_51 = arith.constant 0 : index
    %c0_52 = arith.constant 0 : index
    %c112 = arith.constant 112 : index
    %34 = vector.load %arg14[%c0_51, %c0_52, %c112] : memref<2x32x960xbf16, #tpu.memory_space<vmem>>, vector<2x32x14xbf16>
    tpu.vector_store %arg14[%c0_51, %c0_52, %c112], %33 {strides = array<i32>} : memref<2x32x960xbf16, #tpu.memory_space<vmem>>, vector<2x32x14xbf16>,
    %c0_53 = arith.constant 0 : index
    %c9 = arith.constant 9 : index
    %c0_54 = arith.constant 0 : index
    %35 = vector.load %arg12[%c0_53, %c9, %c0_54] : memref<2x62x14xf32, #tpu.memory_space<vmem>>, vector<2x32x14xf32>
    %36 = arith.truncf %35 : vector<2x32x14xf32> to vector<2x32x14xbf16>
    %c0_55 = arith.constant 0 : index
    %c0_56 = arith.constant 0 : index
    %c126 = arith.constant 126 : index
    %37 = vector.load %arg14[%c0_55, %c0_56, %c126] : memref<2x32x960xbf16, #tpu.memory_space<vmem>>, vector<2x32x14xbf16>
    tpu.vector_store %arg14[%c0_55, %c0_56, %c126], %36 {strides = array<i32>} : memref<2x32x960xbf16, #tpu.memory_space<vmem>>, vector<2x32x14xbf16>,
    %c0_57 = arith.constant 0 : index
    %c10 = arith.constant 10 : index
    %c0_58 = arith.constant 0 : index
    %38 = vector.load %arg12[%c0_57, %c10, %c0_58] : memref<2x62x14xf32, #tpu.memory_space<vmem>>, vector<2x32x14xf32>
    %39 = arith.truncf %38 : vector<2x32x14xf32> to vector<2x32x14xbf16>
    %c0_59 = arith.constant 0 : index
    %c0_60 = arith.constant 0 : index
    %c140 = arith.constant 140 : index
    %40 = vector.load %arg14[%c0_59, %c0_60, %c140] : memref<2x32x960xbf16, #tpu.memory_space<vmem>>, vector<2x32x14xbf16>
    tpu.vector_store %arg14[%c0_59, %c0_60, %c140], %39 {strides = array<i32>} : memref<2x32x960xbf16, #tpu.memory_space<vmem>>, vector<2x32x14xbf16>,
    %c0_61 = arith.constant 0 : index
    %c11 = arith.constant 11 : index
    %c0_62 = arith.constant 0 : index
    %41 = vector.load %arg12[%c0_61, %c11, %c0_62] : memref<2x62x14xf32, #tpu.memory_space<vmem>>, vector<2x32x14xf32>
    %42 = arith.truncf %41 : vector<2x32x14xf32> to vector<2x32x14xbf16>
    %c0_63 = arith.constant 0 : index
    %c0_64 = arith.constant 0 : index
    %c154 = arith.constant 154 : index
    %43 = vector.load %arg14[%c0_63, %c0_64, %c154] : memref<2x32x960xbf16, #tpu.memory_space<vmem>>, vector<2x32x14xbf16>
    tpu.vector_store %arg14[%c0_63, %c0_64, %c154], %42 {strides = array<i32>} : memref<2x32x960xbf16, #tpu.memory_space<vmem>>, vector<2x32x14xbf16>,
    %c0_65 = arith.constant 0 : index
    %c12 = arith.constant 12 : index
    %c0_66 = arith.constant 0 : index
    %44 = vector.load %arg12[%c0_65, %c12, %c0_66] : memref<2x62x14xf32, #tpu.memory_space<vmem>>, vector<2x32x14xf32>
    %45 = arith.truncf %44 : vector<2x32x14xf32> to vector<2x32x14xbf16>
    %c0_67 = arith.constant 0 : index
    %c0_68 = arith.constant 0 : index
    %c168 = arith.constant 168 : index
    %46 = vector.load %arg14[%c0_67, %c0_68, %c168] : memref<2x32x960xbf16, #tpu.memory_space<vmem>>, vector<2x32x14xbf16>
    tpu.vector_store %arg14[%c0_67, %c0_68, %c168], %45 {strides = array<i32>} : memref<2x32x960xbf16, #tpu.memory_space<vmem>>, vector<2x32x14xbf16>,
    %c0_69 = arith.constant 0 : index
    %c13 = arith.constant 13 : index
    %c0_70 = arith.constant 0 : index
    %47 = vector.load %arg12[%c0_69, %c13, %c0_70] : memref<2x62x14xf32, #tpu.memory_space<vmem>>, vector<2x32x14xf32>
    %48 = arith.truncf %47 : vector<2x32x14xf32> to vector<2x32x14xbf16>
    %c0_71 = arith.constant 0 : index
    %c0_72 = arith.constant 0 : index
    %c182 = arith.constant 182 : index
    %49 = vector.load %arg14[%c0_71, %c0_72, %c182] : memref<2x32x960xbf16, #tpu.memory_space<vmem>>, vector<2x32x14xbf16>
    tpu.vector_store %arg14[%c0_71, %c0_72, %c182], %48 {strides = array<i32>} : memref<2x32x960xbf16, #tpu.memory_space<vmem>>, vector<2x32x14xbf16>,
    %c0_73 = arith.constant 0 : index
    %c14_74 = arith.constant 14 : index
    %c0_75 = arith.constant 0 : index
    %50 = vector.load %arg12[%c0_73, %c14_74, %c0_75] : memref<2x62x14xf32, #tpu.memory_space<vmem>>, vector<2x32x14xf32>
    %51 = arith.truncf %50 : vector<2x32x14xf32> to vector<2x32x14xbf16>
    %c0_76 = arith.constant 0 : index
    %c0_77 = arith.constant 0 : index
    %c196 = arith.constant 196 : index
    %52 = vector.load %arg14[%c0_76, %c0_77, %c196] : memref<2x32x960xbf16, #tpu.memory_space<vmem>>, vector<2x32x14xbf16>
    tpu.vector_store %arg14[%c0_76, %c0_77, %c196], %51 {strides = array<i32>} : memref<2x32x960xbf16, #tpu.memory_space<vmem>>, vector<2x32x14xbf16>,
    %c0_78 = arith.constant 0 : index
    %c15_79 = arith.constant 15 : index
    %c0_80 = arith.constant 0 : index
    %53 = vector.load %arg12[%c0_78, %c15_79, %c0_80] : memref<2x62x14xf32, #tpu.memory_space<vmem>>, vector<2x32x14xf32>
    %54 = arith.truncf %53 : vector<2x32x14xf32> to vector<2x32x14xbf16>
    %c0_81 = arith.constant 0 : index
    %c0_82 = arith.constant 0 : index
    %c210 = arith.constant 210 : index
    %55 = vector.load %arg14[%c0_81, %c0_82, %c210] : memref<2x32x960xbf16, #tpu.memory_space<vmem>>, vector<2x32x14xbf16>
    tpu.vector_store %arg14[%c0_81, %c0_82, %c210], %54 {strides = array<i32>} : memref<2x32x960xbf16, #tpu.memory_space<vmem>>, vector<2x32x14xbf16>,
    %c0_83 = arith.constant 0 : index
    %c16 = arith.constant 16 : index
    %c0_84 = arith.constant 0 : index
    %56 = vector.load %arg12[%c0_83, %c16, %c0_84] : memref<2x62x14xf32, #tpu.memory_space<vmem>>, vector<2x32x14xf32>
    %57 = arith.truncf %56 : vector<2x32x14xf32> to vector<2x32x14xbf16>
    %c0_85 = arith.constant 0 : index
    %c0_86 = arith.constant 0 : index
    %c224 = arith.constant 224 : index
    %58 = vector.load %arg14[%c0_85, %c0_86, %c224] : memref<2x32x960xbf16, #tpu.memory_space<vmem>>, vector<2x32x14xbf16>
    tpu.vector_store %arg14[%c0_85, %c0_86, %c224], %57 {strides = array<i32>} : memref<2x32x960xbf16, #tpu.memory_space<vmem>>, vector<2x32x14xbf16>,
    %c0_87 = arith.constant 0 : index
    %c17 = arith.constant 17 : index
    %c0_88 = arith.constant 0 : index
    %59 = vector.load %arg12[%c0_87, %c17, %c0_88] : memref<2x62x14xf32, #tpu.memory_space<vmem>>, vector<2x32x14xf32>
    %60 = arith.truncf %59 : vector<2x32x14xf32> to vector<2x32x14xbf16>
    %c0_89 = arith.constant 0 : index
    %c0_90 = arith.constant 0 : index
    %c238 = arith.constant 238 : index
    %61 = vector.load %arg14[%c0_89, %c0_90, %c238] : memref<2x32x960xbf16, #tpu.memory_space<vmem>>, vector<2x32x14xbf16>
    tpu.vector_store %arg14[%c0_89, %c0_90, %c238], %60 {strides = array<i32>} : memref<2x32x960xbf16, #tpu.memory_space<vmem>>, vector<2x32x14xbf16>,
    %c0_91 = arith.constant 0 : index
    %c18 = arith.constant 18 : index
    %c0_92 = arith.constant 0 : index
    %62 = vector.load %arg12[%c0_91, %c18, %c0_92] : memref<2x62x14xf32, #tpu.memory_space<vmem>>, vector<2x32x14xf32>
    %63 = arith.truncf %62 : vector<2x32x14xf32> to vector<2x32x14xbf16>
    %c0_93 = arith.constant 0 : index
    %c0_94 = arith.constant 0 : index
    %c252 = arith.constant 252 : index
    %64 = vector.load %arg14[%c0_93, %c0_94, %c252] : memref<2x32x960xbf16, #tpu.memory_space<vmem>>, vector<2x32x14xbf16>
    tpu.vector_store %arg14[%c0_93, %c0_94, %c252], %63 {strides = array<i32>} : memref<2x32x960xbf16, #tpu.memory_space<vmem>>, vector<2x32x14xbf16>,
    %c0_95 = arith.constant 0 : index
    %c19 = arith.constant 19 : index
    %c0_96 = arith.constant 0 : index
    %65 = vector.load %arg12[%c0_95, %c19, %c0_96] : memref<2x62x14xf32, #tpu.memory_space<vmem>>, vector<2x32x14xf32>
    %66 = arith.truncf %65 : vector<2x32x14xf32> to vector<2x32x14xbf16>
    %c0_97 = arith.constant 0 : index
    %c0_98 = arith.constant 0 : index
    %c266 = arith.constant 266 : index
    %67 = vector.load %arg14[%c0_97, %c0_98, %c266] : memref<2x32x960xbf16, #tpu.memory_space<vmem>>, vector<2x32x14xbf16>
    tpu.vector_store %arg14[%c0_97, %c0_98, %c266], %66 {strides = array<i32>} : memref<2x32x960xbf16, #tpu.memory_space<vmem>>, vector<2x32x14xbf16>,
    %c0_99 = arith.constant 0 : index
    %c20 = arith.constant 20 : index
    %c0_100 = arith.constant 0 : index
    %68 = vector.load %arg12[%c0_99, %c20, %c0_100] : memref<2x62x14xf32, #tpu.memory_space<vmem>>, vector<2x32x14xf32>
    %69 = arith.truncf %68 : vector<2x32x14xf32> to vector<2x32x14xbf16>
    %c0_101 = arith.constant 0 : index
    %c0_102 = arith.constant 0 : index
    %c280 = arith.constant 280 : index
    %70 = vector.load %arg14[%c0_101, %c0_102, %c280] : memref<2x32x960xbf16, #tpu.memory_space<vmem>>, vector<2x32x14xbf16>
    tpu.vector_store %arg14[%c0_101, %c0_102, %c280], %69 {strides = array<i32>} : memref<2x32x960xbf16, #tpu.memory_space<vmem>>, vector<2x32x14xbf16>,
    %c0_103 = arith.constant 0 : index
    %c21 = arith.constant 21 : index
    %c0_104 = arith.constant 0 : index
    %71 = vector.load %arg12[%c0_103, %c21, %c0_104] : memref<2x62x14xf32, #tpu.memory_space<vmem>>, vector<2x32x14xf32>
    %72 = arith.truncf %71 : vector<2x32x14xf32> to vector<2x32x14xbf16>
    %c0_105 = arith.constant 0 : index
    %c0_106 = arith.constant 0 : index
    %c294 = arith.constant 294 : index
    %73 = vector.load %arg14[%c0_105, %c0_106, %c294] : memref<2x32x960xbf16, #tpu.memory_space<vmem>>, vector<2x32x14xbf16>
    tpu.vector_store %arg14[%c0_105, %c0_106, %c294], %72 {strides = array<i32>} : memref<2x32x960xbf16, #tpu.memory_space<vmem>>, vector<2x32x14xbf16>,
    %c0_107 = arith.constant 0 : index
    %c22 = arith.constant 22 : index
    %c0_108 = arith.constant 0 : index
    %74 = vector.load %arg12[%c0_107, %c22, %c0_108] : memref<2x62x14xf32, #tpu.memory_space<vmem>>, vector<2x32x14xf32>
    %75 = arith.truncf %74 : vector<2x32x14xf32> to vector<2x32x14xbf16>
    %c0_109 = arith.constant 0 : index
    %c0_110 = arith.constant 0 : index
    %c308 = arith.constant 308 : index
    %76 = vector.load %arg14[%c0_109, %c0_110, %c308] : memref<2x32x960xbf16, #tpu.memory_space<vmem>>, vector<2x32x14xbf16>
    tpu.vector_store %arg14[%c0_109, %c0_110, %c308], %75 {strides = array<i32>} : memref<2x32x960xbf16, #tpu.memory_space<vmem>>, vector<2x32x14xbf16>,
    %c0_111 = arith.constant 0 : index
    %c23 = arith.constant 23 : index
    %c0_112 = arith.constant 0 : index
    %77 = vector.load %arg12[%c0_111, %c23, %c0_112] : memref<2x62x14xf32, #tpu.memory_space<vmem>>, vector<2x32x14xf32>
    %78 = arith.truncf %77 : vector<2x32x14xf32> to vector<2x32x14xbf16>
    %c0_113 = arith.constant 0 : index
    %c0_114 = arith.constant 0 : index
    %c322 = arith.constant 322 : index
    %79 = vector.load %arg14[%c0_113, %c0_114, %c322] : memref<2x32x960xbf16, #tpu.memory_space<vmem>>, vector<2x32x14xbf16>
    tpu.vector_store %arg14[%c0_113, %c0_114, %c322], %78 {strides = array<i32>} : memref<2x32x960xbf16, #tpu.memory_space<vmem>>, vector<2x32x14xbf16>,
    %c0_115 = arith.constant 0 : index
    %c24 = arith.constant 24 : index
    %c0_116 = arith.constant 0 : index
    %80 = vector.load %arg12[%c0_115, %c24, %c0_116] : memref<2x62x14xf32, #tpu.memory_space<vmem>>, vector<2x32x14xf32>
    %81 = arith.truncf %80 : vector<2x32x14xf32> to vector<2x32x14xbf16>
    %c0_117 = arith.constant 0 : index
    %c0_118 = arith.constant 0 : index
    %c336 = arith.constant 336 : index
    %82 = vector.load %arg14[%c0_117, %c0_118, %c336] : memref<2x32x960xbf16, #tpu.memory_space<vmem>>, vector<2x32x14xbf16>
    tpu.vector_store %arg14[%c0_117, %c0_118, %c336], %81 {strides = array<i32>} : memref<2x32x960xbf16, #tpu.memory_space<vmem>>, vector<2x32x14xbf16>,
    %c0_119 = arith.constant 0 : index
    %c25 = arith.constant 25 : index
    %c0_120 = arith.constant 0 : index
    %83 = vector.load %arg12[%c0_119, %c25, %c0_120] : memref<2x62x14xf32, #tpu.memory_space<vmem>>, vector<2x32x14xf32>
    %84 = arith.truncf %83 : vector<2x32x14xf32> to vector<2x32x14xbf16>
    %c0_121 = arith.constant 0 : index
    %c0_122 = arith.constant 0 : index
    %c350 = arith.constant 350 : index
    %85 = vector.load %arg14[%c0_121, %c0_122, %c350] : memref<2x32x960xbf16, #tpu.memory_space<vmem>>, vector<2x32x14xbf16>
    tpu.vector_store %arg14[%c0_121, %c0_122, %c350], %84 {strides = array<i32>} : memref<2x32x960xbf16, #tpu.memory_space<vmem>>, vector<2x32x14xbf16>,
    %c0_123 = arith.constant 0 : index
    %c26 = arith.constant 26 : index
    %c0_124 = arith.constant 0 : index
    %86 = vector.load %arg12[%c0_123, %c26, %c0_124] : memref<2x62x14xf32, #tpu.memory_space<vmem>>, vector<2x32x14xf32>
    %87 = arith.truncf %86 : vector<2x32x14xf32> to vector<2x32x14xbf16>
    %c0_125 = arith.constant 0 : index
    %c0_126 = arith.constant 0 : index
    %c364 = arith.constant 364 : index
    %88 = vector.load %arg14[%c0_125, %c0_126, %c364] : memref<2x32x960xbf16, #tpu.memory_space<vmem>>, vector<2x32x14xbf16>
    tpu.vector_store %arg14[%c0_125, %c0_126, %c364], %87 {strides = array<i32>} : memref<2x32x960xbf16, #tpu.memory_space<vmem>>, vector<2x32x14xbf16>,
    %c0_127 = arith.constant 0 : index
    %c27 = arith.constant 27 : index
    %c0_128 = arith.constant 0 : index
    %89 = vector.load %arg12[%c0_127, %c27, %c0_128] : memref<2x62x14xf32, #tpu.memory_space<vmem>>, vector<2x32x14xf32>
    %90 = arith.truncf %89 : vector<2x32x14xf32> to vector<2x32x14xbf16>
    %c0_129 = arith.constant 0 : index
    %c0_130 = arith.constant 0 : index
    %c378 = arith.constant 378 : index
    %91 = vector.load %arg14[%c0_129, %c0_130, %c378] : memref<2x32x960xbf16, #tpu.memory_space<vmem>>, vector<2x32x14xbf16>
    tpu.vector_store %arg14[%c0_129, %c0_130, %c378], %90 {strides = array<i32>} : memref<2x32x960xbf16, #tpu.memory_space<vmem>>, vector<2x32x14xbf16>,
    %c0_131 = arith.constant 0 : index
    %c28_132 = arith.constant 28 : index
    %c0_133 = arith.constant 0 : index
    %92 = vector.load %arg12[%c0_131, %c28_132, %c0_133] : memref<2x62x14xf32, #tpu.memory_space<vmem>>, vector<2x32x14xf32>
    %93 = arith.truncf %92 : vector<2x32x14xf32> to vector<2x32x14xbf16>
    %c0_134 = arith.constant 0 : index
    %c0_135 = arith.constant 0 : index
    %c392 = arith.constant 392 : index
    %94 = vector.load %arg14[%c0_134, %c0_135, %c392] : memref<2x32x960xbf16, #tpu.memory_space<vmem>>, vector<2x32x14xbf16>
    tpu.vector_store %arg14[%c0_134, %c0_135, %c392], %93 {strides = array<i32>} : memref<2x32x960xbf16, #tpu.memory_space<vmem>>, vector<2x32x14xbf16>,
    %c0_136 = arith.constant 0 : index
    %c29 = arith.constant 29 : index
    %c0_137 = arith.constant 0 : index
    %95 = vector.load %arg12[%c0_136, %c29, %c0_137] : memref<2x62x14xf32, #tpu.memory_space<vmem>>, vector<2x32x14xf32>
    %96 = arith.truncf %95 : vector<2x32x14xf32> to vector<2x32x14xbf16>
    %c0_138 = arith.constant 0 : index
    %c0_139 = arith.constant 0 : index
    %c406 = arith.constant 406 : index
    %97 = vector.load %arg14[%c0_138, %c0_139, %c406] : memref<2x32x960xbf16, #tpu.memory_space<vmem>>, vector<2x32x14xbf16>
    tpu.vector_store %arg14[%c0_138, %c0_139, %c406], %96 {strides = array<i32>} : memref<2x32x960xbf16, #tpu.memory_space<vmem>>, vector<2x32x14xbf16>,
    %c0_140 = arith.constant 0 : index
    %c30 = arith.constant 30 : index
    %c0_141 = arith.constant 0 : index
    %98 = vector.load %arg12[%c0_140, %c30, %c0_141] : memref<2x62x14xf32, #tpu.memory_space<vmem>>, vector<2x32x14xf32>
    %99 = arith.truncf %98 : vector<2x32x14xf32> to vector<2x32x14xbf16>
    %c0_142 = arith.constant 0 : index
    %c0_143 = arith.constant 0 : index
    %c420 = arith.constant 420 : index
    %100 = vector.load %arg14[%c0_142, %c0_143, %c420] : memref<2x32x960xbf16, #tpu.memory_space<vmem>>, vector<2x32x14xbf16>
    tpu.vector_store %arg14[%c0_142, %c0_143, %c420], %99 {strides = array<i32>} : memref<2x32x960xbf16, #tpu.memory_space<vmem>>, vector<2x32x14xbf16>,
    %c0_144 = arith.constant 0 : index
    %c0_145 = arith.constant 0 : index
    %c0_146 = arith.constant 0 : index
    %101 = vector.load %arg14[%c0_144, %c0_145, %c0_146] : memref<2x32x960xbf16, #tpu.memory_space<vmem>>, vector<2x32x434xbf16>
    %102 = vector.shape_cast %101 : vector<2x32x434xbf16> to vector<64x434xbf16>
    %c0_147 = arith.constant 0 : index
    %c0_148 = arith.constant 0 : index
    %103 = vector.load %arg1[%c0_147, %c0_148] : memref<434x64xbf16, #tpu.memory_space<vmem>>, vector<434x64xbf16>
    %cst_149 = arith.constant dense<0.000000e+00> : vector<64x64xf32>
    %104 = tpu.matmul %102, %103, %cst_149 {dimension_numbers = #tpu.dot_dimension_numbers<[1], [0], [0], [1], [0, 0, 1, 1], [], []>} : vector<64x434xbf16>, vector<434x64xbf16>, vector<64x64xf32> -> vector<64x64xf32>
    %c0_150 = arith.constant 0 : index
    %c0_151 = arith.constant 0 : index
    %105 = vector.load %arg2[%c0_150, %c0_151] : memref<1x64xf32, #tpu.memory_space<vmem>>, vector<1x64xf32>
    %106 = vector.broadcast %105 : vector<1x64xf32> to vector<64x64xf32>
    %107 = arith.mulf %104, %106 : vector<64x64xf32>
    %c0_152 = arith.constant 0 : index
    %c0_153 = arith.constant 0 : index
    %108 = vector.load %arg3[%c0_152, %c0_153] : memref<1x64xf32, #tpu.memory_space<vmem>>, vector<1x64xf32>
    %109 = vector.broadcast %108 : vector<1x64xf32> to vector<64x64xf32>
    %110 = arith.addf %107, %109 : vector<64x64xf32>
    %cst_154 = arith.constant 0.000000e+00 : f32
    %111 = vector.broadcast %cst_154 : f32 to vector<64x64xf32>
    %112 = arith.maximumf %110, %111 : vector<64x64xf32>
    %113 = vector.shape_cast %112 : vector<64x64xf32> to vector<2x32x64xf32>
    %c0_155 = arith.constant 0 : index
    %c7_156 = arith.constant 7 : index
    %c0_157 = arith.constant 0 : index
    %114 = vector.load %arg13[%c0_155, %c7_156, %c0_157] : memref<2x46x64xf32, #tpu.memory_space<vmem>>, vector<2x32x64xf32>
    tpu.vector_store %arg13[%c0_155, %c7_156, %c0_157], %113 {strides = array<i32>} : memref<2x46x64xf32, #tpu.memory_space<vmem>>, vector<2x32x64xf32>,
    %c0_158 = arith.constant 0 : index
    %c0_159 = arith.constant 0 : index
    %c0_160 = arith.constant 0 : index
    %115 = vector.load %arg13[%c0_158, %c0_159, %c0_160] : memref<2x46x64xf32, #tpu.memory_space<vmem>>, vector<2x32x64xf32>
    %116 = arith.truncf %115 : vector<2x32x64xf32> to vector<2x32x64xbf16>
    %c0_161 = arith.constant 0 : index
    %c0_162 = arith.constant 0 : index
    %c0_163 = arith.constant 0 : index
    %117 = vector.load %arg14[%c0_161, %c0_162, %c0_163] : memref<2x32x960xbf16, #tpu.memory_space<vmem>>, vector<2x32x64xbf16>
    tpu.vector_store %arg14[%c0_161, %c0_162, %c0_163], %116 {strides = array<i32>} : memref<2x32x960xbf16, #tpu.memory_space<vmem>>, vector<2x32x64xbf16>,
    %c0_164 = arith.constant 0 : index
    %c1_165 = arith.constant 1 : index
    %c0_166 = arith.constant 0 : index
    %118 = vector.load %arg13[%c0_164, %c1_165, %c0_166] : memref<2x46x64xf32, #tpu.memory_space<vmem>>, vector<2x32x64xf32>
    %119 = arith.truncf %118 : vector<2x32x64xf32> to vector<2x32x64xbf16>
    %c0_167 = arith.constant 0 : index
    %c0_168 = arith.constant 0 : index
    %c64 = arith.constant 64 : index
    %120 = vector.load %arg14[%c0_167, %c0_168, %c64] : memref<2x32x960xbf16, #tpu.memory_space<vmem>>, vector<2x32x64xbf16>
    tpu.vector_store %arg14[%c0_167, %c0_168, %c64], %119 {strides = array<i32>} : memref<2x32x960xbf16, #tpu.memory_space<vmem>>, vector<2x32x64xbf16>,
    %c0_169 = arith.constant 0 : index
    %c2_170 = arith.constant 2 : index
    %c0_171 = arith.constant 0 : index
    %121 = vector.load %arg13[%c0_169, %c2_170, %c0_171] : memref<2x46x64xf32, #tpu.memory_space<vmem>>, vector<2x32x64xf32>
    %122 = arith.truncf %121 : vector<2x32x64xf32> to vector<2x32x64xbf16>
    %c0_172 = arith.constant 0 : index
    %c0_173 = arith.constant 0 : index
    %c128 = arith.constant 128 : index
    %123 = vector.load %arg14[%c0_172, %c0_173, %c128] : memref<2x32x960xbf16, #tpu.memory_space<vmem>>, vector<2x32x64xbf16>
    tpu.vector_store %arg14[%c0_172, %c0_173, %c128], %122 {strides = array<i32>} : memref<2x32x960xbf16, #tpu.memory_space<vmem>>, vector<2x32x64xbf16>,
    %c0_174 = arith.constant 0 : index
    %c3_175 = arith.constant 3 : index
    %c0_176 = arith.constant 0 : index
    %124 = vector.load %arg13[%c0_174, %c3_175, %c0_176] : memref<2x46x64xf32, #tpu.memory_space<vmem>>, vector<2x32x64xf32>
    %125 = arith.truncf %124 : vector<2x32x64xf32> to vector<2x32x64xbf16>
    %c0_177 = arith.constant 0 : index
    %c0_178 = arith.constant 0 : index
    %c192 = arith.constant 192 : index
    %126 = vector.load %arg14[%c0_177, %c0_178, %c192] : memref<2x32x960xbf16, #tpu.memory_space<vmem>>, vector<2x32x64xbf16>
    tpu.vector_store %arg14[%c0_177, %c0_178, %c192], %125 {strides = array<i32>} : memref<2x32x960xbf16, #tpu.memory_space<vmem>>, vector<2x32x64xbf16>,
    %c0_179 = arith.constant 0 : index
    %c4_180 = arith.constant 4 : index
    %c0_181 = arith.constant 0 : index
    %127 = vector.load %arg13[%c0_179, %c4_180, %c0_181] : memref<2x46x64xf32, #tpu.memory_space<vmem>>, vector<2x32x64xf32>
    %128 = arith.truncf %127 : vector<2x32x64xf32> to vector<2x32x64xbf16>
    %c0_182 = arith.constant 0 : index
    %c0_183 = arith.constant 0 : index
    %c256 = arith.constant 256 : index
    %129 = vector.load %arg14[%c0_182, %c0_183, %c256] : memref<2x32x960xbf16, #tpu.memory_space<vmem>>, vector<2x32x64xbf16>
    tpu.vector_store %arg14[%c0_182, %c0_183, %c256], %128 {strides = array<i32>} : memref<2x32x960xbf16, #tpu.memory_space<vmem>>, vector<2x32x64xbf16>,
    %c0_184 = arith.constant 0 : index
    %c5_185 = arith.constant 5 : index
    %c0_186 = arith.constant 0 : index
    %130 = vector.load %arg13[%c0_184, %c5_185, %c0_186] : memref<2x46x64xf32, #tpu.memory_space<vmem>>, vector<2x32x64xf32>
    %131 = arith.truncf %130 : vector<2x32x64xf32> to vector<2x32x64xbf16>
    %c0_187 = arith.constant 0 : index
    %c0_188 = arith.constant 0 : index
    %c320 = arith.constant 320 : index
    %132 = vector.load %arg14[%c0_187, %c0_188, %c320] : memref<2x32x960xbf16, #tpu.memory_space<vmem>>, vector<2x32x64xbf16>
    tpu.vector_store %arg14[%c0_187, %c0_188, %c320], %131 {strides = array<i32>} : memref<2x32x960xbf16, #tpu.memory_space<vmem>>, vector<2x32x64xbf16>,
    %c0_189 = arith.constant 0 : index
    %c6_190 = arith.constant 6 : index
    %c0_191 = arith.constant 0 : index
    %133 = vector.load %arg13[%c0_189, %c6_190, %c0_191] : memref<2x46x64xf32, #tpu.memory_space<vmem>>, vector<2x32x64xf32>
    %134 = arith.truncf %133 : vector<2x32x64xf32> to vector<2x32x64xbf16>
    %c0_192 = arith.constant 0 : index
    %c0_193 = arith.constant 0 : index
    %c384 = arith.constant 384 : index
    %135 = vector.load %arg14[%c0_192, %c0_193, %c384] : memref<2x32x960xbf16, #tpu.memory_space<vmem>>, vector<2x32x64xbf16>
    tpu.vector_store %arg14[%c0_192, %c0_193, %c384], %134 {strides = array<i32>} : memref<2x32x960xbf16, #tpu.memory_space<vmem>>, vector<2x32x64xbf16>,
    %c0_194 = arith.constant 0 : index
    %c7_195 = arith.constant 7 : index
    %c0_196 = arith.constant 0 : index
    %136 = vector.load %arg13[%c0_194, %c7_195, %c0_196] : memref<2x46x64xf32, #tpu.memory_space<vmem>>, vector<2x32x64xf32>
    %137 = arith.truncf %136 : vector<2x32x64xf32> to vector<2x32x64xbf16>
    %c0_197 = arith.constant 0 : index
    %c0_198 = arith.constant 0 : index
    %c448 = arith.constant 448 : index
    %138 = vector.load %arg14[%c0_197, %c0_198, %c448] : memref<2x32x960xbf16, #tpu.memory_space<vmem>>, vector<2x32x64xbf16>
    tpu.vector_store %arg14[%c0_197, %c0_198, %c448], %137 {strides = array<i32>} : memref<2x32x960xbf16, #tpu.memory_space<vmem>>, vector<2x32x64xbf16>,
    %c0_199 = arith.constant 0 : index
    %c8_200 = arith.constant 8 : index
    %c0_201 = arith.constant 0 : index
    %139 = vector.load %arg13[%c0_199, %c8_200, %c0_201] : memref<2x46x64xf32, #tpu.memory_space<vmem>>, vector<2x32x64xf32>
    %140 = arith.truncf %139 : vector<2x32x64xf32> to vector<2x32x64xbf16>
    %c0_202 = arith.constant 0 : index
    %c0_203 = arith.constant 0 : index
    %c512 = arith.constant 512 : index
    %141 = vector.load %arg14[%c0_202, %c0_203, %c512] : memref<2x32x960xbf16, #tpu.memory_space<vmem>>, vector<2x32x64xbf16>
    tpu.vector_store %arg14[%c0_202, %c0_203, %c512], %140 {strides = array<i32>} : memref<2x32x960xbf16, #tpu.memory_space<vmem>>, vector<2x32x64xbf16>,
    %c0_204 = arith.constant 0 : index
    %c9_205 = arith.constant 9 : index
    %c0_206 = arith.constant 0 : index
    %142 = vector.load %arg13[%c0_204, %c9_205, %c0_206] : memref<2x46x64xf32, #tpu.memory_space<vmem>>, vector<2x32x64xf32>
    %143 = arith.truncf %142 : vector<2x32x64xf32> to vector<2x32x64xbf16>
    %c0_207 = arith.constant 0 : index
    %c0_208 = arith.constant 0 : index
    %c576 = arith.constant 576 : index
    %144 = vector.load %arg14[%c0_207, %c0_208, %c576] : memref<2x32x960xbf16, #tpu.memory_space<vmem>>, vector<2x32x64xbf16>
    tpu.vector_store %arg14[%c0_207, %c0_208, %c576], %143 {strides = array<i32>} : memref<2x32x960xbf16, #tpu.memory_space<vmem>>, vector<2x32x64xbf16>,
    %c0_209 = arith.constant 0 : index
    %c10_210 = arith.constant 10 : index
    %c0_211 = arith.constant 0 : index
    %145 = vector.load %arg13[%c0_209, %c10_210, %c0_211] : memref<2x46x64xf32, #tpu.memory_space<vmem>>, vector<2x32x64xf32>
    %146 = arith.truncf %145 : vector<2x32x64xf32> to vector<2x32x64xbf16>
    %c0_212 = arith.constant 0 : index
    %c0_213 = arith.constant 0 : index
    %c640 = arith.constant 640 : index
    %147 = vector.load %arg14[%c0_212, %c0_213, %c640] : memref<2x32x960xbf16, #tpu.memory_space<vmem>>, vector<2x32x64xbf16>
    tpu.vector_store %arg14[%c0_212, %c0_213, %c640], %146 {strides = array<i32>} : memref<2x32x960xbf16, #tpu.memory_space<vmem>>, vector<2x32x64xbf16>,
    %c0_214 = arith.constant 0 : index
    %c11_215 = arith.constant 11 : index
    %c0_216 = arith.constant 0 : index
    %148 = vector.load %arg13[%c0_214, %c11_215, %c0_216] : memref<2x46x64xf32, #tpu.memory_space<vmem>>, vector<2x32x64xf32>
    %149 = arith.truncf %148 : vector<2x32x64xf32> to vector<2x32x64xbf16>
    %c0_217 = arith.constant 0 : index
    %c0_218 = arith.constant 0 : index
    %c704 = arith.constant 704 : index
    %150 = vector.load %arg14[%c0_217, %c0_218, %c704] : memref<2x32x960xbf16, #tpu.memory_space<vmem>>, vector<2x32x64xbf16>
    tpu.vector_store %arg14[%c0_217, %c0_218, %c704], %149 {strides = array<i32>} : memref<2x32x960xbf16, #tpu.memory_space<vmem>>, vector<2x32x64xbf16>,
    %c0_219 = arith.constant 0 : index
    %c12_220 = arith.constant 12 : index
    %c0_221 = arith.constant 0 : index
    %151 = vector.load %arg13[%c0_219, %c12_220, %c0_221] : memref<2x46x64xf32, #tpu.memory_space<vmem>>, vector<2x32x64xf32>
    %152 = arith.truncf %151 : vector<2x32x64xf32> to vector<2x32x64xbf16>
    %c0_222 = arith.constant 0 : index
    %c0_223 = arith.constant 0 : index
    %c768 = arith.constant 768 : index
    %153 = vector.load %arg14[%c0_222, %c0_223, %c768] : memref<2x32x960xbf16, #tpu.memory_space<vmem>>, vector<2x32x64xbf16>
    tpu.vector_store %arg14[%c0_222, %c0_223, %c768], %152 {strides = array<i32>} : memref<2x32x960xbf16, #tpu.memory_space<vmem>>, vector<2x32x64xbf16>,
    %c0_224 = arith.constant 0 : index
    %c13_225 = arith.constant 13 : index
    %c0_226 = arith.constant 0 : index
    %154 = vector.load %arg13[%c0_224, %c13_225, %c0_226] : memref<2x46x64xf32, #tpu.memory_space<vmem>>, vector<2x32x64xf32>
    %155 = arith.truncf %154 : vector<2x32x64xf32> to vector<2x32x64xbf16>
    %c0_227 = arith.constant 0 : index
    %c0_228 = arith.constant 0 : index
    %c832 = arith.constant 832 : index
    %156 = vector.load %arg14[%c0_227, %c0_228, %c832] : memref<2x32x960xbf16, #tpu.memory_space<vmem>>, vector<2x32x64xbf16>
    tpu.vector_store %arg14[%c0_227, %c0_228, %c832], %155 {strides = array<i32>} : memref<2x32x960xbf16, #tpu.memory_space<vmem>>, vector<2x32x64xbf16>,
    %c0_229 = arith.constant 0 : index
    %c14_230 = arith.constant 14 : index
    %c0_231 = arith.constant 0 : index
    %157 = vector.load %arg13[%c0_229, %c14_230, %c0_231] : memref<2x46x64xf32, #tpu.memory_space<vmem>>, vector<2x32x64xf32>
    %158 = arith.truncf %157 : vector<2x32x64xf32> to vector<2x32x64xbf16>
    %c0_232 = arith.constant 0 : index
    %c0_233 = arith.constant 0 : index
    %c896 = arith.constant 896 : index
    %159 = vector.load %arg14[%c0_232, %c0_233, %c896] : memref<2x32x960xbf16, #tpu.memory_space<vmem>>, vector<2x32x64xbf16>
    tpu.vector_store %arg14[%c0_232, %c0_233, %c896], %158 {strides = array<i32>} : memref<2x32x960xbf16, #tpu.memory_space<vmem>>, vector<2x32x64xbf16>,
    %c0_234 = arith.constant 0 : index
    %c0_235 = arith.constant 0 : index
    %c0_236 = arith.constant 0 : index
    %160 = vector.load %arg14[%c0_234, %c0_235, %c0_236] : memref<2x32x960xbf16, #tpu.memory_space<vmem>>, vector<2x32x960xbf16>
    %161 = vector.shape_cast %160 : vector<2x32x960xbf16> to vector<64x960xbf16>
    %c0_237 = arith.constant 0 : index
    %c0_238 = arith.constant 0 : index
    %c0_239 = arith.constant 0 : index
    %162 = vector.load %arg4[%c0_237, %c0_238, %c0_239] : memref<4x960x64xbf16, #tpu.memory_space<vmem>>, vector<1x960x64xbf16>
    %163 = vector.shape_cast %162 : vector<1x960x64xbf16> to vector<960x64xbf16>
    %cst_240 = arith.constant dense<0.000000e+00> : vector<64x64xf32>
    %164 = tpu.matmul %161, %163, %cst_240 {dimension_numbers = #tpu.dot_dimension_numbers<[1], [0], [0], [1], [0, 0, 1, 1], [], []>} : vector<64x960xbf16>, vector<960x64xbf16>, vector<64x64xf32> -> vector<64x64xf32>
    %c0_241 = arith.constant 0 : index
    %c0_242 = arith.constant 0 : index
    %c0_243 = arith.constant 0 : index
    %165 = vector.load %arg5[%c0_241, %c0_242, %c0_243] : memref<4x1x64xf32, #tpu.memory_space<vmem>>, vector<1x1x64xf32>
    %166 = vector.shape_cast %165 : vector<1x1x64xf32> to vector<1x64xf32>
    %167 = vector.broadcast %166 : vector<1x64xf32> to vector<64x64xf32>
    %168 = arith.mulf %164, %167 : vector<64x64xf32>
    %c0_244 = arith.constant 0 : index
    %c0_245 = arith.constant 0 : index
    %c0_246 = arith.constant 0 : index
    %169 = vector.load %arg6[%c0_244, %c0_245, %c0_246] : memref<4x1x64xf32, #tpu.memory_space<vmem>>, vector<1x1x64xf32>
    %170 = vector.shape_cast %169 : vector<1x1x64xf32> to vector<1x64xf32>
    %171 = vector.broadcast %170 : vector<1x64xf32> to vector<64x64xf32>
    %172 = arith.addf %168, %171 : vector<64x64xf32>
    %cst_247 = arith.constant 0.000000e+00 : f32
    %173 = vector.broadcast %cst_247 : f32 to vector<64x64xf32>
    %174 = arith.maximumf %172, %173 : vector<64x64xf32>
    %175 = vector.shape_cast %174 : vector<64x64xf32> to vector<2x32x64xf32>
    %c0_248 = arith.constant 0 : index
    %c7_249 = arith.constant 7 : index
    %c0_250 = arith.constant 0 : index
    %176 = vector.load %arg13[%c0_248, %c7_249, %c0_250] : memref<2x46x64xf32, #tpu.memory_space<vmem>>, vector<2x32x64xf32>
    tpu.vector_store %arg13[%c0_248, %c7_249, %c0_250], %175 {strides = array<i32>} : memref<2x46x64xf32, #tpu.memory_space<vmem>>, vector<2x32x64xf32>,
    %c0_251 = arith.constant 0 : index
    %c0_252 = arith.constant 0 : index
    %c0_253 = arith.constant 0 : index
    %177 = vector.load %arg13[%c0_251, %c0_252, %c0_253] : memref<2x46x64xf32, #tpu.memory_space<vmem>>, vector<2x32x64xf32>
    %178 = arith.truncf %177 : vector<2x32x64xf32> to vector<2x32x64xbf16>
    %c0_254 = arith.constant 0 : index
    %c0_255 = arith.constant 0 : index
    %c0_256 = arith.constant 0 : index
    %179 = vector.load %arg14[%c0_254, %c0_255, %c0_256] : memref<2x32x960xbf16, #tpu.memory_space<vmem>>, vector<2x32x64xbf16>
    tpu.vector_store %arg14[%c0_254, %c0_255, %c0_256], %178 {strides = array<i32>} : memref<2x32x960xbf16, #tpu.memory_space<vmem>>, vector<2x32x64xbf16>,
    %c0_257 = arith.constant 0 : index
    %c1_258 = arith.constant 1 : index
    %c0_259 = arith.constant 0 : index
    %180 = vector.load %arg13[%c0_257, %c1_258, %c0_259] : memref<2x46x64xf32, #tpu.memory_space<vmem>>, vector<2x32x64xf32>
    %181 = arith.truncf %180 : vector<2x32x64xf32> to vector<2x32x64xbf16>
    %c0_260 = arith.constant 0 : index
    %c0_261 = arith.constant 0 : index
    %c64_262 = arith.constant 64 : index
    %182 = vector.load %arg14[%c0_260, %c0_261, %c64_262] : memref<2x32x960xbf16, #tpu.memory_space<vmem>>, vector<2x32x64xbf16>
    tpu.vector_store %arg14[%c0_260, %c0_261, %c64_262], %181 {strides = array<i32>} : memref<2x32x960xbf16, #tpu.memory_space<vmem>>, vector<2x32x64xbf16>,
    %c0_263 = arith.constant 0 : index
    %c2_264 = arith.constant 2 : index
    %c0_265 = arith.constant 0 : index
    %183 = vector.load %arg13[%c0_263, %c2_264, %c0_265] : memref<2x46x64xf32, #tpu.memory_space<vmem>>, vector<2x32x64xf32>
    %184 = arith.truncf %183 : vector<2x32x64xf32> to vector<2x32x64xbf16>
    %c0_266 = arith.constant 0 : index
    %c0_267 = arith.constant 0 : index
    %c128_268 = arith.constant 128 : index
    %185 = vector.load %arg14[%c0_266, %c0_267, %c128_268] : memref<2x32x960xbf16, #tpu.memory_space<vmem>>, vector<2x32x64xbf16>
    tpu.vector_store %arg14[%c0_266, %c0_267, %c128_268], %184 {strides = array<i32>} : memref<2x32x960xbf16, #tpu.memory_space<vmem>>, vector<2x32x64xbf16>,
    %c0_269 = arith.constant 0 : index
    %c3_270 = arith.constant 3 : index
    %c0_271 = arith.constant 0 : index
    %186 = vector.load %arg13[%c0_269, %c3_270, %c0_271] : memref<2x46x64xf32, #tpu.memory_space<vmem>>, vector<2x32x64xf32>
    %187 = arith.truncf %186 : vector<2x32x64xf32> to vector<2x32x64xbf16>
    %c0_272 = arith.constant 0 : index
    %c0_273 = arith.constant 0 : index
    %c192_274 = arith.constant 192 : index
    %188 = vector.load %arg14[%c0_272, %c0_273, %c192_274] : memref<2x32x960xbf16, #tpu.memory_space<vmem>>, vector<2x32x64xbf16>
    tpu.vector_store %arg14[%c0_272, %c0_273, %c192_274], %187 {strides = array<i32>} : memref<2x32x960xbf16, #tpu.memory_space<vmem>>, vector<2x32x64xbf16>,
    %c0_275 = arith.constant 0 : index
    %c4_276 = arith.constant 4 : index
    %c0_277 = arith.constant 0 : index
    %189 = vector.load %arg13[%c0_275, %c4_276, %c0_277] : memref<2x46x64xf32, #tpu.memory_space<vmem>>, vector<2x32x64xf32>
    %190 = arith.truncf %189 : vector<2x32x64xf32> to vector<2x32x64xbf16>
    %c0_278 = arith.constant 0 : index
    %c0_279 = arith.constant 0 : index
    %c256_280 = arith.constant 256 : index
    %191 = vector.load %arg14[%c0_278, %c0_279, %c256_280] : memref<2x32x960xbf16, #tpu.memory_space<vmem>>, vector<2x32x64xbf16>
    tpu.vector_store %arg14[%c0_278, %c0_279, %c256_280], %190 {strides = array<i32>} : memref<2x32x960xbf16, #tpu.memory_space<vmem>>, vector<2x32x64xbf16>,
    %c0_281 = arith.constant 0 : index
    %c5_282 = arith.constant 5 : index
    %c0_283 = arith.constant 0 : index
    %192 = vector.load %arg13[%c0_281, %c5_282, %c0_283] : memref<2x46x64xf32, #tpu.memory_space<vmem>>, vector<2x32x64xf32>
    %193 = arith.truncf %192 : vector<2x32x64xf32> to vector<2x32x64xbf16>
    %c0_284 = arith.constant 0 : index
    %c0_285 = arith.constant 0 : index
    %c320_286 = arith.constant 320 : index
    %194 = vector.load %arg14[%c0_284, %c0_285, %c320_286] : memref<2x32x960xbf16, #tpu.memory_space<vmem>>, vector<2x32x64xbf16>
    tpu.vector_store %arg14[%c0_284, %c0_285, %c320_286], %193 {strides = array<i32>} : memref<2x32x960xbf16, #tpu.memory_space<vmem>>, vector<2x32x64xbf16>,
    %c0_287 = arith.constant 0 : index
    %c6_288 = arith.constant 6 : index
    %c0_289 = arith.constant 0 : index
    %195 = vector.load %arg13[%c0_287, %c6_288, %c0_289] : memref<2x46x64xf32, #tpu.memory_space<vmem>>, vector<2x32x64xf32>
    %196 = arith.truncf %195 : vector<2x32x64xf32> to vector<2x32x64xbf16>
    %c0_290 = arith.constant 0 : index
    %c0_291 = arith.constant 0 : index
    %c384_292 = arith.constant 384 : index
    %197 = vector.load %arg14[%c0_290, %c0_291, %c384_292] : memref<2x32x960xbf16, #tpu.memory_space<vmem>>, vector<2x32x64xbf16>
    tpu.vector_store %arg14[%c0_290, %c0_291, %c384_292], %196 {strides = array<i32>} : memref<2x32x960xbf16, #tpu.memory_space<vmem>>, vector<2x32x64xbf16>,
    %c0_293 = arith.constant 0 : index
    %c7_294 = arith.constant 7 : index
    %c0_295 = arith.constant 0 : index
    %198 = vector.load %arg13[%c0_293, %c7_294, %c0_295] : memref<2x46x64xf32, #tpu.memory_space<vmem>>, vector<2x32x64xf32>
    %199 = arith.truncf %198 : vector<2x32x64xf32> to vector<2x32x64xbf16>
    %c0_296 = arith.constant 0 : index
    %c0_297 = arith.constant 0 : index
    %c448_298 = arith.constant 448 : index
    %200 = vector.load %arg14[%c0_296, %c0_297, %c448_298] : memref<2x32x960xbf16, #tpu.memory_space<vmem>>, vector<2x32x64xbf16>
    tpu.vector_store %arg14[%c0_296, %c0_297, %c448_298], %199 {strides = array<i32>} : memref<2x32x960xbf16, #tpu.memory_space<vmem>>, vector<2x32x64xbf16>,
    %c0_299 = arith.constant 0 : index
    %c8_300 = arith.constant 8 : index
    %c0_301 = arith.constant 0 : index
    %201 = vector.load %arg13[%c0_299, %c8_300, %c0_301] : memref<2x46x64xf32, #tpu.memory_space<vmem>>, vector<2x32x64xf32>
    %202 = arith.truncf %201 : vector<2x32x64xf32> to vector<2x32x64xbf16>
    %c0_302 = arith.constant 0 : index
    %c0_303 = arith.constant 0 : index
    %c512_304 = arith.constant 512 : index
    %203 = vector.load %arg14[%c0_302, %c0_303, %c512_304] : memref<2x32x960xbf16, #tpu.memory_space<vmem>>, vector<2x32x64xbf16>
    tpu.vector_store %arg14[%c0_302, %c0_303, %c512_304], %202 {strides = array<i32>} : memref<2x32x960xbf16, #tpu.memory_space<vmem>>, vector<2x32x64xbf16>,
    %c0_305 = arith.constant 0 : index
    %c9_306 = arith.constant 9 : index
    %c0_307 = arith.constant 0 : index
    %204 = vector.load %arg13[%c0_305, %c9_306, %c0_307] : memref<2x46x64xf32, #tpu.memory_space<vmem>>, vector<2x32x64xf32>
    %205 = arith.truncf %204 : vector<2x32x64xf32> to vector<2x32x64xbf16>
    %c0_308 = arith.constant 0 : index
    %c0_309 = arith.constant 0 : index
    %c576_310 = arith.constant 576 : index
    %206 = vector.load %arg14[%c0_308, %c0_309, %c576_310] : memref<2x32x960xbf16, #tpu.memory_space<vmem>>, vector<2x32x64xbf16>
    tpu.vector_store %arg14[%c0_308, %c0_309, %c576_310], %205 {strides = array<i32>} : memref<2x32x960xbf16, #tpu.memory_space<vmem>>, vector<2x32x64xbf16>,
    %c0_311 = arith.constant 0 : index
    %c10_312 = arith.constant 10 : index
    %c0_313 = arith.constant 0 : index
    %207 = vector.load %arg13[%c0_311, %c10_312, %c0_313] : memref<2x46x64xf32, #tpu.memory_space<vmem>>, vector<2x32x64xf32>
    %208 = arith.truncf %207 : vector<2x32x64xf32> to vector<2x32x64xbf16>
    %c0_314 = arith.constant 0 : index
    %c0_315 = arith.constant 0 : index
    %c640_316 = arith.constant 640 : index
    %209 = vector.load %arg14[%c0_314, %c0_315, %c640_316] : memref<2x32x960xbf16, #tpu.memory_space<vmem>>, vector<2x32x64xbf16>
    tpu.vector_store %arg14[%c0_314, %c0_315, %c640_316], %208 {strides = array<i32>} : memref<2x32x960xbf16, #tpu.memory_space<vmem>>, vector<2x32x64xbf16>,
    %c0_317 = arith.constant 0 : index
    %c11_318 = arith.constant 11 : index
    %c0_319 = arith.constant 0 : index
    %210 = vector.load %arg13[%c0_317, %c11_318, %c0_319] : memref<2x46x64xf32, #tpu.memory_space<vmem>>, vector<2x32x64xf32>
    %211 = arith.truncf %210 : vector<2x32x64xf32> to vector<2x32x64xbf16>
    %c0_320 = arith.constant 0 : index
    %c0_321 = arith.constant 0 : index
    %c704_322 = arith.constant 704 : index
    %212 = vector.load %arg14[%c0_320, %c0_321, %c704_322] : memref<2x32x960xbf16, #tpu.memory_space<vmem>>, vector<2x32x64xbf16>
    tpu.vector_store %arg14[%c0_320, %c0_321, %c704_322], %211 {strides = array<i32>} : memref<2x32x960xbf16, #tpu.memory_space<vmem>>, vector<2x32x64xbf16>,
    %c0_323 = arith.constant 0 : index
    %c12_324 = arith.constant 12 : index
    %c0_325 = arith.constant 0 : index
    %213 = vector.load %arg13[%c0_323, %c12_324, %c0_325] : memref<2x46x64xf32, #tpu.memory_space<vmem>>, vector<2x32x64xf32>
    %214 = arith.truncf %213 : vector<2x32x64xf32> to vector<2x32x64xbf16>
    %c0_326 = arith.constant 0 : index
    %c0_327 = arith.constant 0 : index
    %c768_328 = arith.constant 768 : index
    %215 = vector.load %arg14[%c0_326, %c0_327, %c768_328] : memref<2x32x960xbf16, #tpu.memory_space<vmem>>, vector<2x32x64xbf16>
    tpu.vector_store %arg14[%c0_326, %c0_327, %c768_328], %214 {strides = array<i32>} : memref<2x32x960xbf16, #tpu.memory_space<vmem>>, vector<2x32x64xbf16>,
    %c0_329 = arith.constant 0 : index
    %c13_330 = arith.constant 13 : index
    %c0_331 = arith.constant 0 : index
    %216 = vector.load %arg13[%c0_329, %c13_330, %c0_331] : memref<2x46x64xf32, #tpu.memory_space<vmem>>, vector<2x32x64xf32>
    %217 = arith.truncf %216 : vector<2x32x64xf32> to vector<2x32x64xbf16>
    %c0_332 = arith.constant 0 : index
    %c0_333 = arith.constant 0 : index
    %c832_334 = arith.constant 832 : index
    %218 = vector.load %arg14[%c0_332, %c0_333, %c832_334] : memref<2x32x960xbf16, #tpu.memory_space<vmem>>, vector<2x32x64xbf16>
    tpu.vector_store %arg14[%c0_332, %c0_333, %c832_334], %217 {strides = array<i32>} : memref<2x32x960xbf16, #tpu.memory_space<vmem>>, vector<2x32x64xbf16>,
    %c0_335 = arith.constant 0 : index
    %c14_336 = arith.constant 14 : index
    %c0_337 = arith.constant 0 : index
    %219 = vector.load %arg13[%c0_335, %c14_336, %c0_337] : memref<2x46x64xf32, #tpu.memory_space<vmem>>, vector<2x32x64xf32>
    %220 = arith.truncf %219 : vector<2x32x64xf32> to vector<2x32x64xbf16>
    %c0_338 = arith.constant 0 : index
    %c0_339 = arith.constant 0 : index
    %c896_340 = arith.constant 896 : index
    %221 = vector.load %arg14[%c0_338, %c0_339, %c896_340] : memref<2x32x960xbf16, #tpu.memory_space<vmem>>, vector<2x32x64xbf16>
    tpu.vector_store %arg14[%c0_338, %c0_339, %c896_340], %220 {strides = array<i32>} : memref<2x32x960xbf16, #tpu.memory_space<vmem>>, vector<2x32x64xbf16>,
    %c0_341 = arith.constant 0 : index
    %c0_342 = arith.constant 0 : index
    %c0_343 = arith.constant 0 : index
    %222 = vector.load %arg14[%c0_341, %c0_342, %c0_343] : memref<2x32x960xbf16, #tpu.memory_space<vmem>>, vector<2x32x960xbf16>
    %223 = vector.shape_cast %222 : vector<2x32x960xbf16> to vector<64x960xbf16>
    %c1_344 = arith.constant 1 : index
    %c0_345 = arith.constant 0 : index
    %c0_346 = arith.constant 0 : index
    %224 = vector.load %arg4[%c1_344, %c0_345, %c0_346] : memref<4x960x64xbf16, #tpu.memory_space<vmem>>, vector<1x960x64xbf16>
    %225 = vector.shape_cast %224 : vector<1x960x64xbf16> to vector<960x64xbf16>
    %cst_347 = arith.constant dense<0.000000e+00> : vector<64x64xf32>
    %226 = tpu.matmul %223, %225, %cst_347 {dimension_numbers = #tpu.dot_dimension_numbers<[1], [0], [0], [1], [0, 0, 1, 1], [], []>} : vector<64x960xbf16>, vector<960x64xbf16>, vector<64x64xf32> -> vector<64x64xf32>
    %c1_348 = arith.constant 1 : index
    %c0_349 = arith.constant 0 : index
    %c0_350 = arith.constant 0 : index
    %227 = vector.load %arg5[%c1_348, %c0_349, %c0_350] : memref<4x1x64xf32, #tpu.memory_space<vmem>>, vector<1x1x64xf32>
    %228 = vector.shape_cast %227 : vector<1x1x64xf32> to vector<1x64xf32>
    %229 = vector.broadcast %228 : vector<1x64xf32> to vector<64x64xf32>
    %230 = arith.mulf %226, %229 : vector<64x64xf32>
    %c1_351 = arith.constant 1 : index
    %c0_352 = arith.constant 0 : index
    %c0_353 = arith.constant 0 : index
    %231 = vector.load %arg6[%c1_351, %c0_352, %c0_353] : memref<4x1x64xf32, #tpu.memory_space<vmem>>, vector<1x1x64xf32>
    %232 = vector.shape_cast %231 : vector<1x1x64xf32> to vector<1x64xf32>
    %233 = vector.broadcast %232 : vector<1x64xf32> to vector<64x64xf32>
    %234 = arith.addf %230, %233 : vector<64x64xf32>
    %cst_354 = arith.constant 0.000000e+00 : f32
    %235 = vector.broadcast %cst_354 : f32 to vector<64x64xf32>
    %236 = arith.maximumf %234, %235 : vector<64x64xf32>
    %237 = vector.shape_cast %236 : vector<64x64xf32> to vector<2x32x64xf32>
    %c0_355 = arith.constant 0 : index
    %c7_356 = arith.constant 7 : index
    %c0_357 = arith.constant 0 : index
    %238 = vector.load %arg13[%c0_355, %c7_356, %c0_357] : memref<2x46x64xf32, #tpu.memory_space<vmem>>, vector<2x32x64xf32>
    tpu.vector_store %arg13[%c0_355, %c7_356, %c0_357], %237 {strides = array<i32>} : memref<2x46x64xf32, #tpu.memory_space<vmem>>, vector<2x32x64xf32>,
    %c0_358 = arith.constant 0 : index
    %c0_359 = arith.constant 0 : index
    %c0_360 = arith.constant 0 : index
    %239 = vector.load %arg13[%c0_358, %c0_359, %c0_360] : memref<2x46x64xf32, #tpu.memory_space<vmem>>, vector<2x32x64xf32>
    %240 = arith.truncf %239 : vector<2x32x64xf32> to vector<2x32x64xbf16>
    %c0_361 = arith.constant 0 : index
    %c0_362 = arith.constant 0 : index
    %c0_363 = arith.constant 0 : index
    %241 = vector.load %arg14[%c0_361, %c0_362, %c0_363] : memref<2x32x960xbf16, #tpu.memory_space<vmem>>, vector<2x32x64xbf16>
    tpu.vector_store %arg14[%c0_361, %c0_362, %c0_363], %240 {strides = array<i32>} : memref<2x32x960xbf16, #tpu.memory_space<vmem>>, vector<2x32x64xbf16>,
    %c0_364 = arith.constant 0 : index
    %c1_365 = arith.constant 1 : index
    %c0_366 = arith.constant 0 : index
    %242 = vector.load %arg13[%c0_364, %c1_365, %c0_366] : memref<2x46x64xf32, #tpu.memory_space<vmem>>, vector<2x32x64xf32>
    %243 = arith.truncf %242 : vector<2x32x64xf32> to vector<2x32x64xbf16>
    %c0_367 = arith.constant 0 : index
    %c0_368 = arith.constant 0 : index
    %c64_369 = arith.constant 64 : index
    %244 = vector.load %arg14[%c0_367, %c0_368, %c64_369] : memref<2x32x960xbf16, #tpu.memory_space<vmem>>, vector<2x32x64xbf16>
    tpu.vector_store %arg14[%c0_367, %c0_368, %c64_369], %243 {strides = array<i32>} : memref<2x32x960xbf16, #tpu.memory_space<vmem>>, vector<2x32x64xbf16>,
    %c0_370 = arith.constant 0 : index
    %c2_371 = arith.constant 2 : index
    %c0_372 = arith.constant 0 : index
    %245 = vector.load %arg13[%c0_370, %c2_371, %c0_372] : memref<2x46x64xf32, #tpu.memory_space<vmem>>, vector<2x32x64xf32>
    %246 = arith.truncf %245 : vector<2x32x64xf32> to vector<2x32x64xbf16>
    %c0_373 = arith.constant 0 : index
    %c0_374 = arith.constant 0 : index
    %c128_375 = arith.constant 128 : index
    %247 = vector.load %arg14[%c0_373, %c0_374, %c128_375] : memref<2x32x960xbf16, #tpu.memory_space<vmem>>, vector<2x32x64xbf16>
    tpu.vector_store %arg14[%c0_373, %c0_374, %c128_375], %246 {strides = array<i32>} : memref<2x32x960xbf16, #tpu.memory_space<vmem>>, vector<2x32x64xbf16>,
    %c0_376 = arith.constant 0 : index
    %c3_377 = arith.constant 3 : index
    %c0_378 = arith.constant 0 : index
    %248 = vector.load %arg13[%c0_376, %c3_377, %c0_378] : memref<2x46x64xf32, #tpu.memory_space<vmem>>, vector<2x32x64xf32>
    %249 = arith.truncf %248 : vector<2x32x64xf32> to vector<2x32x64xbf16>
    %c0_379 = arith.constant 0 : index
    %c0_380 = arith.constant 0 : index
    %c192_381 = arith.constant 192 : index
    %250 = vector.load %arg14[%c0_379, %c0_380, %c192_381] : memref<2x32x960xbf16, #tpu.memory_space<vmem>>, vector<2x32x64xbf16>
    tpu.vector_store %arg14[%c0_379, %c0_380, %c192_381], %249 {strides = array<i32>} : memref<2x32x960xbf16, #tpu.memory_space<vmem>>, vector<2x32x64xbf16>,
    %c0_382 = arith.constant 0 : index
    %c4_383 = arith.constant 4 : index
    %c0_384 = arith.constant 0 : index
    %251 = vector.load %arg13[%c0_382, %c4_383, %c0_384] : memref<2x46x64xf32, #tpu.memory_space<vmem>>, vector<2x32x64xf32>
    %252 = arith.truncf %251 : vector<2x32x64xf32> to vector<2x32x64xbf16>
    %c0_385 = arith.constant 0 : index
    %c0_386 = arith.constant 0 : index
    %c256_387 = arith.constant 256 : index
    %253 = vector.load %arg14[%c0_385, %c0_386, %c256_387] : memref<2x32x960xbf16, #tpu.memory_space<vmem>>, vector<2x32x64xbf16>
    tpu.vector_store %arg14[%c0_385, %c0_386, %c256_387], %252 {strides = array<i32>} : memref<2x32x960xbf16, #tpu.memory_space<vmem>>, vector<2x32x64xbf16>,
    %c0_388 = arith.constant 0 : index
    %c5_389 = arith.constant 5 : index
    %c0_390 = arith.constant 0 : index
    %254 = vector.load %arg13[%c0_388, %c5_389, %c0_390] : memref<2x46x64xf32, #tpu.memory_space<vmem>>, vector<2x32x64xf32>
    %255 = arith.truncf %254 : vector<2x32x64xf32> to vector<2x32x64xbf16>
    %c0_391 = arith.constant 0 : index
    %c0_392 = arith.constant 0 : index
    %c320_393 = arith.constant 320 : index
    %256 = vector.load %arg14[%c0_391, %c0_392, %c320_393] : memref<2x32x960xbf16, #tpu.memory_space<vmem>>, vector<2x32x64xbf16>
    tpu.vector_store %arg14[%c0_391, %c0_392, %c320_393], %255 {strides = array<i32>} : memref<2x32x960xbf16, #tpu.memory_space<vmem>>, vector<2x32x64xbf16>,
    %c0_394 = arith.constant 0 : index
    %c6_395 = arith.constant 6 : index
    %c0_396 = arith.constant 0 : index
    %257 = vector.load %arg13[%c0_394, %c6_395, %c0_396] : memref<2x46x64xf32, #tpu.memory_space<vmem>>, vector<2x32x64xf32>
    %258 = arith.truncf %257 : vector<2x32x64xf32> to vector<2x32x64xbf16>
    %c0_397 = arith.constant 0 : index
    %c0_398 = arith.constant 0 : index
    %c384_399 = arith.constant 384 : index
    %259 = vector.load %arg14[%c0_397, %c0_398, %c384_399] : memref<2x32x960xbf16, #tpu.memory_space<vmem>>, vector<2x32x64xbf16>
    tpu.vector_store %arg14[%c0_397, %c0_398, %c384_399], %258 {strides = array<i32>} : memref<2x32x960xbf16, #tpu.memory_space<vmem>>, vector<2x32x64xbf16>,
    %c0_400 = arith.constant 0 : index
    %c7_401 = arith.constant 7 : index
    %c0_402 = arith.constant 0 : index
    %260 = vector.load %arg13[%c0_400, %c7_401, %c0_402] : memref<2x46x64xf32, #tpu.memory_space<vmem>>, vector<2x32x64xf32>
    %261 = arith.truncf %260 : vector<2x32x64xf32> to vector<2x32x64xbf16>
    %c0_403 = arith.constant 0 : index
    %c0_404 = arith.constant 0 : index
    %c448_405 = arith.constant 448 : index
    %262 = vector.load %arg14[%c0_403, %c0_404, %c448_405] : memref<2x32x960xbf16, #tpu.memory_space<vmem>>, vector<2x32x64xbf16>
    tpu.vector_store %arg14[%c0_403, %c0_404, %c448_405], %261 {strides = array<i32>} : memref<2x32x960xbf16, #tpu.memory_space<vmem>>, vector<2x32x64xbf16>,
    %c0_406 = arith.constant 0 : index
    %c8_407 = arith.constant 8 : index
    %c0_408 = arith.constant 0 : index
    %263 = vector.load %arg13[%c0_406, %c8_407, %c0_408] : memref<2x46x64xf32, #tpu.memory_space<vmem>>, vector<2x32x64xf32>
    %264 = arith.truncf %263 : vector<2x32x64xf32> to vector<2x32x64xbf16>
    %c0_409 = arith.constant 0 : index
    %c0_410 = arith.constant 0 : index
    %c512_411 = arith.constant 512 : index
    %265 = vector.load %arg14[%c0_409, %c0_410, %c512_411] : memref<2x32x960xbf16, #tpu.memory_space<vmem>>, vector<2x32x64xbf16>
    tpu.vector_store %arg14[%c0_409, %c0_410, %c512_411], %264 {strides = array<i32>} : memref<2x32x960xbf16, #tpu.memory_space<vmem>>, vector<2x32x64xbf16>,
    %c0_412 = arith.constant 0 : index
    %c9_413 = arith.constant 9 : index
    %c0_414 = arith.constant 0 : index
    %266 = vector.load %arg13[%c0_412, %c9_413, %c0_414] : memref<2x46x64xf32, #tpu.memory_space<vmem>>, vector<2x32x64xf32>
    %267 = arith.truncf %266 : vector<2x32x64xf32> to vector<2x32x64xbf16>
    %c0_415 = arith.constant 0 : index
    %c0_416 = arith.constant 0 : index
    %c576_417 = arith.constant 576 : index
    %268 = vector.load %arg14[%c0_415, %c0_416, %c576_417] : memref<2x32x960xbf16, #tpu.memory_space<vmem>>, vector<2x32x64xbf16>
    tpu.vector_store %arg14[%c0_415, %c0_416, %c576_417], %267 {strides = array<i32>} : memref<2x32x960xbf16, #tpu.memory_space<vmem>>, vector<2x32x64xbf16>,
    %c0_418 = arith.constant 0 : index
    %c10_419 = arith.constant 10 : index
    %c0_420 = arith.constant 0 : index
    %269 = vector.load %arg13[%c0_418, %c10_419, %c0_420] : memref<2x46x64xf32, #tpu.memory_space<vmem>>, vector<2x32x64xf32>
    %270 = arith.truncf %269 : vector<2x32x64xf32> to vector<2x32x64xbf16>
    %c0_421 = arith.constant 0 : index
    %c0_422 = arith.constant 0 : index
    %c640_423 = arith.constant 640 : index
    %271 = vector.load %arg14[%c0_421, %c0_422, %c640_423] : memref<2x32x960xbf16, #tpu.memory_space<vmem>>, vector<2x32x64xbf16>
    tpu.vector_store %arg14[%c0_421, %c0_422, %c640_423], %270 {strides = array<i32>} : memref<2x32x960xbf16, #tpu.memory_space<vmem>>, vector<2x32x64xbf16>,
    %c0_424 = arith.constant 0 : index
    %c11_425 = arith.constant 11 : index
    %c0_426 = arith.constant 0 : index
    %272 = vector.load %arg13[%c0_424, %c11_425, %c0_426] : memref<2x46x64xf32, #tpu.memory_space<vmem>>, vector<2x32x64xf32>
    %273 = arith.truncf %272 : vector<2x32x64xf32> to vector<2x32x64xbf16>
    %c0_427 = arith.constant 0 : index
    %c0_428 = arith.constant 0 : index
    %c704_429 = arith.constant 704 : index
    %274 = vector.load %arg14[%c0_427, %c0_428, %c704_429] : memref<2x32x960xbf16, #tpu.memory_space<vmem>>, vector<2x32x64xbf16>
    tpu.vector_store %arg14[%c0_427, %c0_428, %c704_429], %273 {strides = array<i32>} : memref<2x32x960xbf16, #tpu.memory_space<vmem>>, vector<2x32x64xbf16>,
    %c0_430 = arith.constant 0 : index
    %c12_431 = arith.constant 12 : index
    %c0_432 = arith.constant 0 : index
    %275 = vector.load %arg13[%c0_430, %c12_431, %c0_432] : memref<2x46x64xf32, #tpu.memory_space<vmem>>, vector<2x32x64xf32>
    %276 = arith.truncf %275 : vector<2x32x64xf32> to vector<2x32x64xbf16>
    %c0_433 = arith.constant 0 : index
    %c0_434 = arith.constant 0 : index
    %c768_435 = arith.constant 768 : index
    %277 = vector.load %arg14[%c0_433, %c0_434, %c768_435] : memref<2x32x960xbf16, #tpu.memory_space<vmem>>, vector<2x32x64xbf16>
    tpu.vector_store %arg14[%c0_433, %c0_434, %c768_435], %276 {strides = array<i32>} : memref<2x32x960xbf16, #tpu.memory_space<vmem>>, vector<2x32x64xbf16>,
    %c0_436 = arith.constant 0 : index
    %c13_437 = arith.constant 13 : index
    %c0_438 = arith.constant 0 : index
    %278 = vector.load %arg13[%c0_436, %c13_437, %c0_438] : memref<2x46x64xf32, #tpu.memory_space<vmem>>, vector<2x32x64xf32>
    %279 = arith.truncf %278 : vector<2x32x64xf32> to vector<2x32x64xbf16>
    %c0_439 = arith.constant 0 : index
    %c0_440 = arith.constant 0 : index
    %c832_441 = arith.constant 832 : index
    %280 = vector.load %arg14[%c0_439, %c0_440, %c832_441] : memref<2x32x960xbf16, #tpu.memory_space<vmem>>, vector<2x32x64xbf16>
    tpu.vector_store %arg14[%c0_439, %c0_440, %c832_441], %279 {strides = array<i32>} : memref<2x32x960xbf16, #tpu.memory_space<vmem>>, vector<2x32x64xbf16>,
    %c0_442 = arith.constant 0 : index
    %c14_443 = arith.constant 14 : index
    %c0_444 = arith.constant 0 : index
    %281 = vector.load %arg13[%c0_442, %c14_443, %c0_444] : memref<2x46x64xf32, #tpu.memory_space<vmem>>, vector<2x32x64xf32>
    %282 = arith.truncf %281 : vector<2x32x64xf32> to vector<2x32x64xbf16>
    %c0_445 = arith.constant 0 : index
    %c0_446 = arith.constant 0 : index
    %c896_447 = arith.constant 896 : index
    %283 = vector.load %arg14[%c0_445, %c0_446, %c896_447] : memref<2x32x960xbf16, #tpu.memory_space<vmem>>, vector<2x32x64xbf16>
    tpu.vector_store %arg14[%c0_445, %c0_446, %c896_447], %282 {strides = array<i32>} : memref<2x32x960xbf16, #tpu.memory_space<vmem>>, vector<2x32x64xbf16>,
    %c0_448 = arith.constant 0 : index
    %c0_449 = arith.constant 0 : index
    %c0_450 = arith.constant 0 : index
    %284 = vector.load %arg14[%c0_448, %c0_449, %c0_450] : memref<2x32x960xbf16, #tpu.memory_space<vmem>>, vector<2x32x960xbf16>
    %285 = vector.shape_cast %284 : vector<2x32x960xbf16> to vector<64x960xbf16>
    %c2_451 = arith.constant 2 : index
    %c0_452 = arith.constant 0 : index
    %c0_453 = arith.constant 0 : index
    %286 = vector.load %arg4[%c2_451, %c0_452, %c0_453] : memref<4x960x64xbf16, #tpu.memory_space<vmem>>, vector<1x960x64xbf16>
    %287 = vector.shape_cast %286 : vector<1x960x64xbf16> to vector<960x64xbf16>
    %cst_454 = arith.constant dense<0.000000e+00> : vector<64x64xf32>
    %288 = tpu.matmul %285, %287, %cst_454 {dimension_numbers = #tpu.dot_dimension_numbers<[1], [0], [0], [1], [0, 0, 1, 1], [], []>} : vector<64x960xbf16>, vector<960x64xbf16>, vector<64x64xf32> -> vector<64x64xf32>
    %c2_455 = arith.constant 2 : index
    %c0_456 = arith.constant 0 : index
    %c0_457 = arith.constant 0 : index
    %289 = vector.load %arg5[%c2_455, %c0_456, %c0_457] : memref<4x1x64xf32, #tpu.memory_space<vmem>>, vector<1x1x64xf32>
    %290 = vector.shape_cast %289 : vector<1x1x64xf32> to vector<1x64xf32>
    %291 = vector.broadcast %290 : vector<1x64xf32> to vector<64x64xf32>
    %292 = arith.mulf %288, %291 : vector<64x64xf32>
    %c2_458 = arith.constant 2 : index
    %c0_459 = arith.constant 0 : index
    %c0_460 = arith.constant 0 : index
    %293 = vector.load %arg6[%c2_458, %c0_459, %c0_460] : memref<4x1x64xf32, #tpu.memory_space<vmem>>, vector<1x1x64xf32>
    %294 = vector.shape_cast %293 : vector<1x1x64xf32> to vector<1x64xf32>
    %295 = vector.broadcast %294 : vector<1x64xf32> to vector<64x64xf32>
    %296 = arith.addf %292, %295 : vector<64x64xf32>
    %cst_461 = arith.constant 0.000000e+00 : f32
    %297 = vector.broadcast %cst_461 : f32 to vector<64x64xf32>
    %298 = arith.maximumf %296, %297 : vector<64x64xf32>
    %299 = vector.shape_cast %298 : vector<64x64xf32> to vector<2x32x64xf32>
    %c0_462 = arith.constant 0 : index
    %c7_463 = arith.constant 7 : index
    %c0_464 = arith.constant 0 : index
    %300 = vector.load %arg13[%c0_462, %c7_463, %c0_464] : memref<2x46x64xf32, #tpu.memory_space<vmem>>, vector<2x32x64xf32>
    tpu.vector_store %arg13[%c0_462, %c7_463, %c0_464], %299 {strides = array<i32>} : memref<2x46x64xf32, #tpu.memory_space<vmem>>, vector<2x32x64xf32>,
    %c0_465 = arith.constant 0 : index
    %c0_466 = arith.constant 0 : index
    %c0_467 = arith.constant 0 : index
    %301 = vector.load %arg13[%c0_465, %c0_466, %c0_467] : memref<2x46x64xf32, #tpu.memory_space<vmem>>, vector<2x32x64xf32>
    %302 = arith.truncf %301 : vector<2x32x64xf32> to vector<2x32x64xbf16>
    %c0_468 = arith.constant 0 : index
    %c0_469 = arith.constant 0 : index
    %c0_470 = arith.constant 0 : index
    %303 = vector.load %arg14[%c0_468, %c0_469, %c0_470] : memref<2x32x960xbf16, #tpu.memory_space<vmem>>, vector<2x32x64xbf16>
    tpu.vector_store %arg14[%c0_468, %c0_469, %c0_470], %302 {strides = array<i32>} : memref<2x32x960xbf16, #tpu.memory_space<vmem>>, vector<2x32x64xbf16>,
    %c0_471 = arith.constant 0 : index
    %c1_472 = arith.constant 1 : index
    %c0_473 = arith.constant 0 : index
    %304 = vector.load %arg13[%c0_471, %c1_472, %c0_473] : memref<2x46x64xf32, #tpu.memory_space<vmem>>, vector<2x32x64xf32>
    %305 = arith.truncf %304 : vector<2x32x64xf32> to vector<2x32x64xbf16>
    %c0_474 = arith.constant 0 : index
    %c0_475 = arith.constant 0 : index
    %c64_476 = arith.constant 64 : index
    %306 = vector.load %arg14[%c0_474, %c0_475, %c64_476] : memref<2x32x960xbf16, #tpu.memory_space<vmem>>, vector<2x32x64xbf16>
    tpu.vector_store %arg14[%c0_474, %c0_475, %c64_476], %305 {strides = array<i32>} : memref<2x32x960xbf16, #tpu.memory_space<vmem>>, vector<2x32x64xbf16>,
    %c0_477 = arith.constant 0 : index
    %c2_478 = arith.constant 2 : index
    %c0_479 = arith.constant 0 : index
    %307 = vector.load %arg13[%c0_477, %c2_478, %c0_479] : memref<2x46x64xf32, #tpu.memory_space<vmem>>, vector<2x32x64xf32>
    %308 = arith.truncf %307 : vector<2x32x64xf32> to vector<2x32x64xbf16>
    %c0_480 = arith.constant 0 : index
    %c0_481 = arith.constant 0 : index
    %c128_482 = arith.constant 128 : index
    %309 = vector.load %arg14[%c0_480, %c0_481, %c128_482] : memref<2x32x960xbf16, #tpu.memory_space<vmem>>, vector<2x32x64xbf16>
    tpu.vector_store %arg14[%c0_480, %c0_481, %c128_482], %308 {strides = array<i32>} : memref<2x32x960xbf16, #tpu.memory_space<vmem>>, vector<2x32x64xbf16>,
    %c0_483 = arith.constant 0 : index
    %c3_484 = arith.constant 3 : index
    %c0_485 = arith.constant 0 : index
    %310 = vector.load %arg13[%c0_483, %c3_484, %c0_485] : memref<2x46x64xf32, #tpu.memory_space<vmem>>, vector<2x32x64xf32>
    %311 = arith.truncf %310 : vector<2x32x64xf32> to vector<2x32x64xbf16>
    %c0_486 = arith.constant 0 : index
    %c0_487 = arith.constant 0 : index
    %c192_488 = arith.constant 192 : index
    %312 = vector.load %arg14[%c0_486, %c0_487, %c192_488] : memref<2x32x960xbf16, #tpu.memory_space<vmem>>, vector<2x32x64xbf16>
    tpu.vector_store %arg14[%c0_486, %c0_487, %c192_488], %311 {strides = array<i32>} : memref<2x32x960xbf16, #tpu.memory_space<vmem>>, vector<2x32x64xbf16>,
    %c0_489 = arith.constant 0 : index
    %c4_490 = arith.constant 4 : index
    %c0_491 = arith.constant 0 : index
    %313 = vector.load %arg13[%c0_489, %c4_490, %c0_491] : memref<2x46x64xf32, #tpu.memory_space<vmem>>, vector<2x32x64xf32>
    %314 = arith.truncf %313 : vector<2x32x64xf32> to vector<2x32x64xbf16>
    %c0_492 = arith.constant 0 : index
    %c0_493 = arith.constant 0 : index
    %c256_494 = arith.constant 256 : index
    %315 = vector.load %arg14[%c0_492, %c0_493, %c256_494] : memref<2x32x960xbf16, #tpu.memory_space<vmem>>, vector<2x32x64xbf16>
    tpu.vector_store %arg14[%c0_492, %c0_493, %c256_494], %314 {strides = array<i32>} : memref<2x32x960xbf16, #tpu.memory_space<vmem>>, vector<2x32x64xbf16>,
    %c0_495 = arith.constant 0 : index
    %c5_496 = arith.constant 5 : index
    %c0_497 = arith.constant 0 : index
    %316 = vector.load %arg13[%c0_495, %c5_496, %c0_497] : memref<2x46x64xf32, #tpu.memory_space<vmem>>, vector<2x32x64xf32>
    %317 = arith.truncf %316 : vector<2x32x64xf32> to vector<2x32x64xbf16>
    %c0_498 = arith.constant 0 : index
    %c0_499 = arith.constant 0 : index
    %c320_500 = arith.constant 320 : index
    %318 = vector.load %arg14[%c0_498, %c0_499, %c320_500] : memref<2x32x960xbf16, #tpu.memory_space<vmem>>, vector<2x32x64xbf16>
    tpu.vector_store %arg14[%c0_498, %c0_499, %c320_500], %317 {strides = array<i32>} : memref<2x32x960xbf16, #tpu.memory_space<vmem>>, vector<2x32x64xbf16>,
    %c0_501 = arith.constant 0 : index
    %c6_502 = arith.constant 6 : index
    %c0_503 = arith.constant 0 : index
    %319 = vector.load %arg13[%c0_501, %c6_502, %c0_503] : memref<2x46x64xf32, #tpu.memory_space<vmem>>, vector<2x32x64xf32>
    %320 = arith.truncf %319 : vector<2x32x64xf32> to vector<2x32x64xbf16>
    %c0_504 = arith.constant 0 : index
    %c0_505 = arith.constant 0 : index
    %c384_506 = arith.constant 384 : index
    %321 = vector.load %arg14[%c0_504, %c0_505, %c384_506] : memref<2x32x960xbf16, #tpu.memory_space<vmem>>, vector<2x32x64xbf16>
    tpu.vector_store %arg14[%c0_504, %c0_505, %c384_506], %320 {strides = array<i32>} : memref<2x32x960xbf16, #tpu.memory_space<vmem>>, vector<2x32x64xbf16>,
    %c0_507 = arith.constant 0 : index
    %c7_508 = arith.constant 7 : index
    %c0_509 = arith.constant 0 : index
    %322 = vector.load %arg13[%c0_507, %c7_508, %c0_509] : memref<2x46x64xf32, #tpu.memory_space<vmem>>, vector<2x32x64xf32>
    %323 = arith.truncf %322 : vector<2x32x64xf32> to vector<2x32x64xbf16>
    %c0_510 = arith.constant 0 : index
    %c0_511 = arith.constant 0 : index
    %c448_512 = arith.constant 448 : index
    %324 = vector.load %arg14[%c0_510, %c0_511, %c448_512] : memref<2x32x960xbf16, #tpu.memory_space<vmem>>, vector<2x32x64xbf16>
    tpu.vector_store %arg14[%c0_510, %c0_511, %c448_512], %323 {strides = array<i32>} : memref<2x32x960xbf16, #tpu.memory_space<vmem>>, vector<2x32x64xbf16>,
    %c0_513 = arith.constant 0 : index
    %c8_514 = arith.constant 8 : index
    %c0_515 = arith.constant 0 : index
    %325 = vector.load %arg13[%c0_513, %c8_514, %c0_515] : memref<2x46x64xf32, #tpu.memory_space<vmem>>, vector<2x32x64xf32>
    %326 = arith.truncf %325 : vector<2x32x64xf32> to vector<2x32x64xbf16>
    %c0_516 = arith.constant 0 : index
    %c0_517 = arith.constant 0 : index
    %c512_518 = arith.constant 512 : index
    %327 = vector.load %arg14[%c0_516, %c0_517, %c512_518] : memref<2x32x960xbf16, #tpu.memory_space<vmem>>, vector<2x32x64xbf16>
    tpu.vector_store %arg14[%c0_516, %c0_517, %c512_518], %326 {strides = array<i32>} : memref<2x32x960xbf16, #tpu.memory_space<vmem>>, vector<2x32x64xbf16>,
    %c0_519 = arith.constant 0 : index
    %c9_520 = arith.constant 9 : index
    %c0_521 = arith.constant 0 : index
    %328 = vector.load %arg13[%c0_519, %c9_520, %c0_521] : memref<2x46x64xf32, #tpu.memory_space<vmem>>, vector<2x32x64xf32>
    %329 = arith.truncf %328 : vector<2x32x64xf32> to vector<2x32x64xbf16>
    %c0_522 = arith.constant 0 : index
    %c0_523 = arith.constant 0 : index
    %c576_524 = arith.constant 576 : index
    %330 = vector.load %arg14[%c0_522, %c0_523, %c576_524] : memref<2x32x960xbf16, #tpu.memory_space<vmem>>, vector<2x32x64xbf16>
    tpu.vector_store %arg14[%c0_522, %c0_523, %c576_524], %329 {strides = array<i32>} : memref<2x32x960xbf16, #tpu.memory_space<vmem>>, vector<2x32x64xbf16>,
    %c0_525 = arith.constant 0 : index
    %c10_526 = arith.constant 10 : index
    %c0_527 = arith.constant 0 : index
    %331 = vector.load %arg13[%c0_525, %c10_526, %c0_527] : memref<2x46x64xf32, #tpu.memory_space<vmem>>, vector<2x32x64xf32>
    %332 = arith.truncf %331 : vector<2x32x64xf32> to vector<2x32x64xbf16>
    %c0_528 = arith.constant 0 : index
    %c0_529 = arith.constant 0 : index
    %c640_530 = arith.constant 640 : index
    %333 = vector.load %arg14[%c0_528, %c0_529, %c640_530] : memref<2x32x960xbf16, #tpu.memory_space<vmem>>, vector<2x32x64xbf16>
    tpu.vector_store %arg14[%c0_528, %c0_529, %c640_530], %332 {strides = array<i32>} : memref<2x32x960xbf16, #tpu.memory_space<vmem>>, vector<2x32x64xbf16>,
    %c0_531 = arith.constant 0 : index
    %c11_532 = arith.constant 11 : index
    %c0_533 = arith.constant 0 : index
    %334 = vector.load %arg13[%c0_531, %c11_532, %c0_533] : memref<2x46x64xf32, #tpu.memory_space<vmem>>, vector<2x32x64xf32>
    %335 = arith.truncf %334 : vector<2x32x64xf32> to vector<2x32x64xbf16>
    %c0_534 = arith.constant 0 : index
    %c0_535 = arith.constant 0 : index
    %c704_536 = arith.constant 704 : index
    %336 = vector.load %arg14[%c0_534, %c0_535, %c704_536] : memref<2x32x960xbf16, #tpu.memory_space<vmem>>, vector<2x32x64xbf16>
    tpu.vector_store %arg14[%c0_534, %c0_535, %c704_536], %335 {strides = array<i32>} : memref<2x32x960xbf16, #tpu.memory_space<vmem>>, vector<2x32x64xbf16>,
    %c0_537 = arith.constant 0 : index
    %c12_538 = arith.constant 12 : index
    %c0_539 = arith.constant 0 : index
    %337 = vector.load %arg13[%c0_537, %c12_538, %c0_539] : memref<2x46x64xf32, #tpu.memory_space<vmem>>, vector<2x32x64xf32>
    %338 = arith.truncf %337 : vector<2x32x64xf32> to vector<2x32x64xbf16>
    %c0_540 = arith.constant 0 : index
    %c0_541 = arith.constant 0 : index
    %c768_542 = arith.constant 768 : index
    %339 = vector.load %arg14[%c0_540, %c0_541, %c768_542] : memref<2x32x960xbf16, #tpu.memory_space<vmem>>, vector<2x32x64xbf16>
    tpu.vector_store %arg14[%c0_540, %c0_541, %c768_542], %338 {strides = array<i32>} : memref<2x32x960xbf16, #tpu.memory_space<vmem>>, vector<2x32x64xbf16>,
    %c0_543 = arith.constant 0 : index
    %c13_544 = arith.constant 13 : index
    %c0_545 = arith.constant 0 : index
    %340 = vector.load %arg13[%c0_543, %c13_544, %c0_545] : memref<2x46x64xf32, #tpu.memory_space<vmem>>, vector<2x32x64xf32>
    %341 = arith.truncf %340 : vector<2x32x64xf32> to vector<2x32x64xbf16>
    %c0_546 = arith.constant 0 : index
    %c0_547 = arith.constant 0 : index
    %c832_548 = arith.constant 832 : index
    %342 = vector.load %arg14[%c0_546, %c0_547, %c832_548] : memref<2x32x960xbf16, #tpu.memory_space<vmem>>, vector<2x32x64xbf16>
    tpu.vector_store %arg14[%c0_546, %c0_547, %c832_548], %341 {strides = array<i32>} : memref<2x32x960xbf16, #tpu.memory_space<vmem>>, vector<2x32x64xbf16>,
    %c0_549 = arith.constant 0 : index
    %c14_550 = arith.constant 14 : index
    %c0_551 = arith.constant 0 : index
    %343 = vector.load %arg13[%c0_549, %c14_550, %c0_551] : memref<2x46x64xf32, #tpu.memory_space<vmem>>, vector<2x32x64xf32>
    %344 = arith.truncf %343 : vector<2x32x64xf32> to vector<2x32x64xbf16>
    %c0_552 = arith.constant 0 : index
    %c0_553 = arith.constant 0 : index
    %c896_554 = arith.constant 896 : index
    %345 = vector.load %arg14[%c0_552, %c0_553, %c896_554] : memref<2x32x960xbf16, #tpu.memory_space<vmem>>, vector<2x32x64xbf16>
    tpu.vector_store %arg14[%c0_552, %c0_553, %c896_554], %344 {strides = array<i32>} : memref<2x32x960xbf16, #tpu.memory_space<vmem>>, vector<2x32x64xbf16>,
    %c0_555 = arith.constant 0 : index
    %c0_556 = arith.constant 0 : index
    %c0_557 = arith.constant 0 : index
    %346 = vector.load %arg14[%c0_555, %c0_556, %c0_557] : memref<2x32x960xbf16, #tpu.memory_space<vmem>>, vector<2x32x960xbf16>
    %347 = vector.shape_cast %346 : vector<2x32x960xbf16> to vector<64x960xbf16>
    %c3_558 = arith.constant 3 : index
    %c0_559 = arith.constant 0 : index
    %c0_560 = arith.constant 0 : index
    %348 = vector.load %arg4[%c3_558, %c0_559, %c0_560] : memref<4x960x64xbf16, #tpu.memory_space<vmem>>, vector<1x960x64xbf16>
    %349 = vector.shape_cast %348 : vector<1x960x64xbf16> to vector<960x64xbf16>
    %cst_561 = arith.constant dense<0.000000e+00> : vector<64x64xf32>
    %350 = tpu.matmul %347, %349, %cst_561 {dimension_numbers = #tpu.dot_dimension_numbers<[1], [0], [0], [1], [0, 0, 1, 1], [], []>} : vector<64x960xbf16>, vector<960x64xbf16>, vector<64x64xf32> -> vector<64x64xf32>
    %c3_562 = arith.constant 3 : index
    %c0_563 = arith.constant 0 : index
    %c0_564 = arith.constant 0 : index
    %351 = vector.load %arg5[%c3_562, %c0_563, %c0_564] : memref<4x1x64xf32, #tpu.memory_space<vmem>>, vector<1x1x64xf32>
    %352 = vector.shape_cast %351 : vector<1x1x64xf32> to vector<1x64xf32>
    %353 = vector.broadcast %352 : vector<1x64xf32> to vector<64x64xf32>
    %354 = arith.mulf %350, %353 : vector<64x64xf32>
    %c3_565 = arith.constant 3 : index
    %c0_566 = arith.constant 0 : index
    %c0_567 = arith.constant 0 : index
    %355 = vector.load %arg6[%c3_565, %c0_566, %c0_567] : memref<4x1x64xf32, #tpu.memory_space<vmem>>, vector<1x1x64xf32>
    %356 = vector.shape_cast %355 : vector<1x1x64xf32> to vector<1x64xf32>
    %357 = vector.broadcast %356 : vector<1x64xf32> to vector<64x64xf32>
    %358 = arith.addf %354, %357 : vector<64x64xf32>
    %cst_568 = arith.constant 0.000000e+00 : f32
    %359 = vector.broadcast %cst_568 : f32 to vector<64x64xf32>
    %360 = arith.maximumf %358, %359 : vector<64x64xf32>
    %361 = vector.shape_cast %360 : vector<64x64xf32> to vector<2x32x64xf32>
    %cst_569 = arith.constant dense<0.000000e+00> : vector<2x64xf32>
    %362 = vector.multi_reduction <add>, %361, %cst_569 [1] : vector<2x32x64xf32> to vector<2x64xf32>
    %cst_570 = arith.constant 3.200000e+01 : f32
    %363 = vector.broadcast %cst_570 : f32 to vector<2x64xf32>
    %364 = arith.divf %362, %363 : vector<2x64xf32>
    %c0_571 = arith.constant 0 : index
    %c0_572 = arith.constant 0 : index
    %365 = vector.load %arg7[%c0_571, %c0_572] : memref<64x32xf32, #tpu.memory_space<vmem>>, vector<64x32xf32>
    %cst_573 = arith.constant dense<0.000000e+00> : vector<2x32xf32>
    %366 = tpu.matmul %364, %365, %cst_573 {dimension_numbers = #tpu.dot_dimension_numbers<[1], [0], [0], [1], [0, 0, 1, 1], [], []>} : vector<2x64xf32>, vector<64x32xf32>, vector<2x32xf32> -> vector<2x32xf32>
    %c0_574 = arith.constant 0 : index
    %c0_575 = arith.constant 0 : index
    %367 = vector.load %arg8[%c0_574, %c0_575] : memref<1x32xf32, #tpu.memory_space<vmem>>, vector<1x32xf32>
    %368 = vector.broadcast %367 : vector<1x32xf32> to vector<2x32xf32>
    %369 = arith.addf %366, %368 : vector<2x32xf32>
    %cst_576 = arith.constant 0.000000e+00 : f32
    %370 = vector.broadcast %cst_576 : f32 to vector<2x32xf32>
    %371 = arith.maximumf %369, %370 : vector<2x32xf32>
    %c0_577 = arith.constant 0 : index
    %c0_578 = arith.constant 0 : index
    %372 = vector.load %arg9[%c0_577, %c0_578] : memref<32x4xf32, #tpu.memory_space<vmem>>, vector<32x4xf32>
    %cst_579 = arith.constant dense<0.000000e+00> : vector<2x4xf32>
    %373 = tpu.matmul %371, %372, %cst_579 {dimension_numbers = #tpu.dot_dimension_numbers<[1], [0], [0], [1], [0, 0, 1, 1], [], []>} : vector<2x32xf32>, vector<32x4xf32>, vector<2x4xf32> -> vector<2x4xf32>
    %c0_580 = arith.constant 0 : index
    %c0_581 = arith.constant 0 : index
    %374 = vector.load %arg10[%c0_580, %c0_581] : memref<1x4xf32, #tpu.memory_space<vmem>>, vector<1x4xf32>
    %375 = vector.broadcast %374 : vector<1x4xf32> to vector<2x4xf32>
    %376 = arith.addf %373, %375 : vector<2x4xf32>
    %c0_582 = arith.constant 0 : index
    %c0_583 = arith.constant 0 : index
    %377 = vector.load %arg11[%c0_582, %c0_583] : memref<2x4xf32, #tpu.memory_space<vmem>>, vector<2x4xf32>
    tpu.vector_store %arg11[%c0_582, %c0_583], %376 {strides = array<i32>} : memref<2x4xf32, #tpu.memory_space<vmem>>, vector<2x4xf32>,
    return
  }
}

</mosaic_0001>

<bundles_post_ra>
// kernel: deepcnn1d_forward.1
= control target key start
LH: loop header
LB: loop body
LE: loop exit
PB: predicated region body
PF: predicated region fallthrough
CT: control target
= control target key end

     0   :  { %vm40_vm0 = vcmask 113664   ;;  %v8118_v2 = vmov 0.0   ;;  %v8119_v9 = vmov 0   ;;  %s8120_s17 = smov 126   ;;  %s8121_s18 = smov 14   ;;  %vm48_vm1 = vcmask 111616   ;;  %s10701_s0 = inlined_call_operand.vmem [shape: f32[2,32,14], index: 0, kind: input, shape index: {}]   ;;  %s10702_s1 = inlined_call_operand.vmem [shape: bf16[434,64], index: 1, kind: input, shape index: {}]   ;;  %s10703_s2 = inlined_call_operand.vmem [shape: f32[1,64], index: 2, kind: input, shape index: {}]   ;;  %s10704_s3 = inlined_call_operand.vmem [shape: f32[1,64], index: 3, kind: input, shape index: {}]   ;;  %s10705_s4 = inlined_call_operand.vmem [shape: bf16[4,960,64], index: 4, kind: input, shape index: {}]   ;;  %s10706_s5 = inlined_call_operand.vmem [shape: f32[4,1,64], index: 5, kind: input, shape index: {}]   ;;  %s10707_s6 = inlined_call_operand.vmem [shape: f32[4,1,64], index: 6, kind: input, shape index: {}]   ;;  %s10708_s7 = inlined_call_operand.vmem [shape: f32[64,32], index: 7, kind: input, shape index: {}]   ;;  %s10709_s8 = inlined_call_operand.vmem [shape: f32[1,32], index: 8, kind: input, shape index: {}]   ;;  %s10710_s9 = inlined_call_operand.vmem [shape: f32[32,4], index: 9, kind: input, shape index: {}]   ;;  %s10711_s10 = inlined_call_operand.vmem [shape: f32[1,4], index: 10, kind: input, shape index: {}]   ;;  %s10712_s11 = inlined_call_operand.hbm [shape: f32[2,4], index: 11, kind: output, shape index: {}]  }
   0x1   :  { %v104_v0 = vld [vmem:[%s10701_s0] sm:$0xff]  ;;  %v105_v1 = vld [vmem:[%s10701_s0 + $0x8] sm:$0xff]  ;;  %42 = vst.msk [vmem:[#allocation2 + $0x8] sm:$0xff] %vm40_vm0, %v8118_v2  ;;  %43 = vst.msk [vmem:[#allocation2 + $0x10] sm:$0xff] %vm40_vm0, %v8118_v2  ;;  %s8122_s19 = smov 12   ;;  %s8123_s20 = smov 26  }
   0x2   :  { %44 = vst.msk [vmem:[#allocation2 + $0x18] sm:$0xff] %vm40_vm0, %v8118_v2  ;;  %41 = vst.msk [vmem:[#allocation2] sm:$0xff] %vm40_vm0, %v8118_v2  ;;  %v106_v3 = vld [vmem:[%s10701_s0 + $0x10] sm:$0xff]  ;;  %v107_v4 = vld [vmem:[%s10701_s0 + $0x18] sm:$0xff]  ;;  %s8124_s21 = smov 28   ;;  %s8125_s22 = smov 40  }
   0x3   :  { %45 = vst.msk [vmem:[#allocation2 + $0x20] sm:$0xff] %vm40_vm0, %v8118_v2  ;;  %46 = vst.msk [vmem:[#allocation2 + $0x28] sm:$0xff] %vm40_vm0, %v8118_v2  ;;  %v108_v5 = vld [vmem:[%s10701_s0 + $0x20] sm:$0xff]  ;;  %v109_v6 = vld [vmem:[%s10701_s0 + $0x28] sm:$0xff]  ;;  %s8126_s23 = smov 42   ;;  %s8127_s24 = smov 54  }
   0x4   :  { %47 = vst.msk [vmem:[#allocation2 + $0x30] sm:$0xff] %vm40_vm0, %v8118_v2  ;;  %50 = vst.msk [vmem:[#allocation2 + $0x40] sm:$0xff] %vm40_vm0, %v8118_v2  ;;  %v110_v7 = vld [vmem:[%s10701_s0 + $0x30] sm:$0xff]  ;;  %v111_v8 = vld [vmem:[%s10701_s0 + $0x38] sm:$0xff]  ;;  %s8128_s25 = smov 56   ;;  %s8129_s26 = smov 68  }
   0x5   :  { %51 = vst.msk [vmem:[#allocation2 + $0x48] sm:$0xff] %vm40_vm0, %v8118_v2  ;;  %52 = vst.msk [vmem:[#allocation2 + $0x50] sm:$0xff] %vm40_vm0, %v8118_v2  ;;  %v7808_v10 = vld [vmem:[%s10702_s1 + $0x40] sm:$0xff]   ;;  %s8130_s27 = smov 70   ;;  %s8131_s28 = smov 82   ;;  %v7810_v53 = vld [vmem:[%s10702_s1 + $0x48] sm:$0xff]  }
   0x6   :  { %53 = vst.msk [vmem:[#allocation2 + $0x58] sm:$0xff] %vm40_vm0, %v8118_v2  ;;  %54 = vst.msk [vmem:[#allocation2 + $0x60] sm:$0xff] %vm40_vm0, %v8118_v2  ;;  %v7809_v11 = vld [vmem:[%s10702_s1] sm:$0xff]   ;;  %7190 = vmatprep.subr.bf16.mxu1 %v7808_v10  ;;  %s10715_s12 = smov 84   ;;  %s10713_s13 = smov 96   ;;  %v7811_v57 = vld [vmem:[%s10702_s1 + $0x8] sm:$0xff]  }
   0x7   :  { %55 = vst.msk [vmem:[#allocation2 + $0x68] sm:$0xff] %vm40_vm0, %v8118_v2  ;;  %56 = vst.msk [vmem:[#allocation2 + $0x70] sm:$0xff] %vm40_vm0, %v8118_v2  ;;  %7191 = vmatpush3.bf16.msra.mxu1 %v7809_v11  ;;  %v7812_v58 = vld [vmem:[%s10702_s1 + $0x50] sm:$0xff]   ;;  %v7814_v63 = vld [vmem:[%s10702_s1 + $0x58] sm:$0xff]   ;;  %s10729_s15 = smov 84   ;;  %s10730_s16 = smov 96  }
   0x8   :  { %112 = vst.msk [vmem:[#allocation2 + $0xf] sm:$0xff] %vm40_vm0, %v104_v0  ;;  %113 = vst.msk [vmem:[#allocation2 + $0x17] sm:$0xff] %vm40_vm0, %v105_v1  ;;  %7192 = vmatprep.subr.bf16.mxu1 %v7810_v53  ;;  %v7813_v59 = vld [vmem:[%s10702_s1 + $0x10] sm:$0xff]   ;;  %v7815_v1 = vld [vmem:[%s10702_s1 + $0x18] sm:$0xff]   ;;  %s10731_s29 = smov 98   ;;  %s10732_s30 = smov 110  }
   0x9   :  { %114 = vst.msk [vmem:[#allocation2 + $0x1f] sm:$0xff] %vm40_vm0, %v106_v3  ;;  %115 = vst.msk [vmem:[#allocation2 + $0x27] sm:$0xff] %vm40_vm0, %v107_v4  ;;  %v136_v12 = vld [vmem:[#allocation2 + $0x1] sm:$0xff]  ;;  %vm430_vm2 = vcmask 97280   ;;  %vm164_vm3 = vcmask 228464   ;;  %vm466_vm4 = vcmask 212064  }
   0xa   :  { %116 = vst.msk [vmem:[#allocation2 + $0x4f] sm:$0xff] %vm40_vm0, %v108_v5  ;;  %73 = vst [vmem:[#allocation4 + $0x8] sm:$0xff] %v8119_v9  ;;  %v169_v23 = vld [vmem:[#allocation2 + $0x2] sm:$0xff]  ;;  %vm499_vm5 = vcmask 326864   ;;  %vm10727_vm6 = vcmask 343264   ;;  %vm10728_vm7 = vcmask 441664  }
   0xb   :  { %72 = vst [vmem:[#allocation4] sm:$0xff] %v8119_v9  ;;  %74 = vst [vmem:[#allocation4 + $0x10] sm:$0xff] %v8119_v9  ;;  %v202_v31 = vld [vmem:[#allocation2 + $0x3] sm:$0xff]  ;;  %7193 = vmatpush3.bf16.msra.mxu1 %v7811_v57  ;;  %vm10726_vm8 = vcmask 458064   ;;  %vm10725_vm9 = vcmask 556464   ;;  %vm10724_vm10 = vcmask 572864  }
   0xc   :  { %75 = vst [vmem:[#allocation4 + $0x18] sm:$0xff] %v8119_v9  ;;  %76 = vst [vmem:[#allocation4 + $0x20] sm:$0xff] %v8119_v9  ;;  %v235_v36 = vld [vmem:[#allocation2 + $0x4] sm:$0xff]  ;;  %7194 = vmatprep.subr.bf16.mxu1 %v7812_v58  ;;  %vm10723_vm11 = vcmask 671264   ;;  %vm10722_vm12 = vcmask 687664   ;;  %vm10721_vm13 = vcmask 786064  }
   0xd   :  { %77 = vst [vmem:[#allocation4 + $0x28] sm:$0xff] %v8119_v9  ;;  %78 = vst [vmem:[#allocation4 + $0x30] sm:$0xff] %v8119_v9  ;;  %v268_v41 = vld [vmem:[#allocation2 + $0x5] sm:$0xff]  ;;  %vm329_vm14 = vcmask 802464   ;;  %vm664_vm15 = vcmask 900864  }
   0xe   :  { %80 = vst [vmem:[#allocation4 + $0x40] sm:$0xff] %v8119_v9  ;;  %81 = vst [vmem:[#allocation4 + $0x48] sm:$0xff] %v8119_v9  ;;  %v301_v46 = vld [vmem:[#allocation2 + $0x6] sm:$0xff] }
   0xf   :  { %82 = vst [vmem:[#allocation4 + $0x50] sm:$0xff] %v8119_v9  ;;  %83 = vst [vmem:[#allocation4 + $0x58] sm:$0xff] %v8119_v9  ;;  %v400_v13 = vld [vmem:[#allocation2 + $0x9] sm:$0xff]  ;;  %v8308_v14 = vld [vmem:[#allocation2 + $0x11] sm:$0xff]  ;;  %7195 = vmatpush3.bf16.msra.mxu1 %v7813_v59 }
  0x10   :  { %84 = vst [vmem:[#allocation4 + $0x60] sm:$0xff] %v8119_v9  ;;  %85 = vst [vmem:[#allocation4 + $0x68] sm:$0xff] %v8119_v9  ;;  %v438_v15 = vld [vmem:[#allocation2 + $0xa] sm:$0xff]  ;;  %v408_v16 = vpack.c.bf16 %v8308_v14, %v400_v13  ;;  %v144_v17 = vpack.c.bf16 %v400_v13, %v136_v12  ;;  %v8311_v18 = vld [vmem:[#allocation2 + $0x12] sm:$0xff]  ;;  %7196 = vmatprep.subr.bf16.mxu1 %v7814_v63 }
  0x11   :  { %86 = vst [vmem:[#allocation4 + $0x70] sm:$0xff] %v8119_v9  ;;  %88 = vst [vmem:[#allocation4 + $0x80] sm:$0xff] %v8119_v9  ;;  %v471_v19 = vld [vmem:[#allocation2 + $0xb] sm:$0xff]  ;;  %v8313_v20 = vld [vmem:[#allocation2 + $0x13] sm:$0xff]  ;;  %v446_v21 = vpack.c.bf16 %v8311_v18, %v438_v15  ;;  %v177_v28 = vpack.c.bf16 %v438_v15, %v169_v23 }
  0x12   :  { %89 = vst [vmem:[#allocation4 + $0x88] sm:$0xff] %v8119_v9  ;;  %90 = vst [vmem:[#allocation4 + $0x90] sm:$0xff] %v8119_v9  ;;  %416 = vrot.lane.b32.xlu0 %v408_v16, %s8120_s17  ;;  %152 = vrot.lane.b32.xlu1 %v144_v17, %s8121_s18  ;;  %v479_v22 = vpack.c.bf16 %v8313_v20, %v471_v19  ;;  %v504_v24 = vld [vmem:[#allocation2 + $0xc] sm:$0xff]  ;;  %v8319_v25 = vld [vmem:[#allocation2 + $0x14] sm:$0xff]  ;;  %v210_v34 = vpack.c.bf16 %v471_v19, %v202_v31 }
  0x13   :  { %91 = vst [vmem:[#allocation4 + $0x98] sm:$0xff] %v8119_v9  ;;  %92 = vst [vmem:[#allocation4 + $0xa0] sm:$0xff] %v8119_v9  ;;  %v8321_v26 = vld [vmem:[#allocation2 + $0x10] sm:$0xff]  ;;  %v8323_v27 = vld [vmem:[#allocation2 + $0x18] sm:$0xff]  ;;  %v512_v29 = vpack.c.bf16 %v8319_v25, %v504_v24  ;;  %v243_v39 = vpack.c.bf16 %v504_v24, %v235_v36  ;;  %7197 = vmatpush3.bf16.msra.mxu1 %v7815_v1 }
  0x14   :  { %93 = vst [vmem:[#allocation4 + $0xa8] sm:$0xff] %v8119_v9  ;;  %94 = vst [vmem:[#allocation4 + $0xb0] sm:$0xff] %v8119_v9  ;;  %v644_v30 = vpack.c.bf16 %v8323_v27, %v8321_v26  ;;  %v537_v32 = vld [vmem:[#allocation2 + $0xd] sm:$0xff]  ;;  %v8330_v33 = vld [vmem:[#allocation2 + $0x15] sm:$0xff] }
  0x15   :  { %96 = vst [vmem:[#allocation4 + $0xc0] sm:$0xff] %v8119_v9  ;;  %97 = vst [vmem:[#allocation4 + $0xc8] sm:$0xff] %v8119_v9  ;;  %v545_v35 = vpack.c.bf16 %v8330_v33, %v537_v32  ;;  %v570_v37 = vld [vmem:[#allocation2 + $0xe] sm:$0xff]  ;;  %v8336_v38 = vld [vmem:[#allocation2 + $0x16] sm:$0xff]  ;;  %v276_v44 = vpack.c.bf16 %v537_v32, %v268_v41 }
  0x16   :  { %98 = vst [vmem:[#allocation4 + $0xd0] sm:$0xff] %v8119_v9  ;;  %99 = vst [vmem:[#allocation4 + $0xd8] sm:$0xff] %v8119_v9  ;;  %454 = vrot.lane.b32.xlu0 %v446_v21, %s8122_s19  ;;  %487 = vrot.lane.b32.xlu1 %v479_v22, %s8123_s20  ;;  %v578_v40 = vpack.c.bf16 %v8336_v38, %v570_v37  ;;  %v603_v42 = vld [vmem:[#allocation2 + $0xf] sm:$0xff]  ;;  %v8341_v43 = vld [vmem:[#allocation2 + $0x17] sm:$0xff]  ;;  %v309_v47 = vpack.c.bf16 %v570_v37, %v301_v46 }
  0x17   :  { %100 = vst [vmem:[#allocation4 + $0xe0] sm:$0xff] %v8119_v9  ;;  %101 = vst [vmem:[#allocation4 + $0xe8] sm:$0xff] %v8119_v9  ;;  %v611_v45 = vpack.c.bf16 %v8341_v43, %v603_v42  ;;  %v367_v48 = vld [vmem:[#allocation2 + $0x8] sm:$0xff]  ;;  %v120_v49 = vld [vmem:[#allocation2] sm:$0xff] }
  0x18   :  { %102 = vst [vmem:[#allocation4 + $0xf0] sm:$0xff] %v8119_v9  ;;  %117 = vst.msk [vmem:[#allocation2 + $0x57] sm:$0xff] %vm40_vm0, %v109_v6  ;;  %v334_v50 = vld [vmem:[#allocation2 + $0x7] sm:$0xff]  ;;  %v670_v51 = vld [vmem:[#allocation2 + $0x19] sm:$0xff]  ;;  %v128_v52 = vpack.c.bf16 %v367_v48, %v120_v49  ;;  %v375_v60 = vpack.c.bf16 %v8321_v26, %v367_v48 }
  0x19   :  { %118 = vst.msk [vmem:[#allocation2 + $0x5f] sm:$0xff] %vm40_vm0, %v110_v7  ;;  %119 = vst.msk [vmem:[#allocation2 + $0x67] sm:$0xff] %vm40_vm0, %v111_v8  ;;  %v342_v54 = vpack.c.bf16 %v603_v42, %v334_v50  ;;  %v677_v55 = vpack.c.bf16 %v670_v51, %v8308_v14  ;;  %v703_v56 = vld [vmem:[#allocation2 + $0x1a] sm:$0xff]  ;;  %v8373_v0 = vld [vmem:[#allocation2 + $0x22] sm:$0xff] }
  0x1a   :  { %133 = vst.msk [vmem:[#allocation4 + $0x40] sm:$0xff] %vm40_vm0, %v644_v30  ;;  %185 = vrot.lane.b32.xlu0 %v177_v28, %s8124_s21  ;;  %520 = vrot.lane.b32.xlu1 %v512_v29, %s8125_s22  ;;  %132 = vst.msk [vmem:[#allocation4] sm:$0xff] %vm40_vm0, %v128_v52  ;;  %v710_v61 = vpack.c.bf16 %v703_v56, %v8311_v18  ;;  %v8368_v62 = vld [vmem:[#allocation2 + $0x21] sm:$0xff]  ;;  %v8387_v5 = vpack.c.bf16 %v8373_v0, %v703_v56  ;;  %v7820_v16 = vld [vmem:[%s10702_s1 + $0x70] sm:$0xff]  }
  0x1b   :  { %v7816_v3 = vld [vmem:[%s10702_s1 + $0x60] sm:$0xff]   ;;  %v8384_v4 = vpack.c.bf16 %v8368_v62, %v670_v51  ;;  %v7818_v10 = vld [vmem:[%s10702_s1 + $0x68] sm:$0xff]   ;;  %49 = vst.msk [vmem:[#allocation2 + $0x38] sm:$0x3f] %vm48_vm1, %v8118_v2  ;;  %57 = vst.msk [vmem:[#allocation2 + $0x78] sm:$0x3f] %vm48_vm1, %v8118_v2 }
  0x1c   :  { %v473_v6 = vld [vmem:[#allocation2 + $0x1b] sm:$0xff]  ;;  %v474_v7 = vld [vmem:[#allocation2 + $0x23] sm:$0xff]  ;;  %7198 = vmatprep.subr.bf16.mxu1 %v7816_v3  ;;  %v7821_v19 = vld [vmem:[%s10702_s1 + $0x30] sm:$0xff]   ;;  %vm697_vm1 = vcmask 1015664  }
  0x1d   :  { %v7817_v8 = vld [vmem:[%s10702_s1 + $0x20] sm:$0xff]   ;;  %v8399_v11 = vpack.c.bf16 %v474_v7, %v473_v6  ;;  %v7819_v14 = vld [vmem:[%s10702_s1 + $0x28] sm:$0xff]   ;;  %v7822_v21 = vld [vmem:[%s10702_s1 + $0x78] sm:$0xff]   ;;  %v8424_v23 = vpack.c.bf16 %v473_v6, %v8313_v20 }
  0x1e   :  { %218 = vrot.lane.b32.xlu0 %v210_v34, %s8126_s23  ;;  %553 = vrot.lane.b32.xlu1 %v545_v35, %s8127_s24  ;;  %v506_v12 = vld [vmem:[#allocation2 + $0x1c] sm:$0xff]  ;;  %v507_v13 = vld [vmem:[#allocation2 + $0x24] sm:$0xff]  ;;  %v541_v59 = vld [vmem:[#allocation2 + $0x4d] sm:$0xff] }
  0x1f   :  { %7199 = vmatpush3.bf16.msra.mxu1 %v7817_v8  ;;  %v539_v15 = vld [vmem:[#allocation2 + $0x1d] sm:$0xff]  ;;  %v8412_v17 = vpack.c.bf16 %v507_v13, %v506_v12  ;;  %v540_v18 = vld [vmem:[#allocation2 + $0x25] sm:$0xff]  ;;  %v8466_v46 = vld [vmem:[#allocation2 + $0x52] sm:$0xff] }
  0x20   :  { %7200 = vmatprep.subr.bf16.mxu1 %v7818_v10  ;;  %v572_v22 = vld [vmem:[#allocation2 + $0x1e] sm:$0xff]  ;;  %v8426_v24 = vpack.c.bf16 %v540_v18, %v539_v15  ;;  %v573_v26 = vld [vmem:[#allocation2 + $0x26] sm:$0xff]  ;;  %v8446_v34 = vpack.c.bf16 %v539_v15, %v8330_v33  ;;  %v8481_v53 = vld [vmem:[#allocation2 + $0x53] sm:$0xff] }
  0x21   :  { %v7823_v28 = vld [vmem:[%s10702_s1 + $0x38] sm:$0xff]   ;;  %v8438_v20 = vpack.c.bf16 %v573_v26, %v572_v22  ;;  %v606_v31 = vld [vmem:[#allocation2 + $0x27] sm:$0xff]  ;;  %v8452_v37 = vpack.c.bf16 %v572_v22, %v8336_v38  ;;  %v607_v8 = vld [vmem:[#allocation2 + $0x4f] sm:$0xff] }
  0x22   :  { %251 = vrot.lane.b32.xlu0 %v243_v39, %s8128_s25  ;;  %586 = vrot.lane.b32.xlu1 %v578_v40, %s8129_s26  ;;  %v605_v29 = vld [vmem:[#allocation2 + $0x1f] sm:$0xff]  ;;  %v639_v36 = vld [vmem:[#allocation2 + $0x28] sm:$0xff]  ;;  %v8454_v39 = vld [vmem:[#allocation2 + $0x51] sm:$0xff] }
  0x23   :  { %7201 = vmatpush3.bf16.msra.mxu1 %v7819_v14  ;;  %v638_v32 = vld [vmem:[#allocation2 + $0x20] sm:$0xff]  ;;  %v612_v35 = vpack.c.bf16 %v606_v31, %v605_v29  ;;  %v8456_v40 = vld [vmem:[#allocation2 + $0x48] sm:$0xff]  ;;  %v8462_v33 = vpack.c.bf16 %v605_v29, %v8341_v43  ;;  %v8486_v57 = vld [vmem:[#allocation2 + $0x54] sm:$0xff] }
  0x24   :  { %7202 = vmatprep.subr.bf16.mxu1 %v7820_v16  ;;  %v672_v41 = vld [vmem:[#allocation2 + $0x29] sm:$0xff]  ;;  %v8474_v43 = vpack.c.bf16 %v638_v32, %v8323_v27  ;;  %v140_v49 = vld [vmem:[#allocation2 + $0x41] sm:$0xff]  ;;  %v8496_v6 = vld [vmem:[#allocation2 + $0x56] sm:$0xff] }
  0x25   :  { %v705_v48 = vld [vmem:[#allocation2 + $0x2a] sm:$0xff]  ;;  %v8501_v13 = vld [vmem:[#allocation2 + $0x57] sm:$0xff]  ;;  %v8511_v29 = vld [vmem:[#allocation2 + $0x61] sm:$0xff] }
  0x26   :  { %284 = vrot.lane.b32.xlu0 %v276_v44, %s8130_s27  ;;  %619 = vrot.lane.b32.xlu1 %v611_v45, %s8131_s28  ;;  %v124_v44 = vld [vmem:[#allocation2 + $0x40] sm:$0xff]  ;;  %v442_v45 = vld [vmem:[#allocation2 + $0x4a] sm:$0xff]  ;;  %v711_v52 = vpack.c.bf16 %v705_v48, %v8373_v0  ;;  %v613_v18 = vpack.c.bf16 %v8501_v13, %v607_v8 }
  0x27   :  { %7203 = vmatpush3.bf16.msra.mxu1 %v7821_v19  ;;  %v130_v38 = vpack.c.bf16 %v8456_v40, %v124_v44  ;;  %v475_v50 = vld [vmem:[#allocation2 + $0x4b] sm:$0xff]  ;;  %v448_v51 = vpack.c.bf16 %v8466_v46, %v442_v45  ;;  %v206_v58 = vld [vmem:[#allocation2 + $0x43] sm:$0xff]  ;;  %v8506_v19 = vld [vmem:[#allocation2 + $0x58] sm:$0xff] }
  0x28   :  { %7204 = vmatprep.subr.bf16.mxu1 %v7822_v21  ;;  %v481_v56 = vpack.c.bf16 %v8481_v53, %v475_v50  ;;  %v239_v63 = vld [vmem:[#allocation2 + $0x44] sm:$0xff]  ;;  %v574_v0 = vld [vmem:[#allocation2 + $0x4e] sm:$0xff]  ;;  %v212_v1 = vpack.c.bf16 %v475_v50, %v206_v58  ;;  %v406_v22 = vld [vmem:[#allocation2 + $0x59] sm:$0xff] }
  0x29   :  { %134 = vst.msk [vmem:[#allocation4 + $0x80] sm:$0xff] %vm40_vm0, %v130_v38  ;;  %v272_v7 = vld [vmem:[#allocation2 + $0x45] sm:$0xff]  ;;  %v640_v15 = vld [vmem:[#allocation2 + $0x50] sm:$0xff]  ;;  %v477_v38 = vld [vmem:[#allocation2 + $0x5b] sm:$0xff] }
  0x2a   :  { %317 = vrot.lane.b32.xlu0 %v309_v47, %s10715_s12  ;;  %652 = vrot.lane.b32.xlu1 %v644_v30, %s10713_s13  ;;  %s10719_s13 = smov 98   ;;  %s10717_s12 = smov 110   ;;  %v8436_v30 = vpack.c.bf16 %v506_v12, %v8319_v25  ;;  %v404_v25 = vld [vmem:[#allocation2 + $0x49] sm:$0xff]  ;;  %v678_v47 = vpack.c.bf16 %v672_v41, %v8368_v62  ;;  %v8491_v62 = vld [vmem:[#allocation2 + $0x55] sm:$0xff]  ;;  %v580_v12 = vpack.c.bf16 %v8496_v6, %v574_v0  ;;  %v543_v50 = vld [vmem:[#allocation2 + $0x5d] sm:$0xff] }
  0x2b   :  { %7205 = vmatpush3.bf16.msra.mxu1 %v7823_v28  ;;  %v410_v42 = vpack.c.bf16 %v8454_v39, %v404_v25  ;;  %v146_v27 = vpack.c.bf16 %v404_v25, %v140_v49  ;;  %v547_v3 = vpack.c.bf16 %v8491_v62, %v541_v59  ;;  %v305_v14 = vld [vmem:[#allocation2 + $0x46] sm:$0xff]  ;;  %v278_v16 = vpack.c.bf16 %v541_v59, %v272_v7  ;;  %v510_v49 = vld [vmem:[#allocation2 + $0x5c] sm:$0xff] }
  0x2c   :  { %1459 = vmatprep.subr.bf16.mxu1 %v8119_v9  ;;  %v645_v9 = vpack.c.bf16 %v639_v36, %v638_v32  ;;  %v338_v21 = vld [vmem:[#allocation2 + $0x47] sm:$0xff]  ;;  %v311_v26 = vpack.c.bf16 %v574_v0, %v305_v14  ;;  %v646_v28 = vpack.c.bf16 %v8506_v19, %v640_v15  ;;  %v8516_v32 = vpack.c.bf16 %v8511_v29, %v406_v22  ;;  %v127_v36 = vld [vmem:[#allocation2 + $0x58] sm:$0xff] }
  0x2d   :  { %v344_v31 = vpack.c.bf16 %v607_v8, %v338_v21  ;;  %v679_v41 = vpack.c.bf16 %v406_v22, %v8454_v39  ;;  %v8524_v44 = vld [vmem:[#allocation2 + $0x62] sm:$0xff] }
  0x2e   :  { %350 = vrot.lane.b32.xlu0 %v342_v54, %s10719_s13  ;;  %685 = vrot.lane.b32.xlu1 %v677_v55, %s10717_s12  ;;  %s8136_s12 = smov 112   ;;  %s8137_s13 = smov 124   ;;  %v173_v54 = vld [vmem:[#allocation2 + $0x42] sm:$0xff] }
  0x2f   :  { %v478_v48 = vld [vmem:[#allocation2 + $0x63] sm:$0xff] }
  0x30   :  { %v8535_v39 = vpack.c.bf16 %v478_v48, %v477_v38  ;;  %v577_v58 = vld [vmem:[#allocation2 + $0x66] sm:$0xff] }
  0x31   :  { %v610_v0 = vld [vmem:[#allocation2 + $0x67] sm:$0xff] }
  0x32   :  { %383 = vrot.lane.b32.xlu0 %v375_v60, %s8136_s12  ;;  %718 = vrot.lane.b32.xlu1 %v710_v61, %s8137_s13  ;;  %v179_v60 = vpack.c.bf16 %v442_v45, %v173_v54  ;;  %v642_v7 = vld [vmem:[#allocation2 + $0x60] sm:$0xff]  ;;  %v8644_v48 = vld [vmem:[#allocation2 + $0x2b] sm:$0xff] }
  0x36   :  { %418 = vrot.lane.b32.xlu0 %v8384_v4, %s8120_s17  ;;  %456 = vrot.lane.b32.xlu1 %v8387_v5, %s8122_s19 }
  0x3a   :  { %154 = vrot.lane.b32.xlu0 %v677_v55, %s8121_s18  ;;  %489 = vrot.lane.b32.xlu1 %v8399_v11, %s8123_s20  ;;  %v508_v55 = vld [vmem:[#allocation2 + $0x4c] sm:$0xff] }
  0x3b   :  { %v245_v10 = vpack.c.bf16 %v508_v55, %v239_v63 }
  0x3e   :  { %187 = vrot.lane.b32.xlu0 %v710_v61, %s8124_s21  ;;  %522 = vrot.lane.b32.xlu1 %v8412_v17, %s8125_s22  ;;  %v514_v61 = vpack.c.bf16 %v8486_v57, %v508_v55  ;;  %v576_v55 = vld [vmem:[#allocation2 + $0x5e] sm:$0xff] }
  0x3f   :  { %v8564_v63 = vpack.c.bf16 %v577_v58, %v576_v55  ;;  %v7827_v58 = vld [vmem:[%s10702_s1 + $0x98] sm:$0xff]  }
  0x42   :  { %220 = vrot.lane.b32.xlu0 %v8424_v23, %s8126_s23  ;;  %555 = vrot.lane.b32.xlu1 %v8426_v24, %s8127_s24 }
  0x46   :  { %253 = vrot.lane.b32.xlu0 %v8436_v30, %s8128_s25  ;;  %588 = vrot.lane.b32.xlu1 %v8438_v20, %s8129_s26 }
  0x4a   :  { %286 = vrot.lane.b32.xlu0 %v8446_v34, %s8130_s27  ;;  %621 = vrot.lane.b32.xlu1 %v612_v35, %s8131_s28  ;;  %v126_v35 = vld [vmem:[#allocation2 + $0x50] sm:$0xff] }
  0x4b   :  { %v131_v25 = vpack.c.bf16 %v127_v36, %v126_v35  ;;  %v8598_v35 = vpack.c.bf16 %v642_v7, %v8506_v19 }
  0x4d   :  { %135 = vst.msk [vmem:[#allocation4 + $0xc0] sm:$0xff] %vm40_vm0, %v131_v25  ;;  %vm362_vm0 = vcmask 917264  }
  0x4e   :  { %319 = vrot.lane.b32.xlu0 %v8452_v37, %s10729_s15  ;;  %654 = vrot.lane.b32.xlu1 %v645_v9, %s10730_s16  ;;  %v444_v9 = vld [vmem:[#allocation2 + $0x5a] sm:$0xff] }
  0x4f   :  { %v8529_v45 = vpack.c.bf16 %v8524_v44, %v444_v9 }
  0x52   :  { %352 = vrot.lane.b32.xlu0 %v8462_v33, %s10731_s29  ;;  %420 = vrot.lane.b32.xlu1 %v410_v42, %s8120_s17  ;;  %v377_v42 = vpack.c.bf16 %v640_v15, %v8456_v40  ;;  %v511_v40 = vld [vmem:[#allocation2 + $0x64] sm:$0xff]  ;;  %v8581_v15 = vpack.c.bf16 %v576_v55, %v8496_v6  ;;  %v8669_v55 = vld [vmem:[#allocation2 + $0x2e] sm:$0xff] }
  0x56   :  { %687 = vrot.lane.b32.xlu0 %v678_v47, %s10732_s30  ;;  %385 = vrot.lane.b32.xlu1 %v8474_v43, %s8136_s12  ;;  %v712_v47 = vpack.c.bf16 %v444_v9, %v8466_v46  ;;  %v544_v46 = vld [vmem:[#allocation2 + $0x65] sm:$0xff] }
  0x5a   :  { %458 = vrot.lane.b32.xlu0 %v448_v51, %s8122_s19  ;;  %720 = vrot.lane.b32.xlu1 %v711_v52, %s8137_s13  ;;  %v8540_v51 = vpack.c.bf16 %v511_v40, %v510_v49 }
  0x5e   :  { %156 = vrot.lane.b32.xlu0 %v146_v27, %s8121_s18  ;;  %491 = vrot.lane.b32.xlu1 %v481_v56, %s8123_s20  ;;  %v8551_v27 = vpack.c.bf16 %v477_v38, %v8481_v53  ;;  %v8553_v56 = vpack.c.bf16 %v544_v46, %v543_v50  ;;  %v8562_v53 = vpack.c.bf16 %v510_v49, %v8486_v57  ;;  %v8646_v49 = vld [vmem:[#allocation4 + $0x18] sm:$0xff]  ;;  %v8660_v46 = vld [vmem:[#allocation2 + $0x2d] sm:$0xff] }
  0x5f   :  { %v8573_v57 = vpack.c.bf16 %v543_v50, %v8491_v62 }
  0x62   :  { %189 = vrot.lane.b32.xlu0 %v179_v60, %s8124_s21  ;;  %524 = vrot.lane.b32.xlu1 %v514_v61, %s8125_s22  ;;  %v609_v61 = vld [vmem:[#allocation2 + $0x5f] sm:$0xff] }
  0x63   :  { %v614_v8 = vpack.c.bf16 %v610_v0, %v609_v61  ;;  %v8589_v22 = vpack.c.bf16 %v609_v61, %v8501_v13  ;;  %v8080_v0 = vld [vmem:[#allocation2 + $0x26] sm:$0xff] }
  0x66   :  { %222 = vrot.lane.b32.xlu0 %v212_v1, %s8126_s23  ;;  %557 = vrot.lane.b32.xlu1 %v547_v3, %s8127_s24 }
  0x6a   :  { %255 = vrot.lane.b32.xlu0 %v245_v10, %s8128_s25  ;;  %590 = vrot.lane.b32.xlu1 %v580_v12, %s8129_s26  ;;  %v643_v10 = vld [vmem:[#allocation2 + $0x68] sm:$0xff] }
  0x6b   :  { %v647_v62 = vpack.c.bf16 %v643_v10, %v642_v7  ;;  %v7828_v7 = vld [vmem:[%s10702_s1 + $0xa0] sm:$0xff]  }
  0x6e   :  { %288 = vrot.lane.b32.xlu0 %v278_v16, %s8130_s27  ;;  %623 = vrot.lane.b32.xlu1 %v613_v18, %s8131_s28  ;;  %v676_v16 = vld [vmem:[#allocation2 + $0x69] sm:$0xff] }
  0x6f   :  { %v680_v6 = vpack.c.bf16 %v676_v16, %v8511_v29 }
  0x72   :  { %321 = vrot.lane.b32.xlu0 %v311_v26, %s10729_s15  ;;  %656 = vrot.lane.b32.xlu1 %v646_v28, %s10730_s16  ;;  %v709_v26 = vld [vmem:[#allocation2 + $0x6a] sm:$0xff] }
  0x73   :  { %v713_v13 = vpack.c.bf16 %v709_v26, %v8524_v44 }
  0x76   :  { %354 = vrot.lane.b32.xlu0 %v344_v31, %s10731_s29  ;;  %422 = vrot.lane.b32.xlu1 %v8516_v32, %s8120_s17  ;;  %s8138_s17 = smov 10  }
  0x7a   :  { %689 = vrot.lane.b32.xlu0 %v679_v41, %s10732_s30  ;;  %387 = vrot.lane.b32.xlu1 %v377_v42, %s8136_s12 }
  0x7e   :  { %460 = vrot.lane.b32.xlu0 %v8529_v45, %s8122_s19  ;;  %722 = vrot.lane.b32.xlu1 %v712_v47, %s8137_s13  ;;  %s8140_s19 = smov 38  }
  0x82   :  { %158 = vrot.lane.b32.xlu0 %v679_v41, %s8121_s18  ;;  %493 = vrot.lane.b32.xlu1 %v8535_v39, %s8123_s20  ;;  %s8139_s18 = smov 24   ;;  %s8141_s20 = smov 52  }
  0x84   :  { %v8542_v52 = vpop.permute.xlu0 %416  ;;  %v153_v54 = vpop.permute.xlu1 %152 }
  0x85   :  { %431 = vst.msk [vmem:[#allocation4 + $0x8] sm:$0xff] %vm430_vm2, %v8542_v52 }
  0x86   :  { %165 = vst.msk [vmem:[#allocation4] sm:$0xff] %vm164_vm3, %v153_v54  ;;  %191 = vrot.lane.b32.xlu0 %v712_v47, %s8124_s21  ;;  %526 = vrot.lane.b32.xlu1 %v8540_v51, %s8125_s22  ;;  %s8142_s21 = smov 66   ;;  %s8143_s22 = smov 122  }
  0x88   :  { %v455_v59 = vpop.permute.xlu0 %454  ;;  %v488_v60 = vpop.permute.xlu1 %487 }
  0x89   :  { %467 = vst.msk [vmem:[#allocation4 + $0x8] sm:$0xff] %vm466_vm4, %v455_v59 }
  0x8a   :  { %500 = vst.msk [vmem:[#allocation4 + $0x8] sm:$0xff] %vm499_vm5, %v488_v60  ;;  %224 = vrot.lane.b32.xlu0 %v8551_v27, %s8126_s23  ;;  %559 = vrot.lane.b32.xlu1 %v8553_v56, %s8127_s24 }
  0x8c   :  { %v186_v1 = vpop.permute.xlu0 %185  ;;  %v521_v3 = vpop.permute.xlu1 %520 }
  0x8d   :  { %198 = vst.msk [vmem:[#allocation4] sm:$0xff] %vm10727_vm6, %v186_v1  ;;  %v848_v1 = vpack.c.bf16 %v8669_v55, %v8080_v0 }
  0x8e   :  { %533 = vst.msk [vmem:[#allocation4 + $0x8] sm:$0xff] %vm10728_vm7, %v521_v3  ;;  %257 = vrot.lane.b32.xlu0 %v8562_v53, %s8128_s25  ;;  %592 = vrot.lane.b32.xlu1 %v8564_v63, %s8129_s26  ;;  %s8144_s25 = smov 80   ;;  %s8145_s26 = smov 8   ;;  %v1007_v3 = vld [vmem:[#allocation2 + $0x33] sm:$0xff] }
  0x8f   :  { %v1013_v16 = vpack.c.bf16 %v1007_v3, %v8644_v48 }
  0x90   :  { %v219_v12 = vpop.permute.xlu0 %218  ;;  %v554_v14 = vpop.permute.xlu1 %553 }
  0x91   :  { %231 = vst.msk [vmem:[#allocation4] sm:$0xff] %vm10726_vm8, %v219_v12  ;;  %v908_v12 = vld [vmem:[#allocation2 + $0x30] sm:$0xff] }
  0x92   :  { %566 = vst.msk [vmem:[#allocation4 + $0x8] sm:$0xff] %vm10725_vm9, %v554_v14  ;;  %290 = vrot.lane.b32.xlu0 %v8573_v57, %s8130_s27  ;;  %625 = vrot.lane.b32.xlu1 %v614_v8, %s8131_s28  ;;  %v8081_v14 = vld [vmem:[#allocation2 + $0x27] sm:$0xff] }
  0x94   :  { %v252_v18 = vpop.permute.xlu0 %251  ;;  %v587_v21 = vpop.permute.xlu1 %586 }
  0x95   :  { %264 = vst.msk [vmem:[#allocation4] sm:$0xff] %vm10724_vm10, %v252_v18  ;;  %vm732_vm10 = vcmask 80896   ;;  %v1045_v18 = vld [vmem:[#allocation2 + $0x34] sm:$0xff] }
  0x96   :  { %599 = vst.msk [vmem:[#allocation4 + $0x8] sm:$0xff] %vm10723_vm11, %v587_v21  ;;  %323 = vrot.lane.b32.xlu0 %v8581_v15, %s10729_s15  ;;  %658 = vrot.lane.b32.xlu1 %v647_v62, %s10730_s16  ;;  %vm730_vm11 = vcmask 1048544   ;;  %s8148_s15 = smov 108   ;;  %s8149_s16 = smov 36   ;;  %v7829_v21 = vld [vmem:[%s10702_s1 + $0xa8] sm:$0xff]  }
  0x98   :  { %v285_v28 = vpop.permute.xlu0 %284  ;;  %v620_v31 = vpop.permute.xlu1 %619 }
  0x99   :  { %297 = vst.msk [vmem:[#allocation4] sm:$0xff] %vm10722_vm12, %v285_v28  ;;  %vm428_vm12 = vcmask 1048560   ;;  %v941_v28 = vld [vmem:[#allocation2 + $0x31] sm:$0xff] }
  0x9a   :  { %632 = vst.msk [vmem:[#allocation4 + $0x8] sm:$0xff] %vm10721_vm13, %v620_v31  ;;  %356 = vrot.lane.b32.xlu0 %v8589_v22, %s10731_s29  ;;  %691 = vrot.lane.b32.xlu1 %v680_v6, %s10732_s30  ;;  %vm395_vm13 = vcmask 1032064   ;;  %v8082_v31 = vld [vmem:[#allocation2 + $0x28] sm:$0xff] }
  0x9c   :  { %v318_v29 = vpop.permute.xlu0 %317  ;;  %v653_v36 = vpop.permute.xlu1 %652 }
  0x9d   :  { %330 = vst.msk [vmem:[#allocation4] sm:$0xff] %vm329_vm14, %v318_v29 }
  0x9e   :  { %665 = vst.msk [vmem:[#allocation4 + $0x8] sm:$0xff] %vm664_vm15, %v653_v36  ;;  %389 = vrot.lane.b32.xlu0 %v8598_v35, %s8136_s12  ;;  %724 = vrot.lane.b32.xlu1 %v713_v13, %s8137_s13  ;;  %s8146_s12 = smov 94   ;;  %s8147_s13 = smov 22   ;;  %v914_v13 = vpack.c.bf16 %v908_v12, %v8082_v31  ;;  %v1078_v36 = vld [vmem:[#allocation2 + $0x35] sm:$0xff] }
  0x9f   :  { %v1011_v12 = vld [vmem:[#allocation2 + $0x73] sm:$0xff] }
  0xa0   :  { %v351_v25 = vpop.permute.xlu0 %350  ;;  %v686_v9 = vpop.permute.xlu1 %685 }
  0xa1   :  { %363 = vst.msk [vmem:[#allocation4] sm:$0xff] %vm362_vm0, %v351_v25  ;;  %v7830_v25 = vld [vmem:[%s10702_s1 + $0xb0] sm:$0xff]  }
  0xa2   :  { %698 = vst.msk [vmem:[#allocation4 + $0x8] sm:$0xff] %vm697_vm1, %v686_v9  ;;  %756 = vrot.lane.b32.xlu0 %v8424_v23, %s8138_s17  ;;  %789 = vrot.lane.b32.xlu1 %v8436_v30, %s8139_s18 }
  0xa4   :  { %v384_v19 = vpop.permute.xlu0 %383  ;;  %v719_v41 = vpop.permute.xlu1 %718 }
  0xa5   :  { %396 = vst.msk [vmem:[#allocation4] sm:$0xff] %vm395_vm13, %v384_v19 }
  0xa6   :  { %731 = vst.msk [vmem:[#allocation4 + $0x8] sm:$0xff] %vm730_vm11, %v719_v41  ;;  %822 = vrot.lane.b32.xlu0 %v8446_v34, %s8140_s19  ;;  %855 = vrot.lane.b32.xlu1 %v8452_v37, %s8141_s20  ;;  %v7824_v34 = vld [vmem:[%s10702_s1 + $0x80] sm:$0xff]  }
  0xa7   :  { %733 = vst.msk [vmem:[#allocation4 + $0x10] sm:$0xff] %vm732_vm10, %v719_v41  ;;  %v974_v41 = vld [vmem:[#allocation2 + $0x32] sm:$0xff] }
  0xa8   :  { %429 = vst.msk [vmem:[#allocation4] sm:$0xff] %vm428_vm12, %v8542_v52  ;;  %v8621_v23 = vpop.permute.xlu0 %418  ;;  %v457_v30 = vpop.permute.xlu1 %456  ;;  %v8078_v52 = vld [vmem:[#allocation2 + $0x24] sm:$0xff] }
  0xa9   :  { %433 = vst.msk [vmem:[#allocation4 + $0x48] sm:$0xff] %vm430_vm2, %v8621_v23 }
  0xaa   :  { %468 = vst.msk [vmem:[#allocation4 + $0x48] sm:$0xff] %vm466_vm4, %v457_v30  ;;  %888 = vrot.lane.b32.xlu0 %v8462_v33, %s8142_s21  ;;  %1020 = vrot.lane.b32.xlu1 %v8399_v11, %s8143_s22  ;;  %v7825_v11 = vld [vmem:[%s10702_s1 + $0x88] sm:$0xff]  }
  0xab   :  { %v8083_v30 = vld [vmem:[#allocation2 + $0x29] sm:$0xff] }
  0xac   :  { %v155_v37 = vpop.permute.xlu0 %154  ;;  %v490_v42 = vpop.permute.xlu1 %489 }
  0xad   :  { %v1142_v44 = vld [vmem:[#allocation4 + $0x8] sm:$0xff]  ;;  %166 = vst.msk [vmem:[#allocation4 + $0x40] sm:$0xff] %vm164_vm3, %v155_v37  ;;  %v1084_v37 = vpack.c.bf16 %v1078_v36, %v8660_v46 }
  0xae   :  { %501 = vst.msk [vmem:[#allocation4 + $0x48] sm:$0xff] %vm499_vm5, %v490_v42  ;;  %1426 = vmatprep.mubr.bf16.mxu1 %v1142_v44  ;;  %921 = vrot.lane.b32.xlu0 %v8474_v43, %s8144_s25  ;;  %v7826_v43 = vld [vmem:[%s10702_s1 + $0x90] sm:$0xff]   ;;  %v7831_v44 = vld [vmem:[%s10702_s1 + $0xb8] sm:$0xff]  }
  0xaf   :  { %v1141_v38 = vld [vmem:[#allocation4] sm:$0xff]  ;;  %1058 = vrot.lane.b32.xlu1 %v8412_v17, %s8145_s26  ;;  %v8653_v17 = vld [vmem:[#allocation2 + $0x2c] sm:$0xff]  ;;  %v1111_v42 = vld [vmem:[#allocation2 + $0x36] sm:$0xff] }
  0xb0   :  { %1427 = vmatmul.mubr.bf16.vlgmr.msra.gmra.mrb[0].mxu1 %v1141_v38  ;;  %v188_v33 = vpop.permute.xlu0 %187  ;;  %v523_v47 = vpop.permute.xlu1 %522  ;;  %v782_v54 = vpack.c.bf16 %v8653_v17, %v8078_v52  ;;  %v1051_v29 = vpack.c.bf16 %v1045_v18, %v8653_v17  ;;  %v7832_v17 = vld [vmem:[%s10702_s1 + $0xc0] sm:$0xff]  }
  0xb1   :  { %1460 = vmatpush1.bf16.msra.mxu1 %v7824_v34  ;;  %199 = vst.msk [vmem:[#allocation4 + $0x40] sm:$0xff] %vm10727_vm6, %v188_v33  ;;  %v947_v34 = vpack.c.bf16 %v941_v28, %v8083_v30  ;;  %v8084_v33 = vld [vmem:[#allocation2 + $0x2a] sm:$0xff]  ;;  %v978_v30 = vld [vmem:[#allocation2 + $0x72] sm:$0xff] }
  0xb2   :  { %534 = vst.msk [vmem:[#allocation4 + $0x48] sm:$0xff] %vm10728_vm7, %v523_v47  ;;  %1461 = vmatprep.subr.bf16.mxu1 %v8646_v49  ;;  %954 = vrot.lane.b32.xlu0 %v8384_v4, %s8146_s12  ;;  %v8077_v4 = vld [vmem:[#allocation2 + $0x23] sm:$0xff]  ;;  %v980_v47 = vpack.c.bf16 %v974_v41, %v8084_v33 }
  0xb3   :  { %1091 = vrot.lane.b32.xlu1 %v8426_v24, %s8147_s13  ;;  %v749_v24 = vpack.c.bf16 %v8644_v48, %v8077_v4  ;;  %v1117_v48 = vpack.c.bf16 %v1111_v42, %v8669_v55  ;;  %v7835_v4 = vld [vmem:[%s10702_s1 + $0xd8] ss:$0 sps:$4 sm:$0x11]   ;;  %v8089_v18 = vld [vmem:[#allocation2 + $0x67] sm:$0xff] }
  0xb4   :  { %v221_v40 = vpop.permute.xlu0 %220  ;;  %v556_v50 = vpop.permute.xlu1 %555 }
  0xb5   :  { %1462 = vmatpush1.bf16.msra.mxu1 %v7825_v11  ;;  %232 = vst.msk [vmem:[#allocation4 + $0x40] sm:$0xff] %vm10726_vm8, %v221_v40  ;;  %vm10734_vm8 = vcmask 671264  }
  0xb6   :  { %567 = vst.msk [vmem:[#allocation4 + $0x48] sm:$0xff] %vm10725_vm9, %v556_v50  ;;  %1463 = vmatprep.subr.bf16.mxu1 %v8646_v49  ;;  %987 = vrot.lane.b32.xlu0 %v8387_v5, %s8148_s15  ;;  %vm10733_vm9 = vcmask 572864   ;;  %v875_v5 = vld [vmem:[#allocation2 + $0x2f] sm:$0xff] }
  0xb7   :  { %1124 = vrot.lane.b32.xlu1 %v8438_v20, %s8149_s16  ;;  %v8079_v20 = vld [vmem:[#allocation2 + $0x25] sm:$0xff]  ;;  %v881_v62 = vpack.c.bf16 %v875_v5, %v8081_v14 }
  0xb8   :  { %v254_v59 = vpop.permute.xlu0 %253  ;;  %v589_v60 = vpop.permute.xlu1 %588  ;;  %v815_v61 = vpack.c.bf16 %v8660_v46, %v8079_v20 }
  0xb9   :  { %1464 = vmatpush1.bf16.msra.mxu1 %v7826_v43  ;;  %265 = vst.msk [vmem:[#allocation4 + $0x40] sm:$0xff] %vm10733_vm9, %v254_v59  ;;  %vm10736_vm9 = vcmask 786064  }
  0xba   :  { %600 = vst.msk [vmem:[#allocation4 + $0x48] sm:$0xff] %vm10734_vm8, %v589_v60  ;;  %1465 = vmatprep.subr.bf16.mxu1 %v8646_v49  ;;  %758 = vrot.lane.b32.xlu0 %v749_v24, %s8138_s17  ;;  %vm10735_vm8 = vcmask 687664   ;;  %v7834_v24 = vld [vmem:[%s10702_s1 + $0xd0] sm:$0xff]  }
  0xbb   :  { %791 = vrot.lane.b32.xlu1 %v782_v54, %s8139_s18 }
  0xbc   :  { %v287_v8 = vpop.permute.xlu0 %286  ;;  %v622_v10 = vpop.permute.xlu1 %621 }
  0xbd   :  { %1466 = vmatpush1.bf16.msra.mxu1 %v7827_v58  ;;  %298 = vst.msk [vmem:[#allocation4 + $0x40] sm:$0xff] %vm10735_vm8, %v287_v8  ;;  %vm1390_vm8 = vcmask 1040384   ;;  %v8088_v8 = vld [vmem:[#allocation2 + $0x66] sm:$0xff] }
  0xbe   :  { %633 = vst.msk [vmem:[#allocation4 + $0x48] sm:$0xff] %vm10736_vm9, %v622_v10  ;;  %1467 = vmatprep.subr.bf16.mxu1 %v8646_v49  ;;  %824 = vrot.lane.b32.xlu0 %v815_v61, %s8140_s19  ;;  %vm10737_vm9 = vcmask 458064  }
  0xbf   :  { %857 = vrot.lane.b32.xlu1 %v848_v1, %s8141_s20  ;;  %v8779_v1 = vld [vmem:[#allocation2 + $0x6e] sm:$0xff] }
  0xc0   :  { %v320_v6 = vpop.permute.xlu0 %319  ;;  %v655_v26 = vpop.permute.xlu1 %654  ;;  %v850_v10 = vpack.c.bf16 %v8779_v1, %v8088_v8 }
  0xc1   :  { %1468 = vmatpush1.bf16.msra.mxu1 %v7828_v7  ;;  %331 = vst.msk [vmem:[#allocation4 + $0x40] sm:$0xff] %vm329_vm14, %v320_v6  ;;  %v879_v7 = vld [vmem:[#allocation2 + $0x6f] sm:$0xff] }
  0xc2   :  { %666 = vst.msk [vmem:[#allocation4 + $0x48] sm:$0xff] %vm664_vm15, %v655_v26  ;;  %1469 = vmatprep.subr.bf16.mxu1 %v8646_v49  ;;  %890 = vrot.lane.b32.xlu0 %v881_v62, %s8142_s21  ;;  %v1049_v26 = vld [vmem:[#allocation2 + $0x74] sm:$0xff] }
  0xc3   :  { %1022 = vrot.lane.b32.xlu1 %v1013_v16, %s8143_s22  ;;  %v912_v16 = vld [vmem:[#allocation2 + $0x70] sm:$0xff] }
  0xc4   :  { %v353_v9 = vpop.permute.xlu0 %352  ;;  %v8702_v19 = vpop.permute.xlu1 %420 }
  0xc5   :  { %1470 = vmatpush1.bf16.msra.mxu1 %v7829_v21  ;;  %364 = vst.msk [vmem:[#allocation4 + $0x40] sm:$0xff] %vm362_vm0, %v353_v9  ;;  %v883_v21 = vpack.c.bf16 %v879_v7, %v8089_v18  ;;  %v1082_v9 = vld [vmem:[#allocation2 + $0x75] sm:$0xff] }
  0xc6   :  { %435 = vst.msk [vmem:[#allocation4 + $0x88] sm:$0xff] %vm430_vm2, %v8702_v19  ;;  %1471 = vmatprep.subr.bf16.mxu1 %v8646_v49  ;;  %923 = vrot.lane.b32.xlu0 %v914_v13, %s8144_s25  ;;  %v945_v13 = vld [vmem:[#allocation2 + $0x71] sm:$0xff] }
  0xc7   :  { %1060 = vrot.lane.b32.xlu1 %v1051_v29, %s8145_s26  ;;  %v8090_v29 = vld [vmem:[#allocation2 + $0x68] sm:$0xff] }
  0xc8   :  { %v688_v38 = vpop.permute.xlu0 %687  ;;  %v386_v11 = vpop.permute.xlu1 %385  ;;  %v916_v36 = vpack.c.bf16 %v912_v16, %v8090_v29 }
  0xc9   :  { %1472 = vmatpush1.bf16.msra.mxu1 %v7830_v25  ;;  %699 = vst.msk [vmem:[#allocation4 + $0x48] sm:$0xff] %vm697_vm1, %v688_v38 }
  0xca   :  { %397 = vst.msk [vmem:[#allocation4 + $0x40] sm:$0xff] %vm395_vm13, %v386_v11  ;;  %1473 = vmatprep.subr.bf16.mxu1 %v8646_v49  ;;  %956 = vrot.lane.b32.xlu0 %v947_v34, %s8146_s12  ;;  %v8091_v34 = vld [vmem:[#allocation2 + $0x69] sm:$0xff] }
  0xcb   :  { %432 = vst.msk [vmem:[#allocation4 + $0x40] sm:$0xff] %vm428_vm12, %v8621_v23  ;;  %1093 = vrot.lane.b32.xlu1 %v1084_v37, %s8147_s13  ;;  %v7833_v23 = vld [vmem:[%s10702_s1 + $0xc8] sm:$0xff]   ;;  %v949_v37 = vpack.c.bf16 %v945_v13, %v8091_v34 }
  0xcc   :  { %v459_v43 = vpop.permute.xlu0 %458  ;;  %v721_v40 = vpop.permute.xlu1 %720 }
  0xcd   :  { %1474 = vmatpush1.bf16.msra.mxu1 %v7831_v44  ;;  %469 = vst.msk [vmem:[#allocation4 + $0x88] sm:$0xff] %vm466_vm4, %v459_v43  ;;  %v1115_v44 = vld [vmem:[#allocation2 + $0x76] sm:$0xff] }
  0xce   :  { %734 = vst.msk [vmem:[#allocation4 + $0x48] sm:$0xff] %vm730_vm11, %v721_v40  ;;  %1475 = vmatprep.subr.bf16.mxu1 %v8646_v49  ;;  %989 = vrot.lane.b32.xlu0 %v980_v47, %s8148_s15  ;;  %v1119_v43 = vpack.c.bf16 %v1115_v44, %v8779_v1 }
  0xcf   :  { %735 = vst.msk [vmem:[#allocation4 + $0x50] sm:$0xff] %vm732_vm10, %v721_v40  ;;  %1126 = vrot.lane.b32.xlu1 %v1117_v48, %s8149_s16  ;;  %v8092_v48 = vld [vmem:[#allocation2 + $0x6a] sm:$0xff] }
  0xd0   :  { %v157_v50 = vpop.permute.xlu0 %156  ;;  %v492_v46 = vpop.permute.xlu1 %491 }
  0xd1   :  { %1476 = vmatpush1.bf16.msra.mxu1 %v7832_v17  ;;  %167 = vst.msk [vmem:[#allocation4 + $0x80] sm:$0xff] %vm164_vm3, %v157_v50  ;;  %v982_v17 = vpack.c.bf16 %v978_v30, %v8092_v48 }
  0xd2   :  { %502 = vst.msk [vmem:[#allocation4 + $0x88] sm:$0xff] %vm499_vm5, %v492_v46  ;;  %1477 = vmatprep.subr.bf16.mxu1 %v8646_v49  ;;  %760 = vrot.lane.b32.xlu0 %v8551_v27, %s8138_s17  ;;  %v1145_v27 = vld [vmem:[#allocation4 + $0x40] sm:$0xff] }
  0xd3   :  { %793 = vrot.lane.b32.xlu1 %v8562_v53, %s8139_s18  ;;  %v1392_v53 = vsel %vm1390_vm8, %v7835_v4, 0  ;;  %vm10739_vm8 = vcmask 572864  }
  0xd4   :  { %v190_v52 = vpop.permute.xlu0 %189  ;;  %v525_v54 = vpop.permute.xlu1 %524 }
  0xd5   :  { %v1146_v55 = vld [vmem:[#allocation4 + $0x48] sm:$0xff]  ;;  %1478 = vmatpush1.bf16.msra.mxu1 %v7833_v23  ;;  %200 = vst.msk [vmem:[#allocation4 + $0x80] sm:$0xff] %vm10727_vm6, %v190_v52  ;;  %vm10738_vm6 = vcmask 556464  }
  0xd6   :  { %535 = vst.msk [vmem:[#allocation4 + $0x88] sm:$0xff] %vm10728_vm7, %v525_v54  ;;  %1434 = vmatprep.mubr.bf16.mxu1 %v1146_v55  ;;  %1479 = vmatprep.subr.bf16.mxu1 %v8646_v49  ;;  %vm10740_vm7 = vcmask 671264  }
  0xd7   :  { %826 = vrot.lane.b32.xlu0 %v8573_v57, %s8140_s19  ;;  %859 = vrot.lane.b32.xlu1 %v8581_v15, %s8141_s20 }
  0xd8   :  { %1435 = vmatmul.mubr.bf16.gmra.mrb[4].mxu1 %v1145_v27  ;;  %v223_v58 = vpop.permute.xlu0 %222  ;;  %v558_v59 = vpop.permute.xlu1 %557 }
  0xd9   :  { %1480 = vmatpush1.bf16.msra.mxu1 %v7834_v24  ;;  %233 = vst.msk [vmem:[#allocation4 + $0x80] sm:$0xff] %vm10737_vm9, %v223_v58  ;;  %vm10742_vm9 = vcmask 786064  }
  0xda   :  { %568 = vst.msk [vmem:[#allocation4 + $0x88] sm:$0xff] %vm10738_vm6, %v558_v59  ;;  %1481 = vmatprep.subr.bf16.mxu1 %v8646_v49  ;;  %vm10741_vm6 = vcmask 687664  }
  0xdb   :  { %892 = vrot.lane.b32.xlu0 %v8589_v22, %s8142_s21  ;;  %1024 = vrot.lane.b32.xlu1 %v8535_v39, %s8143_s22  ;;  %v747_v39 = vld [vmem:[#allocation2 + $0x6b] sm:$0xff] }
  0xdc   :  { %v256_v57 = vpop.permute.xlu0 %255  ;;  %v591_v15 = vpop.permute.xlu1 %590  ;;  %v780_v22 = vld [vmem:[#allocation2 + $0x6c] sm:$0xff]  ;;  %v1015_v6 = vpack.c.bf16 %v1011_v12, %v747_v39 }
  0xdd   :  { %1482 = vmatpush1.bf16.msra.mxu1 %v1392_v53  ;;  %266 = vst.msk [vmem:[#allocation4 + $0x80] sm:$0xff] %vm10739_vm8, %v256_v57  ;;  %v1053_v25 = vpack.c.bf16 %v1049_v26, %v780_v22 }
  0xde   :  { %601 = vst.msk [vmem:[#allocation4 + $0x88] sm:$0xff] %vm10740_vm7, %v591_v15  ;;  %vm10747_vm7 = vmmov %vm10739_vm8  ;;  %vm10748_vm8 = vcmask 671264  }
  0xdf   :  { %925 = vrot.lane.b32.xlu0 %v8598_v35, %s8144_s25  ;;  %1062 = vrot.lane.b32.xlu1 %v8540_v51, %s8145_s26  ;;  %v813_v51 = vld [vmem:[#allocation2 + $0x6d] sm:$0xff]  ;;  %v8085_v35 = vld [vmem:[#allocation2 + $0x63] sm:$0xff] }
  0xe0   :  { %v289_v49 = vpop.permute.xlu0 %288  ;;  %v624_v60 = vpop.permute.xlu1 %623  ;;  %v751_v61 = vpack.c.bf16 %v747_v39, %v8085_v35  ;;  %v1086_v42 = vpack.c.bf16 %v1082_v9, %v813_v51 }
  0xe1   :  { %299 = vst.msk [vmem:[#allocation4 + $0x80] sm:$0xff] %vm10741_vm6, %v289_v49 }
  0xe2   :  { %634 = vst.msk [vmem:[#allocation4 + $0x88] sm:$0xff] %vm10742_vm9, %v624_v60 }
  0xe3   :  { %958 = vrot.lane.b32.xlu0 %v8516_v32, %s8146_s12  ;;  %1095 = vrot.lane.b32.xlu1 %v8553_v56, %s8147_s13  ;;  %v8086_v32 = vld [vmem:[#allocation2 + $0x64] sm:$0xff] }
  0xe4   :  { %v322_v5 = vpop.permute.xlu0 %321  ;;  %v657_v20 = vpop.permute.xlu1 %656  ;;  %v784_v0 = vpack.c.bf16 %v780_v22, %v8086_v32 }
  0xe5   :  { %332 = vst.msk [vmem:[#allocation4 + $0x80] sm:$0xff] %vm329_vm14, %v322_v5 }
  0xe6   :  { %667 = vst.msk [vmem:[#allocation4 + $0x88] sm:$0xff] %vm664_vm15, %v657_v20 }
  0xe7   :  { %991 = vrot.lane.b32.xlu0 %v8529_v45, %s8148_s15  ;;  %1128 = vrot.lane.b32.xlu1 %v8564_v63, %s8149_s16  ;;  %v8087_v45 = vld [vmem:[#allocation2 + $0x65] sm:$0xff] }
  0xe8   :  { %v355_v56 = vpop.permute.xlu0 %354  ;;  %v8781_v3 = vpop.permute.xlu1 %422  ;;  %v817_v63 = vpack.c.bf16 %v813_v51, %v8087_v45 }
  0xe9   :  { %365 = vst.msk [vmem:[#allocation4 + $0x80] sm:$0xff] %vm362_vm0, %v355_v56 }
  0xea   :  { %437 = vst.msk [vmem:[#allocation4 + $0xc8] sm:$0xff] %vm430_vm2, %v8781_v3  ;;  %vm10743_vm2 = vcmask 343264  }
  0xeb   :  { %762 = vrot.lane.b32.xlu0 %v751_v61, %s8138_s17  ;;  %795 = vrot.lane.b32.xlu1 %v784_v0, %s8139_s18 }
  0xec   :  { %v690_v14 = vpop.permute.xlu0 %689  ;;  %v388_v62 = vpop.permute.xlu1 %387 }
  0xed   :  { %700 = vst.msk [vmem:[#allocation4 + $0x88] sm:$0xff] %vm697_vm1, %v690_v14 }
  0xee   :  { %398 = vst.msk [vmem:[#allocation4 + $0x80] sm:$0xff] %vm395_vm13, %v388_v62 }
  0xef   :  { %434 = vst.msk [vmem:[#allocation4 + $0x80] sm:$0xff] %vm428_vm12, %v8702_v19  ;;  %828 = vrot.lane.b32.xlu0 %v817_v63, %s8140_s19  ;;  %861 = vrot.lane.b32.xlu1 %v850_v10, %s8141_s20 }
  0xf0   :  { %v461_v28 = vpop.permute.xlu0 %460  ;;  %v723_v31 = vpop.permute.xlu1 %722 }
  0xf1   :  { %470 = vst.msk [vmem:[#allocation4 + $0xc8] sm:$0xff] %vm466_vm4, %v461_v28  ;;  %vm10744_vm4 = vcmask 441664  }
  0xf2   :  { %736 = vst.msk [vmem:[#allocation4 + $0x88] sm:$0xff] %vm730_vm11, %v723_v31 }
  0xf3   :  { %737 = vst.msk [vmem:[#allocation4 + $0x90] sm:$0xff] %vm732_vm10, %v723_v31  ;;  %894 = vrot.lane.b32.xlu0 %v883_v21, %s8142_s21  ;;  %1026 = vrot.lane.b32.xlu1 %v1015_v6, %s8143_s22 }
  0xf4   :  { %v159_v19 = vpop.permute.xlu0 %158  ;;  %v494_v41 = vpop.permute.xlu1 %493 }
  0xf5   :  { %168 = vst.msk [vmem:[#allocation4 + $0xc0] sm:$0xff] %vm164_vm3, %v159_v19  ;;  %vm10745_vm3 = vcmask 458064  }
  0xf6   :  { %503 = vst.msk [vmem:[#allocation4 + $0xc8] sm:$0xff] %vm499_vm5, %v494_v41  ;;  %v1149_v47 = vld [vmem:[#allocation4 + $0x80] sm:$0xff]  ;;  %vm10746_vm5 = vcmask 556464  }
  0xf7   :  { %927 = vrot.lane.b32.xlu0 %v916_v36, %s8144_s25  ;;  %1064 = vrot.lane.b32.xlu1 %v1053_v25, %s8145_s26 }
  0xf8   :  { %v192_v38 = vpop.permute.xlu0 %191  ;;  %v527_v11 = vpop.permute.xlu1 %526 }
  0xf9   :  { %v1150_v33 = vld [vmem:[#allocation4 + $0x88] sm:$0xff]  ;;  %201 = vst.msk [vmem:[#allocation4 + $0xc0] sm:$0xff] %vm10743_vm2, %v192_v38 }
  0xfa   :  { %536 = vst.msk [vmem:[#allocation4 + $0xc8] sm:$0xff] %vm10744_vm4, %v527_v11  ;;  %1442 = vmatprep.mubr.bf16.mxu1 %v1150_v33 }
  0xfb   :  { %960 = vrot.lane.b32.xlu0 %v949_v37, %s8146_s12  ;;  %1097 = vrot.lane.b32.xlu1 %v1086_v42, %s8147_s13 }
  0xfc   :  { %1443 = vmatmul.mubr.bf16.gmra.mrb[8].mxu1 %v1149_v47  ;;  %v225_v40 = vpop.permute.xlu0 %224  ;;  %v560_v23 = vpop.permute.xlu1 %559 }
  0xfd   :  { %234 = vst.msk [vmem:[#allocation4 + $0xc0] sm:$0xff] %vm10745_vm3, %v225_v40 }
  0xfe   :  { %569 = vst.msk [vmem:[#allocation4 + $0xc8] sm:$0xff] %vm10746_vm5, %v560_v23 }
  0xff   :  { %993 = vrot.lane.b32.xlu0 %v982_v17, %s8148_s15  ;;  %1130 = vrot.lane.b32.xlu1 %v1119_v43, %s8149_s16 }
 0x100   :  { %v258_v50 = vpop.permute.xlu0 %257  ;;  %v593_v46 = vpop.permute.xlu1 %592 }
 0x101   :  { %267 = vst.msk [vmem:[#allocation4 + $0xc0] sm:$0xff] %vm10747_vm7, %v258_v50 }
 0x102   :  { %602 = vst.msk [vmem:[#allocation4 + $0xc8] sm:$0xff] %vm10748_vm8, %v593_v46 }
 0x103   :  { %16 = vsyncpa [#allocation6], 0  ;;  %vm801_vm2 = vcmask 310464   ;;  %vm1103_vm4 = vcmask 294064   ;;  %vm999_vm3 = vcmask 999264   ;;  %vm1136_vm5 = vcmask 408864  }
 0x104   :  { %v291_v4 = vpop.permute.xlu0 %290  ;;  %v626_v24 = vpop.permute.xlu1 %625  ;;  %vm1032_vm7 = vcmask 1048528   ;;  %vm1377_vm8 = vcmask 408576   ;;  %s8150_s30 = smov 64   ;;  %s8153_s23 = smov [#allocation5]  }
 0x105   :  { %300 = vst.msk [vmem:[#allocation4 + $0xc0] sm:$0xff] %vm10741_vm6, %v291_v4  ;;  %vm58_vm6 = vcmask 523264   ;;  %s6514_s24 = sshll.u32 %s8153_s23, 4  ;;  %s6515_s24 = int_to_ptr.vmem [resolvable:$true] %s6514_s24 }
 0x106   :  { %635 = vst.msk [vmem:[#allocation4 + $0xc8] sm:$0xff] %vm10742_vm9, %v626_v24  ;;  %v8901_v24 = vld [vmem:[#allocation4 + $0x20] sm:$0xff]  ;;  %vm64_vm9 = vcmask 521216   ;;  %p8099_p1 = scmp.lt.s32.totalorder %s6515_s24, %s6515_s24 }
 0x107   :  { %59 = vst.msk [vmem:[#allocation3] sm:$0xff] %vm58_vm6, %v8118_v2  ;;  %60 = vst.msk [vmem:[#allocation3 + $0x8] sm:$0xff] %vm58_vm6, %v8118_v2 }
 0x108   :  { %v324_v52 = vpop.permute.xlu0 %323  ;;  %v659_v54 = vpop.permute.xlu1 %658  ;;  %61 = vst.msk [vmem:[#allocation3 + $0x10] sm:$0xff] %vm58_vm6, %v8118_v2  ;;  %62 = vst.msk [vmem:[#allocation3 + $0x18] sm:$0xff] %vm58_vm6, %v8118_v2 }
 0x109   :  { %333 = vst.msk [vmem:[#allocation4 + $0xc0] sm:$0xff] %vm329_vm14, %v324_v52  ;;  %vm768_vm14 = vcmask 195664  }
 0x10a   :  { %668 = vst.msk [vmem:[#allocation4 + $0xc8] sm:$0xff] %vm664_vm15, %v659_v54  ;;  %vm834_vm15 = vcmask 425264  }
 0x10b   :  { %63 = vst.msk [vmem:[#allocation3 + $0x20] sm:$0xff] %vm58_vm6, %v8118_v2  ;;  %66 = vst.msk [vmem:[#allocation3 + $0x30] sm:$0xff] %vm58_vm6, %v8118_v2 }
 0x10c   :  { %v357_v55 = vpop.permute.xlu0 %356  ;;  %v692_v27 = vpop.permute.xlu1 %691  ;;  %67 = vst.msk [vmem:[#allocation3 + $0x38] sm:$0xff] %vm58_vm6, %v8118_v2  ;;  %68 = vst.msk [vmem:[#allocation3 + $0x40] sm:$0xff] %vm58_vm6, %v8118_v2 }
 0x10d   :  { %366 = vst.msk [vmem:[#allocation4 + $0xc0] sm:$0xff] %vm362_vm0, %v357_v55  ;;  %vm867_vm0 = vcmask 540064  }
 0x10e   :  { %701 = vst.msk [vmem:[#allocation4 + $0xc8] sm:$0xff] %vm697_vm1, %v692_v27  ;;  %vm966_vm1 = vcmask 884464  }
 0x10f   :  { %69 = vst.msk [vmem:[#allocation3 + $0x48] sm:$0xff] %vm58_vm6, %v8118_v2  ;;  %70 = vst.msk [vmem:[#allocation3 + $0x50] sm:$0xff] %vm58_vm6, %v8118_v2 }
 0x110   :  { %v390_v53 = vpop.permute.xlu0 %389  ;;  %v725_v58 = vpop.permute.xlu1 %724  ;;  %79 = vst.msk [vmem:[#allocation4 + $0x38] sm:$0xff] %vm58_vm6, %v8901_v24  ;;  %87 = vst.msk [vmem:[#allocation4 + $0x78] sm:$0xff] %vm58_vm6, %v8901_v24 }
 0x111   :  { %399 = vst.msk [vmem:[#allocation4 + $0xc0] sm:$0xff] %vm395_vm13, %v390_v53  ;;  %vm1070_vm13 = vcmask 179264  }
 0x112   :  { %738 = vst.msk [vmem:[#allocation4 + $0xc8] sm:$0xff] %vm730_vm11, %v725_v58  ;;  %vm1034_vm11 = vcmask 64512  }
 0x113   :  { %739 = vst.msk [vmem:[#allocation4 + $0xd0] sm:$0xff] %vm732_vm10, %v725_v58  ;;  %vm900_vm10 = vcmask 654864  }
 0x114   :  { %436 = vst.msk [vmem:[#allocation4 + $0xc0] sm:$0xff] %vm428_vm12, %v8781_v3  ;;  %v757_v59 = vpop.permute.xlu0 %756  ;;  %v790_v57 = vpop.permute.xlu1 %789  ;;  %vm933_vm12 = vcmask 769664  }
 0x115   :  { %769 = vst.msk [vmem:[#allocation4 + $0x10] sm:$0xff] %vm768_vm14, %v757_v59 }
 0x116   :  { %802 = vst.msk [vmem:[#allocation4 + $0x10] sm:$0xff] %vm801_vm2, %v790_v57 }
 0x117   :  { %95 = vst.msk [vmem:[#allocation4 + $0xb8] sm:$0xff] %vm58_vm6, %v8901_v24  ;;  %103 = vst.msk [vmem:[#allocation4 + $0xf8] sm:$0xff] %vm58_vm6, %v8901_v24 }
 0x118   :  { %v823_v15 = vpop.permute.xlu0 %822  ;;  %v856_v49 = vpop.permute.xlu1 %855  ;;  %65 = vst.msk [vmem:[#allocation3 + $0x28] sm:$0x3f] %vm64_vm9, %v8118_v2  ;;  %71 = vst.msk [vmem:[#allocation3 + $0x58] sm:$0x3f] %vm64_vm9, %v8118_v2 }
 0x119   :  { %v1154_v60 = vld [vmem:[#allocation4 + $0xc8] sm:$0xff]  ;;  %835 = vst.msk [vmem:[#allocation4 + $0x10] sm:$0xff] %vm834_vm15, %v823_v15 }
 0x11a   :  { %1450 = vmatprep.mubr.bf16.mxu1 %v1154_v60  ;;  %868 = vst.msk [vmem:[#allocation4 + $0x10] sm:$0xff] %vm867_vm0, %v856_v49 }
 0x11b   :  { %v1153_v39 = vld [vmem:[#allocation4 + $0xc0] sm:$0xff] }
 0x11c   :  { %1451 = vmatmul.mubr.bf16.gmra.mrb[12].mxu1 %v1153_v39  ;;  %v889_v22 = vpop.permute.xlu0 %888  ;;  %v1021_v5 = vpop.permute.xlu1 %1020 }
 0x11d   :  { %901 = vst.msk [vmem:[#allocation4 + $0x10] sm:$0xff] %vm900_vm10, %v889_v22 }
 0x11e   :  { %1035 = vst.msk [vmem:[#allocation4 + $0x18] sm:$0xff] %vm1034_vm11, %v1021_v5 }
 0x120   :  { %v922_v20 = vpop.permute.xlu0 %921 }
 0x121   :  { %v1059_v51 = vpop.permute.xlu1 %1058  ;;  %934 = vst.msk [vmem:[#allocation4 + $0x10] sm:$0xff] %vm933_vm12, %v922_v20 }
 0x122   :  { %1071 = vst.msk [vmem:[#allocation4 + $0x18] sm:$0xff] %vm1070_vm13, %v1059_v51 }
 0x124   :  { %v955_v35 = vpop.permute.xlu0 %954 }
 0x125   :  { %v1092_v61 = vpop.permute.xlu1 %1091  ;;  %967 = vst.msk [vmem:[#allocation4 + $0x10] sm:$0xff] %vm966_vm1, %v955_v35 }
 0x126   :  { %1104 = vst.msk [vmem:[#allocation4 + $0x18] sm:$0xff] %vm1103_vm4, %v1092_v61 }
 0x128   :  { %v988_v32 = vpop.permute.xlu0 %987 }
 0x129   :  { %v1125_v0 = vpop.permute.xlu1 %1124  ;;  %1000 = vst.msk [vmem:[#allocation4 + $0x10] sm:$0xff] %vm999_vm3, %v988_v32 }
 0x12a   :  { %1137 = vst.msk [vmem:[#allocation4 + $0x18] sm:$0xff] %vm1136_vm5, %v1125_v0 }
 0x12b   :  { %1033 = vst.msk [vmem:[#allocation4 + $0x10] sm:$0xff] %vm1032_vm7, %v1021_v5 }
 0x12c   :  { %v759_v1 = vpop.permute.xlu0 %758 }
 0x12d   :  { %v792_v56 = vpop.permute.xlu1 %791  ;;  %770 = vst.msk [vmem:[#allocation4 + $0x50] sm:$0xff] %vm768_vm14, %v759_v1 }
 0x12e   :  { %803 = vst.msk [vmem:[#allocation4 + $0x50] sm:$0xff] %vm801_vm2, %v792_v56 }
 0x130   :  { %v825_v3 = vpop.permute.xlu0 %824 }
 0x131   :  { %v858_v7 = vpop.permute.xlu1 %857  ;;  %v1144_v45 = vld [vmem:[#allocation4 + $0x18] sm:$0xff]  ;;  %836 = vst.msk [vmem:[#allocation4 + $0x50] sm:$0xff] %vm834_vm15, %v825_v3 }
 0x132   :  { %6550 = vmatprep.mubr.msk.bf16.mxu1 %vm1377_vm8, %v1144_v45  ;;  %v1143_v63 = vld [vmem:[#allocation4 + $0x10] sm:$0xff]  ;;  %869 = vst.msk [vmem:[#allocation4 + $0x50] sm:$0xff] %vm867_vm0, %v858_v7 }
 0x133   :  { %1492 = vmatmul.mubr.bf16.vlgmr.msra.gmra.mrb[16].mxu1 %v1143_v63 }
 0x134   :  { %v891_v8 = vpop.permute.xlu0 %890 }
 0x135   :  { %v1023_v10 = vpop.permute.xlu1 %1022  ;;  %902 = vst.msk [vmem:[#allocation4 + $0x50] sm:$0xff] %vm900_vm10, %v891_v8  ;;  %v7836_v8 = vld [vmem:[%s10705_s4 + $0xc0] sm:$0xff]  }
 0x136   :  { %1037 = vst.msk [vmem:[#allocation4 + $0x58] sm:$0xff] %vm1034_vm11, %v1023_v10  ;;  %7270 = vmatprep.subr.bf16.mxu1 %v7836_v8 }
 0x138   :  { %v924_v12 = vpop.permute.xlu0 %923 }
 0x139   :  { %v1061_v14 = vpop.permute.xlu1 %1060  ;;  %935 = vst.msk [vmem:[#allocation4 + $0x50] sm:$0xff] %vm933_vm12, %v924_v12  ;;  %v7838_v12 = vld [vmem:[%s10705_s4 + $0x40] sm:$0xff]  }
 0x13a   :  { %1072 = vst.msk [vmem:[#allocation4 + $0x58] sm:$0xff] %vm1070_vm13, %v1061_v14  ;;  %v7839_v14 = vld [vmem:[%s10705_s4 + $0xc8] sm:$0xff]   ;;  %7230 = vmatprep.subr.bf16.mxu0 %v7838_v12 }
 0x13c   :  { %v957_v62 = vpop.permute.xlu0 %956 }
 0x13d   :  { %v1094_v16 = vpop.permute.xlu1 %1093  ;;  %968 = vst.msk [vmem:[#allocation4 + $0x50] sm:$0xff] %vm966_vm1, %v957_v62  ;;  %v7840_v62 = vld [vmem:[%s10705_s4] sm:$0xff]  }
 0x13e   :  { %1105 = vst.msk [vmem:[#allocation4 + $0x58] sm:$0xff] %vm1103_vm4, %v1094_v16  ;;  %v7841_v16 = vld [vmem:[%s10705_s4 + $0x88] sm:$0xff]   ;;  %7231 = vmatpush3.bf16.msra.mxu0 %v7840_v62 }
 0x140   :  { %v990_v18 = vpop.permute.xlu0 %989 }
 0x141   :  { %v1127_v21 = vpop.permute.xlu1 %1126  ;;  %1001 = vst.msk [vmem:[#allocation4 + $0x50] sm:$0xff] %vm999_vm3, %v990_v18  ;;  %v7842_v18 = vld [vmem:[%s10705_s4 + $0x48] sm:$0xff]  }
 0x142   :  { %1138 = vst.msk [vmem:[#allocation4 + $0x58] sm:$0xff] %vm1136_vm5, %v1127_v21  ;;  %v7843_v21 = vld [vmem:[%s10705_s4 + $0xd0] sm:$0xff]   ;;  %7232 = vmatprep.subr.bf16.mxu0 %v7842_v18 }
 0x143   :  { %1036 = vst.msk [vmem:[#allocation4 + $0x50] sm:$0xff] %vm1032_vm7, %v1023_v10  ;;  %v7837_v10 = vld [vmem:[%s10705_s4 + $0x80] sm:$0xff]  }
 0x144   :  { %v761_v6 = vpop.permute.xlu0 %760  ;;  %7271 = vmatpush3.bf16.msra.mxu1 %v7837_v10 }
 0x145   :  { %v794_v26 = vpop.permute.xlu1 %793  ;;  %771 = vst.msk [vmem:[#allocation4 + $0x90] sm:$0xff] %vm768_vm14, %v761_v6  ;;  %7272 = vmatprep.subr.bf16.mxu1 %v7839_v14  ;;  %v7844_v6 = vld [vmem:[%s10705_s4 + $0x8] sm:$0xff]  }
 0x146   :  { %804 = vst.msk [vmem:[#allocation4 + $0x90] sm:$0xff] %vm801_vm2, %v794_v26  ;;  %v7845_v26 = vld [vmem:[%s10705_s4 + $0x90] sm:$0xff]   ;;  %7233 = vmatpush3.bf16.msra.mxu0 %v7844_v6  ;;  %v7867_v6 = vld [vmem:[%s10705_s4 + $0x38] sm:$0xff]  }
 0x148   :  { %7273 = vmatpush3.bf16.msra.mxu1 %v7841_v16 }
 0x149   :  { %v827_v28 = vpop.permute.xlu0 %826  ;;  %v860_v31 = vpop.permute.xlu1 %859  ;;  %v1148_v13 = vld [vmem:[#allocation4 + $0x58] sm:$0xff]  ;;  %7274 = vmatprep.subr.bf16.mxu1 %v7843_v21 }
 0x14a   :  { %837 = vst.msk [vmem:[#allocation4 + $0x90] sm:$0xff] %vm834_vm15, %v827_v28  ;;  %6551 = vmatprep.mubr.msk.bf16.mxu1 %vm1377_vm8, %v1148_v13  ;;  %v1147_v29 = vld [vmem:[#allocation4 + $0x50] sm:$0xff]  ;;  %v7866_v21 = vld [vmem:[%s10705_s4 + $0x78] sm:$0xff]  }
 0x14b   :  { %870 = vst.msk [vmem:[#allocation4 + $0x90] sm:$0xff] %vm867_vm0, %v860_v31  ;;  %1500 = vmatmul.mubr.bf16.gmra.mrb[20].mxu1 %v1147_v29  ;;  %v7846_v28 = vld [vmem:[%s10705_s4 + $0x50] sm:$0xff]   ;;  %v7847_v31 = vld [vmem:[%s10705_s4 + $0xd8] sm:$0xff]  }
 0x14c   :  { %7275 = vmatpush3.bf16.msra.mxu1 %v7845_v26  ;;  %v7848_v13 = vld [vmem:[%s10705_s4 + $0x10] sm:$0xff]   ;;  %v7849_v29 = vld [vmem:[%s10705_s4 + $0x98] sm:$0xff]   ;;  %7234 = vmatprep.subr.bf16.mxu0 %v7846_v28 }
 0x14d   :  { %v893_v36 = vpop.permute.xlu0 %892  ;;  %v1025_v25 = vpop.permute.xlu1 %1024  ;;  %7276 = vmatprep.subr.bf16.mxu1 %v7847_v31  ;;  %7235 = vmatpush3.bf16.msra.mxu0 %v7848_v13 }
 0x14e   :  { %903 = vst.msk [vmem:[#allocation4 + $0x90] sm:$0xff] %vm900_vm10, %v893_v36  ;;  %v7850_v36 = vld [vmem:[%s10705_s4 + $0x58] sm:$0xff]  }
 0x14f   :  { %1039 = vst.msk [vmem:[#allocation4 + $0x98] sm:$0xff] %vm1034_vm11, %v1025_v25  ;;  %7236 = vmatprep.subr.bf16.mxu0 %v7850_v36 }
 0x150   :  { %7277 = vmatpush3.bf16.msra.mxu1 %v7849_v29 }
 0x151   :  { %v926_v9 = vpop.permute.xlu0 %925  ;;  %v1063_v19 = vpop.permute.xlu1 %1062 }
 0x152   :  { %936 = vst.msk [vmem:[#allocation4 + $0x90] sm:$0xff] %vm933_vm12, %v926_v9  ;;  %v7852_v9 = vld [vmem:[%s10705_s4 + $0x18] sm:$0xff]  }
 0x153   :  { %1073 = vst.msk [vmem:[#allocation4 + $0x98] sm:$0xff] %vm1070_vm13, %v1063_v19  ;;  %v7853_v19 = vld [vmem:[%s10705_s4 + $0xa0] sm:$0xff]   ;;  %7237 = vmatpush3.bf16.msra.mxu0 %v7852_v9 }
 0x155   :  { %v959_v41 = vpop.permute.xlu0 %958  ;;  %v1096_v30 = vpop.permute.xlu1 %1095 }
 0x156   :  { %969 = vst.msk [vmem:[#allocation4 + $0x90] sm:$0xff] %vm966_vm1, %v959_v41 }
 0x157   :  { %1106 = vst.msk [vmem:[#allocation4 + $0x98] sm:$0xff] %vm1103_vm4, %v1096_v30  ;;  %v8987_v30 = vld [vmem:[%s10703_s2] ss:$0 sm:$0xff] }
 0x159   :  { %v992_v34 = vpop.permute.xlu0 %991  ;;  %v1129_v37 = vpop.permute.xlu1 %1128 }
 0x15a   :  { %1002 = vst.msk [vmem:[#allocation4 + $0x90] sm:$0xff] %vm999_vm3, %v992_v34  ;;  %v7854_v34 = vld [vmem:[%s10705_s4 + $0x60] sm:$0xff]  }
 0x15b   :  { %1139 = vst.msk [vmem:[#allocation4 + $0x98] sm:$0xff] %vm1136_vm5, %v1129_v37  ;;  %v7855_v37 = vld [vmem:[%s10705_s4 + $0xe8] sm:$0xff]   ;;  %7238 = vmatprep.subr.bf16.mxu0 %v7854_v34 }
 0x15c   :  { %1038 = vst.msk [vmem:[#allocation4 + $0x90] sm:$0xff] %vm1032_vm7, %v1025_v25  ;;  %v7851_v25 = vld [vmem:[%s10705_s4 + $0xe0] sm:$0xff]  }
 0x15d   :  { %v763_v42 = vpop.permute.xlu0 %762  ;;  %v796_v44 = vpop.permute.xlu1 %795  ;;  %7278 = vmatprep.subr.bf16.mxu1 %v7851_v25 }
 0x15e   :  { %772 = vst.msk [vmem:[#allocation4 + $0xd0] sm:$0xff] %vm768_vm14, %v763_v42  ;;  %7279 = vmatpush3.bf16.msra.mxu1 %v7853_v19  ;;  %vm1614_vm14 = vcmask 1048064  }
 0x15f   :  { %805 = vst.msk [vmem:[#allocation4 + $0xd0] sm:$0xff] %vm801_vm2, %v796_v44  ;;  %7280 = vmatprep.subr.bf16.mxu1 %v7855_v37  ;;  %vm8152_vm2 = vmmov 0  }
 0x161   :  { %v829_v38 = vpop.permute.xlu0 %828  ;;  %v862_v11 = vpop.permute.xlu1 %861 }
 0x162   :  { %v1152_v33 = vld [vmem:[#allocation4 + $0x98] sm:$0xff]  ;;  %838 = vst.msk [vmem:[#allocation4 + $0xd0] sm:$0xff] %vm834_vm15, %v829_v38  ;;  %v8999_v38 = vld [vmem:[%s10704_s3] ss:$0 sm:$0xff]  ;;  %vm6346_vm15 = vcmask 1041409  }
 0x163   :  { %6552 = vmatprep.mubr.msk.bf16.mxu1 %vm1377_vm8, %v1152_v33  ;;  %v1151_v47 = vld [vmem:[#allocation4 + $0x90] sm:$0xff]  ;;  %871 = vst.msk [vmem:[#allocation4 + $0xd0] sm:$0xff] %vm867_vm0, %v862_v11  ;;  %vm6432_vm0 = vcmask 261120  }
 0x164   :  { %1508 = vmatmul.mubr.bf16.gmra.mrb[24].mxu1 %v1151_v47 }
 0x165   :  { %v895_v48 = vpop.permute.xlu0 %894  ;;  %v1027_v17 = vpop.permute.xlu1 %1026 }
 0x166   :  { %904 = vst.msk [vmem:[#allocation4 + $0xd0] sm:$0xff] %vm900_vm10, %v895_v48  ;;  %vm6506_vm10 = vcmask 25600  }
 0x167   :  { %1041 = vst.msk [vmem:[#allocation4 + $0xd8] sm:$0xff] %vm1034_vm11, %v1027_v17 }
 0x169   :  { %v928_v43 = vpop.permute.xlu0 %927  ;;  %v1065_v40 = vpop.permute.xlu1 %1064 }
 0x16a   :  { %937 = vst.msk [vmem:[#allocation4 + $0xd0] sm:$0xff] %vm933_vm12, %v928_v43  ;;  %v7857_v43 = vld [vmem:[%s10705_s4 + $0xa8] sm:$0xff]  }
 0x16b   :  { %1074 = vst.msk [vmem:[#allocation4 + $0xd8] sm:$0xff] %vm1070_vm13, %v1065_v40  ;;  %7281 = vmatpush3.bf16.msra.mxu1 %v7857_v43 }
 0x16d   :  { %v961_v23 = vpop.permute.xlu0 %960  ;;  %v1098_v50 = vpop.permute.xlu1 %1097 }
 0x16e   :  { %970 = vst.msk [vmem:[#allocation4 + $0xd0] sm:$0xff] %vm966_vm1, %v961_v23 }
 0x16f   :  { %1107 = vst.msk [vmem:[#allocation4 + $0xd8] sm:$0xff] %vm1103_vm4, %v1098_v50 }
 0x171   :  { %v994_v46 = vpop.permute.xlu0 %993  ;;  %v1131_v4 = vpop.permute.xlu1 %1130 }
 0x172   :  { %1003 = vst.msk [vmem:[#allocation4 + $0xd0] sm:$0xff] %vm999_vm3, %v994_v46 }
 0x173   :  { %1140 = vst.msk [vmem:[#allocation4 + $0xd8] sm:$0xff] %vm1136_vm5, %v1131_v4  ;;  %v7858_v4 = vld [vmem:[%s10705_s4 + $0x68] sm:$0xff]  }
 0x174   :  { %1040 = vst.msk [vmem:[#allocation4 + $0xd0] sm:$0xff] %vm1032_vm7, %v1027_v17  ;;  %v7856_v17 = vld [vmem:[%s10705_s4 + $0x20] sm:$0xff]  }
 0x175   :  { %7239 = vmatpush3.bf16.msra.mxu0 %v7856_v17 }
 0x176   :  { %7240 = vmatprep.subr.bf16.mxu0 %v7858_v4 }
 0x17a   :  { %v1156_v52 = vld [vmem:[#allocation4 + $0xd8] sm:$0xff] }
 0x17b   :  { %6553 = vmatprep.mubr.msk.bf16.mxu1 %vm1377_vm8, %v1156_v52  ;;  %v1155_v54 = vld [vmem:[#allocation4 + $0xd0] sm:$0xff] }
 0x17c   :  { %1516 = vmatmul.mubr.bf16.gmra.mrb[28].mxu1 %v1155_v54  ;;  %v7859_v52 = vld [vmem:[%s10705_s4 + $0xf0] sm:$0xff]   ;;  %v7860_v54 = vld [vmem:[%s10705_s4 + $0x28] sm:$0xff]  }
 0x17d   :  { %7282 = vmatprep.subr.bf16.mxu1 %v7859_v52  ;;  %7241 = vmatpush3.bf16.msra.mxu0 %v7860_v54 }
 0x183   :  { %v7206_v55 = vpop.f32.mrb[0].mxu1 }
 0x184   :  { %v7207_v27 = vpop.f32.mrb[1].mxu1 }
 0x185   :  { %v8912_v53 = vadd.f32 %v7207_v27, %v7206_v55  ;;  %v7209_v58 = vpop.f32.mrb[2].mxu1  ;;  %v7861_v27 = vld [vmem:[%s10705_s4 + $0xb0] sm:$0xff]  }
 0x186   :  { %v7210_v59 = vpop.f32.mrb[3].mxu1  ;;  %7283 = vmatpush3.bf16.msra.mxu1 %v7861_v27 }
 0x187   :  { %v8914_v57 = vadd.f32 %v7210_v59, %v7209_v58  ;;  %v7863_v58 = vld [vmem:[%s10705_s4 + $0xf8] sm:$0xff]   ;;  %v7864_v59 = vld [vmem:[%s10705_s4 + $0x30] sm:$0xff]  }
 0x188   :  { %7284 = vmatprep.subr.bf16.mxu1 %v7863_v58 }
 0x1ab   :  { %v7212_v15 = vpop.f32.mrb[4].mxu1 }
 0x1ac   :  { %v7213_v49 = vpop.f32.mrb[5].mxu1 }
 0x1ad   :  { %v8918_v60 = vadd.f32 %v7213_v49, %v7212_v15  ;;  %v7215_v39 = vpop.f32.mrb[6].mxu1 }
 0x1ae   :  { %v7216_v22 = vpop.f32.mrb[7].mxu1 }
 0x1af   :  { %v8920_v5 = vadd.f32 %v7216_v22, %v7215_v39 }
 0x1cf   :  { %v7218_v20 = vpop.f32.mrb[8].mxu1 }
 0x1d0   :  { %v7219_v51 = vpop.f32.mrb[9].mxu1 }
 0x1d1   :  { %v8922_v35 = vadd.f32 %v7219_v51, %v7218_v20  ;;  %v7221_v61 = vpop.f32.mrb[10].mxu1 }
 0x1d2   :  { %v7222_v32 = vpop.f32.mrb[11].mxu1 }
 0x1d3   :  { %v8924_v0 = vadd.f32 %v7222_v32, %v7221_v61 }
 0x1ef   :  { %v7224_v1 = vpop.f32.mrb[12].mxu1 }
 0x1f0   :  { %v7225_v56 = vpop.f32.mrb[13].mxu1 }
 0x1f1   :  { %v8926_v3 = vadd.f32 %v7225_v56, %v7224_v1  ;;  %v7227_v7 = vpop.f32.mrb[14].mxu1 }
 0x1f2   :  { %v7228_v45 = vpop.f32.mrb[15].mxu1 }
 0x1f3   :  { %v8928_v63 = vadd.f32 %v7228_v45, %v7227_v7 }
 0x206   :  { %v1493_v41 = vpop.f32.mrb[16].mxu1 }
 0x207   :  { %v1494_v42 = vadd.f32 %v8912_v53, %v1493_v41  ;;  %v1495_v44 = vpop.f32.mrb[17].mxu1  ;;  %v7862_v53 = vld [vmem:[%s10705_s4 + $0x70] sm:$0xff]  }
 0x208   :  { %v1496_v11 = vpop.f32.mrb[18].mxu1  ;;  %7242 = vmatprep.subr.bf16.mxu0 %v7862_v53 }
 0x209   :  { %v1531_v33 = vmul.f32 %v8987_v30, %v1494_v42  ;;  %v1497_v47 = vadd.f32 %v8914_v57, %v1496_v11  ;;  %v1498_v48 = vpop.f32.mrb[19].mxu1  ;;  %v7865_v57 = vld [vmem:[%s10705_s4 + $0xb8] sm:$0xff]   ;;  %7243 = vmatpush3.bf16.msra.mxu0 %v7864_v59 }
 0x20a   :  { %7285 = vmatpush3.bf16.msra.mxu1 %v7865_v57  ;;  %7244 = vmatprep.subr.bf16.mxu0 %v7866_v21 }
 0x20b   :  { %v1546_v40 = vadd.f32 %v8999_v38, %v1531_v33  ;;  %v1532_v23 = vmul.f32 %v8987_v30, %v1497_v47  ;;  %2642 = vmatprep.subr.bf16.mxu1 %v8901_v24 }
 0x20d   :  { %v1554_v50 = vmax.f32 %v1546_v40, 0.0  ;;  %v1547_v46 = vadd.f32 %v8999_v38, %v1532_v23  ;;  %7245 = vmatpush3.bf16.msra.mxu0 %v7867_v6 }
 0x20f   :  { %1562 = vst.msk [vmem:[#allocation3 + $0x7] sm:$0xff] %vm58_vm6, %v1554_v50  ;;  %v1555_v55 = vmax.f32 %v1547_v46, 0.0 }
 0x211   :  { %1563 = vst.msk [vmem:[#allocation3 + $0xf] sm:$0xff] %vm58_vm6, %v1555_v55 }
 0x216   :  { %v1731_v15 = vld [vmem:[#allocation3 + $0x7] sm:$0xff] }
 0x217   :  { %v1683_v49 = vld [vmem:[#allocation3 + $0x5] sm:$0xff] }
 0x218   :  { %v1715_v39 = vld [vmem:[#allocation3 + $0x6] sm:$0xff]  ;;  %v1907_v20 = vld [vmem:[#allocation3 + $0xe] sm:$0xff] }
 0x219   :  { %v1667_v22 = vld [vmem:[#allocation3 + $0x4] sm:$0xff]  ;;  %v1732_v51 = vld [vmem:[#allocation3 + $0xf] sm:$0xff]  ;;  %v1723_v45 = vpack.c.bf16 %v1907_v20, %v1715_v39 }
 0x21a   :  { %v9039_v61 = vld [vmem:[#allocation3 + $0xd] sm:$0xff]  ;;  %v1739_v32 = vpack.c.bf16 %v1732_v51, %v1731_v15  ;;  %v1619_v12 = vld [vmem:[#allocation3 + $0x2] sm:$0xff] }
 0x21b   :  { %v1691_v1 = vpack.c.bf16 %v9039_v61, %v1683_v49  ;;  %v9042_v56 = vld [vmem:[#allocation3 + $0xb] sm:$0xff]  ;;  %v1570_v62 = vld [vmem:[#allocation3] sm:$0xff]  ;;  %1727 = vst.msk [vmem:[#allocation4 + $0x18] sm:$0xff] %vm58_vm6, %v1723_v45 }
 0x21c   :  { %v9044_v7 = vld [vmem:[#allocation3 + $0x9] sm:$0xff]  ;;  %1747 = vrot.lane.b32.xlu0 %v1739_v32, %s8150_s30  ;;  %v1586_v28 = vld [vmem:[#allocation3 + $0x1] sm:$0xff] }
 0x21d   :  { %v9046_v8 = vld [vmem:[#allocation3 + $0xc] sm:$0xff]  ;;  %1699 = vrot.lane.b32.xlu1 %v1691_v1, %s8150_s30  ;;  %v1635_v26 = vld [vmem:[#allocation3 + $0x3] sm:$0xff]  ;;  %v1594_v29 = vpack.c.bf16 %v9044_v7, %v1586_v28 }
 0x21e   :  { %v1675_v10 = vpack.c.bf16 %v9046_v8, %v1667_v22  ;;  %v1620_v14 = vld [vmem:[#allocation3 + $0xa] sm:$0xff]  ;;  %v1643_v13 = vpack.c.bf16 %v9042_v56, %v1635_v26  ;;  %v1501_v36 = vpop.f32.mrb[20].mxu1 }
 0x21f   :  { %v1627_v16 = vpack.c.bf16 %v1620_v14, %v1619_v12  ;;  %v9052_v18 = vld [vmem:[#allocation3 + $0x8] sm:$0xff]  ;;  %v1502_v25 = vadd.f32 %v8918_v60, %v1501_v36  ;;  %v1503_v9 = vpop.f32.mrb[21].mxu1 }
 0x220   :  { %1679 = vst.msk [vmem:[#allocation4 + $0x10] sm:$0xff] %vm58_vm6, %v1675_v10  ;;  %v1578_v31 = vpack.c.bf16 %v9052_v18, %v1570_v62  ;;  %1651 = vrot.lane.b32.xlu0 %v1643_v13, %s8150_s30  ;;  %v1504_v19 = vpop.f32.mrb[22].mxu1 }
 0x221   :  { %1631 = vst.msk [vmem:[#allocation4 + $0x8] sm:$0xff] %vm58_vm6, %v1627_v16  ;;  %1602 = vrot.lane.b32.xlu1 %v1594_v29, %s8150_s30  ;;  %v1533_v41 = vmul.f32 %v8987_v30, %v1502_v25  ;;  %v1505_v34 = vadd.f32 %v8920_v5, %v1504_v19  ;;  %v1506_v37 = vpop.f32.mrb[23].mxu1 }
 0x222   :  { %1582 = vst.msk [vmem:[#allocation4] sm:$0xff] %vm58_vm6, %v1578_v31 }
 0x223   :  { %v1548_v42 = vadd.f32 %v8999_v38, %v1533_v41  ;;  %v1534_v44 = vmul.f32 %v8987_v30, %v1505_v34 }
 0x225   :  { %v1556_v11 = vmax.f32 %v1548_v42, 0.0  ;;  %v1549_v33 = vadd.f32 %v8999_v38, %v1534_v44 }
 0x227   :  { %1564 = vst.msk [vmem:[#allocation3 + $0x17] sm:$0xff] %vm58_vm6, %v1556_v11  ;;  %v1557_v60 = vmax.f32 %v1549_v33, 0.0 }
 0x229   :  { %1565 = vst.msk [vmem:[#allocation3 + $0x1f] sm:$0xff] %vm58_vm6, %v1557_v60 }
 0x22e   :  { %v1908_v47 = vld [vmem:[#allocation3 + $0x16] sm:$0xff] }
 0x22f   :  { %v9076_v48 = vld [vmem:[#allocation3 + $0x13] sm:$0xff]  ;;  %v1915_v5 = vpack.c.bf16 %v1908_v47, %v1907_v20 }
 0x230   :  { %v9078_v17 = vld [vmem:[#allocation3 + $0x11] sm:$0xff]  ;;  %v1909_v40 = vld [vmem:[#allocation3 + $0x1e] sm:$0xff]  ;;  %v1910_v21 = vld [vmem:[#allocation3 + $0x26] sm:$0xff] }
 0x231   :  { %v1621_v43 = vld [vmem:[#allocation3 + $0x12] sm:$0xff]  ;;  %v9080_v23 = vld [vmem:[#allocation3 + $0x1b] sm:$0xff]  ;;  %v1724_v54 = vpack.c.bf16 %v1909_v40, %v1908_v47  ;;  %1919 = vst.msk [vmem:[#allocation4 + $0x38] sm:$0xff] %vm58_vm6, %v1915_v5  ;;  %v1862_v16 = vld [vmem:[#allocation3 + $0x24] sm:$0xff]  ;;  %v1916_v26 = vpack.c.bf16 %v1910_v21, %v1909_v40 }
 0x232   :  { %v9082_v50 = vld [vmem:[#allocation3 + $0x19] sm:$0xff]  ;;  %v1819_v46 = vpack.c.bf16 %v1621_v43, %v1620_v14  ;;  %v1644_v4 = vpack.c.bf16 %v9080_v23, %v9076_v48  ;;  %v1572_v57 = vld [vmem:[#allocation3 + $0x10] sm:$0xff]  ;;  %v1814_v1 = vld [vmem:[#allocation3 + $0x22] sm:$0xff] }
 0x233   :  { %v1595_v52 = vpack.c.bf16 %v9082_v50, %v9078_v17  ;;  %v1733_v55 = vld [vmem:[#allocation3 + $0x17] sm:$0xff]  ;;  %v1734_v27 = vld [vmem:[#allocation3 + $0x1f] sm:$0xff]  ;;  %1728 = vst.msk [vmem:[#allocation4 + $0x58] sm:$0xff] %vm58_vm6, %v1724_v54  ;;  %v1771_v51 = vpack.c.bf16 %v1572_v57, %v9052_v18  ;;  %1920 = vst.msk [vmem:[#allocation4 + $0x78] sm:$0xff] %vm58_vm6, %v1916_v26 }
 0x234   :  { %v9089_v53 = vld [vmem:[#allocation3 + $0x1d] sm:$0xff]  ;;  %1823 = vst.msk [vmem:[#allocation4 + $0x28] sm:$0xff] %vm58_vm6, %v1819_v46  ;;  %1653 = vrot.lane.b32.xlu0 %v1644_v4, %s8150_s30  ;;  %v1669_v49 = vld [vmem:[#allocation3 + $0x14] sm:$0xff]  ;;  %v1740_v45 = vpack.c.bf16 %v1734_v27, %v1733_v55 }
 0x235   :  { %v1622_v58 = vld [vmem:[#allocation3 + $0x1a] sm:$0xff]  ;;  %1604 = vrot.lane.b32.xlu1 %v1595_v52, %s8150_s30  ;;  %v1867_v32 = vpack.c.bf16 %v1669_v49, %v9046_v8  ;;  %1775 = vst.msk [vmem:[#allocation4 + $0x20] sm:$0xff] %vm58_vm6, %v1771_v51 }
 0x236   :  { %v1628_v59 = vpack.c.bf16 %v1622_v58, %v1621_v43  ;;  %v1573_v15 = vld [vmem:[#allocation3 + $0x18] sm:$0xff]  ;;  %v1820_v14 = vpack.c.bf16 %v1814_v1, %v1622_v58  ;;  %v1766_v62 = vld [vmem:[#allocation3 + $0x20] sm:$0xff] }
 0x237   :  { %v9095_v39 = vld [vmem:[#allocation3 + $0x15] sm:$0xff]  ;;  %v1579_v22 = vpack.c.bf16 %v1573_v15, %v1572_v57  ;;  %v1509_v6 = vpop.f32.mrb[24].mxu1  ;;  %1871 = vst.msk [vmem:[#allocation4 + $0x30] sm:$0xff] %vm58_vm6, %v1867_v32  ;;  %v1772_v8 = vpack.c.bf16 %v1766_v62, %v1573_v15  ;;  %v7871_v57 = vld [vmem:[%s10705_s4 + $0x140] sm:$0xff]  }
 0x238   :  { %v1670_v20 = vld [vmem:[#allocation3 + $0x1c] sm:$0xff]  ;;  %v1692_v10 = vpack.c.bf16 %v9089_v53, %v9095_v39  ;;  %1632 = vst.msk [vmem:[#allocation4 + $0x48] sm:$0xff] %vm58_vm6, %v1628_v59  ;;  %v1510_v28 = vadd.f32 %v8922_v35, %v1509_v6  ;;  %v1511_v31 = vpop.f32.mrb[25].mxu1  ;;  %1749 = vrot.lane.b32.xlu0 %v1740_v45, %s8150_s30  ;;  %1824 = vst.msk [vmem:[#allocation4 + $0x68] sm:$0xff] %vm58_vm6, %v1820_v14  ;;  %7310 = vmatprep.subr.bf16.mxu0 %v7871_v57 }
 0x239   :  { %v1676_v12 = vpack.c.bf16 %v1670_v20, %v1669_v49  ;;  %1583 = vst.msk [vmem:[#allocation4 + $0x40] sm:$0xff] %vm58_vm6, %v1579_v22  ;;  %v1868_v18 = vpack.c.bf16 %v1862_v16, %v1670_v20  ;;  %v1512_v13 = vpop.f32.mrb[26].mxu1  ;;  %1776 = vst.msk [vmem:[#allocation4 + $0x60] sm:$0xff] %vm58_vm6, %v1772_v8 }
 0x23a   :  { %1701 = vrot.lane.b32.xlu1 %v1692_v10, %s8150_s30  ;;  %v1535_v29 = vmul.f32 %v8987_v30, %v1510_v28  ;;  %v1513_v35 = vadd.f32 %v8924_v0, %v1512_v13  ;;  %v1514_v36 = vpop.f32.mrb[27].mxu1 }
 0x23b   :  { %1680 = vst.msk [vmem:[#allocation4 + $0x50] sm:$0xff] %vm58_vm6, %v1676_v12  ;;  %1872 = vst.msk [vmem:[#allocation4 + $0x70] sm:$0xff] %vm58_vm6, %v1868_v18 }
 0x23c   :  { %v1550_v25 = vadd.f32 %v8999_v38, %v1535_v29  ;;  %v1536_v9 = vmul.f32 %v8987_v30, %v1513_v35 }
 0x23e   :  { %v1558_v19 = vmax.f32 %v1550_v25, 0.0  ;;  %v1551_v41 = vadd.f32 %v8999_v38, %v1536_v9 }
 0x240   :  { %1566 = vst.msk [vmem:[#allocation3 + $0x37] sm:$0xff] %vm58_vm6, %v1558_v19  ;;  %v1559_v34 = vmax.f32 %v1551_v41, 0.0 }
 0x242   :  { %1567 = vst.msk [vmem:[#allocation3 + $0x3f] sm:$0xff] %vm58_vm6, %v1559_v34 }
 0x247   :  { %v1639_v37 = vld [vmem:[#allocation3 + $0x33] sm:$0xff] }
 0x248   :  { %v1590_v42 = vld [vmem:[#allocation3 + $0x31] sm:$0xff] }
 0x249   :  { %v1623_v44 = vld [vmem:[#allocation3 + $0x32] sm:$0xff]  ;;  %v1911_v11 = vld [vmem:[#allocation3 + $0x3e] sm:$0xff] }
 0x24a   :  { %v9120_v33 = vld [vmem:[#allocation3 + $0x3b] sm:$0xff]  ;;  %v1574_v40 = vld [vmem:[#allocation3 + $0x30] sm:$0xff] }
 0x24b   :  { %v9122_v0 = vld [vmem:[#allocation3 + $0x39] sm:$0xff]  ;;  %v1645_v60 = vpack.c.bf16 %v9120_v33, %v1639_v37 }
 0x24c   :  { %v1596_v47 = vpack.c.bf16 %v9122_v0, %v1590_v42  ;;  %v1736_v43 = vld [vmem:[#allocation3 + $0x3f] sm:$0xff]  ;;  %v1719_v54 = vld [vmem:[#allocation3 + $0x36] sm:$0xff] }
 0x24d   :  { %v1624_v5 = vld [vmem:[#allocation3 + $0x3a] sm:$0xff]  ;;  %1655 = vrot.lane.b32.xlu0 %v1645_v60, %s8150_s30  ;;  %v1725_v27 = vpack.c.bf16 %v1911_v11, %v1719_v54 }
 0x24e   :  { %v9126_v46 = vld [vmem:[#allocation3 + $0x3d] sm:$0xff]  ;;  %v1629_v4 = vpack.c.bf16 %v1624_v5, %v1623_v44  ;;  %1606 = vrot.lane.b32.xlu1 %v1596_v47, %s8150_s30  ;;  %v1671_v58 = vld [vmem:[#allocation3 + $0x34] sm:$0xff] }
 0x24f   :  { %v9128_v52 = vld [vmem:[#allocation3 + $0x38] sm:$0xff]  ;;  %1729 = vst.msk [vmem:[#allocation4 + $0x98] sm:$0xff] %vm58_vm6, %v1725_v27  ;;  %v1517_v32 = vpop.f32.mrb[28].mxu1 }
 0x250   :  { %v1580_v55 = vpack.c.bf16 %v9128_v52, %v1574_v40  ;;  %v9133_v59 = vld [vmem:[#allocation3 + $0x3c] sm:$0xff]  ;;  %1633 = vst.msk [vmem:[#allocation4 + $0x88] sm:$0xff] %vm58_vm6, %v1629_v4  ;;  %v1518_v1 = vadd.f32 %v8926_v3, %v1517_v32  ;;  %v1519_v45 = vpop.f32.mrb[29].mxu1 }
 0x251   :  { %v1735_v15 = vld [vmem:[#allocation3 + $0x37] sm:$0xff]  ;;  %v1677_v22 = vpack.c.bf16 %v9133_v59, %v1671_v58  ;;  %v1520_v10 = vpop.f32.mrb[30].mxu1  ;;  %v1830_v32 = vld [vmem:[#allocation3 + $0x23] sm:$0xff] }
 0x252   :  { %v1687_v49 = vld [vmem:[#allocation3 + $0x35] sm:$0xff]  ;;  %v1741_v20 = vpack.c.bf16 %v1736_v43, %v1735_v15  ;;  %1584 = vst.msk [vmem:[#allocation4 + $0x80] sm:$0xff] %vm58_vm6, %v1580_v55  ;;  %v1537_v12 = vmul.f32 %v8987_v30, %v1518_v1  ;;  %v1521_v14 = vadd.f32 %v8928_v63, %v1520_v10  ;;  %v1522_v62 = vpop.f32.mrb[31].mxu1  ;;  %v1883_v1 = vpack.c.bf16 %v9095_v39, %v9039_v61 }
 0x253   :  { %v1693_v51 = vpack.c.bf16 %v9126_v46, %v1687_v49  ;;  %1681 = vst.msk [vmem:[#allocation4 + $0x90] sm:$0xff] %vm58_vm6, %v1677_v22 }
 0x254   :  { %1751 = vrot.lane.b32.xlu0 %v1741_v20, %s8150_s30  ;;  %v1552_v16 = vadd.f32 %v8999_v38, %v1537_v12  ;;  %v1538_v21 = vmul.f32 %v8987_v30, %v1521_v14  ;;  %v1835_v20 = vpack.c.bf16 %v9076_v48, %v9042_v56  ;;  %v1836_v56 = vpack.c.bf16 %v1830_v32, %v9080_v23  ;;  %v1782_v48 = vld [vmem:[#allocation3 + $0x21] sm:$0xff] }
 0x255   :  { %1703 = vrot.lane.b32.xlu1 %v1693_v51, %s8150_s30  ;;  %v1787_v51 = vpack.c.bf16 %v9078_v17, %v9044_v7  ;;  %v1878_v7 = vld [vmem:[#allocation3 + $0x25] sm:$0xff]  ;;  %v1788_v17 = vpack.c.bf16 %v1782_v48, %v9082_v50 }
 0x256   :  { %v1560_v6 = vmax.f32 %v1552_v16, 0.0  ;;  %v1553_v8 = vadd.f32 %v8999_v38, %v1538_v21  ;;  %v1884_v45 = vpack.c.bf16 %v1878_v7, %v9089_v53  ;;  %v7868_v21 = vld [vmem:[%s10705_s4 + $0x180] sm:$0xff]  }
 0x258   :  { %1568 = vst.msk [vmem:[#allocation3 + $0x47] sm:$0xff] %vm58_vm6, %v1560_v6  ;;  %v1561_v3 = vmax.f32 %v1553_v8, 0.0 }
 0x25a   :  { %1569 = vst.msk [vmem:[#allocation3 + $0x4f] sm:$0xff] %vm58_vm6, %v1561_v3  ;;  %v7869_v3 = vld [vmem:[%s10705_s4 + $0x188] sm:$0xff]  }
 0x25f   :  { %v1912_v18 = vld [vmem:[#allocation3 + $0x46] sm:$0xff] }
 0x260   :  { %v9154_v26 = vld [vmem:[#allocation3 + $0x43] sm:$0xff]  ;;  %v1917_v63 = vpack.c.bf16 %v1912_v18, %v1911_v11 }
 0x261   :  { %v9156_v28 = vld [vmem:[#allocation3 + $0x41] sm:$0xff]  ;;  %v1913_v13 = vld [vmem:[#allocation3 + $0x4e] sm:$0xff]  ;;  %v1914_v15 = vld [vmem:[#allocation3 + $0x56] sm:$0xff]  ;;  %v1837_v10 = vpack.c.bf16 %v9154_v26, %v9120_v33 }
 0x262   :  { %v1625_v31 = vld [vmem:[#allocation3 + $0x42] sm:$0xff]  ;;  %v9158_v29 = vld [vmem:[#allocation3 + $0x4b] sm:$0xff]  ;;  %v1726_v25 = vpack.c.bf16 %v1913_v13, %v1912_v18  ;;  %1921 = vst.msk [vmem:[#allocation4 + $0xb8] sm:$0xff] %vm58_vm6, %v1917_v63  ;;  %v1866_v57 = vld [vmem:[#allocation3 + $0x54] sm:$0xff]  ;;  %v1918_v22 = vpack.c.bf16 %v1914_v15, %v1913_v13  ;;  %v1789_v61 = vpack.c.bf16 %v9156_v28, %v9122_v0 }
 0x263   :  { %v9160_v35 = vld [vmem:[#allocation3 + $0x49] sm:$0xff]  ;;  %v1821_v30 = vpack.c.bf16 %v1625_v31, %v1624_v5  ;;  %v1646_v38 = vpack.c.bf16 %v9158_v29, %v9154_v26  ;;  %v1576_v37 = vld [vmem:[#allocation3 + $0x40] sm:$0xff]  ;;  %v1818_v27 = vld [vmem:[#allocation3 + $0x52] sm:$0xff] }
 0x264   :  { %v1597_v36 = vpack.c.bf16 %v9160_v35, %v9156_v28  ;;  %v1738_v9 = vld [vmem:[#allocation3 + $0x4f] sm:$0xff]  ;;  %1730 = vst.msk [vmem:[#allocation4 + $0xd8] sm:$0xff] %vm58_vm6, %v1726_v25  ;;  %v1673_v44 = vld [vmem:[#allocation3 + $0x44] sm:$0xff]  ;;  %v1773_v5 = vpack.c.bf16 %v1576_v37, %v9128_v52  ;;  %1922 = vst.msk [vmem:[#allocation4 + $0xf8] sm:$0xff] %vm58_vm6, %v1918_v22 }
 0x265   :  { %v9167_v19 = vld [vmem:[#allocation3 + $0x4d] sm:$0xff]  ;;  %1825 = vst.msk [vmem:[#allocation4 + $0xa8] sm:$0xff] %vm58_vm6, %v1821_v30  ;;  %1657 = vrot.lane.b32.xlu0 %v1646_v38, %s8150_s30  ;;  %v1689_v60 = vld [vmem:[#allocation3 + $0x45] sm:$0xff]  ;;  %v1869_v40 = vpack.c.bf16 %v1673_v44, %v9133_v59  ;;  %v1882_v12 = vld [vmem:[#allocation3 + $0x55] sm:$0xff] }
 0x266   :  { %v1626_v41 = vld [vmem:[#allocation3 + $0x4a] sm:$0xff]  ;;  %1608 = vrot.lane.b32.xlu1 %v1597_v36, %s8150_s30  ;;  %v1694_v54 = vpack.c.bf16 %v9167_v19, %v1689_v60  ;;  %1777 = vst.msk [vmem:[#allocation4 + $0xa0] sm:$0xff] %vm58_vm6, %v1773_v5  ;;  %v1834_v23 = vld [vmem:[#allocation3 + $0x53] sm:$0xff]  ;;  %v1885_v39 = vpack.c.bf16 %v1689_v60, %v9126_v46  ;;  %v1886_v14 = vpack.c.bf16 %v1882_v12, %v9167_v19  ;;  %v7872_v18 = vld [vmem:[%s10705_s4 + $0x100] sm:$0xff]  }
 0x267   :  { %v1630_v34 = vpack.c.bf16 %v1626_v41, %v1625_v31  ;;  %v1577_v42 = vld [vmem:[#allocation3 + $0x48] sm:$0xff]  ;;  %1873 = vst.msk [vmem:[#allocation4 + $0xb0] sm:$0xff] %vm58_vm6, %v1869_v40  ;;  %v1770_v58 = vld [vmem:[#allocation3 + $0x50] sm:$0xff]  ;;  %v1822_v52 = vpack.c.bf16 %v1818_v27, %v1626_v41  ;;  %v1838_v50 = vpack.c.bf16 %v1834_v23, %v9158_v29  ;;  %v7880_v38 = vld [vmem:[%s10705_s4 + $0x158] sm:$0xff]  }
 0x268   :  { %v1737_v11 = vld [vmem:[#allocation3 + $0x47] sm:$0xff]  ;;  %v1581_v47 = vpack.c.bf16 %v1577_v42, %v1576_v37  ;;  %v1774_v59 = vpack.c.bf16 %v1770_v58, %v1577_v42  ;;  %v1786_v53 = vld [vmem:[#allocation3 + $0x51] sm:$0xff] }
 0x269   :  { %v1674_v43 = vld [vmem:[#allocation3 + $0x4c] sm:$0xff]  ;;  %v1742_v4 = vpack.c.bf16 %v1738_v9, %v1737_v11  ;;  %1634 = vst.msk [vmem:[#allocation4 + $0xc8] sm:$0xff] %vm58_vm6, %v1630_v34  ;;  %1826 = vst.msk [vmem:[#allocation4 + $0xe8] sm:$0xff] %vm58_vm6, %v1822_v52  ;;  %v1790_v33 = vpack.c.bf16 %v1786_v53, %v9160_v35  ;;  %v7873_v35 = vld [vmem:[%s10705_s4 + $0x198] sm:$0xff]  }
 0x26a   :  { %v1678_v55 = vpack.c.bf16 %v1674_v43, %v1673_v44  ;;  %1585 = vst.msk [vmem:[#allocation4 + $0xc0] sm:$0xff] %vm58_vm6, %v1581_v47  ;;  %1705 = vrot.lane.b32.xlu1 %v1694_v54, %s8150_s30  ;;  %v1870_v49 = vpack.c.bf16 %v1866_v57, %v1674_v43  ;;  %1778 = vst.msk [vmem:[#allocation4 + $0xe0] sm:$0xff] %vm58_vm6, %v1774_v59  ;;  %v7874_v31 = vld [vmem:[%s10705_s4 + $0x148] sm:$0xff]   ;;  %v7870_v63 = vld [vmem:[%s10705_s4 + $0x190] sm:$0xff]  }
 0x26b   :  { %1753 = vrot.lane.b32.xlu0 %v1742_v4, %s8150_s30  ;;  %v7875_v13 = vld [vmem:[%s10705_s4 + $0x108] sm:$0xff]   ;;  %v7877_v29 = vld [vmem:[%s10705_s4 + $0x150] sm:$0xff]   ;;  %v7876_v36 = vld [vmem:[%s10705_s4 + $0x1a0] sm:$0xff]  }
 0x26c   :  { %1682 = vst.msk [vmem:[#allocation4 + $0xd0] sm:$0xff] %vm58_vm6, %v1678_v55  ;;  %1874 = vst.msk [vmem:[#allocation4 + $0xf0] sm:$0xff] %vm58_vm6, %v1870_v49  ;;  %v7878_v30 = vld [vmem:[%s10705_s4 + $0x110] sm:$0xff]   ;;  %v7881_v25 = vld [vmem:[%s10705_s4 + $0x118] sm:$0xff]  }
 0x26d   :  { %v7883_v41 = vld [vmem:[%s10705_s4 + $0x160] sm:$0xff]   ;;  %v7879_v34 = vld [vmem:[%s10705_s4 + $0x1a8] sm:$0xff]   ;;  %v7882_v60 = vld [vmem:[%s10705_s4 + $0x1b0] sm:$0xff]  }
 0x26e   :  { %1795 = vrot.lane.b32.xlu1 %v1787_v51, %s8150_s30  ;;  %v7884_v37 = vld [vmem:[%s10705_s4 + $0x120] sm:$0xff]   ;;  %v7886_v11 = vld [vmem:[%s10705_s4 + $0x168] sm:$0xff]   ;;  %v7889_v40 = vld [vmem:[%s10705_s4 + $0x170] sm:$0xff]  }
 0x26f   :  { %1843 = vrot.lane.b32.xlu0 %v1835_v20, %s8150_s30  ;;  %v7887_v47 = vld [vmem:[%s10705_s4 + $0x128] sm:$0xff]   ;;  %v7885_v4 = vld [vmem:[%s10705_s4 + $0x1b8] sm:$0xff]   ;;  %v7890_v54 = vld [vmem:[%s10705_s4 + $0x130] sm:$0xff]  }
 0x270   :  { %v7892_v58 = vld [vmem:[%s10705_s4 + $0x178] sm:$0xff]   ;;  %v7888_v52 = vld [vmem:[%s10705_s4 + $0x1c0] sm:$0xff]   ;;  %v7891_v57 = vld [vmem:[%s10705_s4 + $0x1c8] sm:$0xff]  }
 0x271   :  { %v7893_v59 = vld [vmem:[%s10705_s4 + $0x138] sm:$0xff]   ;;  %v7894_v15 = vld [vmem:[%s10705_s4 + $0x1d0] sm:$0xff]  }
 0x272   :  { %1845 = vrot.lane.b32.xlu1 %v1836_v56, %s8150_s30  ;;  %v7895_v20 = vld [vmem:[%s10705_s4 + $0x1d8] sm:$0xff]  }
 0x273   :  { %1891 = vrot.lane.b32.xlu0 %v1883_v1, %s8150_s30 }
 0x276   :  { %1893 = vrot.lane.b32.xlu1 %v1884_v45, %s8150_s30 }
 0x277   :  { %1797 = vrot.lane.b32.xlu0 %v1788_v17, %s8150_s30 }
 0x27a   :  { %1799 = vrot.lane.b32.xlu1 %v1789_v61, %s8150_s30 }
 0x27b   :  { %1847 = vrot.lane.b32.xlu0 %v1837_v10, %s8150_s30 }
 0x27e   :  { %1849 = vrot.lane.b32.xlu1 %v1838_v50, %s8150_s30 }
 0x27f   :  { %1895 = vrot.lane.b32.xlu0 %v1885_v39, %s8150_s30 }
 0x282   :  { %1897 = vrot.lane.b32.xlu1 %v1886_v14, %s8150_s30 }
 0x283   :  { %1801 = vrot.lane.b32.xlu0 %v1790_v33, %s8150_s30 }
 0x28e   :  { %v1748_v0 = vpop.permute.xlu0 %1747 }
 0x28f   :  { %v1700_v62 = vpop.permute.xlu1 %1699  ;;  %1759 = vst.msk [vmem:[#allocation4 + $0x18] sm:$0xff] %vm1614_vm14, %v1748_v0 }
 0x290   :  { %1711 = vst.msk [vmem:[#allocation4 + $0x10] sm:$0xff] %vm1614_vm14, %v1700_v62  ;;  %v1930_v62 = vld [vmem:[#allocation4 + $0x38] sm:$0xff] }
 0x292   :  { %v1652_v46 = vpop.permute.xlu0 %1651 }
 0x293   :  { %v1603_v16 = vpop.permute.xlu1 %1602  ;;  %1663 = vst.msk [vmem:[#allocation4 + $0x8] sm:$0xff] %vm1614_vm14, %v1652_v46 }
 0x294   :  { %1615 = vst.msk [vmem:[#allocation4] sm:$0xff] %vm1614_vm14, %v1603_v16 }
 0x296   :  { %v1926_v6 = vld [vmem:[#allocation4 + $0x18] sm:$0xff] }
 0x297   :  { %v1925_v8 = vld [vmem:[#allocation4 + $0x10] sm:$0xff]  ;;  %2544 = vmatprep.mubr.bf16.mxu1 %v1926_v6 }
 0x298   :  { %2545 = vmatmul.mubr.bf16.vlgmr.msra.gmra.mrb[32].mxu1 %v1925_v8 }
 0x299   :  { %2643 = vmatpush1.bf16.msra.mxu1 %v7868_v21 }
 0x29a   :  { %v1924_v26 = vld [vmem:[#allocation4 + $0x8] sm:$0xff]  ;;  %2644 = vmatprep.subr.bf16.mxu1 %v8901_v24 }
 0x29b   :  { %v1923_v28 = vld [vmem:[#allocation4] sm:$0xff]  ;;  %2479 = vmatprep.mubr.bf16.mxu0 %v1924_v26 }
 0x29c   :  { %2480 = vmatmul.mubr.bf16.vlgmr.msra.gmra.mrb[0].mxu0 %v1923_v28  ;;  %v1938_v28 = vld [vmem:[#allocation4 + $0x78] sm:$0xff] }
 0x29d   :  { %2645 = vmatpush1.bf16.msra.mxu1 %v7869_v3  ;;  %7311 = vmatpush3.bf16.msra.mxu0 %v7872_v18 }
 0x29e   :  { %2646 = vmatprep.subr.bf16.mxu1 %v8901_v24  ;;  %7312 = vmatprep.subr.bf16.mxu0 %v7874_v31 }
 0x2a1   :  { %2647 = vmatpush1.bf16.msra.mxu1 %v7870_v63  ;;  %7313 = vmatpush3.bf16.msra.mxu0 %v7875_v13 }
 0x2a2   :  { %2648 = vmatprep.subr.bf16.mxu1 %v8901_v24  ;;  %7314 = vmatprep.subr.bf16.mxu0 %v7877_v29 }
 0x2a5   :  { %2649 = vmatpush1.bf16.msra.mxu1 %v7873_v35  ;;  %7315 = vmatpush3.bf16.msra.mxu0 %v7878_v30 }
 0x2a6   :  { %v1654_v9 = vpop.permute.xlu0 %1653  ;;  %2650 = vmatprep.subr.bf16.mxu1 %v8901_v24  ;;  %7316 = vmatprep.subr.bf16.mxu0 %v7880_v38 }
 0x2a7   :  { %v1605_v19 = vpop.permute.xlu1 %1604  ;;  %1664 = vst.msk [vmem:[#allocation4 + $0x48] sm:$0xff] %vm1614_vm14, %v1654_v9 }
 0x2a8   :  { %1616 = vst.msk [vmem:[#allocation4 + $0x40] sm:$0xff] %vm1614_vm14, %v1605_v19 }
 0x2a9   :  { %2651 = vmatpush1.bf16.msra.mxu1 %v7876_v36  ;;  %7317 = vmatpush3.bf16.msra.mxu0 %v7881_v25  ;;  %v1946_v36 = vld [vmem:[#allocation4 + $0xb8] sm:$0xff] }
 0x2aa   :  { %v1750_v42 = vpop.permute.xlu0 %1749  ;;  %2652 = vmatprep.subr.bf16.mxu1 %v8901_v24  ;;  %7318 = vmatprep.subr.bf16.mxu0 %v7883_v41  ;;  %v1954_v41 = vld [vmem:[#allocation4 + $0xf8] sm:$0xff] }
 0x2ab   :  { %1760 = vst.msk [vmem:[#allocation4 + $0x58] sm:$0xff] %vm1614_vm14, %v1750_v42 }
 0x2ac   :  { %v1702_v44 = vpop.permute.xlu1 %1701 }
 0x2ad   :  { %1712 = vst.msk [vmem:[#allocation4 + $0x50] sm:$0xff] %vm1614_vm14, %v1702_v44  ;;  %2653 = vmatpush1.bf16.msra.mxu1 %v7879_v34  ;;  %7319 = vmatpush3.bf16.msra.mxu0 %v7884_v37 }
 0x2ae   :  { %v1932_v43 = vld [vmem:[#allocation4 + $0x48] sm:$0xff]  ;;  %2654 = vmatprep.subr.bf16.mxu1 %v8901_v24  ;;  %7320 = vmatprep.subr.bf16.mxu0 %v7886_v11 }
 0x2af   :  { %v1931_v5 = vld [vmem:[#allocation4 + $0x40] sm:$0xff]  ;;  %2487 = vmatprep.mubr.bf16.mxu0 %v1932_v43 }
 0x2b0   :  { %2488 = vmatmul.mubr.bf16.gmra.mrb[4].mxu0 %v1931_v5 }
 0x2b1   :  { %2655 = vmatpush1.bf16.msra.mxu1 %v7882_v60  ;;  %7321 = vmatpush3.bf16.msra.mxu0 %v7887_v47 }
 0x2b2   :  { %v1934_v55 = vld [vmem:[#allocation4 + $0x58] sm:$0xff]  ;;  %2656 = vmatprep.subr.bf16.mxu1 %v8901_v24  ;;  %7322 = vmatprep.subr.bf16.mxu0 %v7889_v40 }
 0x2b3   :  { %2552 = vmatprep.mubr.bf16.mxu1 %v1934_v55 }
 0x2b4   :  { %v1933_v27 = vld [vmem:[#allocation4 + $0x50] sm:$0xff] }
 0x2b5   :  { %2553 = vmatmul.mubr.bf16.gmra.mrb[36].mxu1 %v1933_v27  ;;  %7323 = vmatpush3.bf16.msra.mxu0 %v7890_v54 }
 0x2b6   :  { %2657 = vmatpush1.bf16.msra.mxu1 %v7885_v4  ;;  %7324 = vmatprep.subr.bf16.mxu0 %v7892_v58 }
 0x2b7   :  { %2658 = vmatprep.subr.bf16.mxu1 %v8901_v24 }
 0x2b9   :  { %7325 = vmatpush3.bf16.msra.mxu0 %v7893_v59 }
 0x2ba   :  { %2659 = vmatpush1.bf16.msra.mxu1 %v7888_v52 }
 0x2bb   :  { %2660 = vmatprep.subr.bf16.mxu1 %v8901_v24 }
 0x2be   :  { %2661 = vmatpush1.bf16.msra.mxu1 %v7891_v57 }
 0x2bf   :  { %v1656_v49 = vpop.permute.xlu0 %1655  ;;  %2662 = vmatprep.subr.bf16.mxu1 %v8901_v24 }
 0x2c0   :  { %v1607_v22 = vpop.permute.xlu1 %1606  ;;  %1665 = vst.msk [vmem:[#allocation4 + $0x88] sm:$0xff] %vm1614_vm14, %v1656_v49 }
 0x2c1   :  { %1617 = vst.msk [vmem:[#allocation4 + $0x80] sm:$0xff] %vm1614_vm14, %v1607_v22 }
 0x2c2   :  { %2663 = vmatpush1.bf16.msra.mxu1 %v7894_v15 }
 0x2c3   :  { %2664 = vmatprep.subr.bf16.mxu1 %v8901_v24 }
 0x2c6   :  { %v1752_v51 = vpop.permute.xlu0 %1751  ;;  %2665 = vmatpush1.bf16.msra.mxu1 %v7895_v20 }
 0x2c7   :  { %v1704_v32 = vpop.permute.xlu1 %1703  ;;  %1761 = vst.msk [vmem:[#allocation4 + $0x98] sm:$0xff] %vm1614_vm14, %v1752_v51  ;;  %v1940_v1 = vld [vmem:[#allocation4 + $0x88] sm:$0xff] }
 0x2c8   :  { %1713 = vst.msk [vmem:[#allocation4 + $0x90] sm:$0xff] %vm1614_vm14, %v1704_v32  ;;  %v1939_v56 = vld [vmem:[#allocation4 + $0x80] sm:$0xff]  ;;  %2495 = vmatprep.mubr.bf16.mxu0 %v1940_v1 }
 0x2c9   :  { %2496 = vmatmul.mubr.bf16.gmra.mrb[8].mxu0 %v1939_v56 }
 0x2ce   :  { %v1942_v48 = vld [vmem:[#allocation4 + $0x98] sm:$0xff] }
 0x2cf   :  { %v1941_v7 = vld [vmem:[#allocation4 + $0x90] sm:$0xff]  ;;  %2560 = vmatprep.mubr.bf16.mxu1 %v1942_v48 }
 0x2d0   :  { %2561 = vmatmul.mubr.bf16.gmra.mrb[40].mxu1 %v1941_v7 }
 0x2d7   :  { %v1658_v17 = vpop.permute.xlu0 %1657 }
 0x2d8   :  { %v1609_v45 = vpop.permute.xlu1 %1608  ;;  %1666 = vst.msk [vmem:[#allocation4 + $0xc8] sm:$0xff] %vm1614_vm14, %v1658_v17 }
 0x2d9   :  { %1618 = vst.msk [vmem:[#allocation4 + $0xc0] sm:$0xff] %vm1614_vm14, %v1609_v45 }
 0x2dc   :  { %v1706_v61 = vpop.permute.xlu1 %1705 }
 0x2dd   :  { %v1754_v10 = vpop.permute.xlu0 %1753  ;;  %1714 = vst.msk [vmem:[#allocation4 + $0xd0] sm:$0xff] %vm1614_vm14, %v1706_v61  ;;  %v7897_v61 = vld [vmem:[%s10705_s4 + $0x1e0] sm:$0xff]  }
 0x2de   :  { %1762 = vst.msk [vmem:[#allocation4 + $0xd8] sm:$0xff] %vm1614_vm14, %v1754_v10  ;;  %v7896_v10 = vld [vmem:[%s10705_s4 + $0x220] sm:$0xff]  }
 0x2df   :  { %v1948_v50 = vld [vmem:[#allocation4 + $0xc8] sm:$0xff]  ;;  %7350 = vmatprep.subr.bf16.mxu0 %v7896_v10 }
 0x2e0   :  { %v1796_v39 = vpop.permute.xlu1 %1795  ;;  %v1947_v53 = vld [vmem:[#allocation4 + $0xc0] sm:$0xff]  ;;  %2503 = vmatprep.mubr.bf16.mxu0 %v1948_v50  ;;  %v7900_v50 = vld [vmem:[%s10705_s4 + $0x230] sm:$0xff]  }
 0x2e1   :  { %v1844_v23 = vpop.permute.xlu0 %1843  ;;  %1807 = vst.msk [vmem:[#allocation4 + $0x20] sm:$0xff] %vm1614_vm14, %v1796_v39  ;;  %2504 = vmatmul.mubr.bf16.gmra.mrb[12].mxu0 %v1947_v53  ;;  %v7899_v39 = vld [vmem:[%s10705_s4 + $0x1e8] sm:$0xff]  }
 0x2e2   :  { %1855 = vst.msk [vmem:[#allocation4 + $0x28] sm:$0xff] %vm1614_vm14, %v1844_v23  ;;  %v7898_v23 = vld [vmem:[%s10705_s4 + $0x228] sm:$0xff]  }
 0x2e4   :  { %v1846_v33 = vpop.permute.xlu1 %1845  ;;  %v1949_v0 = vld [vmem:[#allocation4 + $0xd0] sm:$0xff] }
 0x2e5   :  { %v1892_v12 = vpop.permute.xlu0 %1891  ;;  %v1950_v14 = vld [vmem:[#allocation4 + $0xd8] sm:$0xff]  ;;  %1856 = vst.msk [vmem:[#allocation4 + $0x68] sm:$0xff] %vm1614_vm14, %v1846_v33  ;;  %v7901_v33 = vld [vmem:[%s10705_s4 + $0x1f0] sm:$0xff]  }
 0x2e6   :  { %1903 = vst.msk [vmem:[#allocation4 + $0x30] sm:$0xff] %vm1614_vm14, %v1892_v12  ;;  %2568 = vmatprep.mubr.bf16.mxu1 %v1950_v14 }
 0x2e7   :  { %2569 = vmatmul.mubr.bf16.gmra.mrb[44].mxu1 %v1949_v0 }
 0x2e8   :  { %6616 = vmatprep.mubr.msk.bf16.mxu1 %vm58_vm6, %v1930_v62  ;;  %v1894_v16 = vpop.permute.xlu1 %1893  ;;  %v1927_v6 = vld [vmem:[#allocation4 + $0x20] sm:$0xff]  ;;  %v7902_v62 = vld [vmem:[%s10705_s4 + $0x238] sm:$0xff]  }
 0x2e9   :  { %v1798_v46 = vpop.permute.xlu0 %1797  ;;  %v1928_v21 = vld [vmem:[#allocation4 + $0x28] sm:$0xff]  ;;  %1904 = vst.msk [vmem:[#allocation4 + $0x70] sm:$0xff] %vm1614_vm14, %v1894_v16 }
 0x2ea   :  { %1808 = vst.msk [vmem:[#allocation4 + $0x60] sm:$0xff] %vm1614_vm14, %v1798_v46  ;;  %2609 = vmatprep.mubr.bf16.mxu0 %v1928_v21 }
 0x2eb   :  { %2610 = vmatmul.mubr.bf16.vlgmr.msra.gmra.mrb[16].mxu0 %v1927_v6 }
 0x2ec   :  { %v1800_v3 = vpop.permute.xlu1 %1799  ;;  %v1936_v18 = vld [vmem:[#allocation4 + $0x68] sm:$0xff]  ;;  %7351 = vmatpush3.bf16.msra.mxu0 %v7897_v61 }
 0x2ed   :  { %v1848_v8 = vpop.permute.xlu0 %1847  ;;  %v1929_v26 = vld [vmem:[#allocation4 + $0x30] sm:$0xff]  ;;  %1809 = vst.msk [vmem:[#allocation4 + $0xa0] sm:$0xff] %vm1614_vm14, %v1800_v3  ;;  %2617 = vmatprep.mubr.bf16.mxu0 %v1936_v18  ;;  %7352 = vmatprep.subr.bf16.mxu0 %v7898_v23 }
 0x2ee   :  { %1857 = vst.msk [vmem:[#allocation4 + $0xa8] sm:$0xff] %vm1614_vm14, %v1848_v8  ;;  %v7903_v8 = vld [vmem:[%s10705_s4 + $0x1f8] sm:$0xff]  }
 0x2ef   :  { %2675 = vmatmul.mubr.bf16.vlgmr.msra.gmra.mrb[48].mxu1 %v1929_v26  ;;  %v7904_v26 = vld [vmem:[%s10705_s4 + $0x240] sm:$0xff]  }
 0x2f0   :  { %6617 = vmatprep.mubr.msk.bf16.mxu1 %vm58_vm6, %v1938_v28  ;;  %v1850_v63 = vpop.permute.xlu1 %1849  ;;  %v1937_v38 = vld [vmem:[#allocation4 + $0x70] sm:$0xff]  ;;  %7353 = vmatpush3.bf16.msra.mxu0 %v7899_v39 }
 0x2f1   :  { %v1896_v31 = vpop.permute.xlu0 %1895  ;;  %v1935_v13 = vld [vmem:[#allocation4 + $0x60] sm:$0xff]  ;;  %1858 = vst.msk [vmem:[#allocation4 + $0xe8] sm:$0xff] %vm1614_vm14, %v1850_v63  ;;  %7354 = vmatprep.subr.bf16.mxu0 %v7900_v50 }
 0x2f2   :  { %1905 = vst.msk [vmem:[#allocation4 + $0xb0] sm:$0xff] %vm1614_vm14, %v1896_v31 }
 0x2f3   :  { %2618 = vmatmul.mubr.bf16.gmra.mrb[20].mxu0 %v1935_v13  ;;  %v7905_v13 = vld [vmem:[%s10705_s4 + $0x200] sm:$0xff]  }
 0x2f4   :  { %v1898_v35 = vpop.permute.xlu1 %1897  ;;  %v1943_v25 = vld [vmem:[#allocation4 + $0xa0] sm:$0xff]  ;;  %7355 = vmatpush3.bf16.msra.mxu0 %v7901_v33 }
 0x2f5   :  { %v1802_v29 = vpop.permute.xlu0 %1801  ;;  %v1944_v30 = vld [vmem:[#allocation4 + $0xa8] sm:$0xff]  ;;  %1906 = vst.msk [vmem:[#allocation4 + $0xf0] sm:$0xff] %vm1614_vm14, %v1898_v35  ;;  %7356 = vmatprep.subr.bf16.mxu0 %v7902_v62  ;;  %v7908_v62 = vld [vmem:[%s10705_s4 + $0x250] sm:$0xff]  }
 0x2f6   :  { %1810 = vst.msk [vmem:[#allocation4 + $0xe0] sm:$0xff] %vm1614_vm14, %v1802_v29  ;;  %2625 = vmatprep.mubr.bf16.mxu0 %v1944_v30  ;;  %v7906_v35 = vld [vmem:[%s10705_s4 + $0x248] sm:$0xff]  }
 0x2f7   :  { %2683 = vmatmul.mubr.bf16.gmra.mrb[52].mxu1 %v1937_v38  ;;  %v7907_v30 = vld [vmem:[%s10705_s4 + $0x208] sm:$0xff]  }
 0x2f8   :  { %6618 = vmatprep.mubr.msk.bf16.mxu1 %vm58_vm6, %v1946_v36  ;;  %v1952_v9 = vld [vmem:[#allocation4 + $0xe8] sm:$0xff]  ;;  %7357 = vmatpush3.bf16.msra.mxu0 %v7903_v8 }
 0x2f9   :  { %v1945_v19 = vld [vmem:[#allocation4 + $0xb0] sm:$0xff]  ;;  %7358 = vmatprep.subr.bf16.mxu0 %v7904_v26 }
 0x2fb   :  { %2626 = vmatmul.mubr.bf16.gmra.mrb[24].mxu0 %v1943_v25 }
 0x2fc   :  { %2633 = vmatprep.mubr.bf16.mxu0 %v1952_v9  ;;  %v1953_v37 = vld [vmem:[#allocation4 + $0xf0] sm:$0xff]  ;;  %7359 = vmatpush3.bf16.msra.mxu0 %v7905_v13 }
 0x2fd   :  { %v1951_v34 = vld [vmem:[#allocation4 + $0xe0] sm:$0xff]  ;;  %7360 = vmatprep.subr.bf16.mxu0 %v7906_v35 }
 0x2ff   :  { %2691 = vmatmul.mubr.bf16.gmra.mrb[56].mxu1 %v1945_v19 }
 0x300   :  { %6619 = vmatprep.mubr.msk.bf16.mxu1 %vm58_vm6, %v1954_v41  ;;  %7361 = vmatpush3.bf16.msra.mxu0 %v7907_v30 }
 0x301   :  { %7362 = vmatprep.subr.bf16.mxu0 %v7908_v62 }
 0x303   :  { %2634 = vmatmul.mubr.bf16.gmra.mrb[28].mxu0 %v1951_v34 }
 0x307   :  { %2699 = vmatmul.mubr.bf16.gmra.mrb[60].mxu1 %v1953_v37 }
 0x36b   :  { %v7286_v42 = vpop.f32.mrb[32].mxu1 }
 0x36c   :  { %v7287_v44 = vpop.f32.mrb[33].mxu1 }
 0x36d   :  { %v7288_v11 = vadd.f32 %v7287_v44, %v7286_v42  ;;  %v7289_v60 = vpop.f32.mrb[34].mxu1 }
 0x36e   :  { %v7290_v47 = vpop.f32.mrb[35].mxu1 }
 0x36f   :  { %v7291_v43 = vadd.f32 %v7290_v47, %v7289_v60  ;;  %v7246_v5 = vpop.f32.mrb[0].mxu0 }
 0x370   :  { %v7247_v40 = vpop.f32.mrb[1].mxu0 }
 0x371   :  { %v7248_v4 = vadd.f32 %v7247_v40, %v7246_v5  ;;  %v7249_v54 = vpop.f32.mrb[2].mxu0 }
 0x372   :  { %v7250_v55 = vpop.f32.mrb[3].mxu0 }
 0x373   :  { %v9340_v27 = vadd.f32 %v7288_v11, %v7248_v4  ;;  %v7251_v58 = vadd.f32 %v7250_v55, %v7249_v54 }
 0x375   :  { %v9342_v52 = vadd.f32 %v7291_v43, %v7251_v58 }
 0x383   :  { %v7252_v59 = vpop.f32.mrb[4].mxu0 }
 0x384   :  { %v7253_v57 = vpop.f32.mrb[5].mxu0 }
 0x385   :  { %v7254_v15 = vadd.f32 %v7253_v57, %v7252_v59  ;;  %v7255_v49 = vpop.f32.mrb[6].mxu0 }
 0x386   :  { %v7256_v22 = vpop.f32.mrb[7].mxu0 }
 0x387   :  { %v7257_v20 = vadd.f32 %v7256_v22, %v7255_v49 }
 0x388   :  { %v7292_v51 = vpop.f32.mrb[36].mxu1 }
 0x389   :  { %v7293_v32 = vpop.f32.mrb[37].mxu1 }
 0x38a   :  { %v7294_v1 = vadd.f32 %v7293_v32, %v7292_v51  ;;  %v7295_v56 = vpop.f32.mrb[38].mxu1  ;;  %v9402_v32 = vld [vmem:[%s10707_s6] ss:$0 sm:$0xff] }
 0x38b   :  { %v7296_v48 = vpop.f32.mrb[39].mxu1 }
 0x38c   :  { %v9344_v7 = vadd.f32 %v7294_v1, %v7254_v15  ;;  %v7297_v17 = vadd.f32 %v7296_v48, %v7295_v56  ;;  %v9396_v15 = vld [vmem:[%s10706_s5] ss:$0 sm:$0xff] }
 0x38e   :  { %v9346_v45 = vadd.f32 %v7297_v17, %v7257_v20 }
 0x39c   :  { %v7258_v53 = vpop.f32.mrb[8].mxu0 }
 0x39d   :  { %v7259_v12 = vpop.f32.mrb[9].mxu0 }
 0x39e   :  { %v7260_v14 = vadd.f32 %v7259_v12, %v7258_v53  ;;  %v7261_v0 = vpop.f32.mrb[10].mxu0 }
 0x39f   :  { %v7262_v46 = vpop.f32.mrb[11].mxu0 }
 0x3a0   :  { %v7263_v16 = vadd.f32 %v7262_v46, %v7261_v0  ;;  %v7909_v46 = vld [vmem:[%s10705_s4 + $0x210] sm:$0xff]  }
 0x3a1   :  { %7363 = vmatpush3.bf16.msra.mxu0 %v7909_v46 }
 0x3a3   :  { %v7298_v21 = vpop.f32.mrb[40].mxu1 }
 0x3a4   :  { %v7299_v6 = vpop.f32.mrb[41].mxu1 }
 0x3a5   :  { %v7300_v3 = vadd.f32 %v7299_v6, %v7298_v21  ;;  %v7301_v18 = vpop.f32.mrb[42].mxu1 }
 0x3a6   :  { %v7302_v28 = vpop.f32.mrb[43].mxu1 }
 0x3a7   :  { %v9375_v31 = vadd.f32 %v7300_v3, %v7260_v14  ;;  %v7303_v63 = vadd.f32 %v7302_v28, %v7301_v18 }
 0x3a9   :  { %v9380_v29 = vadd.f32 %v7303_v63, %v7263_v16  ;;  %v7910_v16 = vld [vmem:[%s10705_s4 + $0x258] sm:$0xff]  }
 0x3aa   :  { %v7911_v63 = vld [vmem:[%s10705_s4 + $0x218] sm:$0xff]   ;;  %7364 = vmatprep.subr.bf16.mxu0 %v7910_v16 }
 0x3ab   :  { %7365 = vmatpush3.bf16.msra.mxu0 %v7911_v63 }
 0x3b4   :  { %v7264_v38 = vpop.f32.mrb[12].mxu0 }
 0x3b5   :  { %v7265_v36 = vpop.f32.mrb[13].mxu0 }
 0x3b6   :  { %v7266_v25 = vadd.f32 %v7265_v36, %v7264_v38  ;;  %v7267_v9 = vpop.f32.mrb[14].mxu0 }
 0x3b7   :  { %v7268_v19 = vpop.f32.mrb[15].mxu0 }
 0x3b8   :  { %v7269_v41 = vadd.f32 %v7268_v19, %v7267_v9 }
 0x3ba   :  { %v7304_v34 = vpop.f32.mrb[44].mxu1 }
 0x3bb   :  { %v7305_v37 = vpop.f32.mrb[45].mxu1 }
 0x3bc   :  { %v7306_v42 = vadd.f32 %v7305_v37, %v7304_v34  ;;  %v7307_v44 = vpop.f32.mrb[46].mxu1 }
 0x3bd   :  { %v7308_v11 = vpop.f32.mrb[47].mxu1 }
 0x3be   :  { %v9388_v60 = vadd.f32 %v7306_v42, %v7266_v25  ;;  %v7309_v47 = vadd.f32 %v7308_v11, %v7307_v44  ;;  %v7326_v43 = vpop.f32.mrb[16].mxu0 }
 0x3bf   :  { %v7327_v5 = vpop.f32.mrb[17].mxu0 }
 0x3c0   :  { %v9390_v40 = vadd.f32 %v7309_v47, %v7269_v41  ;;  %v7328_v4 = vadd.f32 %v7327_v5, %v7326_v43  ;;  %v7329_v54 = vpop.f32.mrb[18].mxu0 }
 0x3c1   :  { %v7330_v55 = vpop.f32.mrb[19].mxu0 }
 0x3c2   :  { %v7331_v58 = vadd.f32 %v7330_v55, %v7329_v54  ;;  %v2612_v59 = vadd.f32 %v7328_v4, %v9340_v27  ;;  %v2676_v57 = vpop.f32.mrb[48].mxu1 }
 0x3c3   :  { %v2678_v49 = vpop.f32.mrb[49].mxu1 }
 0x3c4   :  { %v2677_v22 = vadd.f32 %v2676_v57, %v2612_v59  ;;  %v2615_v20 = vadd.f32 %v7331_v58, %v9342_v52  ;;  %v2679_v51 = vpop.f32.mrb[50].mxu1 }
 0x3c5   :  { %v2681_v1 = vpop.f32.mrb[51].mxu1 }
 0x3c6   :  { %v2714_v56 = vmul.f32 %v9396_v15, %v2677_v22  ;;  %v2680_v27 = vadd.f32 %v2679_v51, %v2615_v20  ;;  %v7332_v48 = vpop.f32.mrb[20].mxu0 }
 0x3c7   :  { %v7333_v17 = vpop.f32.mrb[21].mxu0 }
 0x3c8   :  { %v2729_v10 = vadd.f32 %v9402_v32, %v2714_v56  ;;  %v2715_v61 = vmul.f32 %v9396_v15, %v2680_v27  ;;  %v7334_v23 = vadd.f32 %v7333_v17, %v7332_v48  ;;  %v7335_v39 = vpop.f32.mrb[22].mxu0  ;;  %v7912_v48 = vld [vmem:[%s10705_s4 + $0x2a0] sm:$0xff]  }
 0x3c9   :  { %v7336_v50 = vpop.f32.mrb[23].mxu0  ;;  %7390 = vmatprep.subr.bf16.mxu0 %v7912_v48 }
 0x3ca   :  { %v2737_v52 = vmax.f32 %v2729_v10, 0.0  ;;  %v2730_v53 = vadd.f32 %v9402_v32, %v2715_v61  ;;  %v7337_v12 = vadd.f32 %v7336_v50, %v7335_v39  ;;  %v2620_v33 = vadd.f32 %v7334_v23, %v9344_v7  ;;  %v2684_v14 = vpop.f32.mrb[52].mxu1 }
 0x3cb   :  { %v2686_v0 = vpop.f32.mrb[53].mxu1 }
 0x3cc   :  { %2745 = vst.msk [vmem:[#allocation3 + $0x7] sm:$0xff] %vm58_vm6, %v2737_v52  ;;  %v2738_v21 = vmax.f32 %v2730_v53, 0.0  ;;  %v2685_v6 = vadd.f32 %v2684_v14, %v2620_v33  ;;  %v2623_v7 = vadd.f32 %v7337_v12, %v9346_v45  ;;  %v2687_v8 = vpop.f32.mrb[54].mxu1 }
 0x3cd   :  { %v2689_v3 = vpop.f32.mrb[55].mxu1 }
 0x3ce   :  { %2746 = vst.msk [vmem:[#allocation3 + $0xf] sm:$0xff] %vm58_vm6, %v2738_v21  ;;  %v2716_v18 = vmul.f32 %v9396_v15, %v2685_v6  ;;  %v2688_v26 = vadd.f32 %v2687_v8, %v2623_v7  ;;  %v7338_v28 = vpop.f32.mrb[24].mxu0 }
 0x3cf   :  { %v7339_v13 = vpop.f32.mrb[25].mxu0 }
 0x3d0   :  { %v2731_v35 = vadd.f32 %v9402_v32, %v2716_v18  ;;  %v2717_v45 = vmul.f32 %v9396_v15, %v2688_v26  ;;  %v7340_v30 = vadd.f32 %v7339_v13, %v7338_v28  ;;  %v7341_v38 = vpop.f32.mrb[26].mxu0 }
 0x3d1   :  { %v7342_v36 = vpop.f32.mrb[27].mxu0 }
 0x3d2   :  { %v2739_v25 = vmax.f32 %v2731_v35, 0.0  ;;  %v2732_v9 = vadd.f32 %v9402_v32, %v2717_v45  ;;  %v7343_v19 = vadd.f32 %v7342_v36, %v7341_v38  ;;  %v2628_v41 = vadd.f32 %v7340_v30, %v9375_v31  ;;  %v2692_v34 = vpop.f32.mrb[56].mxu1 }
 0x3d3   :  { %v2694_v37 = vpop.f32.mrb[57].mxu1  ;;  %v2817_v43 = vld [vmem:[#allocation3 + $0x3] sm:$0xff] }
 0x3d4   :  { %2747 = vst.msk [vmem:[#allocation3 + $0x17] sm:$0xff] %vm58_vm6, %v2739_v25  ;;  %v2740_v42 = vmax.f32 %v2732_v9, 0.0  ;;  %v2693_v44 = vadd.f32 %v2692_v34, %v2628_v41  ;;  %v2631_v11 = vadd.f32 %v7343_v19, %v9380_v29  ;;  %v2695_v47 = vpop.f32.mrb[58].mxu1  ;;  %v2769_v5 = vld [vmem:[#allocation3 + $0x1] sm:$0xff] }
 0x3d5   :  { %v2697_v4 = vpop.f32.mrb[59].mxu1  ;;  %v9431_v54 = vld [vmem:[#allocation3 + $0xb] sm:$0xff]  ;;  %v2801_v58 = vld [vmem:[#allocation3 + $0x2] sm:$0xff] }
 0x3d6   :  { %v9433_v55 = vld [vmem:[#allocation3 + $0x9] sm:$0xff]  ;;  %2748 = vst.msk [vmem:[#allocation3 + $0x1f] sm:$0xff] %vm58_vm6, %v2740_v42  ;;  %v2718_v31 = vmul.f32 %v9396_v15, %v2693_v44  ;;  %v2696_v59 = vadd.f32 %v2695_v47, %v2631_v11  ;;  %v7344_v57 = vpop.f32.mrb[28].mxu0  ;;  %v2825_v49 = vpack.c.bf16 %v9431_v54, %v2817_v43  ;;  %v2753_v20 = vld [vmem:[#allocation3] sm:$0xff] }
 0x3d7   :  { %v2777_v22 = vpack.c.bf16 %v9433_v55, %v2769_v5  ;;  %v2802_v29 = vld [vmem:[#allocation3 + $0xa] sm:$0xff]  ;;  %v7345_v1 = vpop.f32.mrb[29].mxu0  ;;  %v7920_v47 = vld [vmem:[%s10705_s4 + $0x320] sm:$0xff]  }
 0x3d8   :  { %v2754_v51 = vld [vmem:[#allocation3 + $0x8] sm:$0xff]  ;;  %v2809_v56 = vpack.c.bf16 %v2802_v29, %v2801_v58  ;;  %v2733_v17 = vadd.f32 %v9402_v32, %v2718_v31  ;;  %v2719_v10 = vmul.f32 %v9396_v15, %v2696_v59  ;;  %v7346_v61 = vadd.f32 %v7345_v1, %v7344_v57  ;;  %v7347_v23 = vpop.f32.mrb[30].mxu0  ;;  %2833 = vrot.lane.b32.xlu0 %v2825_v49, %s8150_s30 }
 0x3d9   :  { %v2761_v27 = vpack.c.bf16 %v2754_v51, %v2753_v20  ;;  %2785 = vrot.lane.b32.xlu1 %v2777_v22, %s8150_s30  ;;  %v2897_v39 = vld [vmem:[#allocation3 + $0x6] sm:$0xff]  ;;  %v2898_v50 = vld [vmem:[#allocation3 + $0xe] sm:$0xff]  ;;  %v7348_v52 = vpop.f32.mrb[31].mxu0  ;;  %7430 = vmatprep.subr.bf16.mxu1 %v7920_v47 }
 0x3da   :  { %2813 = vst.msk [vmem:[#allocation4 + $0x8] sm:$0xff] %vm58_vm6, %v2809_v56  ;;  %v2905_v53 = vpack.c.bf16 %v2898_v50, %v2897_v39  ;;  %v9448_v12 = vld [vmem:[#allocation3 + $0xc] sm:$0xff]  ;;  %v2741_v33 = vmax.f32 %v2733_v17, 0.0  ;;  %v2734_v14 = vadd.f32 %v9402_v32, %v2719_v10  ;;  %v7349_v0 = vadd.f32 %v7348_v52, %v7347_v23  ;;  %v2700_v46 = vpop.f32.mrb[60].mxu1  ;;  %v2849_v16 = vld [vmem:[#allocation3 + $0x4] sm:$0xff] }
 0x3db   :  { %2765 = vst.msk [vmem:[#allocation4] sm:$0xff] %vm58_vm6, %v2761_v27  ;;  %v2636_v62 = vadd.f32 %v7346_v61, %v9388_v60  ;;  %v2702_v21 = vpop.f32.mrb[61].mxu1  ;;  %v2857_v6 = vpack.c.bf16 %v9448_v12, %v2849_v16  ;;  %v9456_v26 = vld [vmem:[#allocation3 + $0x13] sm:$0xff]  ;;  %v7924_v23 = vld [vmem:[%s10705_s4 + $0x328] sm:$0xff]  }
 0x3dc   :  { %2909 = vst.msk [vmem:[#allocation4 + $0x18] sm:$0xff] %vm58_vm6, %v2905_v53  ;;  %2749 = vst.msk [vmem:[#allocation3 + $0x37] sm:$0xff] %vm58_vm6, %v2741_v33  ;;  %v2742_v7 = vmax.f32 %v2734_v14, 0.0  ;;  %v2639_v3 = vadd.f32 %v7349_v0, %v9390_v40  ;;  %v2703_v18 = vpop.f32.mrb[62].mxu1  ;;  %v2803_v28 = vld [vmem:[#allocation3 + $0x12] sm:$0xff]  ;;  %v7925_v39 = vld [vmem:[%s10705_s4 + $0x2e8] sm:$0xff]  }
 0x3dd   :  { %v2701_v8 = vadd.f32 %v2700_v46, %v2636_v62  ;;  %v2755_v63 = vld [vmem:[#allocation3 + $0x10] sm:$0xff]  ;;  %v2705_v13 = vpop.f32.mrb[63].mxu1  ;;  %v9458_v60 = vld [vmem:[#allocation3 + $0x1b] sm:$0xff]  ;;  %2861 = vst.msk [vmem:[#allocation4 + $0x10] sm:$0xff] %vm58_vm6, %v2857_v6  ;;  %v3001_v30 = vpack.c.bf16 %v2803_v28, %v2802_v29 }
 0x3de   :  { %v9460_v35 = vld [vmem:[#allocation3 + $0x11] sm:$0xff]  ;;  %v9462_v45 = vld [vmem:[#allocation3 + $0x19] sm:$0xff]  ;;  %v2953_v38 = vpack.c.bf16 %v2755_v63, %v2754_v51  ;;  %2750 = vst.msk [vmem:[#allocation3 + $0x3f] sm:$0xff] %vm58_vm6, %v2742_v7  ;;  %v2704_v36 = vadd.f32 %v2703_v18, %v2639_v3  ;;  %v2826_v25 = vpack.c.bf16 %v9458_v60, %v9456_v26 }
 0x3df   :  { %v2720_v40 = vmul.f32 %v9396_v15, %v2701_v8  ;;  %v2778_v9 = vpack.c.bf16 %v9462_v45, %v9460_v35  ;;  %v9471_v19 = vld [vmem:[#allocation3 + $0x1a] sm:$0xff]  ;;  %3005 = vst.msk [vmem:[#allocation4 + $0x28] sm:$0xff] %vm58_vm6, %v3001_v30  ;;  %v7928_v52 = vld [vmem:[%s10705_s4 + $0x330] sm:$0xff]  }
 0x3e0   :  { %v9473_v41 = vld [vmem:[#allocation3 + $0x18] sm:$0xff]  ;;  %2957 = vst.msk [vmem:[#allocation4 + $0x20] sm:$0xff] %vm58_vm6, %v2953_v38  ;;  %v2721_v37 = vmul.f32 %v9396_v15, %v2704_v36  ;;  %2835 = vrot.lane.b32.xlu0 %v2826_v25, %s8150_s30  ;;  %v2810_v44 = vpack.c.bf16 %v9471_v19, %v2803_v28  ;;  %v7921_v15 = vld [vmem:[%s10705_s4 + $0x2e0] sm:$0xff]   ;;  %v9543_v13 = vld [vmem:[#allocation3 + $0xd] sm:$0xff] }
 0x3e1   :  { %v2735_v34 = vadd.f32 %v9402_v32, %v2720_v40  ;;  %2787 = vrot.lane.b32.xlu1 %v2778_v9, %s8150_s30  ;;  %v2899_v42 = vld [vmem:[#allocation3 + $0x16] sm:$0xff]  ;;  %v2762_v11 = vpack.c.bf16 %v9473_v41, %v2755_v63  ;;  %v9490_v58 = vld [vmem:[#allocation3 + $0x1e] sm:$0xff]  ;;  %7431 = vmatpush3.bf16.msra.mxu1 %v7921_v15  ;;  %v2913_v40 = vld [vmem:[#allocation3 + $0x7] sm:$0xff] }
 0x3e2   :  { %v3097_v43 = vpack.c.bf16 %v2899_v42, %v2898_v50  ;;  %v2736_v4 = vadd.f32 %v9402_v32, %v2721_v37  ;;  %v2851_v31 = vld [vmem:[#allocation3 + $0x14] sm:$0xff]  ;;  %2814 = vst.msk [vmem:[#allocation4 + $0x48] sm:$0xff] %vm58_vm6, %v2810_v44  ;;  %v2906_v59 = vpack.c.bf16 %v9490_v58, %v2899_v42  ;;  %v9515_v50 = vld [vmem:[#allocation3 + $0x1c] sm:$0xff]  ;;  %7432 = vmatprep.subr.bf16.mxu1 %v7924_v23  ;;  %v2865_v37 = vld [vmem:[#allocation3 + $0x5] sm:$0xff] }
 0x3e3   :  { %v2743_v5 = vmax.f32 %v2735_v34, 0.0  ;;  %2766 = vst.msk [vmem:[#allocation4 + $0x40] sm:$0xff] %vm58_vm6, %v2762_v11  ;;  %v3049_v57 = vpack.c.bf16 %v2851_v31, %v9448_v12  ;;  %v2821_v49 = vld [vmem:[#allocation3 + $0x33] sm:$0xff]  ;;  %v2858_v53 = vpack.c.bf16 %v9515_v50, %v2851_v31  ;;  %v7936_v15 = vld [vmem:[%s10705_s4 + $0x340] sm:$0xff]  }
 0x3e4   :  { %3101 = vst.msk [vmem:[#allocation4 + $0x38] sm:$0xff] %vm58_vm6, %v3097_v43  ;;  %v2744_v32 = vmax.f32 %v2736_v4, 0.0  ;;  %v2773_v22 = vld [vmem:[#allocation3 + $0x31] sm:$0xff]  ;;  %2910 = vst.msk [vmem:[#allocation4 + $0x58] sm:$0xff] %vm58_vm6, %v2906_v59  ;;  %v2873_v43 = vpack.c.bf16 %v9543_v13, %v2865_v37  ;;  %v9562_v4 = vld [vmem:[#allocation3 + $0x1d] sm:$0xff] }
 0x3e5   :  { %2751 = vst.msk [vmem:[#allocation3 + $0x47] sm:$0xff] %vm58_vm6, %v2743_v5  ;;  %v9498_v29 = vld [vmem:[#allocation3 + $0x3b] sm:$0xff]  ;;  %v2805_v51 = vld [vmem:[#allocation3 + $0x32] sm:$0xff]  ;;  %3053 = vst.msk [vmem:[#allocation4 + $0x30] sm:$0xff] %vm58_vm6, %v3049_v57  ;;  %7433 = vmatpush3.bf16.msra.mxu1 %v7925_v39 }
 0x3e6   :  { %v9500_v20 = vld [vmem:[#allocation3 + $0x39] sm:$0xff]  ;;  %2752 = vst.msk [vmem:[#allocation3 + $0x4f] sm:$0xff] %vm58_vm6, %v2744_v32  ;;  %v2827_v1 = vpack.c.bf16 %v9498_v29, %v2821_v49  ;;  %v2757_v48 = vld [vmem:[#allocation3 + $0x30] sm:$0xff]  ;;  %7434 = vmatprep.subr.bf16.mxu1 %v7928_v52  ;;  %2862 = vst.msk [vmem:[#allocation4 + $0x50] sm:$0xff] %vm58_vm6, %v2858_v53 }
 0x3e7   :  { %v2779_v56 = vpack.c.bf16 %v9500_v20, %v2773_v22  ;;  %v2806_v27 = vld [vmem:[#allocation3 + $0x3a] sm:$0xff]  ;;  %v7929_v12 = vld [vmem:[%s10705_s4 + $0x2f0] sm:$0xff]  }
 0x3e8   :  { %v2758_v17 = vld [vmem:[#allocation3 + $0x38] sm:$0xff]  ;;  %v2811_v10 = vpack.c.bf16 %v2806_v27, %v2805_v51  ;;  %2837 = vrot.lane.b32.xlu0 %v2827_v1, %s8150_s30  ;;  %v2914_v63 = vld [vmem:[#allocation3 + $0xf] sm:$0xff]  ;;  %v7937_v22 = vld [vmem:[%s10705_s4 + $0x300] sm:$0xff]  }
 0x3e9   :  { %v2763_v61 = vpack.c.bf16 %v2758_v17, %v2757_v48  ;;  %2789 = vrot.lane.b32.xlu1 %v2779_v56, %s8150_s30  ;;  %v2901_v33 = vld [vmem:[#allocation3 + $0x36] sm:$0xff]  ;;  %v9526_v14 = vld [vmem:[#allocation3 + $0x3e] sm:$0xff]  ;;  %7435 = vmatpush3.bf16.msra.mxu1 %v7929_v12  ;;  %v2921_v47 = vpack.c.bf16 %v2914_v63, %v2913_v40 }
 0x3ea   :  { %2815 = vst.msk [vmem:[#allocation4 + $0x88] sm:$0xff] %vm58_vm6, %v2811_v10  ;;  %v2907_v0 = vpack.c.bf16 %v9526_v14, %v2901_v33  ;;  %v2853_v9 = vld [vmem:[#allocation3 + $0x34] sm:$0xff]  ;;  %v2854_v34 = vld [vmem:[#allocation3 + $0x3c] sm:$0xff]  ;;  %v3044_v12 = vld [vmem:[#allocation3 + $0x24] sm:$0xff] }
 0x3eb   :  { %2767 = vst.msk [vmem:[#allocation4 + $0x80] sm:$0xff] %vm58_vm6, %v2763_v61  ;;  %v7932_v42 = vld [vmem:[%s10705_s4 + $0x338] sm:$0xff]   ;;  %v2859_v11 = vpack.c.bf16 %v2854_v34, %v2853_v9  ;;  %v2996_v10 = vld [vmem:[#allocation3 + $0x22] sm:$0xff]  ;;  %v7941_v9 = vld [vmem:[%s10705_s4 + $0x350] sm:$0xff]  }
 0x3ec   :  { %v9530_v62 = vld [vmem:[#allocation3 + $0x43] sm:$0xff]  ;;  %2911 = vst.msk [vmem:[#allocation4 + $0x98] sm:$0xff] %vm58_vm6, %v2907_v0  ;;  %v7933_v44 = vld [vmem:[%s10705_s4 + $0x2f8] sm:$0xff]   ;;  %7436 = vmatprep.subr.bf16.mxu1 %v7932_v42  ;;  %v3002_v52 = vpack.c.bf16 %v2996_v10, %v9471_v19  ;;  %v7916_v10 = vld [vmem:[%s10705_s4 + $0x2b0] sm:$0xff]  }
 0x3ed   :  { %v2807_v46 = vld [vmem:[#allocation3 + $0x42] sm:$0xff]  ;;  %v9532_v21 = vld [vmem:[#allocation3 + $0x4b] sm:$0xff]  ;;  %v2915_v31 = vld [vmem:[#allocation3 + $0x17] sm:$0xff]  ;;  %2863 = vst.msk [vmem:[#allocation4 + $0x90] sm:$0xff] %vm58_vm6, %v2859_v11  ;;  %7437 = vmatpush3.bf16.msra.mxu1 %v7933_v44 }
 0x3ee   :  { %v2759_v16 = vld [vmem:[#allocation3 + $0x40] sm:$0xff]  ;;  %v9536_v7 = vld [vmem:[#allocation3 + $0x49] sm:$0xff]  ;;  %v3003_v8 = vpack.c.bf16 %v2807_v46, %v2806_v27  ;;  %v2828_v18 = vpack.c.bf16 %v9532_v21, %v9530_v62  ;;  %v9572_v49 = vld [vmem:[#allocation3 + $0x15] sm:$0xff]  ;;  %7438 = vmatprep.subr.bf16.mxu1 %v7936_v15  ;;  %3006 = vst.msk [vmem:[#allocation4 + $0x68] sm:$0xff] %vm58_vm6, %v3002_v52  ;;  %v3017_v15 = vpack.c.bf16 %v9456_v26, %v9431_v54 }
 0x3ef   :  { %v9534_v6 = vld [vmem:[#allocation3 + $0x41] sm:$0xff]  ;;  %v2955_v3 = vpack.c.bf16 %v2759_v16, %v2758_v17  ;;  %v9545_v30 = vld [vmem:[#allocation3 + $0x4a] sm:$0xff]  ;;  %v2874_v39 = vpack.c.bf16 %v9562_v4, %v9572_v49  ;;  %v3000_v33 = vld [vmem:[#allocation3 + $0x52] sm:$0xff]  ;;  %v3019_v26 = vpack.c.bf16 %v9530_v62, %v9498_v29 }
 0x3f0   :  { %v2780_v28 = vpack.c.bf16 %v9536_v7, %v9534_v6  ;;  %v9547_v38 = vld [vmem:[#allocation3 + $0x48] sm:$0xff]  ;;  %3007 = vst.msk [vmem:[#allocation4 + $0xa8] sm:$0xff] %vm58_vm6, %v3003_v8  ;;  %2839 = vrot.lane.b32.xlu0 %v2828_v18, %s8150_s30  ;;  %v2812_v36 = vpack.c.bf16 %v9545_v30, %v2807_v46  ;;  %v2916_v5 = vld [vmem:[#allocation3 + $0x1f] sm:$0xff]  ;;  %v3004_v8 = vpack.c.bf16 %v3000_v33, %v9545_v30  ;;  %v2917_v63 = vld [vmem:[#allocation3 + $0x37] sm:$0xff] }
 0x3f1   :  { %2959 = vst.msk [vmem:[#allocation4 + $0xa0] sm:$0xff] %vm58_vm6, %v2955_v3  ;;  %v2764_v25 = vpack.c.bf16 %v9547_v38, %v2759_v16  ;;  %v2903_v59 = vld [vmem:[#allocation3 + $0x46] sm:$0xff]  ;;  %v2904_v57 = vld [vmem:[#allocation3 + $0x4e] sm:$0xff]  ;;  %v2922_v23 = vpack.c.bf16 %v2916_v5, %v2915_v31  ;;  %v9588_v46 = vld [vmem:[#allocation3 + $0x3d] sm:$0xff]  ;;  %v3050_v16 = vpack.c.bf16 %v3044_v12, %v9515_v50  ;;  %7439 = vmatpush3.bf16.msra.mxu1 %v7937_v22 }
 0x3f2   :  { %2791 = vrot.lane.b32.xlu1 %v2780_v28, %s8150_s30  ;;  %2816 = vst.msk [vmem:[#allocation4 + $0xc8] sm:$0xff] %vm58_vm6, %v2812_v36  ;;  %v2855_v32 = vld [vmem:[#allocation3 + $0x44] sm:$0xff]  ;;  %v2908_v51 = vpack.c.bf16 %v2904_v57, %v2903_v59  ;;  %v2856_v1 = vld [vmem:[#allocation3 + $0x4c] sm:$0xff]  ;;  %v3099_v27 = vpack.c.bf16 %v2903_v59, %v9526_v14  ;;  %v3048_v3 = vld [vmem:[#allocation3 + $0x54] sm:$0xff]  ;;  %v2969_v31 = vpack.c.bf16 %v9460_v35, %v9433_v55 }
 0x3f3   :  { %2768 = vst.msk [vmem:[#allocation4 + $0xc0] sm:$0xff] %vm58_vm6, %v2764_v25  ;;  %v3051_v56 = vpack.c.bf16 %v2855_v32, %v2854_v34  ;;  %v2860_v48 = vpack.c.bf16 %v2856_v1, %v2855_v32  ;;  %v7938_v17 = vld [vmem:[%s10705_s4 + $0x348] sm:$0xff]   ;;  %v2948_v61 = vld [vmem:[#allocation3 + $0x20] sm:$0xff]  ;;  %v2952_v14 = vld [vmem:[#allocation3 + $0x50] sm:$0xff] }
 0x3f4   :  { %2929 = vrot.lane.b32.xlu0 %v2921_v47, %s8150_s30  ;;  %2912 = vst.msk [vmem:[#allocation4 + $0xd8] sm:$0xff] %vm58_vm6, %v2908_v51  ;;  %v2954_v53 = vpack.c.bf16 %v2948_v61, %v9473_v41  ;;  %3103 = vst.msk [vmem:[#allocation4 + $0xb8] sm:$0xff] %vm58_vm6, %v3099_v27  ;;  %v2918_v0 = vld [vmem:[#allocation3 + $0x3f] sm:$0xff]  ;;  %v2956_v19 = vpack.c.bf16 %v2952_v14, %v9547_v38  ;;  %v3052_v41 = vpack.c.bf16 %v3048_v3, %v2856_v1  ;;  %v3096_v28 = vld [vmem:[#allocation3 + $0x56] sm:$0xff] }
 0x3f5   :  { %3055 = vst.msk [vmem:[#allocation4 + $0xb0] sm:$0xff] %vm58_vm6, %v3051_v56  ;;  %2864 = vst.msk [vmem:[#allocation4 + $0xd0] sm:$0xff] %vm58_vm6, %v2860_v48  ;;  %v3092_v18 = vld [vmem:[#allocation3 + $0x26] sm:$0xff]  ;;  %v2869_v40 = vld [vmem:[#allocation3 + $0x35] sm:$0xff]  ;;  %v3100_v38 = vpack.c.bf16 %v3096_v28, %v2904_v57  ;;  %v2923_v36 = vpack.c.bf16 %v2918_v0, %v2917_v63  ;;  %7440 = vmatprep.subr.bf16.mxu1 %v7938_v17  ;;  %v3065_v57 = vpack.c.bf16 %v9572_v49, %v9543_v13 }
 0x3f6   :  { %2881 = vrot.lane.b32.xlu1 %v2873_v43, %s8150_s30  ;;  %2958 = vst.msk [vmem:[#allocation4 + $0x60] sm:$0xff] %vm58_vm6, %v2954_v53  ;;  %v7940_v50 = vld [vmem:[%s10705_s4 + $0x308] sm:$0xff]   ;;  %3054 = vst.msk [vmem:[#allocation4 + $0x70] sm:$0xff] %vm58_vm6, %v3050_v16  ;;  %v3098_v30 = vpack.c.bf16 %v3092_v18, %v9490_v58  ;;  %v2875_v25 = vpack.c.bf16 %v9588_v46, %v2869_v40  ;;  %v7943_v44 = vld [vmem:[%s10705_s4 + $0x310] sm:$0xff]  }
 0x3f7   :  { %3008 = vst.msk [vmem:[#allocation4 + $0xe8] sm:$0xff] %vm58_vm6, %v3004_v8  ;;  %2960 = vst.msk [vmem:[#allocation4 + $0xe0] sm:$0xff] %vm58_vm6, %v2956_v19  ;;  %v2920_v34 = vld [vmem:[#allocation3 + $0x4f] sm:$0xff]  ;;  %v2919_v58 = vld [vmem:[#allocation3 + $0x47] sm:$0xff]  ;;  %7441 = vmatpush3.bf16.msra.mxu1 %v7940_v50 }
 0x3f8   :  { %2931 = vrot.lane.b32.xlu0 %v2922_v23, %s8150_s30  ;;  %3056 = vst.msk [vmem:[#allocation4 + $0xf0] sm:$0xff] %vm58_vm6, %v3052_v41  ;;  %v2872_v37 = vld [vmem:[#allocation3 + $0x4d] sm:$0xff]  ;;  %3102 = vst.msk [vmem:[#allocation4 + $0x78] sm:$0xff] %vm58_vm6, %v3098_v30  ;;  %v2871_v42 = vld [vmem:[#allocation3 + $0x45] sm:$0xff]  ;;  %v2924_v11 = vpack.c.bf16 %v2920_v34, %v2919_v58  ;;  %7442 = vmatprep.subr.bf16.mxu1 %v7941_v9 }
 0x3f9   :  { %3104 = vst.msk [vmem:[#allocation4 + $0xf8] sm:$0xff] %vm58_vm6, %v3100_v38  ;;  %v2876_v47 = vpack.c.bf16 %v2872_v37, %v2871_v42  ;;  %v7944_v43 = vld [vmem:[%s10705_s4 + $0x358] sm:$0xff]   ;;  %v3012_v59 = vld [vmem:[#allocation3 + $0x23] sm:$0xff]  ;;  %v3067_v13 = vpack.c.bf16 %v2871_v42, %v9588_v46  ;;  %v7917_v61 = vld [vmem:[%s10705_s4 + $0x270] sm:$0xff]  }
 0x3fa   :  { %2883 = vrot.lane.b32.xlu1 %v2874_v39, %s8150_s30  ;;  %v7946_v5 = vld [vmem:[%s10705_s4 + $0x318] sm:$0xff]   ;;  %v3018_v32 = vpack.c.bf16 %v3012_v59, %v9458_v60  ;;  %v2964_v22 = vld [vmem:[#allocation3 + $0x21] sm:$0xff]  ;;  %v2971_v60 = vpack.c.bf16 %v9534_v6, %v9500_v20  ;;  %v7930_v63 = vld [vmem:[%s10705_s4 + $0x2d0] sm:$0xff]  }
 0x3fb   :  { %7443 = vmatpush3.bf16.msra.mxu1 %v7943_v44  ;;  %v3060_v51 = vld [vmem:[#allocation3 + $0x25] sm:$0xff]  ;;  %v2970_v54 = vpack.c.bf16 %v2964_v22, %v9462_v45  ;;  %v3016_v35 = vld [vmem:[#allocation3 + $0x53] sm:$0xff] }
 0x3fc   :  { %2933 = vrot.lane.b32.xlu0 %v2923_v36, %s8150_s30  ;;  %7444 = vmatprep.subr.bf16.mxu1 %v7944_v43  ;;  %v3066_v55 = vpack.c.bf16 %v3060_v51, %v9562_v4  ;;  %v3020_v45 = vpack.c.bf16 %v3016_v35, %v9532_v21  ;;  %v2968_v4 = vld [vmem:[#allocation3 + $0x51] sm:$0xff]  ;;  %v7913_v21 = vld [vmem:[%s10705_s4 + $0x260] sm:$0xff]   ;;  %v7915_v17 = vld [vmem:[%s10705_s4 + $0x268] sm:$0xff]  }
 0x3fd   :  { %v3064_v49 = vld [vmem:[#allocation3 + $0x55] sm:$0xff]  ;;  %v2972_v29 = vpack.c.bf16 %v2968_v4, %v9536_v7  ;;  %v7914_v7 = vld [vmem:[%s10705_s4 + $0x2a8] sm:$0xff]   ;;  %v7922_v14 = vld [vmem:[%s10705_s4 + $0x2c0] sm:$0xff]  }
 0x3fe   :  { %2885 = vrot.lane.b32.xlu1 %v2875_v25, %s8150_s30  ;;  %v3068_v62 = vpack.c.bf16 %v3064_v49, %v2872_v37  ;;  %v7918_v12 = vld [vmem:[%s10705_s4 + $0x2b8] sm:$0xff]   ;;  %v7923_v0 = vld [vmem:[%s10705_s4 + $0x280] sm:$0xff]   ;;  %v7926_v3 = vld [vmem:[%s10705_s4 + $0x2c8] sm:$0xff]  }
 0x3ff   :  { %7445 = vmatpush3.bf16.msra.mxu1 %v7946_v5  ;;  %v7919_v33 = vld [vmem:[%s10705_s4 + $0x278] sm:$0xff]   ;;  %v7927_v41 = vld [vmem:[%s10705_s4 + $0x288] sm:$0xff]   ;;  %v7931_v40 = vld [vmem:[%s10705_s4 + $0x290] sm:$0xff]  }
 0x400   :  { %2935 = vrot.lane.b32.xlu0 %v2924_v11, %s8150_s30  ;;  %v7934_v25 = vld [vmem:[%s10705_s4 + $0x2d8] sm:$0xff]   ;;  %v7939_v42 = vld [vmem:[%s10705_s4 + $0x360] sm:$0xff]   ;;  %v7942_v5 = vld [vmem:[%s10705_s4 + $0x368] sm:$0xff]  }
 0x401   :  { %v7935_v9 = vld [vmem:[%s10705_s4 + $0x298] sm:$0xff]   ;;  %v7945_v59 = vld [vmem:[%s10705_s4 + $0x370] sm:$0xff]  }
 0x402   :  { %2887 = vrot.lane.b32.xlu1 %v2876_v47, %s8150_s30 }
 0x404   :  { %3025 = vrot.lane.b32.xlu0 %v3017_v15, %s8150_s30 }
 0x406   :  { %2977 = vrot.lane.b32.xlu1 %v2969_v31, %s8150_s30 }
 0x408   :  { %3073 = vrot.lane.b32.xlu0 %v3065_v57, %s8150_s30 }
 0x40a   :  { %3027 = vrot.lane.b32.xlu1 %v3018_v32, %s8150_s30 }
 0x40c   :  { %2979 = vrot.lane.b32.xlu0 %v2970_v54, %s8150_s30  ;;  %v7947_v54 = vld [vmem:[%s10705_s4 + $0x378] sm:$0xff]  }
 0x40e   :  { %3075 = vrot.lane.b32.xlu1 %v3066_v55, %s8150_s30 }
 0x410   :  { %3029 = vrot.lane.b32.xlu0 %v3019_v26, %s8150_s30 }
 0x412   :  { %2981 = vrot.lane.b32.xlu1 %v2971_v60, %s8150_s30 }
 0x414   :  { %3077 = vrot.lane.b32.xlu0 %v3067_v13, %s8150_s30  ;;  %v7948_v13 = vld [vmem:[%s10705_s4 + $0x380] sm:$0xff]  }
 0x416   :  { %3031 = vrot.lane.b32.xlu1 %v3020_v45, %s8150_s30 }
 0x418   :  { %2983 = vrot.lane.b32.xlu0 %v2972_v29, %s8150_s30 }
 0x41a   :  { %3079 = vrot.lane.b32.xlu1 %v3068_v62, %s8150_s30 }
 0x44a   :  { %v2834_v20 = vpop.permute.xlu0 %2833 }
 0x44b   :  { %v2786_v6 = vpop.permute.xlu1 %2785  ;;  %2845 = vst.msk [vmem:[#allocation4 + $0x8] sm:$0xff] %vm1614_vm14, %v2834_v20  ;;  %v7949_v20 = vld [vmem:[%s10705_s4 + $0x388] sm:$0xff]  }
 0x44c   :  { %2797 = vst.msk [vmem:[#allocation4] sm:$0xff] %vm1614_vm14, %v2786_v6 }
 0x452   :  { %v2836_v1 = vpop.permute.xlu0 %2835  ;;  %v3106_v27 = vld [vmem:[#allocation4 + $0x8] sm:$0xff] }
 0x453   :  { %v2788_v56 = vpop.permute.xlu1 %2787  ;;  %v3105_v48 = vld [vmem:[#allocation4] sm:$0xff]  ;;  %2846 = vst.msk [vmem:[#allocation4 + $0x48] sm:$0xff] %vm1614_vm14, %v2836_v1  ;;  %3662 = vmatprep.mubr.bf16.mxu0 %v3106_v27 }
 0x454   :  { %2798 = vst.msk [vmem:[#allocation4 + $0x40] sm:$0xff] %vm1614_vm14, %v2788_v56  ;;  %3663 = vmatmul.mubr.bf16.vlgmr.msra.gmra.mrb[32].mxu0 %v3105_v48  ;;  %v7950_v56 = vld [vmem:[%s10705_s4 + $0x390] sm:$0xff]  }
 0x455   :  { %7391 = vmatpush3.bf16.msra.mxu0 %v7913_v21 }
 0x456   :  { %7392 = vmatprep.subr.bf16.mxu0 %v7914_v7 }
 0x459   :  { %7393 = vmatpush3.bf16.msra.mxu0 %v7915_v17 }
 0x45a   :  { %v2838_v23 = vpop.permute.xlu0 %2837  ;;  %v3114_v52 = vld [vmem:[#allocation4 + $0x48] sm:$0xff]  ;;  %7394 = vmatprep.subr.bf16.mxu0 %v7916_v10  ;;  %v3112_v10 = vld [vmem:[#allocation4 + $0x38] sm:$0xff] }
 0x45b   :  { %v2790_v39 = vpop.permute.xlu1 %2789  ;;  %v3113_v53 = vld [vmem:[#allocation4 + $0x40] sm:$0xff]  ;;  %2847 = vst.msk [vmem:[#allocation4 + $0x88] sm:$0xff] %vm1614_vm14, %v2838_v23  ;;  %3670 = vmatprep.mubr.bf16.mxu0 %v3114_v52 }
 0x45c   :  { %2799 = vst.msk [vmem:[#allocation4 + $0x80] sm:$0xff] %vm1614_vm14, %v2790_v39  ;;  %3671 = vmatmul.mubr.bf16.gmra.mrb[36].mxu0 %v3113_v53  ;;  %v7952_v52 = vld [vmem:[%s10705_s4 + $0x3a0] sm:$0xff]   ;;  %v7953_v53 = vld [vmem:[%s10705_s4 + $0x3a8] sm:$0xff]  }
 0x45d   :  { %7395 = vmatpush3.bf16.msra.mxu0 %v7917_v61  ;;  %v7951_v61 = vld [vmem:[%s10705_s4 + $0x398] sm:$0xff]  }
 0x45e   :  { %7396 = vmatprep.subr.bf16.mxu0 %v7918_v12 }
 0x461   :  { %7397 = vmatpush3.bf16.msra.mxu0 %v7919_v33  ;;  %v7954_v33 = vld [vmem:[%s10705_s4 + $0x3b0] sm:$0xff]  }
 0x462   :  { %v2840_v46 = vpop.permute.xlu0 %2839  ;;  %v3122_v8 = vld [vmem:[#allocation4 + $0x88] sm:$0xff]  ;;  %7398 = vmatprep.subr.bf16.mxu0 %v7922_v14  ;;  %v7955_v14 = vld [vmem:[%s10705_s4 + $0x3b8] sm:$0xff]  }
 0x463   :  { %v3121_v19 = vld [vmem:[#allocation4 + $0x80] sm:$0xff]  ;;  %2848 = vst.msk [vmem:[#allocation4 + $0xc8] sm:$0xff] %vm1614_vm14, %v2840_v46  ;;  %3678 = vmatprep.mubr.bf16.mxu0 %v3122_v8  ;;  %v3120_v46 = vld [vmem:[#allocation4 + $0x78] sm:$0xff] }
 0x464   :  { %v2792_v16 = vpop.permute.xlu1 %2791  ;;  %3679 = vmatmul.mubr.bf16.gmra.mrb[40].mxu0 %v3121_v19  ;;  %v3128_v8 = vld [vmem:[#allocation4 + $0xb8] sm:$0xff] }
 0x465   :  { %2800 = vst.msk [vmem:[#allocation4 + $0xc0] sm:$0xff] %vm1614_vm14, %v2792_v16  ;;  %7399 = vmatpush3.bf16.msra.mxu0 %v7923_v0 }
 0x466   :  { %v2930_v18 = vpop.permute.xlu0 %2929  ;;  %7400 = vmatprep.subr.bf16.mxu0 %v7926_v3  ;;  %v3136_v3 = vld [vmem:[#allocation4 + $0xf8] sm:$0xff] }
 0x467   :  { %2941 = vst.msk [vmem:[#allocation4 + $0x18] sm:$0xff] %vm1614_vm14, %v2930_v18 }
 0x468   :  { %v2882_v28 = vpop.permute.xlu1 %2881 }
 0x469   :  { %2893 = vst.msk [vmem:[#allocation4 + $0x10] sm:$0xff] %vm1614_vm14, %v2882_v28  ;;  %7401 = vmatpush3.bf16.msra.mxu0 %v7927_v41 }
 0x46a   :  { %v2932_v50 = vpop.permute.xlu0 %2931  ;;  %v3130_v38 = vld [vmem:[#allocation4 + $0xc8] sm:$0xff]  ;;  %7402 = vmatprep.subr.bf16.mxu0 %v7930_v63 }
 0x46b   :  { %2942 = vst.msk [vmem:[#allocation4 + $0x58] sm:$0xff] %vm1614_vm14, %v2932_v50  ;;  %3686 = vmatprep.mubr.bf16.mxu0 %v3130_v38 }
 0x46c   :  { %v2884_v30 = vpop.permute.xlu1 %2883  ;;  %v3129_v36 = vld [vmem:[#allocation4 + $0xc0] sm:$0xff] }
 0x46d   :  { %2894 = vst.msk [vmem:[#allocation4 + $0x50] sm:$0xff] %vm1614_vm14, %v2884_v30  ;;  %3687 = vmatmul.mubr.bf16.gmra.mrb[44].mxu0 %v3129_v36 }
 0x46e   :  { %7403 = vmatpush3.bf16.msra.mxu0 %v7931_v40  ;;  %v2934_v34 = vpop.permute.xlu0 %2933  ;;  %v3108_v58 = vld [vmem:[#allocation4 + $0x18] sm:$0xff] }
 0x46f   :  { %7404 = vmatprep.subr.bf16.mxu0 %v7934_v25  ;;  %2943 = vst.msk [vmem:[#allocation4 + $0x98] sm:$0xff] %vm1614_vm14, %v2934_v34  ;;  %3727 = vmatprep.mubr.bf16.mxu0 %v3108_v58 }
 0x470   :  { %v2886_v37 = vpop.permute.xlu1 %2885  ;;  %v3107_v47 = vld [vmem:[#allocation4 + $0x10] sm:$0xff] }
 0x471   :  { %2895 = vst.msk [vmem:[#allocation4 + $0x90] sm:$0xff] %vm1614_vm14, %v2886_v37 }
 0x472   :  { %7405 = vmatpush3.bf16.msra.mxu0 %v7935_v9  ;;  %v2936_v44 = vpop.permute.xlu0 %2935  ;;  %v3116_v43 = vld [vmem:[#allocation4 + $0x58] sm:$0xff] }
 0x473   :  { %3825 = vmatprep.subr.bf16.mxu0 %v8901_v24  ;;  %2944 = vst.msk [vmem:[#allocation4 + $0xd8] sm:$0xff] %vm1614_vm14, %v2936_v44 }
 0x474   :  { %v2888_v11 = vpop.permute.xlu1 %2887  ;;  %v3115_v22 = vld [vmem:[#allocation4 + $0x50] sm:$0xff] }
 0x475   :  { %2896 = vst.msk [vmem:[#allocation4 + $0xd0] sm:$0xff] %vm1614_vm14, %v2888_v11  ;;  %3728 = vmatmul.mubr.bf16.vlgmr.msra.gmra.mrb[48].mxu0 %v3107_v47 }
 0x476   :  { %3826 = vmatpush1.bf16.msra.mxu0 %v7939_v42  ;;  %3735 = vmatprep.mubr.bf16.mxu0 %v3116_v43  ;;  %v3026_v15 = vpop.permute.xlu0 %3025  ;;  %v3124_v51 = vld [vmem:[#allocation4 + $0x98] sm:$0xff] }
 0x477   :  { %3827 = vmatprep.subr.bf16.mxu0 %v8901_v24  ;;  %3037 = vst.msk [vmem:[#allocation4 + $0x28] sm:$0xff] %vm1614_vm14, %v3026_v15 }
 0x478   :  { %v2978_v31 = vpop.permute.xlu1 %2977  ;;  %v3123_v29 = vld [vmem:[#allocation4 + $0x90] sm:$0xff] }
 0x479   :  { %2989 = vst.msk [vmem:[#allocation4 + $0x20] sm:$0xff] %vm1614_vm14, %v2978_v31 }
 0x47a   :  { %3828 = vmatpush1.bf16.msra.mxu0 %v7942_v5  ;;  %v3074_v57 = vpop.permute.xlu0 %3073  ;;  %v3132_v62 = vld [vmem:[#allocation4 + $0xd8] sm:$0xff] }
 0x47b   :  { %3829 = vmatprep.subr.bf16.mxu0 %v8901_v24  ;;  %3085 = vst.msk [vmem:[#allocation4 + $0x30] sm:$0xff] %vm1614_vm14, %v3074_v57 }
 0x47c   :  { %v3028_v32 = vpop.permute.xlu1 %3027  ;;  %v3131_v17 = vld [vmem:[#allocation4 + $0xd0] sm:$0xff] }
 0x47d   :  { %3038 = vst.msk [vmem:[#allocation4 + $0x68] sm:$0xff] %vm1614_vm14, %v3028_v32  ;;  %3736 = vmatmul.mubr.bf16.gmra.mrb[52].mxu0 %v3115_v22 }
 0x47e   :  { %3830 = vmatpush1.bf16.msra.mxu0 %v7945_v59  ;;  %3743 = vmatprep.mubr.bf16.mxu0 %v3124_v51  ;;  %v2980_v55 = vpop.permute.xlu0 %2979  ;;  %v3110_v60 = vld [vmem:[#allocation4 + $0x28] sm:$0xff] }
 0x47f   :  { %3831 = vmatprep.subr.bf16.mxu0 %v8901_v24  ;;  %2990 = vst.msk [vmem:[#allocation4 + $0x60] sm:$0xff] %vm1614_vm14, %v2980_v55  ;;  %3792 = vmatprep.mubr.bf16.mxu1 %v3110_v60 }
 0x480   :  { %v3076_v26 = vpop.permute.xlu1 %3075  ;;  %v3109_v35 = vld [vmem:[#allocation4 + $0x20] sm:$0xff] }
 0x481   :  { %3086 = vst.msk [vmem:[#allocation4 + $0x70] sm:$0xff] %vm1614_vm14, %v3076_v26  ;;  %3793 = vmatmul.mubr.bf16.vlgmr.msra.gmra.mrb[64].mxu1 %v3109_v35 }
 0x482   :  { %3832 = vmatpush1.bf16.msra.mxu0 %v7947_v54  ;;  %v3030_v45 = vpop.permute.xlu0 %3029  ;;  %v3111_v0 = vld [vmem:[#allocation4 + $0x30] sm:$0xff] }
 0x483   :  { %3833 = vmatprep.subr.bf16.mxu0 %v8901_v24  ;;  %3039 = vst.msk [vmem:[#allocation4 + $0xa8] sm:$0xff] %vm1614_vm14, %v3030_v45  ;;  %v7957_v45 = vld [vmem:[%s10705_s4 + $0x3c0] sm:$0xff]  }
 0x484   :  { %v2982_v4 = vpop.permute.xlu1 %2981  ;;  %v3118_v49 = vld [vmem:[#allocation4 + $0x68] sm:$0xff] }
 0x485   :  { %2991 = vst.msk [vmem:[#allocation4 + $0xa0] sm:$0xff] %vm1614_vm14, %v2982_v4  ;;  %3800 = vmatprep.mubr.bf16.mxu1 %v3118_v49  ;;  %3744 = vmatmul.mubr.bf16.gmra.mrb[56].mxu0 %v3123_v29  ;;  %v7958_v4 = vld [vmem:[%s10705_s4 + $0x408] sm:$0xff]  }
 0x486   :  { %3834 = vmatpush1.bf16.msra.mxu0 %v7948_v13  ;;  %3751 = vmatprep.mubr.bf16.mxu0 %v3132_v62  ;;  %v3078_v6 = vpop.permute.xlu0 %3077  ;;  %v3117_v1 = vld [vmem:[#allocation4 + $0x60] sm:$0xff]  ;;  %v7959_v62 = vld [vmem:[%s10705_s4 + $0x3c8] sm:$0xff]  }
 0x487   :  { %3835 = vmatprep.subr.bf16.mxu0 %v8901_v24  ;;  %3087 = vst.msk [vmem:[#allocation4 + $0xb0] sm:$0xff] %vm1614_vm14, %v3078_v6  ;;  %v7956_v13 = vld [vmem:[%s10705_s4 + $0x400] sm:$0xff]   ;;  %v7960_v6 = vld [vmem:[%s10705_s4 + $0x410] sm:$0xff]  }
 0x488   :  { %v3032_v21 = vpop.permute.xlu1 %3031  ;;  %v3119_v16 = vld [vmem:[#allocation4 + $0x70] sm:$0xff]  ;;  %7470 = vmatprep.subr.bf16.mxu1 %v7956_v13 }
 0x489   :  { %3040 = vst.msk [vmem:[#allocation4 + $0xe8] sm:$0xff] %vm1614_vm14, %v3032_v21  ;;  %3801 = vmatmul.mubr.bf16.gmra.mrb[68].mxu1 %v3117_v1 }
 0x48a   :  { %3836 = vmatpush1.bf16.msra.mxu0 %v7949_v20  ;;  %v2984_v27 = vpop.permute.xlu0 %2983  ;;  %v3126_v7 = vld [vmem:[#allocation4 + $0xa8] sm:$0xff]  ;;  %7471 = vmatpush3.bf16.msra.mxu1 %v7957_v45 }
 0x48b   :  { %3837 = vmatprep.subr.bf16.mxu0 %v8901_v24  ;;  %2992 = vst.msk [vmem:[#allocation4 + $0xe0] sm:$0xff] %vm1614_vm14, %v2984_v27  ;;  %3808 = vmatprep.mubr.bf16.mxu1 %v3126_v7 }
 0x48c   :  { %v3080_v48 = vpop.permute.xlu1 %3079  ;;  %v3125_v23 = vld [vmem:[#allocation4 + $0xa0] sm:$0xff]  ;;  %7472 = vmatprep.subr.bf16.mxu1 %v7958_v4 }
 0x48d   :  { %3088 = vst.msk [vmem:[#allocation4 + $0xf0] sm:$0xff] %vm1614_vm14, %v3080_v48  ;;  %3752 = vmatmul.mubr.bf16.gmra.mrb[60].mxu0 %v3131_v17  ;;  %v7961_v17 = vld [vmem:[%s10705_s4 + $0x3d0] sm:$0xff]  }
 0x48e   :  { %3838 = vmatpush1.bf16.msra.mxu0 %v7950_v56  ;;  %6802 = vmatprep.mubr.msk.bf16.mxu0 %vm58_vm6, %v3112_v10  ;;  %v3127_v19 = vld [vmem:[#allocation4 + $0xb0] sm:$0xff] }
 0x48f   :  { %3839 = vmatprep.subr.bf16.mxu0 %v8901_v24  ;;  %7473 = vmatpush3.bf16.msra.mxu1 %v7959_v62 }
 0x490   :  { %v3134_v39 = vld [vmem:[#allocation4 + $0xe8] sm:$0xff]  ;;  %7474 = vmatprep.subr.bf16.mxu1 %v7960_v6 }
 0x491   :  { %3809 = vmatmul.mubr.bf16.gmra.mrb[72].mxu1 %v3125_v23 }
 0x492   :  { %3840 = vmatpush1.bf16.msra.mxu0 %v7951_v61  ;;  %3816 = vmatprep.mubr.bf16.mxu1 %v3134_v39  ;;  %v3133_v12 = vld [vmem:[#allocation4 + $0xe0] sm:$0xff]  ;;  %v7962_v61 = vld [vmem:[%s10705_s4 + $0x418] sm:$0xff]  }
 0x493   :  { %3841 = vmatprep.subr.bf16.mxu0 %v8901_v24  ;;  %7475 = vmatpush3.bf16.msra.mxu1 %v7961_v17 }
 0x494   :  { %v3135_v41 = vld [vmem:[#allocation4 + $0xf0] sm:$0xff]  ;;  %7476 = vmatprep.subr.bf16.mxu1 %v7962_v61 }
 0x496   :  { %3842 = vmatpush1.bf16.msra.mxu0 %v7952_v52 }
 0x497   :  { %3843 = vmatprep.subr.bf16.mxu0 %v8901_v24 }
 0x499   :  { %3817 = vmatmul.mubr.bf16.gmra.mrb[76].mxu1 %v3133_v12 }
 0x49a   :  { %3844 = vmatpush1.bf16.msra.mxu0 %v7953_v53 }
 0x49b   :  { %3845 = vmatprep.subr.bf16.mxu0 %v8901_v24 }
 0x49e   :  { %3846 = vmatpush1.bf16.msra.mxu0 %v7954_v33 }
 0x49f   :  { %3847 = vmatprep.subr.bf16.mxu0 %v8901_v24 }
 0x4a2   :  { %3848 = vmatpush1.bf16.msra.mxu0 %v7955_v14 }
 0x4a5   :  { %3858 = vmatmul.mubr.bf16.vlgmr.msra.gmra.mrb[64].mxu0 %v3111_v0  ;;  %v7963_v0 = vld [vmem:[%s10705_s4 + $0x3d8] sm:$0xff]  }
 0x4a6   :  { %6803 = vmatprep.mubr.msk.bf16.mxu0 %vm58_vm6, %v3120_v46  ;;  %7477 = vmatpush3.bf16.msra.mxu1 %v7963_v0 }
 0x4ad   :  { %3866 = vmatmul.mubr.bf16.gmra.mrb[68].mxu0 %v3119_v16  ;;  %v7964_v16 = vld [vmem:[%s10705_s4 + $0x420] sm:$0xff]  }
 0x4ae   :  { %6804 = vmatprep.mubr.msk.bf16.mxu0 %vm58_vm6, %v3128_v8  ;;  %7478 = vmatprep.subr.bf16.mxu1 %v7964_v16 }
 0x4b5   :  { %3874 = vmatmul.mubr.bf16.gmra.mrb[72].mxu0 %v3127_v19 }
 0x4b6   :  { %6805 = vmatprep.mubr.msk.bf16.mxu0 %vm58_vm6, %v3136_v3 }
 0x4bd   :  { %3882 = vmatmul.mubr.bf16.gmra.mrb[76].mxu0 %v3135_v41 }
 0x527   :  { %v7366_v18 = vpop.f32.mrb[32].mxu0 }
 0x528   :  { %v7367_v28 = vpop.f32.mrb[33].mxu0 }
 0x529   :  { %v7368_v63 = vadd.f32 %v7367_v28, %v7366_v18  ;;  %v7369_v40 = vpop.f32.mrb[34].mxu0 }
 0x52a   :  { %v7370_v50 = vpop.f32.mrb[35].mxu0 }
 0x52b   :  { %v7371_v30 = vadd.f32 %v7370_v50, %v7369_v40  ;;  %v7965_v40 = vld [vmem:[%s10705_s4 + $0x3e0] sm:$0xff]  }
 0x52c   :  { %7479 = vmatpush3.bf16.msra.mxu1 %v7965_v40 }
 0x52f   :  { %v7372_v38 = vpop.f32.mrb[36].mxu0 }
 0x530   :  { %v7373_v36 = vpop.f32.mrb[37].mxu0 }
 0x531   :  { %v7374_v25 = vadd.f32 %v7373_v36, %v7372_v38  ;;  %v7375_v9 = vpop.f32.mrb[38].mxu0 }
 0x532   :  { %v7376_v34 = vpop.f32.mrb[39].mxu0 }
 0x533   :  { %v7377_v37 = vadd.f32 %v7376_v34, %v7375_v9 }
 0x537   :  { %v7378_v58 = vpop.f32.mrb[40].mxu0 }
 0x538   :  { %v7379_v42 = vpop.f32.mrb[41].mxu0 }
 0x539   :  { %v7380_v44 = vadd.f32 %v7379_v42, %v7378_v58  ;;  %v7381_v11 = vpop.f32.mrb[42].mxu0  ;;  %v7967_v42 = vld [vmem:[%s10705_s4 + $0x3e8] sm:$0xff]  }
 0x53a   :  { %v7382_v47 = vpop.f32.mrb[43].mxu0 }
 0x53b   :  { %v7383_v43 = vadd.f32 %v7382_v47, %v7381_v11 }
 0x540   :  { %v7384_v5 = vpop.f32.mrb[44].mxu0 }
 0x541   :  { %v7385_v15 = vpop.f32.mrb[45].mxu0 }
 0x542   :  { %v9778_v31 = vadd.f32 %v7385_v15, %v7384_v5  ;;  %v7387_v59 = vpop.f32.mrb[46].mxu0 }
 0x543   :  { %v7388_v57 = vpop.f32.mrb[47].mxu0 }
 0x544   :  { %v9780_v32 = vadd.f32 %v7388_v57, %v7387_v59 }
 0x548   :  { %v7406_v22 = vpop.f32.mrb[48].mxu0 }
 0x549   :  { %v7407_v51 = vpop.f32.mrb[49].mxu0 }
 0x54a   :  { %v7408_v54 = vadd.f32 %v7407_v51, %v7406_v22  ;;  %v7409_v55 = vpop.f32.mrb[50].mxu0 }
 0x54b   :  { %v7410_v26 = vpop.f32.mrb[51].mxu0 }
 0x54c   :  { %v3730_v60 = vadd.f32 %v7408_v54, %v7368_v63  ;;  %v7411_v35 = vadd.f32 %v7410_v26, %v7409_v55 }
 0x54e   :  { %v3733_v49 = vadd.f32 %v7411_v35, %v7371_v30  ;;  %v7966_v30 = vld [vmem:[%s10705_s4 + $0x428] sm:$0xff]  }
 0x54f   :  { %7480 = vmatprep.subr.bf16.mxu1 %v7966_v30 }
 0x550   :  { %v7412_v29 = vpop.f32.mrb[52].mxu0  ;;  %7481 = vmatpush3.bf16.msra.mxu1 %v7967_v42 }
 0x551   :  { %v7413_v20 = vpop.f32.mrb[53].mxu0 }
 0x552   :  { %v7414_v21 = vadd.f32 %v7413_v20, %v7412_v29  ;;  %v7415_v1 = vpop.f32.mrb[54].mxu0 }
 0x553   :  { %v7416_v56 = vpop.f32.mrb[55].mxu0 }
 0x554   :  { %v3738_v27 = vadd.f32 %v7414_v21, %v7374_v25  ;;  %v7417_v48 = vadd.f32 %v7416_v56, %v7415_v1  ;;  %v7446_v7 = vpop.f32.mrb[64].mxu1 }
 0x555   :  { %v7447_v10 = vpop.f32.mrb[65].mxu1 }
 0x556   :  { %v3741_v23 = vadd.f32 %v7417_v48, %v7377_v37  ;;  %v7448_v39 = vadd.f32 %v7447_v10, %v7446_v7  ;;  %v7449_v52 = vpop.f32.mrb[66].mxu1 }
 0x557   :  { %v7450_v53 = vpop.f32.mrb[67].mxu1 }
 0x558   :  { %v7451_v12 = vadd.f32 %v7450_v53, %v7449_v52  ;;  %v7418_v33 = vpop.f32.mrb[56].mxu0  ;;  %v3795_v14 = vadd.f32 %v7448_v39, %v3730_v60 }
 0x559   :  { %v7419_v46 = vpop.f32.mrb[57].mxu0 }
 0x55a   :  { %v7420_v8 = vadd.f32 %v7419_v46, %v7418_v33  ;;  %v7421_v19 = vpop.f32.mrb[58].mxu0  ;;  %v3798_v3 = vadd.f32 %v7451_v12, %v3733_v49  ;;  %v7968_v12 = vld [vmem:[%s10705_s4 + $0x430] sm:$0xff]  }
 0x55b   :  { %v7422_v41 = vpop.f32.mrb[59].mxu0  ;;  %v7969_v33 = vld [vmem:[%s10705_s4 + $0x3f0] sm:$0xff]   ;;  %7482 = vmatprep.subr.bf16.mxu1 %v7968_v12 }
 0x55c   :  { %v3746_v18 = vadd.f32 %v7420_v8, %v7380_v44  ;;  %v7423_v28 = vadd.f32 %v7422_v41, %v7421_v19  ;;  %v7452_v63 = vpop.f32.mrb[68].mxu1  ;;  %7483 = vmatpush3.bf16.msra.mxu1 %v7969_v33 }
 0x55d   :  { %v7453_v50 = vpop.f32.mrb[69].mxu1 }
 0x55e   :  { %v3749_v38 = vadd.f32 %v7423_v28, %v7383_v43  ;;  %v7454_v36 = vadd.f32 %v7453_v50, %v7452_v63  ;;  %v7455_v25 = vpop.f32.mrb[70].mxu1 }
 0x55f   :  { %v7456_v9 = vpop.f32.mrb[71].mxu1 }
 0x560   :  { %v7457_v34 = vadd.f32 %v7456_v9, %v7455_v25  ;;  %v7424_v37 = vpop.f32.mrb[60].mxu0  ;;  %v3803_v58 = vadd.f32 %v7454_v36, %v3738_v27  ;;  %v9832_v27 = vld [vmem:[%s10707_s6 + $0x1] ss:$0 sm:$0xff] }
 0x561   :  { %v7425_v44 = vpop.f32.mrb[61].mxu0 }
 0x562   :  { %v7426_v11 = vadd.f32 %v7425_v44, %v7424_v37  ;;  %v7427_v47 = vpop.f32.mrb[62].mxu0  ;;  %v3806_v5 = vadd.f32 %v7457_v34, %v3741_v23 }
 0x563   :  { %v7428_v15 = vpop.f32.mrb[63].mxu0 }
 0x564   :  { %v3754_v59 = vadd.f32 %v7426_v11, %v9778_v31  ;;  %v7429_v43 = vadd.f32 %v7428_v15, %v7427_v47  ;;  %v7458_v57 = vpop.f32.mrb[72].mxu1 }
 0x565   :  { %v7459_v22 = vpop.f32.mrb[73].mxu1 }
 0x566   :  { %v3757_v51 = vadd.f32 %v7429_v43, %v9780_v32  ;;  %v7460_v54 = vadd.f32 %v7459_v22, %v7458_v57  ;;  %v7461_v55 = vpop.f32.mrb[74].mxu1  ;;  %v9827_v32 = vld [vmem:[%s10706_s5 + $0x1] ss:$0 sm:$0xff] }
 0x567   :  { %v7462_v26 = vpop.f32.mrb[75].mxu1 }
 0x568   :  { %v7463_v60 = vadd.f32 %v7462_v26, %v7461_v55  ;;  %v3811_v35 = vadd.f32 %v7460_v54, %v3746_v18  ;;  %v7971_v18 = vld [vmem:[%s10705_s4 + $0x3f8] sm:$0xff]   ;;  %v7972_v55 = vld [vmem:[%s10705_s4 + $0x480] sm:$0xff]  }
 0x56a   :  { %v3814_v13 = vadd.f32 %v7463_v60, %v3749_v38 }
 0x56c   :  { %v7464_v45 = vpop.f32.mrb[76].mxu1 }
 0x56d   :  { %v7465_v4 = vpop.f32.mrb[77].mxu1 }
 0x56e   :  { %v7466_v49 = vadd.f32 %v7465_v4, %v7464_v45  ;;  %v7467_v29 = vpop.f32.mrb[78].mxu1 }
 0x56f   :  { %v7468_v62 = vpop.f32.mrb[79].mxu1 }
 0x570   :  { %v7469_v20 = vadd.f32 %v7468_v62, %v7467_v29  ;;  %v9820_v6 = vadd.f32 %v7466_v49, %v3754_v59 }
 0x572   :  { %v9822_v31 = vadd.f32 %v7469_v20, %v3757_v51 }
 0x578   :  { %v3859_v21 = vpop.f32.mrb[64].mxu0 }
 0x579   :  { %v3860_v1 = vadd.f32 %v3859_v21, %v3795_v14  ;;  %v3861_v56 = vpop.f32.mrb[65].mxu0  ;;  %v7970_v14 = vld [vmem:[%s10705_s4 + $0x438] sm:$0xff]  }
 0x57a   :  { %v3862_v48 = vpop.f32.mrb[66].mxu0  ;;  %7484 = vmatprep.subr.bf16.mxu1 %v7970_v14 }
 0x57b   :  { %v3898_v7 = vmul.f32 %v9827_v32, %v3860_v1  ;;  %v3863_v17 = vadd.f32 %v3862_v48, %v3798_v3  ;;  %v3864_v10 = vpop.f32.mrb[67].mxu0  ;;  %7485 = vmatpush3.bf16.msra.mxu1 %v7971_v18 }
 0x57c   :  { %7510 = vmatprep.subr.bf16.mxu1 %v7972_v55 }
 0x57d   :  { %v3914_v61 = vadd.f32 %v9832_v27, %v3898_v7  ;;  %v3899_v23 = vmul.f32 %v9827_v32, %v3863_v17 }
 0x57f   :  { %v3922_v39 = vmax.f32 %v3914_v61, 0.0  ;;  %v3915_v52 = vadd.f32 %v9832_v27, %v3899_v23 }
 0x580   :  { %v3867_v53 = vpop.f32.mrb[68].mxu0 }
 0x581   :  { %3930 = vst.msk [vmem:[#allocation3 + $0x7] sm:$0xff] %vm58_vm6, %v3922_v39  ;;  %v3923_v0 = vmax.f32 %v3915_v52, 0.0  ;;  %v3868_v46 = vadd.f32 %v3867_v53, %v3803_v58  ;;  %v3869_v16 = vpop.f32.mrb[69].mxu0 }
 0x582   :  { %v3870_v8 = vpop.f32.mrb[70].mxu0 }
 0x583   :  { %3931 = vst.msk [vmem:[#allocation3 + $0xf] sm:$0xff] %vm58_vm6, %v3923_v0  ;;  %v3900_v19 = vmul.f32 %v9827_v32, %v3868_v46  ;;  %v3871_v3 = vadd.f32 %v3870_v8, %v3806_v5  ;;  %v3872_v41 = vpop.f32.mrb[71].mxu0 }
 0x585   :  { %v3916_v28 = vadd.f32 %v9832_v27, %v3900_v19  ;;  %v3901_v63 = vmul.f32 %v9827_v32, %v3871_v3 }
 0x587   :  { %v3924_v40 = vmax.f32 %v3916_v28, 0.0  ;;  %v3917_v50 = vadd.f32 %v9832_v27, %v3901_v63  ;;  %v7980_v28 = vld [vmem:[%s10705_s4 + $0x500] sm:$0xff]  }
 0x588   :  { %v3875_v30 = vpop.f32.mrb[72].mxu0  ;;  %v4002_v9 = vld [vmem:[#allocation3 + $0x3] sm:$0xff]  ;;  %7550 = vmatprep.subr.bf16.mxu0 %v7980_v28 }
 0x589   :  { %3932 = vst.msk [vmem:[#allocation3 + $0x17] sm:$0xff] %vm58_vm6, %v3924_v40  ;;  %v3925_v38 = vmax.f32 %v3917_v50, 0.0  ;;  %v3876_v36 = vadd.f32 %v3875_v30, %v3811_v35  ;;  %v3877_v25 = vpop.f32.mrb[73].mxu0  ;;  %v3954_v34 = vld [vmem:[#allocation3 + $0x1] sm:$0xff] }
 0x58a   :  { %v3878_v37 = vpop.f32.mrb[74].mxu0  ;;  %v9857_v58 = vld [vmem:[#allocation3 + $0xb] sm:$0xff]  ;;  %v3986_v44 = vld [vmem:[#allocation3 + $0x2] sm:$0xff] }
 0x58b   :  { %v9859_v42 = vld [vmem:[#allocation3 + $0x9] sm:$0xff]  ;;  %3933 = vst.msk [vmem:[#allocation3 + $0x1f] sm:$0xff] %vm58_vm6, %v3925_v38  ;;  %v3902_v11 = vmul.f32 %v9827_v32, %v3876_v36  ;;  %v3879_v47 = vadd.f32 %v3878_v37, %v3814_v13  ;;  %v3880_v5 = vpop.f32.mrb[75].mxu0  ;;  %v4010_v15 = vpack.c.bf16 %v9857_v58, %v4002_v9  ;;  %v3938_v57 = vld [vmem:[#allocation3] sm:$0xff] }
 0x58c   :  { %v3962_v59 = vpack.c.bf16 %v9859_v42, %v3954_v34  ;;  %v3987_v43 = vld [vmem:[#allocation3 + $0xa] sm:$0xff] }
 0x58d   :  { %v3939_v22 = vld [vmem:[#allocation3 + $0x8] sm:$0xff]  ;;  %v3994_v51 = vpack.c.bf16 %v3987_v43, %v3986_v44  ;;  %v3918_v26 = vadd.f32 %v9832_v27, %v3902_v11  ;;  %v3903_v60 = vmul.f32 %v9827_v32, %v3879_v47  ;;  %4018 = vrot.lane.b32.xlu0 %v4010_v15, %s8150_s30 }
 0x58e   :  { %v3946_v54 = vpack.c.bf16 %v3939_v22, %v3938_v57  ;;  %3970 = vrot.lane.b32.xlu1 %v3962_v59, %s8150_s30  ;;  %v4082_v35 = vld [vmem:[#allocation3 + $0x6] sm:$0xff]  ;;  %v4083_v13 = vld [vmem:[#allocation3 + $0xe] sm:$0xff] }
 0x58f   :  { %3998 = vst.msk [vmem:[#allocation4 + $0x8] sm:$0xff] %vm58_vm6, %v3994_v51  ;;  %v4090_v45 = vpack.c.bf16 %v4083_v13, %v4082_v35  ;;  %v4034_v4 = vld [vmem:[#allocation3 + $0x4] sm:$0xff]  ;;  %v4035_v49 = vld [vmem:[#allocation3 + $0xc] sm:$0xff]  ;;  %v3926_v29 = vmax.f32 %v3918_v26, 0.0  ;;  %v3919_v62 = vadd.f32 %v9832_v27, %v3903_v60 }
 0x590   :  { %3950 = vst.msk [vmem:[#allocation4] sm:$0xff] %vm58_vm6, %v3946_v54  ;;  %v4042_v20 = vpack.c.bf16 %v4035_v49, %v4034_v4  ;;  %v3883_v21 = vpop.f32.mrb[76].mxu0  ;;  %v9878_v7 = vld [vmem:[#allocation3 + $0x13] sm:$0xff]  ;;  %v7984_v51 = vld [vmem:[%s10705_s4 + $0x508] sm:$0xff]  }
 0x591   :  { %4094 = vst.msk [vmem:[#allocation4 + $0x18] sm:$0xff] %vm58_vm6, %v4090_v45  ;;  %3934 = vst.msk [vmem:[#allocation3 + $0x37] sm:$0xff] %vm58_vm6, %v3926_v29  ;;  %v3927_v1 = vmax.f32 %v3919_v62, 0.0  ;;  %v3884_v56 = vadd.f32 %v3883_v21, %v9820_v6  ;;  %v3885_v48 = vpop.f32.mrb[77].mxu0  ;;  %v3988_v17 = vld [vmem:[#allocation3 + $0x12] sm:$0xff]  ;;  %v7985_v54 = vld [vmem:[%s10705_s4 + $0x4c8] sm:$0xff]  }
 0x592   :  { %v3940_v10 = vld [vmem:[#allocation3 + $0x10] sm:$0xff]  ;;  %4046 = vst.msk [vmem:[#allocation4 + $0x10] sm:$0xff] %vm58_vm6, %v4042_v20  ;;  %v3886_v61 = vpop.f32.mrb[78].mxu0  ;;  %v9881_v23 = vld [vmem:[#allocation3 + $0x1b] sm:$0xff]  ;;  %v4186_v53 = vpack.c.bf16 %v3988_v17, %v3987_v43 }
 0x593   :  { %v9883_v39 = vld [vmem:[#allocation3 + $0x11] sm:$0xff]  ;;  %v9885_v52 = vld [vmem:[#allocation3 + $0x19] sm:$0xff]  ;;  %v4138_v12 = vpack.c.bf16 %v3940_v10, %v3939_v22  ;;  %3935 = vst.msk [vmem:[#allocation3 + $0x3f] sm:$0xff] %vm58_vm6, %v3927_v1  ;;  %v3904_v6 = vmul.f32 %v9827_v32, %v3884_v56  ;;  %v3887_v33 = vadd.f32 %v3886_v61, %v9822_v31  ;;  %v3888_v14 = vpop.f32.mrb[79].mxu0  ;;  %v4011_v0 = vpack.c.bf16 %v9881_v23, %v9878_v7 }
 0x594   :  { %v3963_v46 = vpack.c.bf16 %v9885_v52, %v9883_v39  ;;  %v9894_v16 = vld [vmem:[#allocation3 + $0x1a] sm:$0xff]  ;;  %4190 = vst.msk [vmem:[#allocation4 + $0x28] sm:$0xff] %vm58_vm6, %v4186_v53  ;;  %v7988_v26 = vld [vmem:[%s10705_s4 + $0x510] sm:$0xff]  }
 0x595   :  { %v9896_v8 = vld [vmem:[#allocation3 + $0x18] sm:$0xff]  ;;  %4142 = vst.msk [vmem:[#allocation4 + $0x20] sm:$0xff] %vm58_vm6, %v4138_v12  ;;  %v3920_v19 = vadd.f32 %v9832_v27, %v3904_v6  ;;  %v3905_v3 = vmul.f32 %v9827_v32, %v3887_v33  ;;  %4020 = vrot.lane.b32.xlu0 %v4011_v0, %s8150_s30  ;;  %v3995_v41 = vpack.c.bf16 %v9894_v16, %v3988_v17  ;;  %v7981_v32 = vld [vmem:[%s10705_s4 + $0x4c0] sm:$0xff]   ;;  %v7989_v35 = vld [vmem:[%s10705_s4 + $0x4d0] sm:$0xff]  }
 0x596   :  { %3972 = vrot.lane.b32.xlu1 %v3963_v46, %s8150_s30  ;;  %v4084_v31 = vld [vmem:[#allocation3 + $0x16] sm:$0xff]  ;;  %v3947_v18 = vpack.c.bf16 %v9896_v8, %v3940_v10  ;;  %v9913_v30 = vld [vmem:[#allocation3 + $0x1e] sm:$0xff]  ;;  %7551 = vmatpush3.bf16.msra.mxu0 %v7981_v32  ;;  %v9965_v53 = vld [vmem:[#allocation3 + $0xd] sm:$0xff] }
 0x597   :  { %v4282_v63 = vpack.c.bf16 %v4084_v31, %v4083_v13  ;;  %v3928_v40 = vmax.f32 %v3920_v19, 0.0  ;;  %v3921_v50 = vadd.f32 %v9832_v27, %v3905_v3  ;;  %v4036_v38 = vld [vmem:[#allocation3 + $0x14] sm:$0xff]  ;;  %3999 = vst.msk [vmem:[#allocation4 + $0x48] sm:$0xff] %vm58_vm6, %v3995_v41  ;;  %v4091_v36 = vpack.c.bf16 %v9913_v30, %v4084_v31  ;;  %v9937_v55 = vld [vmem:[#allocation3 + $0x1c] sm:$0xff]  ;;  %7552 = vmatprep.subr.bf16.mxu0 %v7984_v51  ;;  %v4098_v33 = vld [vmem:[#allocation3 + $0x7] sm:$0xff] }
 0x598   :  { %3951 = vst.msk [vmem:[#allocation4 + $0x40] sm:$0xff] %vm58_vm6, %v3947_v18  ;;  %v4234_v25 = vpack.c.bf16 %v4036_v38, %v4035_v49  ;;  %v4006_v9 = vld [vmem:[#allocation3 + $0x33] sm:$0xff]  ;;  %v4043_v60 = vpack.c.bf16 %v9937_v55, %v4036_v38  ;;  %v4050_v3 = vld [vmem:[#allocation3 + $0x5] sm:$0xff] }
 0x599   :  { %4286 = vst.msk [vmem:[#allocation4 + $0x38] sm:$0xff] %vm58_vm6, %v4282_v63  ;;  %3936 = vst.msk [vmem:[#allocation3 + $0x47] sm:$0xff] %vm58_vm6, %v3928_v40  ;;  %v3929_v27 = vmax.f32 %v3921_v50, 0.0  ;;  %v3958_v34 = vld [vmem:[#allocation3 + $0x31] sm:$0xff]  ;;  %v4058_v63 = vpack.c.bf16 %v9965_v53, %v4050_v3  ;;  %v4101_v40 = vld [vmem:[#allocation3 + $0x1f] sm:$0xff] }
 0x59a   :  { %v9920_v37 = vld [vmem:[#allocation3 + $0x3b] sm:$0xff]  ;;  %v3990_v11 = vld [vmem:[#allocation3 + $0x32] sm:$0xff]  ;;  %4095 = vst.msk [vmem:[#allocation4 + $0x58] sm:$0xff] %vm58_vm6, %v4091_v36  ;;  %4238 = vst.msk [vmem:[#allocation4 + $0x30] sm:$0xff] %vm58_vm6, %v4234_v25  ;;  %7553 = vmatpush3.bf16.msra.mxu0 %v7985_v54 }
 0x59b   :  { %v9922_v44 = vld [vmem:[#allocation3 + $0x39] sm:$0xff]  ;;  %3937 = vst.msk [vmem:[#allocation3 + $0x4f] sm:$0xff] %vm58_vm6, %v3929_v27  ;;  %v4012_v47 = vpack.c.bf16 %v9920_v37, %v4006_v9  ;;  %v3942_v59 = vld [vmem:[#allocation3 + $0x30] sm:$0xff]  ;;  %7554 = vmatprep.subr.bf16.mxu0 %v7988_v26  ;;  %4047 = vst.msk [vmem:[#allocation4 + $0x50] sm:$0xff] %vm58_vm6, %v4043_v60 }
 0x59c   :  { %v3964_v5 = vpack.c.bf16 %v9922_v44, %v3958_v34  ;;  %v3991_v15 = vld [vmem:[#allocation3 + $0x3a] sm:$0xff]  ;;  %v4099_v61 = vld [vmem:[#allocation3 + $0xf] sm:$0xff] }
 0x59d   :  { %v3943_v43 = vld [vmem:[#allocation3 + $0x38] sm:$0xff]  ;;  %v3996_v57 = vpack.c.bf16 %v3991_v15, %v3990_v11  ;;  %4022 = vrot.lane.b32.xlu0 %v4012_v47, %s8150_s30  ;;  %v4106_v28 = vpack.c.bf16 %v4099_v61, %v4098_v33  ;;  %v7996_v32 = vld [vmem:[%s10705_s4 + $0x520] sm:$0xff]  }
 0x59e   :  { %v3948_v22 = vpack.c.bf16 %v3943_v43, %v3942_v59  ;;  %3974 = vrot.lane.b32.xlu1 %v3964_v5, %s8150_s30  ;;  %v4086_v13 = vld [vmem:[#allocation3 + $0x36] sm:$0xff]  ;;  %v9948_v45 = vld [vmem:[#allocation3 + $0x3e] sm:$0xff]  ;;  %7555 = vmatpush3.bf16.msra.mxu0 %v7989_v35 }
 0x59f   :  { %4000 = vst.msk [vmem:[#allocation4 + $0x88] sm:$0xff] %vm58_vm6, %v3996_v57  ;;  %v4092_v4 = vpack.c.bf16 %v9948_v45, %v4086_v13  ;;  %v4038_v46 = vld [vmem:[#allocation3 + $0x34] sm:$0xff]  ;;  %v4039_v19 = vld [vmem:[#allocation3 + $0x3c] sm:$0xff]  ;;  %v4229_v35 = vld [vmem:[#allocation3 + $0x24] sm:$0xff] }
 0x5a0   :  { %3952 = vst.msk [vmem:[#allocation4 + $0x80] sm:$0xff] %vm58_vm6, %v3948_v22  ;;  %v9952_v49 = vld [vmem:[#allocation3 + $0x43] sm:$0xff]  ;;  %v7992_v31 = vld [vmem:[%s10705_s4 + $0x518] sm:$0xff]   ;;  %v4044_v18 = vpack.c.bf16 %v4039_v19, %v4038_v46  ;;  %v8001_v46 = vld [vmem:[%s10705_s4 + $0x530] sm:$0xff]  }
 0x5a1   :  { %v3992_v29 = vld [vmem:[#allocation3 + $0x42] sm:$0xff]  ;;  %4096 = vst.msk [vmem:[#allocation4 + $0x98] sm:$0xff] %vm58_vm6, %v4092_v4  ;;  %v7993_v41 = vld [vmem:[%s10705_s4 + $0x4d8] sm:$0xff]   ;;  %7556 = vmatprep.subr.bf16.mxu0 %v7992_v31 }
 0x5a2   :  { %v3944_v62 = vld [vmem:[#allocation3 + $0x40] sm:$0xff]  ;;  %v9954_v20 = vld [vmem:[#allocation3 + $0x4b] sm:$0xff]  ;;  %v4188_v56 = vpack.c.bf16 %v3992_v29, %v3991_v15  ;;  %v4100_v38 = vld [vmem:[#allocation3 + $0x17] sm:$0xff]  ;;  %4048 = vst.msk [vmem:[#allocation4 + $0x90] sm:$0xff] %vm58_vm6, %v4044_v18  ;;  %7557 = vmatpush3.bf16.msra.mxu0 %v7993_v41 }
 0x5a3   :  { %v9956_v21 = vld [vmem:[#allocation3 + $0x41] sm:$0xff]  ;;  %v9958_v1 = vld [vmem:[#allocation3 + $0x49] sm:$0xff]  ;;  %v4140_v48 = vpack.c.bf16 %v3944_v62, %v3943_v43  ;;  %v4013_v17 = vpack.c.bf16 %v9954_v20, %v9952_v49  ;;  %v9994_v9 = vld [vmem:[#allocation3 + $0x15] sm:$0xff]  ;;  %v4107_v51 = vpack.c.bf16 %v4101_v40, %v4100_v38  ;;  %7558 = vmatprep.subr.bf16.mxu0 %v7996_v32  ;;  %v4202_v32 = vpack.c.bf16 %v9878_v7, %v9857_v58 }
 0x5a4   :  { %v3965_v10 = vpack.c.bf16 %v9958_v1, %v9956_v21  ;;  %v9967_v12 = vld [vmem:[#allocation3 + $0x4a] sm:$0xff]  ;;  %4192 = vst.msk [vmem:[#allocation4 + $0xa8] sm:$0xff] %vm58_vm6, %v4188_v56  ;;  %v9984_v50 = vld [vmem:[#allocation3 + $0x1d] sm:$0xff]  ;;  %v4185_v13 = vld [vmem:[#allocation3 + $0x52] sm:$0xff]  ;;  %v4154_v38 = vpack.c.bf16 %v9883_v39, %v9859_v42  ;;  %v4204_v7 = vpack.c.bf16 %v9952_v49, %v9920_v37 }
 0x5a5   :  { %v9969_v6 = vld [vmem:[#allocation3 + $0x48] sm:$0xff]  ;;  %4144 = vst.msk [vmem:[#allocation4 + $0xa0] sm:$0xff] %vm58_vm6, %v4140_v48  ;;  %4024 = vrot.lane.b32.xlu0 %v4013_v17, %s8150_s30  ;;  %v3997_v14 = vpack.c.bf16 %v9967_v12, %v3992_v29  ;;  %v7997_v34 = vld [vmem:[%s10705_s4 + $0x4e0] sm:$0xff]   ;;  %v4059_v54 = vpack.c.bf16 %v9984_v50, %v9994_v9  ;;  %v4189_v56 = vpack.c.bf16 %v4185_v13, %v9967_v12  ;;  %v4233_v48 = vld [vmem:[#allocation3 + $0x54] sm:$0xff] }
 0x5a6   :  { %3976 = vrot.lane.b32.xlu1 %v3965_v10, %s8150_s30  ;;  %v3949_v0 = vpack.c.bf16 %v9969_v6, %v3944_v62  ;;  %v4088_v36 = vld [vmem:[#allocation3 + $0x46] sm:$0xff]  ;;  %v4089_v25 = vld [vmem:[#allocation3 + $0x4e] sm:$0xff]  ;;  %v10010_v29 = vld [vmem:[#allocation3 + $0x3d] sm:$0xff]  ;;  %v4235_v62 = vpack.c.bf16 %v4229_v35, %v9937_v55  ;;  %7559 = vmatpush3.bf16.msra.mxu0 %v7997_v34 }
 0x5a7   :  { %4001 = vst.msk [vmem:[#allocation4 + $0xc8] sm:$0xff] %vm58_vm6, %v3997_v14  ;;  %v4040_v27 = vld [vmem:[#allocation3 + $0x44] sm:$0xff]  ;;  %v4093_v11 = vpack.c.bf16 %v4089_v25, %v4088_v36  ;;  %v4041_v47 = vld [vmem:[#allocation3 + $0x4c] sm:$0xff]  ;;  %v4284_v15 = vpack.c.bf16 %v4088_v36, %v9948_v45  ;;  %v4281_v10 = vld [vmem:[#allocation3 + $0x56] sm:$0xff] }
 0x5a8   :  { %3953 = vst.msk [vmem:[#allocation4 + $0xc0] sm:$0xff] %vm58_vm6, %v3949_v0  ;;  %v4236_v5 = vpack.c.bf16 %v4040_v27, %v4039_v19  ;;  %v4045_v59 = vpack.c.bf16 %v4041_v47, %v4040_v27  ;;  %v7998_v43 = vld [vmem:[%s10705_s4 + $0x528] sm:$0xff]   ;;  %v4133_v22 = vld [vmem:[#allocation3 + $0x20] sm:$0xff]  ;;  %v4137_v45 = vld [vmem:[#allocation3 + $0x50] sm:$0xff] }
 0x5a9   :  { %4114 = vrot.lane.b32.xlu0 %v4106_v28, %s8150_s30  ;;  %v4181_v57 = vld [vmem:[#allocation3 + $0x22] sm:$0xff]  ;;  %4097 = vst.msk [vmem:[#allocation4 + $0xd8] sm:$0xff] %vm58_vm6, %v4093_v11  ;;  %v4139_v60 = vpack.c.bf16 %v4133_v22, %v9896_v8  ;;  %4288 = vst.msk [vmem:[#allocation4 + $0xb8] sm:$0xff] %vm58_vm6, %v4284_v15  ;;  %v4237_v8 = vpack.c.bf16 %v4233_v48, %v4041_v47  ;;  %v4102_v61 = vld [vmem:[#allocation3 + $0x37] sm:$0xff]  ;;  %7560 = vmatprep.subr.bf16.mxu0 %v7998_v43 }
 0x5aa   :  { %4066 = vrot.lane.b32.xlu1 %v4058_v63, %s8150_s30  ;;  %v4187_v26 = vpack.c.bf16 %v4181_v57, %v9894_v16  ;;  %4240 = vst.msk [vmem:[#allocation4 + $0xb0] sm:$0xff] %vm58_vm6, %v4236_v5  ;;  %v4103_v4 = vld [vmem:[#allocation3 + $0x3f] sm:$0xff]  ;;  %4049 = vst.msk [vmem:[#allocation4 + $0xd0] sm:$0xff] %vm58_vm6, %v4045_v59  ;;  %v4141_v16 = vpack.c.bf16 %v4137_v45, %v9969_v6  ;;  %v4054_v33 = vld [vmem:[#allocation3 + $0x35] sm:$0xff]  ;;  %v4285_v6 = vpack.c.bf16 %v4281_v10, %v4089_v25 }
 0x5ab   :  { %4143 = vst.msk [vmem:[#allocation4 + $0x60] sm:$0xff] %vm58_vm6, %v4139_v60  ;;  %v4277_v17 = vld [vmem:[#allocation3 + $0x26] sm:$0xff]  ;;  %4239 = vst.msk [vmem:[#allocation4 + $0x70] sm:$0xff] %vm58_vm6, %v4235_v62  ;;  %v4108_v14 = vpack.c.bf16 %v4103_v4, %v4102_v61  ;;  %v4060_v0 = vpack.c.bf16 %v10010_v29, %v4054_v33  ;;  %v4105_v19 = vld [vmem:[#allocation3 + $0x4f] sm:$0xff]  ;;  %v4250_v25 = vpack.c.bf16 %v9994_v9, %v9965_v53 }
 0x5ac   :  { %4191 = vst.msk [vmem:[#allocation4 + $0x68] sm:$0xff] %vm58_vm6, %v4187_v26  ;;  %v8000_v55 = vld [vmem:[%s10705_s4 + $0x4e8] sm:$0xff]   ;;  %4193 = vst.msk [vmem:[#allocation4 + $0xe8] sm:$0xff] %vm58_vm6, %v4189_v56  ;;  %v4283_v12 = vpack.c.bf16 %v4277_v17, %v9913_v30  ;;  %v8003_v41 = vld [vmem:[%s10705_s4 + $0x4f0] sm:$0xff]  }
 0x5ad   :  { %4116 = vrot.lane.b32.xlu0 %v4107_v51, %s8150_s30  ;;  %4145 = vst.msk [vmem:[#allocation4 + $0xe0] sm:$0xff] %vm58_vm6, %v4141_v16  ;;  %4241 = vst.msk [vmem:[#allocation4 + $0xf0] sm:$0xff] %vm58_vm6, %v4237_v8  ;;  %v4057_v3 = vld [vmem:[#allocation3 + $0x4d] sm:$0xff]  ;;  %v4056_v31 = vld [vmem:[#allocation3 + $0x45] sm:$0xff]  ;;  %7561 = vmatpush3.bf16.msra.mxu0 %v8000_v55 }
 0x5ae   :  { %4068 = vrot.lane.b32.xlu1 %v4059_v54, %s8150_s30  ;;  %4287 = vst.msk [vmem:[#allocation4 + $0x78] sm:$0xff] %vm58_vm6, %v4283_v12  ;;  %4289 = vst.msk [vmem:[#allocation4 + $0xf8] sm:$0xff] %vm58_vm6, %v4285_v6  ;;  %v4104_v30 = vld [vmem:[#allocation3 + $0x47] sm:$0xff]  ;;  %v4061_v28 = vpack.c.bf16 %v4057_v3, %v4056_v31  ;;  %7562 = vmatprep.subr.bf16.mxu0 %v8001_v46  ;;  %v8004_v63 = vld [vmem:[%s10705_s4 + $0x538] sm:$0xff]   ;;  %v4252_v53 = vpack.c.bf16 %v4056_v31, %v10010_v29 }
 0x5af   :  { %v4109_v18 = vpack.c.bf16 %v4105_v19, %v4104_v30  ;;  %v8006_v40 = vld [vmem:[%s10705_s4 + $0x4f8] sm:$0xff]   ;;  %v4197_v36 = vld [vmem:[#allocation3 + $0x23] sm:$0xff]  ;;  %v7976_v57 = vld [vmem:[%s10705_s4 + $0x490] sm:$0xff]  }
 0x5b0   :  { %v4203_v27 = vpack.c.bf16 %v4197_v36, %v9881_v23  ;;  %v4149_v34 = vld [vmem:[#allocation3 + $0x21] sm:$0xff]  ;;  %v4156_v23 = vpack.c.bf16 %v9956_v21, %v9922_v44  ;;  %v4201_v39 = vld [vmem:[#allocation3 + $0x53] sm:$0xff] }
 0x5b1   :  { %4118 = vrot.lane.b32.xlu0 %v4108_v14, %s8150_s30  ;;  %7563 = vmatpush3.bf16.msra.mxu0 %v8003_v41  ;;  %v4245_v11 = vld [vmem:[#allocation3 + $0x25] sm:$0xff]  ;;  %v4155_v58 = vpack.c.bf16 %v4149_v34, %v9885_v52  ;;  %v4205_v52 = vpack.c.bf16 %v4201_v39, %v9954_v20  ;;  %v4249_v9 = vld [vmem:[#allocation3 + $0x55] sm:$0xff] }
 0x5b2   :  { %4070 = vrot.lane.b32.xlu1 %v4060_v0, %s8150_s30  ;;  %7564 = vmatprep.subr.bf16.mxu0 %v8004_v63  ;;  %v4251_v42 = vpack.c.bf16 %v4245_v11, %v9984_v50  ;;  %v4153_v50 = vld [vmem:[#allocation3 + $0x51] sm:$0xff]  ;;  %v4253_v49 = vpack.c.bf16 %v4249_v9, %v4057_v3  ;;  %v7973_v20 = vld [vmem:[%s10705_s4 + $0x440] sm:$0xff]   ;;  %v7975_v43 = vld [vmem:[%s10705_s4 + $0x448] sm:$0xff]  }
 0x5b3   :  { %v4157_v37 = vpack.c.bf16 %v4153_v50, %v9958_v1  ;;  %v7974_v1 = vld [vmem:[%s10705_s4 + $0x488] sm:$0xff]   ;;  %v7977_v22 = vld [vmem:[%s10705_s4 + $0x450] sm:$0xff]   ;;  %v7978_v35 = vld [vmem:[%s10705_s4 + $0x498] sm:$0xff]  }
 0x5b4   :  { %v7979_v13 = vld [vmem:[%s10705_s4 + $0x458] sm:$0xff]   ;;  %v7982_v45 = vld [vmem:[%s10705_s4 + $0x4a0] sm:$0xff]   ;;  %v7986_v48 = vld [vmem:[%s10705_s4 + $0x4a8] sm:$0xff]  }
 0x5b5   :  { %4120 = vrot.lane.b32.xlu0 %v4109_v18, %s8150_s30  ;;  %7565 = vmatpush3.bf16.msra.mxu0 %v8006_v40  ;;  %v7983_v4 = vld [vmem:[%s10705_s4 + $0x460] sm:$0xff]   ;;  %v7987_v8 = vld [vmem:[%s10705_s4 + $0x468] sm:$0xff]   ;;  %v7990_v61 = vld [vmem:[%s10705_s4 + $0x4b0] sm:$0xff]  }
 0x5b6   :  { %4072 = vrot.lane.b32.xlu1 %v4061_v28, %s8150_s30  ;;  %v7991_v33 = vld [vmem:[%s10705_s4 + $0x470] sm:$0xff]   ;;  %v7994_v0 = vld [vmem:[%s10705_s4 + $0x4b8] sm:$0xff]   ;;  %v7999_v31 = vld [vmem:[%s10705_s4 + $0x540] sm:$0xff]  }
 0x5b7   :  { %v7995_v46 = vld [vmem:[%s10705_s4 + $0x478] sm:$0xff]   ;;  %v8002_v40 = vld [vmem:[%s10705_s4 + $0x548] sm:$0xff]   ;;  %v8005_v36 = vld [vmem:[%s10705_s4 + $0x550] sm:$0xff]  }
 0x5b9   :  { %4210 = vrot.lane.b32.xlu0 %v4202_v32, %s8150_s30 }
 0x5ba   :  { %4162 = vrot.lane.b32.xlu1 %v4154_v38, %s8150_s30 }
 0x5bd   :  { %4258 = vrot.lane.b32.xlu0 %v4250_v25, %s8150_s30 }
 0x5be   :  { %4212 = vrot.lane.b32.xlu1 %v4203_v27, %s8150_s30 }
 0x5c1   :  { %4164 = vrot.lane.b32.xlu0 %v4155_v58, %s8150_s30  ;;  %v8007_v58 = vld [vmem:[%s10705_s4 + $0x558] sm:$0xff]  }
 0x5c2   :  { %4260 = vrot.lane.b32.xlu1 %v4251_v42, %s8150_s30 }
 0x5c5   :  { %4214 = vrot.lane.b32.xlu0 %v4204_v7, %s8150_s30 }
 0x5c6   :  { %4166 = vrot.lane.b32.xlu1 %v4156_v23, %s8150_s30 }
 0x5c9   :  { %4262 = vrot.lane.b32.xlu0 %v4252_v53, %s8150_s30  ;;  %v8008_v53 = vld [vmem:[%s10705_s4 + $0x560] sm:$0xff]  }
 0x5ca   :  { %4216 = vrot.lane.b32.xlu1 %v4205_v52, %s8150_s30 }
 0x5cd   :  { %4168 = vrot.lane.b32.xlu0 %v4157_v37, %s8150_s30 }
 0x5ce   :  { %4264 = vrot.lane.b32.xlu1 %v4253_v49, %s8150_s30 }
 0x5ff   :  { %v4019_v44 = vpop.permute.xlu0 %4018 }
 0x600   :  { %v3971_v21 = vpop.permute.xlu1 %3970  ;;  %4030 = vst.msk [vmem:[#allocation4 + $0x8] sm:$0xff] %vm1614_vm14, %v4019_v44  ;;  %v8009_v44 = vld [vmem:[%s10705_s4 + $0x568] sm:$0xff]  }
 0x601   :  { %3982 = vst.msk [vmem:[#allocation4] sm:$0xff] %vm1614_vm14, %v3971_v21 }
 0x607   :  { %v4021_v47 = vpop.permute.xlu0 %4020  ;;  %v4291_v15 = vld [vmem:[#allocation4 + $0x8] sm:$0xff] }
 0x608   :  { %v3973_v5 = vpop.permute.xlu1 %3972  ;;  %v4290_v59 = vld [vmem:[#allocation4] sm:$0xff]  ;;  %4031 = vst.msk [vmem:[#allocation4 + $0x48] sm:$0xff] %vm1614_vm14, %v4021_v47  ;;  %4847 = vmatprep.mubr.bf16.mxu1 %v4291_v15 }
 0x609   :  { %3983 = vst.msk [vmem:[#allocation4 + $0x40] sm:$0xff] %vm1614_vm14, %v3973_v5  ;;  %4848 = vmatmul.mubr.bf16.vlgmr.msra.gmra.mrb[80].mxu1 %v4290_v59  ;;  %v8010_v5 = vld [vmem:[%s10705_s4 + $0x570] sm:$0xff]  }
 0x60a   :  { %7511 = vmatpush3.bf16.msra.mxu1 %v7973_v20 }
 0x60b   :  { %7512 = vmatprep.subr.bf16.mxu1 %v7974_v1 }
 0x60e   :  { %7513 = vmatpush3.bf16.msra.mxu1 %v7975_v43 }
 0x60f   :  { %v4023_v51 = vpop.permute.xlu0 %4022  ;;  %v4299_v26 = vld [vmem:[#allocation4 + $0x48] sm:$0xff]  ;;  %7514 = vmatprep.subr.bf16.mxu1 %v7976_v57  ;;  %v4297_v57 = vld [vmem:[#allocation4 + $0x38] sm:$0xff] }
 0x610   :  { %v3975_v54 = vpop.permute.xlu1 %3974  ;;  %v4298_v60 = vld [vmem:[#allocation4 + $0x40] sm:$0xff]  ;;  %4032 = vst.msk [vmem:[#allocation4 + $0x88] sm:$0xff] %vm1614_vm14, %v4023_v51  ;;  %4855 = vmatprep.mubr.bf16.mxu1 %v4299_v26 }
 0x611   :  { %3984 = vst.msk [vmem:[#allocation4 + $0x80] sm:$0xff] %vm1614_vm14, %v3975_v54  ;;  %4856 = vmatmul.mubr.bf16.gmra.mrb[84].mxu1 %v4298_v60  ;;  %v8012_v26 = vld [vmem:[%s10705_s4 + $0x580] sm:$0xff]   ;;  %v8013_v60 = vld [vmem:[%s10705_s4 + $0x588] sm:$0xff]  }
 0x612   :  { %7515 = vmatpush3.bf16.msra.mxu1 %v7977_v22  ;;  %v8011_v22 = vld [vmem:[%s10705_s4 + $0x578] sm:$0xff]  }
 0x613   :  { %7516 = vmatprep.subr.bf16.mxu1 %v7978_v35 }
 0x616   :  { %7517 = vmatpush3.bf16.msra.mxu1 %v7979_v13  ;;  %v8014_v13 = vld [vmem:[%s10705_s4 + $0x590] sm:$0xff]  }
 0x617   :  { %v4025_v29 = vpop.permute.xlu0 %4024  ;;  %v4307_v56 = vld [vmem:[#allocation4 + $0x88] sm:$0xff]  ;;  %7518 = vmatprep.subr.bf16.mxu1 %v7982_v45  ;;  %v8015_v45 = vld [vmem:[%s10705_s4 + $0x598] sm:$0xff]  }
 0x618   :  { %v3977_v62 = vpop.permute.xlu1 %3976  ;;  %v4306_v16 = vld [vmem:[#allocation4 + $0x80] sm:$0xff]  ;;  %4033 = vst.msk [vmem:[#allocation4 + $0xc8] sm:$0xff] %vm1614_vm14, %v4025_v29  ;;  %4863 = vmatprep.mubr.bf16.mxu1 %v4307_v56  ;;  %v4305_v29 = vld [vmem:[#allocation4 + $0x78] sm:$0xff] }
 0x619   :  { %3985 = vst.msk [vmem:[#allocation4 + $0xc0] sm:$0xff] %vm1614_vm14, %v3977_v62  ;;  %4864 = vmatmul.mubr.bf16.gmra.mrb[88].mxu1 %v4306_v16  ;;  %v4313_v56 = vld [vmem:[#allocation4 + $0xb8] sm:$0xff] }
 0x61a   :  { %7519 = vmatpush3.bf16.msra.mxu1 %v7983_v4 }
 0x61b   :  { %v4115_v17 = vpop.permute.xlu0 %4114  ;;  %7520 = vmatprep.subr.bf16.mxu1 %v7986_v48  ;;  %v4321_v48 = vld [vmem:[#allocation4 + $0xf8] sm:$0xff] }
 0x61c   :  { %v4067_v10 = vpop.permute.xlu1 %4066  ;;  %4126 = vst.msk [vmem:[#allocation4 + $0x18] sm:$0xff] %vm1614_vm14, %v4115_v17 }
 0x61d   :  { %4078 = vst.msk [vmem:[#allocation4 + $0x10] sm:$0xff] %vm1614_vm14, %v4067_v10 }
 0x61e   :  { %7521 = vmatpush3.bf16.msra.mxu1 %v7987_v8 }
 0x61f   :  { %v4117_v55 = vpop.permute.xlu0 %4116  ;;  %v4315_v6 = vld [vmem:[#allocation4 + $0xc8] sm:$0xff]  ;;  %7522 = vmatprep.subr.bf16.mxu1 %v7990_v61 }
 0x620   :  { %v4069_v12 = vpop.permute.xlu1 %4068  ;;  %v4314_v14 = vld [vmem:[#allocation4 + $0xc0] sm:$0xff]  ;;  %4127 = vst.msk [vmem:[#allocation4 + $0x58] sm:$0xff] %vm1614_vm14, %v4117_v55  ;;  %4871 = vmatprep.mubr.bf16.mxu1 %v4315_v6 }
 0x621   :  { %4079 = vst.msk [vmem:[#allocation4 + $0x50] sm:$0xff] %vm1614_vm14, %v4069_v12  ;;  %4872 = vmatmul.mubr.bf16.gmra.mrb[92].mxu1 %v4314_v14 }
 0x622   :  { %7523 = vmatpush3.bf16.msra.mxu1 %v7991_v33 }
 0x623   :  { %v4119_v19 = vpop.permute.xlu0 %4118  ;;  %7524 = vmatprep.subr.bf16.mxu1 %v7994_v0  ;;  %v4293_v30 = vld [vmem:[#allocation4 + $0x18] sm:$0xff] }
 0x624   :  { %v4071_v3 = vpop.permute.xlu1 %4070  ;;  %4128 = vst.msk [vmem:[#allocation4 + $0x98] sm:$0xff] %vm1614_vm14, %v4119_v19  ;;  %4912 = vmatprep.mubr.bf16.mxu1 %v4293_v30  ;;  %v4292_v28 = vld [vmem:[#allocation4 + $0x10] sm:$0xff] }
 0x625   :  { %4080 = vst.msk [vmem:[#allocation4 + $0x90] sm:$0xff] %vm1614_vm14, %v4071_v3 }
 0x626   :  { %7525 = vmatpush3.bf16.msra.mxu1 %v7995_v46 }
 0x627   :  { %v4121_v41 = vpop.permute.xlu0 %4120  ;;  %5010 = vmatprep.subr.bf16.mxu1 %v8901_v24  ;;  %v4301_v63 = vld [vmem:[#allocation4 + $0x58] sm:$0xff] }
 0x628   :  { %v4073_v18 = vpop.permute.xlu1 %4072  ;;  %4129 = vst.msk [vmem:[#allocation4 + $0xd8] sm:$0xff] %vm1614_vm14, %v4121_v41  ;;  %v4300_v34 = vld [vmem:[#allocation4 + $0x50] sm:$0xff] }
 0x629   :  { %4081 = vst.msk [vmem:[#allocation4 + $0xd0] sm:$0xff] %vm1614_vm14, %v4073_v18  ;;  %4913 = vmatmul.mubr.bf16.vlgmr.msra.gmra.mrb[96].mxu1 %v4292_v28 }
 0x62a   :  { %5011 = vmatpush1.bf16.msra.mxu1 %v7999_v31  ;;  %4920 = vmatprep.mubr.bf16.mxu1 %v4301_v63 }
 0x62b   :  { %v4211_v32 = vpop.permute.xlu0 %4210  ;;  %5012 = vmatprep.subr.bf16.mxu1 %v8901_v24  ;;  %v4309_v11 = vld [vmem:[#allocation4 + $0x98] sm:$0xff] }
 0x62c   :  { %v4163_v38 = vpop.permute.xlu1 %4162  ;;  %4222 = vst.msk [vmem:[#allocation4 + $0x28] sm:$0xff] %vm1614_vm14, %v4211_v32  ;;  %v4308_v37 = vld [vmem:[#allocation4 + $0x90] sm:$0xff] }
 0x62d   :  { %4174 = vst.msk [vmem:[#allocation4 + $0x20] sm:$0xff] %vm1614_vm14, %v4163_v38 }
 0x62e   :  { %5013 = vmatpush1.bf16.msra.mxu1 %v8002_v40 }
 0x62f   :  { %v4259_v25 = vpop.permute.xlu0 %4258  ;;  %5014 = vmatprep.subr.bf16.mxu1 %v8901_v24  ;;  %v4317_v49 = vld [vmem:[#allocation4 + $0xd8] sm:$0xff] }
 0x630   :  { %v4213_v27 = vpop.permute.xlu1 %4212  ;;  %4270 = vst.msk [vmem:[#allocation4 + $0x30] sm:$0xff] %vm1614_vm14, %v4259_v25  ;;  %v4316_v43 = vld [vmem:[#allocation4 + $0xd0] sm:$0xff] }
 0x631   :  { %4223 = vst.msk [vmem:[#allocation4 + $0x68] sm:$0xff] %vm1614_vm14, %v4213_v27  ;;  %4921 = vmatmul.mubr.bf16.gmra.mrb[100].mxu1 %v4300_v34 }
 0x632   :  { %5015 = vmatpush1.bf16.msra.mxu1 %v8005_v36  ;;  %4928 = vmatprep.mubr.bf16.mxu1 %v4309_v11 }
 0x633   :  { %v4165_v42 = vpop.permute.xlu0 %4164  ;;  %v4295_v23 = vld [vmem:[#allocation4 + $0x28] sm:$0xff]  ;;  %5016 = vmatprep.subr.bf16.mxu1 %v8901_v24 }
 0x634   :  { %v4261_v7 = vpop.permute.xlu1 %4260  ;;  %v4294_v39 = vld [vmem:[#allocation4 + $0x20] sm:$0xff]  ;;  %4175 = vst.msk [vmem:[#allocation4 + $0x60] sm:$0xff] %vm1614_vm14, %v4165_v42  ;;  %4977 = vmatprep.mubr.bf16.mxu0 %v4295_v23 }
 0x635   :  { %4271 = vst.msk [vmem:[#allocation4 + $0x70] sm:$0xff] %vm1614_vm14, %v4261_v7  ;;  %4978 = vmatmul.mubr.bf16.vlgmr.msra.gmra.mrb[80].mxu0 %v4294_v39 }
 0x636   :  { %5017 = vmatpush1.bf16.msra.mxu1 %v8007_v58 }
 0x637   :  { %v4215_v52 = vpop.permute.xlu0 %4214  ;;  %5018 = vmatprep.subr.bf16.mxu1 %v8901_v24  ;;  %v4296_v4 = vld [vmem:[#allocation4 + $0x30] sm:$0xff] }
 0x638   :  { %v4167_v50 = vpop.permute.xlu1 %4166  ;;  %v4303_v9 = vld [vmem:[#allocation4 + $0x68] sm:$0xff]  ;;  %4224 = vst.msk [vmem:[#allocation4 + $0xa8] sm:$0xff] %vm1614_vm14, %v4215_v52  ;;  %v8017_v52 = vld [vmem:[%s10705_s4 + $0x5a0] sm:$0xff]  }
 0x639   :  { %4176 = vst.msk [vmem:[#allocation4 + $0xa0] sm:$0xff] %vm1614_vm14, %v4167_v50  ;;  %4985 = vmatprep.mubr.bf16.mxu0 %v4303_v9  ;;  %4929 = vmatmul.mubr.bf16.gmra.mrb[104].mxu1 %v4308_v37  ;;  %v8018_v50 = vld [vmem:[%s10705_s4 + $0x5e8] sm:$0xff]  }
 0x63a   :  { %5019 = vmatpush1.bf16.msra.mxu1 %v8008_v53  ;;  %4936 = vmatprep.mubr.bf16.mxu1 %v4317_v49  ;;  %v8016_v53 = vld [vmem:[%s10705_s4 + $0x5e0] sm:$0xff]   ;;  %v8019_v49 = vld [vmem:[%s10705_s4 + $0x5a8] sm:$0xff]  }
 0x63b   :  { %v4263_v21 = vpop.permute.xlu0 %4262  ;;  %5020 = vmatprep.subr.bf16.mxu1 %v8901_v24  ;;  %v4302_v47 = vld [vmem:[#allocation4 + $0x60] sm:$0xff]  ;;  %7590 = vmatprep.subr.bf16.mxu0 %v8016_v53 }
 0x63c   :  { %v4217_v20 = vpop.permute.xlu1 %4216  ;;  %4272 = vst.msk [vmem:[#allocation4 + $0xb0] sm:$0xff] %vm1614_vm14, %v4263_v21  ;;  %v4304_v62 = vld [vmem:[#allocation4 + $0x70] sm:$0xff]  ;;  %7591 = vmatpush3.bf16.msra.mxu0 %v8017_v52 }
 0x63d   :  { %4225 = vst.msk [vmem:[#allocation4 + $0xe8] sm:$0xff] %vm1614_vm14, %v4217_v20  ;;  %4986 = vmatmul.mubr.bf16.gmra.mrb[84].mxu0 %v4302_v47  ;;  %7592 = vmatprep.subr.bf16.mxu0 %v8018_v50  ;;  %v8020_v21 = vld [vmem:[%s10705_s4 + $0x5f0] sm:$0xff]  }
 0x63e   :  { %5021 = vmatpush1.bf16.msra.mxu1 %v8009_v44 }
 0x63f   :  { %v4169_v15 = vpop.permute.xlu0 %4168  ;;  %v4311_v1 = vld [vmem:[#allocation4 + $0xa8] sm:$0xff]  ;;  %5022 = vmatprep.subr.bf16.mxu1 %v8901_v24 }
 0x640   :  { %v4265_v59 = vpop.permute.xlu1 %4264  ;;  %4177 = vst.msk [vmem:[#allocation4 + $0xe0] sm:$0xff] %vm1614_vm14, %v4169_v15  ;;  %4993 = vmatprep.mubr.bf16.mxu0 %v4311_v1  ;;  %v4310_v51 = vld [vmem:[#allocation4 + $0xa0] sm:$0xff]  ;;  %7593 = vmatpush3.bf16.msra.mxu0 %v8019_v49 }
 0x641   :  { %4273 = vst.msk [vmem:[#allocation4 + $0xf0] sm:$0xff] %vm1614_vm14, %v4265_v59  ;;  %4937 = vmatmul.mubr.bf16.gmra.mrb[108].mxu1 %v4316_v43  ;;  %v8021_v43 = vld [vmem:[%s10705_s4 + $0x5b0] sm:$0xff]   ;;  %7594 = vmatprep.subr.bf16.mxu0 %v8020_v21 }
 0x642   :  { %5023 = vmatpush1.bf16.msra.mxu1 %v8010_v5  ;;  %6990 = vmatprep.mubr.msk.bf16.mxu1 %vm58_vm6, %v4297_v57 }
 0x643   :  { %5024 = vmatprep.subr.bf16.mxu1 %v8901_v24  ;;  %v4312_v16 = vld [vmem:[#allocation4 + $0xb0] sm:$0xff] }
 0x644   :  { %v4319_v54 = vld [vmem:[#allocation4 + $0xe8] sm:$0xff]  ;;  %7595 = vmatpush3.bf16.msra.mxu0 %v8021_v43 }
 0x645   :  { %4994 = vmatmul.mubr.bf16.gmra.mrb[88].mxu0 %v4310_v51 }
 0x646   :  { %5025 = vmatpush1.bf16.msra.mxu1 %v8011_v22  ;;  %5001 = vmatprep.mubr.bf16.mxu0 %v4319_v54  ;;  %v8022_v22 = vld [vmem:[%s10705_s4 + $0x5f8] sm:$0xff]  }
 0x647   :  { %5026 = vmatprep.subr.bf16.mxu1 %v8901_v24  ;;  %v4318_v35 = vld [vmem:[#allocation4 + $0xe0] sm:$0xff]  ;;  %7596 = vmatprep.subr.bf16.mxu0 %v8022_v22 }
 0x648   :  { %v4320_v8 = vld [vmem:[#allocation4 + $0xf0] sm:$0xff] }
 0x64a   :  { %5027 = vmatpush1.bf16.msra.mxu1 %v8012_v26 }
 0x64b   :  { %5028 = vmatprep.subr.bf16.mxu1 %v8901_v24 }
 0x64d   :  { %5002 = vmatmul.mubr.bf16.gmra.mrb[92].mxu0 %v4318_v35 }
 0x64e   :  { %5029 = vmatpush1.bf16.msra.mxu1 %v8013_v60 }
 0x64f   :  { %5030 = vmatprep.subr.bf16.mxu1 %v8901_v24 }
 0x652   :  { %5031 = vmatpush1.bf16.msra.mxu1 %v8014_v13 }
 0x653   :  { %5032 = vmatprep.subr.bf16.mxu1 %v8901_v24 }
 0x656   :  { %5033 = vmatpush1.bf16.msra.mxu1 %v8015_v45 }
 0x659   :  { %5043 = vmatmul.mubr.bf16.vlgmr.msra.gmra.mrb[112].mxu1 %v4296_v4  ;;  %v8023_v4 = vld [vmem:[%s10705_s4 + $0x5b8] sm:$0xff]  }
 0x65a   :  { %6991 = vmatprep.mubr.msk.bf16.mxu1 %vm58_vm6, %v4305_v29  ;;  %7597 = vmatpush3.bf16.msra.mxu0 %v8023_v4 }
 0x661   :  { %5051 = vmatmul.mubr.bf16.gmra.mrb[116].mxu1 %v4304_v62  ;;  %v8024_v62 = vld [vmem:[%s10705_s4 + $0x600] sm:$0xff]  }
 0x662   :  { %6992 = vmatprep.mubr.msk.bf16.mxu1 %vm58_vm6, %v4313_v56  ;;  %7598 = vmatprep.subr.bf16.mxu0 %v8024_v62 }
 0x669   :  { %5059 = vmatmul.mubr.bf16.gmra.mrb[120].mxu1 %v4312_v16 }
 0x66a   :  { %6993 = vmatprep.mubr.msk.bf16.mxu1 %vm58_vm6, %v4321_v48 }
 0x671   :  { %5067 = vmatmul.mubr.bf16.gmra.mrb[124].mxu1 %v4320_v8 }
 0x6dc   :  { %v7486_v17 = vpop.f32.mrb[80].mxu1 }
 0x6dd   :  { %v7487_v10 = vpop.f32.mrb[81].mxu1 }
 0x6de   :  { %v7488_v61 = vadd.f32 %v7487_v10, %v7486_v17  ;;  %v7489_v33 = vpop.f32.mrb[82].mxu1 }
 0x6df   :  { %v7490_v55 = vpop.f32.mrb[83].mxu1 }
 0x6e0   :  { %v7491_v12 = vadd.f32 %v7490_v55, %v7489_v33  ;;  %v8025_v33 = vld [vmem:[%s10705_s4 + $0x5c0] sm:$0xff]  }
 0x6e1   :  { %7599 = vmatpush3.bf16.msra.mxu0 %v8025_v33 }
 0x6e4   :  { %v7492_v6 = vpop.f32.mrb[84].mxu1 }
 0x6e5   :  { %v7493_v14 = vpop.f32.mrb[85].mxu1 }
 0x6e6   :  { %v7494_v0 = vadd.f32 %v7493_v14, %v7492_v6  ;;  %v7495_v46 = vpop.f32.mrb[86].mxu1 }
 0x6e7   :  { %v7496_v19 = vpop.f32.mrb[87].mxu1 }
 0x6e8   :  { %v7497_v3 = vadd.f32 %v7496_v19, %v7495_v46 }
 0x6ec   :  { %v7498_v30 = vpop.f32.mrb[88].mxu1 }
 0x6ed   :  { %v7499_v31 = vpop.f32.mrb[89].mxu1 }
 0x6ee   :  { %v7500_v41 = vadd.f32 %v7499_v31, %v7498_v30  ;;  %v7501_v18 = vpop.f32.mrb[90].mxu1  ;;  %v8027_v31 = vld [vmem:[%s10705_s4 + $0x5c8] sm:$0xff]  }
 0x6ef   :  { %v7502_v28 = vpop.f32.mrb[91].mxu1 }
 0x6f0   :  { %v7503_v63 = vadd.f32 %v7502_v28, %v7501_v18 }
 0x6f4   :  { %v7504_v40 = vpop.f32.mrb[92].mxu1 }
 0x6f5   :  { %v7505_v32 = vpop.f32.mrb[93].mxu1 }
 0x6f6   :  { %v10200_v38 = vadd.f32 %v7505_v32, %v7504_v40  ;;  %v7507_v36 = vpop.f32.mrb[94].mxu1 }
 0x6f7   :  { %v7508_v25 = vpop.f32.mrb[95].mxu1 }
 0x6f8   :  { %v10202_v27 = vadd.f32 %v7508_v25, %v7507_v36 }
 0x6fc   :  { %v7526_v34 = vpop.f32.mrb[96].mxu1 }
 0x6fd   :  { %v7527_v11 = vpop.f32.mrb[97].mxu1 }
 0x6fe   :  { %v7528_v58 = vadd.f32 %v7527_v11, %v7526_v34  ;;  %v7529_v42 = vpop.f32.mrb[98].mxu1 }
 0x6ff   :  { %v7530_v7 = vpop.f32.mrb[99].mxu1 }
 0x700   :  { %v4915_v23 = vadd.f32 %v7528_v58, %v7488_v61  ;;  %v7531_v39 = vadd.f32 %v7530_v7, %v7529_v42 }
 0x702   :  { %v4918_v9 = vadd.f32 %v7531_v39, %v7491_v12  ;;  %v8026_v12 = vld [vmem:[%s10705_s4 + $0x608] sm:$0xff]  }
 0x703   :  { %7600 = vmatprep.subr.bf16.mxu0 %v8026_v12 }
 0x704   :  { %v7532_v37 = vpop.f32.mrb[100].mxu1  ;;  %7601 = vmatpush3.bf16.msra.mxu0 %v8027_v31 }
 0x705   :  { %v7533_v44 = vpop.f32.mrb[101].mxu1 }
 0x706   :  { %v7534_v20 = vadd.f32 %v7533_v44, %v7532_v37  ;;  %v7535_v47 = vpop.f32.mrb[102].mxu1 }
 0x707   :  { %v7536_v5 = vpop.f32.mrb[103].mxu1 }
 0x708   :  { %v4923_v15 = vadd.f32 %v7534_v20, %v7494_v0  ;;  %v7537_v59 = vadd.f32 %v7536_v5, %v7535_v47  ;;  %v7566_v1 = vpop.f32.mrb[80].mxu0 }
 0x709   :  { %v7567_v57 = vpop.f32.mrb[81].mxu0 }
 0x70a   :  { %v4926_v51 = vadd.f32 %v7537_v59, %v7497_v3  ;;  %v7568_v54 = vadd.f32 %v7567_v57, %v7566_v1  ;;  %v7569_v26 = vpop.f32.mrb[82].mxu0 }
 0x70b   :  { %v7570_v60 = vpop.f32.mrb[83].mxu0 }
 0x70c   :  { %v7571_v35 = vadd.f32 %v7570_v60, %v7569_v26  ;;  %v7538_v13 = vpop.f32.mrb[104].mxu1  ;;  %v4980_v45 = vadd.f32 %v7568_v54, %v4915_v23 }
 0x70d   :  { %v7539_v29 = vpop.f32.mrb[105].mxu1 }
 0x70e   :  { %v7540_v56 = vadd.f32 %v7539_v29, %v7538_v13  ;;  %v7541_v16 = vpop.f32.mrb[106].mxu1  ;;  %v4983_v48 = vadd.f32 %v7571_v35, %v4918_v9  ;;  %v8028_v35 = vld [vmem:[%s10705_s4 + $0x610] sm:$0xff]  }
 0x70f   :  { %v7542_v8 = vpop.f32.mrb[107].mxu1  ;;  %v8029_v13 = vld [vmem:[%s10705_s4 + $0x5d0] sm:$0xff]   ;;  %7602 = vmatprep.subr.bf16.mxu0 %v8028_v35 }
 0x710   :  { %v4931_v17 = vadd.f32 %v7540_v56, %v7500_v41  ;;  %v7543_v10 = vadd.f32 %v7542_v8, %v7541_v16  ;;  %v7572_v61 = vpop.f32.mrb[84].mxu0  ;;  %7603 = vmatpush3.bf16.msra.mxu0 %v8029_v13 }
 0x711   :  { %v7573_v55 = vpop.f32.mrb[85].mxu0 }
 0x712   :  { %v4934_v6 = vadd.f32 %v7543_v10, %v7503_v63  ;;  %v7574_v14 = vadd.f32 %v7573_v55, %v7572_v61  ;;  %v7575_v0 = vpop.f32.mrb[86].mxu0 }
 0x713   :  { %v7576_v46 = vpop.f32.mrb[87].mxu0 }
 0x714   :  { %v7577_v19 = vadd.f32 %v7576_v46, %v7575_v0  ;;  %v7544_v3 = vpop.f32.mrb[108].mxu1  ;;  %v4988_v30 = vadd.f32 %v7574_v14, %v4923_v15  ;;  %v10254_v15 = vld [vmem:[%s10707_s6 + $0x2] ss:$0 sm:$0xff] }
 0x715   :  { %v7545_v41 = vpop.f32.mrb[109].mxu1 }
 0x716   :  { %v7546_v18 = vadd.f32 %v7545_v41, %v7544_v3  ;;  %v7547_v28 = vpop.f32.mrb[110].mxu1  ;;  %v4991_v40 = vadd.f32 %v7577_v19, %v4926_v51 }
 0x717   :  { %v7548_v32 = vpop.f32.mrb[111].mxu1 }
 0x718   :  { %v4939_v36 = vadd.f32 %v7546_v18, %v10200_v38  ;;  %v7549_v63 = vadd.f32 %v7548_v32, %v7547_v28  ;;  %v7578_v25 = vpop.f32.mrb[88].mxu0 }
 0x719   :  { %v7579_v34 = vpop.f32.mrb[89].mxu0 }
 0x71a   :  { %v4942_v11 = vadd.f32 %v7549_v63, %v10202_v27  ;;  %v7580_v58 = vadd.f32 %v7579_v34, %v7578_v25  ;;  %v7581_v42 = vpop.f32.mrb[90].mxu0  ;;  %v10249_v27 = vld [vmem:[%s10706_s5 + $0x2] ss:$0 sm:$0xff] }
 0x71b   :  { %v7582_v7 = vpop.f32.mrb[91].mxu0 }
 0x71c   :  { %v7583_v23 = vadd.f32 %v7582_v7, %v7581_v42  ;;  %v4996_v39 = vadd.f32 %v7580_v58, %v4931_v17  ;;  %v8031_v17 = vld [vmem:[%s10705_s4 + $0x5d8] sm:$0xff]   ;;  %v8032_v42 = vld [vmem:[%s10705_s4 + $0x660] sm:$0xff]  }
 0x71e   :  { %v4999_v53 = vadd.f32 %v7583_v23, %v4934_v6 }
 0x720   :  { %v7584_v52 = vpop.f32.mrb[92].mxu0 }
 0x721   :  { %v7585_v50 = vpop.f32.mrb[93].mxu0 }
 0x722   :  { %v7586_v9 = vadd.f32 %v7585_v50, %v7584_v52  ;;  %v7587_v37 = vpop.f32.mrb[94].mxu0 }
 0x723   :  { %v7588_v49 = vpop.f32.mrb[95].mxu0 }
 0x724   :  { %v7589_v44 = vadd.f32 %v7588_v49, %v7587_v37  ;;  %v10242_v21 = vadd.f32 %v7586_v9, %v4939_v36 }
 0x726   :  { %v10244_v38 = vadd.f32 %v7589_v44, %v4942_v11 }
 0x72c   :  { %v5044_v20 = vpop.f32.mrb[112].mxu1 }
 0x72d   :  { %v5045_v47 = vadd.f32 %v5044_v20, %v4980_v45  ;;  %v5046_v5 = vpop.f32.mrb[113].mxu1  ;;  %v8030_v45 = vld [vmem:[%s10705_s4 + $0x618] sm:$0xff]  }
 0x72e   :  { %v5047_v59 = vpop.f32.mrb[114].mxu1  ;;  %7604 = vmatprep.subr.bf16.mxu0 %v8030_v45 }
 0x72f   :  { %v5083_v1 = vmul.f32 %v10249_v27, %v5045_v47  ;;  %v5048_v43 = vadd.f32 %v5047_v59, %v4983_v48  ;;  %v5049_v57 = vpop.f32.mrb[115].mxu1  ;;  %7605 = vmatpush3.bf16.msra.mxu0 %v8031_v17 }
 0x730   :  { %7630 = vmatprep.subr.bf16.mxu0 %v8032_v42 }
 0x731   :  { %v5099_v22 = vadd.f32 %v10254_v15, %v5083_v1  ;;  %v5084_v51 = vmul.f32 %v10249_v27, %v5048_v43 }
 0x733   :  { %v5107_v54 = vmax.f32 %v5099_v22, 0.0  ;;  %v5100_v26 = vadd.f32 %v10254_v15, %v5084_v51 }
 0x734   :  { %v5052_v60 = vpop.f32.mrb[116].mxu1 }
 0x735   :  { %5115 = vst.msk [vmem:[#allocation3 + $0x7] sm:$0xff] %vm58_vm6, %v5107_v54  ;;  %v5108_v4 = vmax.f32 %v5100_v26, 0.0  ;;  %v5053_v29 = vadd.f32 %v5052_v60, %v4988_v30  ;;  %v5054_v62 = vpop.f32.mrb[117].mxu1 }
 0x736   :  { %v5055_v56 = vpop.f32.mrb[118].mxu1 }
 0x737   :  { %5116 = vst.msk [vmem:[#allocation3 + $0xf] sm:$0xff] %vm58_vm6, %v5108_v4  ;;  %v5085_v16 = vmul.f32 %v10249_v27, %v5053_v29  ;;  %v5056_v48 = vadd.f32 %v5055_v56, %v4991_v40  ;;  %v5057_v8 = vpop.f32.mrb[119].mxu1 }
 0x739   :  { %v5101_v10 = vadd.f32 %v10254_v15, %v5085_v16  ;;  %v5086_v61 = vmul.f32 %v10249_v27, %v5056_v48 }
 0x73b   :  { %v5109_v33 = vmax.f32 %v5101_v10, 0.0  ;;  %v5102_v55 = vadd.f32 %v10254_v15, %v5086_v61  ;;  %v8040_v10 = vld [vmem:[%s10705_s4 + $0x6e0] sm:$0xff]  }
 0x73c   :  { %v5060_v12 = vpop.f32.mrb[120].mxu1  ;;  %v5187_v46 = vld [vmem:[#allocation3 + $0x3] sm:$0xff]  ;;  %7670 = vmatprep.subr.bf16.mxu1 %v8040_v10 }
 0x73d   :  { %5117 = vst.msk [vmem:[#allocation3 + $0x17] sm:$0xff] %vm58_vm6, %v5109_v33  ;;  %v5110_v6 = vmax.f32 %v5102_v55, 0.0  ;;  %v5061_v14 = vadd.f32 %v5060_v12, %v4996_v39  ;;  %v5062_v0 = vpop.f32.mrb[121].mxu1  ;;  %v5139_v19 = vld [vmem:[#allocation3 + $0x1] sm:$0xff] }
 0x73e   :  { %v5063_v3 = vpop.f32.mrb[122].mxu1  ;;  %v10279_v30 = vld [vmem:[#allocation3 + $0xb] sm:$0xff]  ;;  %v5171_v41 = vld [vmem:[#allocation3 + $0x2] sm:$0xff] }
 0x73f   :  { %v10281_v31 = vld [vmem:[#allocation3 + $0x9] sm:$0xff]  ;;  %5118 = vst.msk [vmem:[#allocation3 + $0x1f] sm:$0xff] %vm58_vm6, %v5110_v6  ;;  %v5087_v18 = vmul.f32 %v10249_v27, %v5061_v14  ;;  %v5064_v28 = vadd.f32 %v5063_v3, %v4999_v53  ;;  %v5065_v40 = vpop.f32.mrb[123].mxu1  ;;  %v5195_v32 = vpack.c.bf16 %v10279_v30, %v5187_v46  ;;  %v5123_v25 = vld [vmem:[#allocation3] sm:$0xff] }
 0x740   :  { %v5147_v36 = vpack.c.bf16 %v10281_v31, %v5139_v19  ;;  %v5172_v63 = vld [vmem:[#allocation3 + $0xa] sm:$0xff] }
 0x741   :  { %v5124_v34 = vld [vmem:[#allocation3 + $0x8] sm:$0xff]  ;;  %v5179_v11 = vpack.c.bf16 %v5172_v63, %v5171_v41  ;;  %v5103_v7 = vadd.f32 %v10254_v15, %v5087_v18  ;;  %v5088_v23 = vmul.f32 %v10249_v27, %v5064_v28  ;;  %5203 = vrot.lane.b32.xlu0 %v5195_v32, %s8150_s30 }
 0x742   :  { %v5131_v58 = vpack.c.bf16 %v5124_v34, %v5123_v25  ;;  %5155 = vrot.lane.b32.xlu1 %v5147_v36, %s8150_s30  ;;  %v5267_v39 = vld [vmem:[#allocation3 + $0x6] sm:$0xff]  ;;  %v5268_v53 = vld [vmem:[#allocation3 + $0xe] sm:$0xff] }
 0x743   :  { %5183 = vst.msk [vmem:[#allocation4 + $0x8] sm:$0xff] %vm58_vm6, %v5179_v11  ;;  %v5275_v52 = vpack.c.bf16 %v5268_v53, %v5267_v39  ;;  %v5219_v50 = vld [vmem:[#allocation3 + $0x4] sm:$0xff]  ;;  %v5220_v9 = vld [vmem:[#allocation3 + $0xc] sm:$0xff]  ;;  %v5111_v37 = vmax.f32 %v5103_v7, 0.0  ;;  %v5104_v49 = vadd.f32 %v10254_v15, %v5088_v23 }
 0x744   :  { %5135 = vst.msk [vmem:[#allocation4] sm:$0xff] %vm58_vm6, %v5131_v58  ;;  %v5227_v44 = vpack.c.bf16 %v5220_v9, %v5219_v50  ;;  %v5068_v20 = vpop.f32.mrb[124].mxu1  ;;  %v10300_v1 = vld [vmem:[#allocation3 + $0x13] sm:$0xff]  ;;  %v8044_v11 = vld [vmem:[%s10705_s4 + $0x6e8] sm:$0xff]  }
 0x745   :  { %5279 = vst.msk [vmem:[#allocation4 + $0x18] sm:$0xff] %vm58_vm6, %v5275_v52  ;;  %5119 = vst.msk [vmem:[#allocation3 + $0x37] sm:$0xff] %vm58_vm6, %v5111_v37  ;;  %v5112_v47 = vmax.f32 %v5104_v49, 0.0  ;;  %v5069_v5 = vadd.f32 %v5068_v20, %v10242_v21  ;;  %v5070_v59 = vpop.f32.mrb[125].mxu1  ;;  %v5173_v43 = vld [vmem:[#allocation3 + $0x12] sm:$0xff]  ;;  %v8045_v58 = vld [vmem:[%s10705_s4 + $0x6a8] sm:$0xff]  }
 0x746   :  { %v5125_v57 = vld [vmem:[#allocation3 + $0x10] sm:$0xff]  ;;  %5231 = vst.msk [vmem:[#allocation4 + $0x10] sm:$0xff] %vm58_vm6, %v5227_v44  ;;  %v5071_v22 = vpop.f32.mrb[126].mxu1  ;;  %v10303_v51 = vld [vmem:[#allocation3 + $0x1b] sm:$0xff]  ;;  %v5371_v60 = vpack.c.bf16 %v5173_v43, %v5172_v63 }
 0x747   :  { %v10305_v54 = vld [vmem:[#allocation3 + $0x11] sm:$0xff]  ;;  %v10307_v26 = vld [vmem:[#allocation3 + $0x19] sm:$0xff]  ;;  %v5323_v35 = vpack.c.bf16 %v5125_v57, %v5124_v34  ;;  %5120 = vst.msk [vmem:[#allocation3 + $0x3f] sm:$0xff] %vm58_vm6, %v5112_v47  ;;  %v5089_v21 = vmul.f32 %v10249_v27, %v5069_v5  ;;  %v5072_v13 = vadd.f32 %v5071_v22, %v10244_v38  ;;  %v5073_v45 = vpop.f32.mrb[127].mxu1  ;;  %v5196_v4 = vpack.c.bf16 %v10303_v51, %v10300_v1 }
 0x748   :  { %v5148_v29 = vpack.c.bf16 %v10307_v26, %v10305_v54  ;;  %v10316_v62 = vld [vmem:[#allocation3 + $0x1a] sm:$0xff]  ;;  %5375 = vst.msk [vmem:[#allocation4 + $0x28] sm:$0xff] %vm58_vm6, %v5371_v60  ;;  %v8048_v7 = vld [vmem:[%s10705_s4 + $0x6f0] sm:$0xff]  }
 0x749   :  { %v10318_v56 = vld [vmem:[#allocation3 + $0x18] sm:$0xff]  ;;  %5327 = vst.msk [vmem:[#allocation4 + $0x20] sm:$0xff] %vm58_vm6, %v5323_v35  ;;  %v5105_v16 = vadd.f32 %v10254_v15, %v5089_v21  ;;  %v5090_v48 = vmul.f32 %v10249_v27, %v5072_v13  ;;  %5205 = vrot.lane.b32.xlu0 %v5196_v4, %s8150_s30  ;;  %v5180_v8 = vpack.c.bf16 %v10316_v62, %v5173_v43  ;;  %v8041_v27 = vld [vmem:[%s10705_s4 + $0x6a0] sm:$0xff]   ;;  %v8049_v39 = vld [vmem:[%s10705_s4 + $0x6b0] sm:$0xff]  }
 0x74a   :  { %5157 = vrot.lane.b32.xlu1 %v5148_v29, %s8150_s30  ;;  %v5269_v38 = vld [vmem:[#allocation3 + $0x16] sm:$0xff]  ;;  %v5132_v17 = vpack.c.bf16 %v10318_v56, %v5125_v57  ;;  %v10335_v12 = vld [vmem:[#allocation3 + $0x1e] sm:$0xff]  ;;  %7671 = vmatpush3.bf16.msra.mxu1 %v8041_v27  ;;  %v10387_v60 = vld [vmem:[#allocation3 + $0xd] sm:$0xff] }
 0x74b   :  { %v5467_v61 = vpack.c.bf16 %v5269_v38, %v5268_v53  ;;  %v5113_v33 = vmax.f32 %v5105_v16, 0.0  ;;  %v5106_v55 = vadd.f32 %v10254_v15, %v5090_v48  ;;  %v5221_v6 = vld [vmem:[#allocation3 + $0x14] sm:$0xff]  ;;  %5184 = vst.msk [vmem:[#allocation4 + $0x48] sm:$0xff] %vm58_vm6, %v5180_v8  ;;  %v5276_v14 = vpack.c.bf16 %v10335_v12, %v5269_v38  ;;  %v10359_v42 = vld [vmem:[#allocation3 + $0x1c] sm:$0xff]  ;;  %7672 = vmatprep.subr.bf16.mxu1 %v8044_v11  ;;  %v5283_v13 = vld [vmem:[#allocation3 + $0x7] sm:$0xff] }
 0x74c   :  { %5136 = vst.msk [vmem:[#allocation4 + $0x40] sm:$0xff] %vm58_vm6, %v5132_v17  ;;  %v5419_v0 = vpack.c.bf16 %v5221_v6, %v5220_v9  ;;  %v5191_v46 = vld [vmem:[#allocation3 + $0x33] sm:$0xff]  ;;  %v5228_v23 = vpack.c.bf16 %v10359_v42, %v5221_v6  ;;  %v5235_v48 = vld [vmem:[#allocation3 + $0x5] sm:$0xff] }
 0x74d   :  { %5471 = vst.msk [vmem:[#allocation4 + $0x38] sm:$0xff] %vm58_vm6, %v5467_v61  ;;  %5121 = vst.msk [vmem:[#allocation3 + $0x47] sm:$0xff] %vm58_vm6, %v5113_v33  ;;  %v5114_v15 = vmax.f32 %v5106_v55, 0.0  ;;  %v5143_v19 = vld [vmem:[#allocation3 + $0x31] sm:$0xff]  ;;  %v5243_v61 = vpack.c.bf16 %v10387_v60, %v5235_v48  ;;  %v5286_v33 = vld [vmem:[#allocation3 + $0x1f] sm:$0xff] }
 0x74e   :  { %v10342_v3 = vld [vmem:[#allocation3 + $0x3b] sm:$0xff]  ;;  %v5175_v18 = vld [vmem:[#allocation3 + $0x32] sm:$0xff]  ;;  %5280 = vst.msk [vmem:[#allocation4 + $0x58] sm:$0xff] %vm58_vm6, %v5276_v14  ;;  %5423 = vst.msk [vmem:[#allocation4 + $0x30] sm:$0xff] %vm58_vm6, %v5419_v0  ;;  %7673 = vmatpush3.bf16.msra.mxu1 %v8045_v58 }
 0x74f   :  { %v10344_v41 = vld [vmem:[#allocation3 + $0x39] sm:$0xff]  ;;  %5122 = vst.msk [vmem:[#allocation3 + $0x4f] sm:$0xff] %vm58_vm6, %v5114_v15  ;;  %v5197_v28 = vpack.c.bf16 %v10342_v3, %v5191_v46  ;;  %v5127_v36 = vld [vmem:[#allocation3 + $0x30] sm:$0xff]  ;;  %7674 = vmatprep.subr.bf16.mxu1 %v8048_v7  ;;  %5232 = vst.msk [vmem:[#allocation4 + $0x50] sm:$0xff] %vm58_vm6, %v5228_v23 }
 0x750   :  { %v5149_v40 = vpack.c.bf16 %v10344_v41, %v5143_v19  ;;  %v5176_v32 = vld [vmem:[#allocation3 + $0x3a] sm:$0xff]  ;;  %v5284_v22 = vld [vmem:[#allocation3 + $0xf] sm:$0xff] }
 0x751   :  { %v5128_v63 = vld [vmem:[#allocation3 + $0x38] sm:$0xff]  ;;  %v5181_v25 = vpack.c.bf16 %v5176_v32, %v5175_v18  ;;  %5207 = vrot.lane.b32.xlu0 %v5197_v28, %s8150_s30  ;;  %v5291_v10 = vpack.c.bf16 %v5284_v22, %v5283_v13  ;;  %v8056_v27 = vld [vmem:[%s10705_s4 + $0x700] sm:$0xff]  }
 0x752   :  { %v5133_v34 = vpack.c.bf16 %v5128_v63, %v5127_v36  ;;  %5159 = vrot.lane.b32.xlu1 %v5149_v40, %s8150_s30  ;;  %v5271_v53 = vld [vmem:[#allocation3 + $0x36] sm:$0xff]  ;;  %v10370_v52 = vld [vmem:[#allocation3 + $0x3e] sm:$0xff]  ;;  %7675 = vmatpush3.bf16.msra.mxu1 %v8049_v39 }
 0x753   :  { %5185 = vst.msk [vmem:[#allocation4 + $0x88] sm:$0xff] %vm58_vm6, %v5181_v25  ;;  %v5277_v50 = vpack.c.bf16 %v10370_v52, %v5271_v53  ;;  %v5223_v29 = vld [vmem:[#allocation3 + $0x34] sm:$0xff]  ;;  %v5224_v16 = vld [vmem:[#allocation3 + $0x3c] sm:$0xff]  ;;  %v5414_v39 = vld [vmem:[#allocation3 + $0x24] sm:$0xff] }
 0x754   :  { %5137 = vst.msk [vmem:[#allocation4 + $0x80] sm:$0xff] %vm58_vm6, %v5133_v34  ;;  %v10374_v9 = vld [vmem:[#allocation3 + $0x43] sm:$0xff]  ;;  %v8052_v38 = vld [vmem:[%s10705_s4 + $0x6f8] sm:$0xff]   ;;  %v5229_v17 = vpack.c.bf16 %v5224_v16, %v5223_v29  ;;  %v8061_v29 = vld [vmem:[%s10705_s4 + $0x710] sm:$0xff]  }
 0x755   :  { %v5177_v37 = vld [vmem:[#allocation3 + $0x42] sm:$0xff]  ;;  %5281 = vst.msk [vmem:[#allocation4 + $0x98] sm:$0xff] %vm58_vm6, %v5277_v50  ;;  %v8053_v8 = vld [vmem:[%s10705_s4 + $0x6b8] sm:$0xff]   ;;  %7676 = vmatprep.subr.bf16.mxu1 %v8052_v38 }
 0x756   :  { %v5129_v49 = vld [vmem:[#allocation3 + $0x40] sm:$0xff]  ;;  %v10376_v44 = vld [vmem:[#allocation3 + $0x4b] sm:$0xff]  ;;  %v5373_v5 = vpack.c.bf16 %v5177_v37, %v5176_v32  ;;  %v5285_v6 = vld [vmem:[#allocation3 + $0x17] sm:$0xff]  ;;  %5233 = vst.msk [vmem:[#allocation4 + $0x90] sm:$0xff] %vm58_vm6, %v5229_v17  ;;  %7677 = vmatpush3.bf16.msra.mxu1 %v8053_v8 }
 0x757   :  { %v10378_v20 = vld [vmem:[#allocation3 + $0x41] sm:$0xff]  ;;  %v10380_v47 = vld [vmem:[#allocation3 + $0x49] sm:$0xff]  ;;  %v5325_v59 = vpack.c.bf16 %v5129_v49, %v5128_v63  ;;  %v5198_v43 = vpack.c.bf16 %v10376_v44, %v10374_v9  ;;  %v10416_v46 = vld [vmem:[#allocation3 + $0x15] sm:$0xff]  ;;  %v5292_v11 = vpack.c.bf16 %v5286_v33, %v5285_v6  ;;  %7678 = vmatprep.subr.bf16.mxu1 %v8056_v27  ;;  %v5387_v27 = vpack.c.bf16 %v10300_v1, %v10279_v30 }
 0x758   :  { %v5150_v57 = vpack.c.bf16 %v10380_v47, %v10378_v20  ;;  %v10389_v35 = vld [vmem:[#allocation3 + $0x4a] sm:$0xff]  ;;  %5377 = vst.msk [vmem:[#allocation4 + $0xa8] sm:$0xff] %vm58_vm6, %v5373_v5  ;;  %v10406_v55 = vld [vmem:[#allocation3 + $0x1d] sm:$0xff]  ;;  %v5370_v53 = vld [vmem:[#allocation3 + $0x52] sm:$0xff]  ;;  %v5339_v6 = vpack.c.bf16 %v10305_v54, %v10281_v31  ;;  %v5389_v1 = vpack.c.bf16 %v10374_v9, %v10342_v3 }
 0x759   :  { %v10391_v21 = vld [vmem:[#allocation3 + $0x48] sm:$0xff]  ;;  %5329 = vst.msk [vmem:[#allocation4 + $0xa0] sm:$0xff] %vm58_vm6, %v5325_v59  ;;  %5209 = vrot.lane.b32.xlu0 %v5198_v43, %s8150_s30  ;;  %v5182_v45 = vpack.c.bf16 %v10389_v35, %v5177_v37  ;;  %v8057_v19 = vld [vmem:[%s10705_s4 + $0x6c0] sm:$0xff]   ;;  %v5244_v58 = vpack.c.bf16 %v10406_v55, %v10416_v46  ;;  %v5374_v5 = vpack.c.bf16 %v5370_v53, %v10389_v35  ;;  %v5418_v59 = vld [vmem:[#allocation3 + $0x54] sm:$0xff] }
 0x75a   :  { %5161 = vrot.lane.b32.xlu1 %v5150_v57, %s8150_s30  ;;  %v5134_v4 = vpack.c.bf16 %v10391_v21, %v5129_v49  ;;  %v5273_v14 = vld [vmem:[#allocation3 + $0x46] sm:$0xff]  ;;  %v5274_v0 = vld [vmem:[#allocation3 + $0x4e] sm:$0xff]  ;;  %v10432_v37 = vld [vmem:[#allocation3 + $0x3d] sm:$0xff]  ;;  %v5420_v49 = vpack.c.bf16 %v5414_v39, %v10359_v42  ;;  %7679 = vmatpush3.bf16.msra.mxu1 %v8057_v19 }
 0x75b   :  { %5186 = vst.msk [vmem:[#allocation4 + $0xc8] sm:$0xff] %vm58_vm6, %v5182_v45  ;;  %v5225_v15 = vld [vmem:[#allocation3 + $0x44] sm:$0xff]  ;;  %v5278_v18 = vpack.c.bf16 %v5274_v0, %v5273_v14  ;;  %v5226_v28 = vld [vmem:[#allocation3 + $0x4c] sm:$0xff]  ;;  %v5469_v32 = vpack.c.bf16 %v5273_v14, %v10370_v52  ;;  %v5466_v57 = vld [vmem:[#allocation3 + $0x56] sm:$0xff] }
 0x75c   :  { %5138 = vst.msk [vmem:[#allocation4 + $0xc0] sm:$0xff] %vm58_vm6, %v5134_v4  ;;  %v5421_v40 = vpack.c.bf16 %v5225_v15, %v5224_v16  ;;  %v5230_v36 = vpack.c.bf16 %v5226_v28, %v5225_v15  ;;  %v8058_v63 = vld [vmem:[%s10705_s4 + $0x708] sm:$0xff]   ;;  %v5318_v34 = vld [vmem:[#allocation3 + $0x20] sm:$0xff]  ;;  %v5322_v52 = vld [vmem:[#allocation3 + $0x50] sm:$0xff] }
 0x75d   :  { %5299 = vrot.lane.b32.xlu0 %v5291_v10, %s8150_s30  ;;  %v5366_v25 = vld [vmem:[#allocation3 + $0x22] sm:$0xff]  ;;  %5282 = vst.msk [vmem:[#allocation4 + $0xd8] sm:$0xff] %vm58_vm6, %v5278_v18  ;;  %v5324_v23 = vpack.c.bf16 %v5318_v34, %v10318_v56  ;;  %5473 = vst.msk [vmem:[#allocation4 + $0xb8] sm:$0xff] %vm58_vm6, %v5469_v32  ;;  %v5422_v56 = vpack.c.bf16 %v5418_v59, %v5226_v28  ;;  %v5287_v22 = vld [vmem:[#allocation3 + $0x37] sm:$0xff]  ;;  %7680 = vmatprep.subr.bf16.mxu1 %v8058_v63 }
 0x75e   :  { %5251 = vrot.lane.b32.xlu1 %v5243_v61, %s8150_s30  ;;  %v5372_v7 = vpack.c.bf16 %v5366_v25, %v10316_v62  ;;  %5425 = vst.msk [vmem:[#allocation4 + $0xb0] sm:$0xff] %vm58_vm6, %v5421_v40  ;;  %v5288_v50 = vld [vmem:[#allocation3 + $0x3f] sm:$0xff]  ;;  %5234 = vst.msk [vmem:[#allocation4 + $0xd0] sm:$0xff] %vm58_vm6, %v5230_v36  ;;  %v5326_v62 = vpack.c.bf16 %v5322_v52, %v10391_v21  ;;  %v5239_v13 = vld [vmem:[#allocation3 + $0x35] sm:$0xff]  ;;  %v5470_v21 = vpack.c.bf16 %v5466_v57, %v5274_v0 }
 0x75f   :  { %5328 = vst.msk [vmem:[#allocation4 + $0x60] sm:$0xff] %vm58_vm6, %v5324_v23  ;;  %v5462_v43 = vld [vmem:[#allocation3 + $0x26] sm:$0xff]  ;;  %5424 = vst.msk [vmem:[#allocation4 + $0x70] sm:$0xff] %vm58_vm6, %v5420_v49  ;;  %v5293_v45 = vpack.c.bf16 %v5288_v50, %v5287_v22  ;;  %v5245_v4 = vpack.c.bf16 %v10432_v37, %v5239_v13  ;;  %v5290_v16 = vld [vmem:[#allocation3 + $0x4f] sm:$0xff]  ;;  %v5435_v0 = vpack.c.bf16 %v10416_v46, %v10387_v60 }
 0x760   :  { %5376 = vst.msk [vmem:[#allocation4 + $0x68] sm:$0xff] %vm58_vm6, %v5372_v7  ;;  %v8060_v42 = vld [vmem:[%s10705_s4 + $0x6c8] sm:$0xff]   ;;  %5378 = vst.msk [vmem:[#allocation4 + $0xe8] sm:$0xff] %vm58_vm6, %v5374_v5  ;;  %v5468_v35 = vpack.c.bf16 %v5462_v43, %v10335_v12  ;;  %v8063_v8 = vld [vmem:[%s10705_s4 + $0x6d0] sm:$0xff]  }
 0x761   :  { %5301 = vrot.lane.b32.xlu0 %v5292_v11, %s8150_s30  ;;  %5330 = vst.msk [vmem:[#allocation4 + $0xe0] sm:$0xff] %vm58_vm6, %v5326_v62  ;;  %5426 = vst.msk [vmem:[#allocation4 + $0xf0] sm:$0xff] %vm58_vm6, %v5422_v56  ;;  %v5242_v48 = vld [vmem:[#allocation3 + $0x4d] sm:$0xff]  ;;  %v5241_v38 = vld [vmem:[#allocation3 + $0x45] sm:$0xff]  ;;  %7681 = vmatpush3.bf16.msra.mxu1 %v8060_v42 }
 0x762   :  { %5253 = vrot.lane.b32.xlu1 %v5244_v58, %s8150_s30  ;;  %5472 = vst.msk [vmem:[#allocation4 + $0x78] sm:$0xff] %vm58_vm6, %v5468_v35  ;;  %5474 = vst.msk [vmem:[#allocation4 + $0xf8] sm:$0xff] %vm58_vm6, %v5470_v21  ;;  %v5289_v12 = vld [vmem:[#allocation3 + $0x47] sm:$0xff]  ;;  %v5246_v10 = vpack.c.bf16 %v5242_v48, %v5241_v38  ;;  %7682 = vmatprep.subr.bf16.mxu1 %v8061_v29  ;;  %v8064_v61 = vld [vmem:[%s10705_s4 + $0x718] sm:$0xff]   ;;  %v5437_v60 = vpack.c.bf16 %v5241_v38, %v10432_v37 }
 0x763   :  { %v5294_v17 = vpack.c.bf16 %v5290_v16, %v5289_v12  ;;  %v8066_v33 = vld [vmem:[%s10705_s4 + $0x6d8] sm:$0xff]   ;;  %v5382_v14 = vld [vmem:[#allocation3 + $0x23] sm:$0xff]  ;;  %v8036_v25 = vld [vmem:[%s10705_s4 + $0x670] sm:$0xff]  }
 0x764   :  { %v5388_v15 = vpack.c.bf16 %v5382_v14, %v10303_v51  ;;  %v5334_v19 = vld [vmem:[#allocation3 + $0x21] sm:$0xff]  ;;  %v5341_v51 = vpack.c.bf16 %v10378_v20, %v10344_v41  ;;  %v5386_v54 = vld [vmem:[#allocation3 + $0x53] sm:$0xff] }
 0x765   :  { %5303 = vrot.lane.b32.xlu0 %v5293_v45, %s8150_s30  ;;  %7683 = vmatpush3.bf16.msra.mxu1 %v8063_v8  ;;  %v5430_v18 = vld [vmem:[#allocation3 + $0x25] sm:$0xff]  ;;  %v5340_v30 = vpack.c.bf16 %v5334_v19, %v10307_v26  ;;  %v5390_v26 = vpack.c.bf16 %v5386_v54, %v10376_v44  ;;  %v5434_v46 = vld [vmem:[#allocation3 + $0x55] sm:$0xff] }
 0x766   :  { %5255 = vrot.lane.b32.xlu1 %v5245_v4, %s8150_s30  ;;  %7684 = vmatprep.subr.bf16.mxu1 %v8064_v61  ;;  %v5436_v31 = vpack.c.bf16 %v5430_v18, %v10406_v55  ;;  %v5338_v55 = vld [vmem:[#allocation3 + $0x51] sm:$0xff]  ;;  %v5438_v9 = vpack.c.bf16 %v5434_v46, %v5242_v48  ;;  %v8033_v44 = vld [vmem:[%s10705_s4 + $0x620] sm:$0xff]   ;;  %v8035_v63 = vld [vmem:[%s10705_s4 + $0x628] sm:$0xff]  }
 0x767   :  { %v5342_v3 = vpack.c.bf16 %v5338_v55, %v10380_v47  ;;  %v8034_v47 = vld [vmem:[%s10705_s4 + $0x668] sm:$0xff]   ;;  %v8037_v34 = vld [vmem:[%s10705_s4 + $0x630] sm:$0xff]   ;;  %v8038_v39 = vld [vmem:[%s10705_s4 + $0x678] sm:$0xff]  }
 0x768   :  { %v8039_v53 = vld [vmem:[%s10705_s4 + $0x638] sm:$0xff]   ;;  %v8042_v52 = vld [vmem:[%s10705_s4 + $0x680] sm:$0xff]   ;;  %v8046_v59 = vld [vmem:[%s10705_s4 + $0x688] sm:$0xff]  }
 0x769   :  { %5305 = vrot.lane.b32.xlu0 %v5294_v17, %s8150_s30  ;;  %7685 = vmatpush3.bf16.msra.mxu1 %v8066_v33  ;;  %v8043_v50 = vld [vmem:[%s10705_s4 + $0x640] sm:$0xff]   ;;  %v8047_v56 = vld [vmem:[%s10705_s4 + $0x648] sm:$0xff]   ;;  %v8050_v22 = vld [vmem:[%s10705_s4 + $0x690] sm:$0xff]  }
 0x76a   :  { %5257 = vrot.lane.b32.xlu1 %v5246_v10, %s8150_s30  ;;  %v8051_v13 = vld [vmem:[%s10705_s4 + $0x650] sm:$0xff]   ;;  %v8054_v4 = vld [vmem:[%s10705_s4 + $0x698] sm:$0xff]   ;;  %v8059_v38 = vld [vmem:[%s10705_s4 + $0x720] sm:$0xff]  }
 0x76b   :  { %v8055_v29 = vld [vmem:[%s10705_s4 + $0x658] sm:$0xff]   ;;  %v8062_v33 = vld [vmem:[%s10705_s4 + $0x728] sm:$0xff]   ;;  %v8065_v14 = vld [vmem:[%s10705_s4 + $0x730] sm:$0xff]  }
 0x76d   :  { %5395 = vrot.lane.b32.xlu0 %v5387_v27, %s8150_s30 }
 0x76e   :  { %5347 = vrot.lane.b32.xlu1 %v5339_v6, %s8150_s30 }
 0x771   :  { %5443 = vrot.lane.b32.xlu0 %v5435_v0, %s8150_s30 }
 0x772   :  { %5397 = vrot.lane.b32.xlu1 %v5388_v15, %s8150_s30 }
 0x775   :  { %5349 = vrot.lane.b32.xlu0 %v5340_v30, %s8150_s30  ;;  %v8067_v30 = vld [vmem:[%s10705_s4 + $0x738] sm:$0xff]  }
 0x776   :  { %5445 = vrot.lane.b32.xlu1 %v5436_v31, %s8150_s30 }
 0x779   :  { %5399 = vrot.lane.b32.xlu0 %v5389_v1, %s8150_s30 }
 0x77a   :  { %5351 = vrot.lane.b32.xlu1 %v5341_v51, %s8150_s30 }
 0x77d   :  { %5447 = vrot.lane.b32.xlu0 %v5437_v60, %s8150_s30  ;;  %v8068_v60 = vld [vmem:[%s10705_s4 + $0x740] sm:$0xff]  }
 0x77e   :  { %5401 = vrot.lane.b32.xlu1 %v5390_v26, %s8150_s30 }
 0x781   :  { %5353 = vrot.lane.b32.xlu0 %v5342_v3, %s8150_s30 }
 0x782   :  { %5449 = vrot.lane.b32.xlu1 %v5438_v9, %s8150_s30 }
 0x7b3   :  { %v5204_v41 = vpop.permute.xlu0 %5203 }
 0x7b4   :  { %v5156_v20 = vpop.permute.xlu1 %5155  ;;  %5215 = vst.msk [vmem:[#allocation4 + $0x8] sm:$0xff] %vm1614_vm14, %v5204_v41  ;;  %v8069_v41 = vld [vmem:[%s10705_s4 + $0x748] sm:$0xff]  }
 0x7b5   :  { %5167 = vst.msk [vmem:[#allocation4] sm:$0xff] %vm1614_vm14, %v5156_v20 }
 0x7bb   :  { %v5206_v28 = vpop.permute.xlu0 %5205  ;;  %v5476_v32 = vld [vmem:[#allocation4 + $0x8] sm:$0xff] }
 0x7bc   :  { %v5158_v40 = vpop.permute.xlu1 %5157  ;;  %v5475_v36 = vld [vmem:[#allocation4] sm:$0xff]  ;;  %5216 = vst.msk [vmem:[#allocation4 + $0x48] sm:$0xff] %vm1614_vm14, %v5206_v28  ;;  %6032 = vmatprep.mubr.bf16.mxu0 %v5476_v32 }
 0x7bd   :  { %5168 = vst.msk [vmem:[#allocation4 + $0x40] sm:$0xff] %vm1614_vm14, %v5158_v40  ;;  %6033 = vmatmul.mubr.bf16.vlgmr.msra.gmra.mrb[96].mxu0 %v5475_v36  ;;  %v8070_v40 = vld [vmem:[%s10705_s4 + $0x750] sm:$0xff]  }
 0x7be   :  { %7631 = vmatpush3.bf16.msra.mxu0 %v8033_v44 }
 0x7bf   :  { %7632 = vmatprep.subr.bf16.mxu0 %v8034_v47 }
 0x7c2   :  { %7633 = vmatpush3.bf16.msra.mxu0 %v8035_v63 }
 0x7c3   :  { %v5208_v11 = vpop.permute.xlu0 %5207  ;;  %v5484_v7 = vld [vmem:[#allocation4 + $0x48] sm:$0xff]  ;;  %7634 = vmatprep.subr.bf16.mxu0 %v8036_v25  ;;  %v5482_v25 = vld [vmem:[#allocation4 + $0x38] sm:$0xff] }
 0x7c4   :  { %v5160_v58 = vpop.permute.xlu1 %5159  ;;  %v5483_v23 = vld [vmem:[#allocation4 + $0x40] sm:$0xff]  ;;  %5217 = vst.msk [vmem:[#allocation4 + $0x88] sm:$0xff] %vm1614_vm14, %v5208_v11  ;;  %6040 = vmatprep.mubr.bf16.mxu0 %v5484_v7 }
 0x7c5   :  { %5169 = vst.msk [vmem:[#allocation4 + $0x80] sm:$0xff] %vm1614_vm14, %v5160_v58  ;;  %6041 = vmatmul.mubr.bf16.gmra.mrb[100].mxu0 %v5483_v23  ;;  %v8072_v7 = vld [vmem:[%s10705_s4 + $0x760] sm:$0xff]   ;;  %v8073_v23 = vld [vmem:[%s10705_s4 + $0x768] sm:$0xff]  }
 0x7c6   :  { %7635 = vmatpush3.bf16.msra.mxu0 %v8037_v34  ;;  %v8071_v34 = vld [vmem:[%s10705_s4 + $0x758] sm:$0xff]  }
 0x7c7   :  { %7636 = vmatprep.subr.bf16.mxu0 %v8038_v39 }
 0x7ca   :  { %7637 = vmatpush3.bf16.msra.mxu0 %v8039_v53  ;;  %v8074_v53 = vld [vmem:[%s10705_s4 + $0x770] sm:$0xff]  }
 0x7cb   :  { %v5210_v37 = vpop.permute.xlu0 %5209  ;;  %v5492_v5 = vld [vmem:[#allocation4 + $0x88] sm:$0xff]  ;;  %7638 = vmatprep.subr.bf16.mxu0 %v8042_v52  ;;  %v8075_v52 = vld [vmem:[%s10705_s4 + $0x778] sm:$0xff]  }
 0x7cc   :  { %v5162_v49 = vpop.permute.xlu1 %5161  ;;  %v5491_v62 = vld [vmem:[#allocation4 + $0x80] sm:$0xff]  ;;  %5218 = vst.msk [vmem:[#allocation4 + $0xc8] sm:$0xff] %vm1614_vm14, %v5210_v37  ;;  %6048 = vmatprep.mubr.bf16.mxu0 %v5492_v5  ;;  %v5490_v37 = vld [vmem:[#allocation4 + $0x78] sm:$0xff] }
 0x7cd   :  { %5170 = vst.msk [vmem:[#allocation4 + $0xc0] sm:$0xff] %vm1614_vm14, %v5162_v49  ;;  %6049 = vmatmul.mubr.bf16.gmra.mrb[104].mxu0 %v5491_v62  ;;  %v5498_v5 = vld [vmem:[#allocation4 + $0xb8] sm:$0xff] }
 0x7ce   :  { %7639 = vmatpush3.bf16.msra.mxu0 %v8043_v50 }
 0x7cf   :  { %v5300_v43 = vpop.permute.xlu0 %5299  ;;  %7640 = vmatprep.subr.bf16.mxu0 %v8046_v59  ;;  %v5506_v59 = vld [vmem:[#allocation4 + $0xf8] sm:$0xff] }
 0x7d0   :  { %v5252_v57 = vpop.permute.xlu1 %5251  ;;  %5311 = vst.msk [vmem:[#allocation4 + $0x18] sm:$0xff] %vm1614_vm14, %v5300_v43  ;;  %v6330_v43 = vld [vmem:[%s10708_s7 + $0x8] sm:$0xff] }
 0x7d1   :  { %5263 = vst.msk [vmem:[#allocation4 + $0x10] sm:$0xff] %vm1614_vm14, %v5252_v57  ;;  %v8151_v57 = vmov 0.0|0.0  }
 0x7d2   :  { %7641 = vmatpush3.bf16.msra.mxu0 %v8047_v56 }
 0x7d3   :  { %v5302_v42 = vpop.permute.xlu0 %5301  ;;  %v5500_v21 = vld [vmem:[#allocation4 + $0xc8] sm:$0xff]  ;;  %7642 = vmatprep.subr.bf16.mxu0 %v8050_v22 }
 0x7d4   :  { %v5254_v35 = vpop.permute.xlu1 %5253  ;;  %v5499_v45 = vld [vmem:[#allocation4 + $0xc0] sm:$0xff]  ;;  %5312 = vst.msk [vmem:[#allocation4 + $0x58] sm:$0xff] %vm1614_vm14, %v5302_v42  ;;  %6056 = vmatprep.mubr.bf16.mxu0 %v5500_v21  ;;  %v6332_v42 = vld [vmem:[%s10708_s7 + $0x18] sm:$0xff] }
 0x7d5   :  { %5264 = vst.msk [vmem:[#allocation4 + $0x50] sm:$0xff] %vm1614_vm14, %v5254_v35  ;;  %6057 = vmatmul.mubr.bf16.gmra.mrb[108].mxu0 %v5499_v45  ;;  %v6333_v35 = vld [vmem:[%s10708_s7 + $0x20] sm:$0xff]  ;;  %v6334_v45 = vld [vmem:[%s10708_s7 + $0x28] sm:$0xff] }
 0x7d6   :  { %7643 = vmatpush3.bf16.msra.mxu0 %v8051_v13  ;;  %v6331_v13 = vld [vmem:[%s10708_s7 + $0x10] sm:$0xff] }
 0x7d7   :  { %v5304_v16 = vpop.permute.xlu0 %5303  ;;  %7644 = vmatprep.subr.bf16.mxu0 %v8054_v4  ;;  %v5478_v12 = vld [vmem:[#allocation4 + $0x18] sm:$0xff]  ;;  %v7758_v21 = vpack.c.bf16 %v6332_v42, %v6331_v13 }
 0x7d8   :  { %v5256_v48 = vpop.permute.xlu1 %5255  ;;  %5313 = vst.msk [vmem:[#allocation4 + $0x98] sm:$0xff] %vm1614_vm14, %v5304_v16  ;;  %6097 = vmatprep.mubr.bf16.mxu0 %v5478_v12  ;;  %v5477_v10 = vld [vmem:[#allocation4 + $0x10] sm:$0xff]  ;;  %v7761_v16 = vpack.c.bf16 %v6334_v45, %v6333_v35 }
 0x7d9   :  { %5265 = vst.msk [vmem:[#allocation4 + $0x90] sm:$0xff] %vm1614_vm14, %v5256_v48 }
 0x7da   :  { %7645 = vmatpush3.bf16.msra.mxu0 %v8055_v29 }
 0x7db   :  { %v5306_v8 = vpop.permute.xlu0 %5305  ;;  %6195 = vmatprep.subr.bf16.mxu0 %v8901_v24  ;;  %v5486_v61 = vld [vmem:[#allocation4 + $0x58] sm:$0xff] }
 0x7dc   :  { %v5258_v17 = vpop.permute.xlu1 %5257  ;;  %5314 = vst.msk [vmem:[#allocation4 + $0xd8] sm:$0xff] %vm1614_vm14, %v5306_v8  ;;  %v5485_v19 = vld [vmem:[#allocation4 + $0x50] sm:$0xff]  ;;  %v6336_v8 = vld [vmem:[%s10708_s7 + $0x38] sm:$0xff] }
 0x7dd   :  { %5266 = vst.msk [vmem:[#allocation4 + $0xd0] sm:$0xff] %vm1614_vm14, %v5258_v17  ;;  %6098 = vmatmul.mubr.bf16.vlgmr.msra.gmra.mrb[112].mxu0 %v5477_v10 }
 0x7de   :  { %6196 = vmatpush1.bf16.msra.mxu0 %v8059_v38  ;;  %6105 = vmatprep.mubr.bf16.mxu0 %v5486_v61  ;;  %v6335_v38 = vld [vmem:[%s10708_s7 + $0x30] sm:$0xff] }
 0x7df   :  { %v5396_v27 = vpop.permute.xlu0 %5395  ;;  %6197 = vmatprep.subr.bf16.mxu0 %v8901_v24  ;;  %v5494_v18 = vld [vmem:[#allocation4 + $0x98] sm:$0xff]  ;;  %v7764_v61 = vpack.c.bf16 %v6336_v8, %v6335_v38 }
 0x7e0   :  { %v5348_v6 = vpop.permute.xlu1 %5347  ;;  %5407 = vst.msk [vmem:[#allocation4 + $0x28] sm:$0xff] %vm1614_vm14, %v5396_v27  ;;  %v5493_v3 = vld [vmem:[#allocation4 + $0x90] sm:$0xff] }
 0x7e1   :  { %5359 = vst.msk [vmem:[#allocation4 + $0x20] sm:$0xff] %vm1614_vm14, %v5348_v6 }
 0x7e2   :  { %6198 = vmatpush1.bf16.msra.mxu0 %v8062_v33 }
 0x7e3   :  { %v5444_v0 = vpop.permute.xlu0 %5443  ;;  %6199 = vmatprep.subr.bf16.mxu0 %v8901_v24  ;;  %v5502_v9 = vld [vmem:[#allocation4 + $0xd8] sm:$0xff] }
 0x7e4   :  { %v5398_v15 = vpop.permute.xlu1 %5397  ;;  %5455 = vst.msk [vmem:[#allocation4 + $0x30] sm:$0xff] %vm1614_vm14, %v5444_v0  ;;  %v5501_v63 = vld [vmem:[#allocation4 + $0xd0] sm:$0xff] }
 0x7e5   :  { %5408 = vst.msk [vmem:[#allocation4 + $0x68] sm:$0xff] %vm1614_vm14, %v5398_v15  ;;  %6106 = vmatmul.mubr.bf16.gmra.mrb[116].mxu0 %v5485_v19 }
 0x7e6   :  { %6200 = vmatpush1.bf16.msra.mxu0 %v8065_v14  ;;  %6113 = vmatprep.mubr.bf16.mxu0 %v5494_v18 }
 0x7e7   :  { %v5350_v31 = vpop.permute.xlu0 %5349  ;;  %v5480_v51 = vld [vmem:[#allocation4 + $0x28] sm:$0xff]  ;;  %6201 = vmatprep.subr.bf16.mxu0 %v8901_v24 }
 0x7e8   :  { %v5446_v1 = vpop.permute.xlu1 %5445  ;;  %v5479_v54 = vld [vmem:[#allocation4 + $0x20] sm:$0xff]  ;;  %5360 = vst.msk [vmem:[#allocation4 + $0x60] sm:$0xff] %vm1614_vm14, %v5350_v31  ;;  %6162 = vmatprep.mubr.bf16.mxu1 %v5480_v51 }
 0x7e9   :  { %5456 = vst.msk [vmem:[#allocation4 + $0x70] sm:$0xff] %vm1614_vm14, %v5446_v1  ;;  %6163 = vmatmul.mubr.bf16.vlgmr.msra.gmra.mrb[128].mxu1 %v5479_v54 }
 0x7ea   :  { %6202 = vmatpush1.bf16.msra.mxu0 %v8067_v30 }
 0x7eb   :  { %v5400_v26 = vpop.permute.xlu0 %5399  ;;  %6203 = vmatprep.subr.bf16.mxu0 %v8901_v24  ;;  %v5481_v50 = vld [vmem:[#allocation4 + $0x30] sm:$0xff] }
 0x7ec   :  { %v5352_v55 = vpop.permute.xlu1 %5351  ;;  %v5488_v46 = vld [vmem:[#allocation4 + $0x68] sm:$0xff]  ;;  %5409 = vst.msk [vmem:[#allocation4 + $0xa8] sm:$0xff] %vm1614_vm14, %v5400_v26 }
 0x7ed   :  { %5361 = vst.msk [vmem:[#allocation4 + $0xa0] sm:$0xff] %vm1614_vm14, %v5352_v55  ;;  %6170 = vmatprep.mubr.bf16.mxu1 %v5488_v46  ;;  %6114 = vmatmul.mubr.bf16.gmra.mrb[120].mxu0 %v5493_v3 }
 0x7ee   :  { %6204 = vmatpush1.bf16.msra.mxu0 %v8068_v60  ;;  %6121 = vmatprep.mubr.bf16.mxu0 %v5502_v9 }
 0x7ef   :  { %v5448_v20 = vpop.permute.xlu0 %5447  ;;  %6205 = vmatprep.subr.bf16.mxu0 %v8901_v24  ;;  %v5487_v28 = vld [vmem:[#allocation4 + $0x60] sm:$0xff] }
 0x7f0   :  { %v5402_v44 = vpop.permute.xlu1 %5401  ;;  %5457 = vst.msk [vmem:[#allocation4 + $0xb0] sm:$0xff] %vm1614_vm14, %v5448_v20  ;;  %v5489_v49 = vld [vmem:[#allocation4 + $0x70] sm:$0xff] }
 0x7f1   :  { %5410 = vst.msk [vmem:[#allocation4 + $0xe8] sm:$0xff] %vm1614_vm14, %v5402_v44  ;;  %6171 = vmatmul.mubr.bf16.gmra.mrb[132].mxu1 %v5487_v28 }
 0x7f2   :  { %6206 = vmatpush1.bf16.msra.mxu0 %v8069_v41 }
 0x7f3   :  { %v5354_v32 = vpop.permute.xlu0 %5353  ;;  %v5496_v47 = vld [vmem:[#allocation4 + $0xa8] sm:$0xff]  ;;  %6207 = vmatprep.subr.bf16.mxu0 %v8901_v24 }
 0x7f4   :  { %v5450_v36 = vpop.permute.xlu1 %5449  ;;  %5362 = vst.msk [vmem:[#allocation4 + $0xe0] sm:$0xff] %vm1614_vm14, %v5354_v32  ;;  %6178 = vmatprep.mubr.bf16.mxu1 %v5496_v47  ;;  %v5495_v11 = vld [vmem:[#allocation4 + $0xa0] sm:$0xff] }
 0x7f5   :  { %5458 = vst.msk [vmem:[#allocation4 + $0xf0] sm:$0xff] %vm1614_vm14, %v5450_v36  ;;  %6122 = vmatmul.mubr.bf16.gmra.mrb[124].mxu0 %v5501_v63 }
 0x7f6   :  { %6208 = vmatpush1.bf16.msra.mxu0 %v8070_v40  ;;  %7178 = vmatprep.mubr.msk.bf16.mxu0 %vm58_vm6, %v5482_v25 }
 0x7f7   :  { %6209 = vmatprep.subr.bf16.mxu0 %v8901_v24  ;;  %v5497_v62 = vld [vmem:[#allocation4 + $0xb0] sm:$0xff] }
 0x7f8   :  { %v5504_v58 = vld [vmem:[#allocation4 + $0xe8] sm:$0xff] }
 0x7f9   :  { %6179 = vmatmul.mubr.bf16.gmra.mrb[136].mxu1 %v5495_v11 }
 0x7fa   :  { %6210 = vmatpush1.bf16.msra.mxu0 %v8071_v34  ;;  %6186 = vmatprep.mubr.bf16.mxu1 %v5504_v58 }
 0x7fb   :  { %6211 = vmatprep.subr.bf16.mxu0 %v8901_v24  ;;  %v5503_v39 = vld [vmem:[#allocation4 + $0xe0] sm:$0xff] }
 0x7fc   :  { %v5505_v56 = vld [vmem:[#allocation4 + $0xf0] sm:$0xff] }
 0x7fe   :  { %6212 = vmatpush1.bf16.msra.mxu0 %v8072_v7 }
 0x7ff   :  { %6213 = vmatprep.subr.bf16.mxu0 %v8901_v24 }
 0x801   :  { %6187 = vmatmul.mubr.bf16.gmra.mrb[140].mxu1 %v5503_v39 }
 0x802   :  { %6214 = vmatpush1.bf16.msra.mxu0 %v8073_v23 }
 0x803   :  { %6215 = vmatprep.subr.bf16.mxu0 %v8901_v24 }
 0x806   :  { %6216 = vmatpush1.bf16.msra.mxu0 %v8074_v53 }
 0x807   :  { %6217 = vmatprep.subr.bf16.mxu0 %v8901_v24  ;;  %v6329_v24 = vld [vmem:[%s10708_s7] sm:$0xff] }
 0x808   :  { %v7755_v22 = vpack.c.bf16 %v6330_v43, %v6329_v24 }
 0x80a   :  { %6218 = vmatpush1.bf16.msra.mxu0 %v8075_v52 }
 0x80b   :  { %7754 = vmatprep.subr.bf16.mxu0 %v8151_v57 }
 0x80d   :  { %6228 = vmatmul.mubr.bf16.vlgmr.msra.gmra.mrb[128].mxu0 %v5481_v50 }
 0x80e   :  { %7179 = vmatprep.mubr.msk.bf16.mxu0 %vm58_vm6, %v5490_v37  ;;  %7756 = vmatpush3.bf16.msra.mxu0 %v7755_v22 }
 0x80f   :  { %7757 = vmatprep.subr.bf16.mxu0 %v8151_v57 }
 0x812   :  { %7759 = vmatpush3.bf16.msra.mxu0 %v7758_v21 }
 0x813   :  { %7760 = vmatprep.subr.bf16.mxu0 %v8151_v57 }
 0x815   :  { %6236 = vmatmul.mubr.bf16.gmra.mrb[132].mxu0 %v5489_v49 }
 0x816   :  { %7180 = vmatprep.mubr.msk.bf16.mxu0 %vm58_vm6, %v5498_v5  ;;  %7762 = vmatpush3.bf16.msra.mxu0 %v7761_v16 }
 0x817   :  { %7763 = vmatprep.subr.bf16.mxu0 %v8151_v57 }
 0x81a   :  { %7765 = vmatpush3.bf16.msra.mxu0 %v7764_v61 }
 0x81b   :  { %7766 = vmatprep.subr.bf16.mxu0 %v8151_v57 }
 0x81d   :  { %6244 = vmatmul.mubr.bf16.gmra.mrb[136].mxu0 %v5497_v62 }
 0x81e   :  { %7181 = vmatprep.mubr.msk.bf16.mxu0 %vm58_vm6, %v5506_v59 }
 0x825   :  { %6252 = vmatmul.mubr.bf16.gmra.mrb[140].mxu0 %v5505_v56 }
 0x826   :  { %7740 = vmatprep.mubr.msk.f32.mxu0 %vm8152_vm2, %v8118_v2 }
 0x890   :  { %v7606_v4 = vpop.f32.mrb[96].mxu0 }
 0x891   :  { %v7607_v29 = vpop.f32.mrb[97].mxu0 }
 0x892   :  { %v7608_v48 = vadd.f32 %v7607_v29, %v7606_v4  ;;  %v7609_v12 = vpop.f32.mrb[98].mxu0 }
 0x893   :  { %v7610_v17 = vpop.f32.mrb[99].mxu0 }
 0x894   :  { %v7611_v10 = vadd.f32 %v7610_v17, %v7609_v12 }
 0x898   :  { %v7612_v33 = vpop.f32.mrb[100].mxu0 }
 0x899   :  { %v7613_v27 = vpop.f32.mrb[101].mxu0 }
 0x89a   :  { %v7614_v6 = vadd.f32 %v7613_v27, %v7612_v33  ;;  %v7615_v14 = vpop.f32.mrb[102].mxu0 }
 0x89b   :  { %v7616_v0 = vpop.f32.mrb[103].mxu0 }
 0x89c   :  { %v7617_v15 = vadd.f32 %v7616_v0, %v7615_v14 }
 0x8a0   :  { %v7618_v19 = vpop.f32.mrb[104].mxu0 }
 0x8a1   :  { %v7619_v18 = vpop.f32.mrb[105].mxu0 }
 0x8a2   :  { %v7620_v30 = vadd.f32 %v7619_v18, %v7618_v19  ;;  %v7621_v31 = vpop.f32.mrb[106].mxu0 }
 0x8a3   :  { %v7622_v1 = vpop.f32.mrb[107].mxu0 }
 0x8a4   :  { %v7623_v51 = vadd.f32 %v7622_v1, %v7621_v31 }
 0x8a8   :  { %v7624_v54 = vpop.f32.mrb[108].mxu0 }
 0x8a9   :  { %v7625_v60 = vpop.f32.mrb[109].mxu0 }
 0x8aa   :  { %v7626_v26 = vadd.f32 %v7625_v60, %v7624_v54  ;;  %v7627_v55 = vpop.f32.mrb[110].mxu0 }
 0x8ab   :  { %v7628_v46 = vpop.f32.mrb[111].mxu0 }
 0x8ac   :  { %v7629_v3 = vadd.f32 %v7628_v46, %v7627_v55 }
 0x8b0   :  { %v7646_v9 = vpop.f32.mrb[112].mxu0 }
 0x8b1   :  { %v7647_v41 = vpop.f32.mrb[113].mxu0 }
 0x8b2   :  { %v7648_v20 = vadd.f32 %v7647_v41, %v7646_v9  ;;  %v7649_v44 = vpop.f32.mrb[114].mxu0 }
 0x8b3   :  { %v7650_v28 = vpop.f32.mrb[115].mxu0 }
 0x8b4   :  { %v6100_v40 = vadd.f32 %v7648_v20, %v7608_v48  ;;  %v7651_v32 = vadd.f32 %v7650_v28, %v7649_v44 }
 0x8b6   :  { %v6103_v36 = vadd.f32 %v7651_v32, %v7611_v10  ;;  %v7185_v32 = vld [vmem:[%s10707_s6 + $0x3] ss:$0 sm:$0xff] }
 0x8b8   :  { %v7652_v47 = vpop.f32.mrb[116].mxu0 }
 0x8b9   :  { %v7653_v63 = vpop.f32.mrb[117].mxu0 }
 0x8ba   :  { %v7654_v25 = vadd.f32 %v7653_v63, %v7652_v47  ;;  %v7655_v34 = vpop.f32.mrb[118].mxu0 }
 0x8bb   :  { %v7656_v11 = vpop.f32.mrb[119].mxu0 }
 0x8bc   :  { %v6108_v58 = vadd.f32 %v7654_v25, %v7614_v6  ;;  %v7657_v7 = vadd.f32 %v7656_v11, %v7655_v34  ;;  %v7686_v23 = vpop.f32.mrb[128].mxu1 }
 0x8bd   :  { %v7687_v39 = vpop.f32.mrb[129].mxu1 }
 0x8be   :  { %v6111_v53 = vadd.f32 %v7657_v7, %v7617_v15  ;;  %v7688_v52 = vadd.f32 %v7687_v39, %v7686_v23  ;;  %v7689_v50 = vpop.f32.mrb[130].mxu1 }
 0x8bf   :  { %v7690_v37 = vpop.f32.mrb[131].mxu1 }
 0x8c0   :  { %v7691_v49 = vadd.f32 %v7690_v37, %v7689_v50  ;;  %v7658_v5 = vpop.f32.mrb[120].mxu0  ;;  %v6165_v62 = vadd.f32 %v7688_v52, %v6100_v40 }
 0x8c1   :  { %v7659_v59 = vpop.f32.mrb[121].mxu0 }
 0x8c2   :  { %v7660_v56 = vadd.f32 %v7659_v59, %v7658_v5  ;;  %v7661_v24 = vpop.f32.mrb[122].mxu0  ;;  %v6168_v43 = vadd.f32 %v7691_v49, %v6103_v36 }
 0x8c3   :  { %v7662_v22 = vpop.f32.mrb[123].mxu0 }
 0x8c4   :  { %v6116_v13 = vadd.f32 %v7660_v56, %v7620_v30  ;;  %v7663_v42 = vadd.f32 %v7662_v22, %v7661_v24  ;;  %v7692_v35 = vpop.f32.mrb[132].mxu1 }
 0x8c5   :  { %v7693_v21 = vpop.f32.mrb[133].mxu1 }
 0x8c6   :  { %v6119_v45 = vadd.f32 %v7663_v42, %v7623_v51  ;;  %v7694_v4 = vadd.f32 %v7693_v21, %v7692_v35  ;;  %v7695_v29 = vpop.f32.mrb[134].mxu1 }
 0x8c7   :  { %v7696_v16 = vpop.f32.mrb[135].mxu1 }
 0x8c8   :  { %v7697_v48 = vadd.f32 %v7696_v16, %v7695_v29  ;;  %v7664_v12 = vpop.f32.mrb[124].mxu0  ;;  %v6173_v38 = vadd.f32 %v7694_v4, %v6108_v58 }
 0x8c9   :  { %v7665_v8 = vpop.f32.mrb[125].mxu0 }
 0x8ca   :  { %v7666_v17 = vadd.f32 %v7665_v8, %v7664_v12  ;;  %v7667_v10 = vpop.f32.mrb[126].mxu0  ;;  %v6176_v61 = vadd.f32 %v7697_v48, %v6111_v53 }
 0x8cb   :  { %v7668_v33 = vpop.f32.mrb[127].mxu0 }
 0x8cc   :  { %v6124_v27 = vadd.f32 %v7666_v17, %v7626_v26  ;;  %v7669_v6 = vadd.f32 %v7668_v33, %v7667_v10  ;;  %v7698_v14 = vpop.f32.mrb[136].mxu1  ;;  %v7183_v26 = vld [vmem:[%s10706_s5 + $0x3] ss:$0 sm:$0xff] }
 0x8cd   :  { %v7699_v0 = vpop.f32.mrb[137].mxu1 }
 0x8ce   :  { %v6127_v15 = vadd.f32 %v7669_v6, %v7629_v3  ;;  %v7700_v19 = vadd.f32 %v7699_v0, %v7698_v14  ;;  %v7701_v18 = vpop.f32.mrb[138].mxu1 }
 0x8cf   :  { %v7702_v30 = vpop.f32.mrb[139].mxu1 }
 0x8d0   :  { %v7703_v31 = vadd.f32 %v7702_v30, %v7701_v18  ;;  %v6181_v1 = vadd.f32 %v7700_v19, %v6116_v13 }
 0x8d2   :  { %v6184_v51 = vadd.f32 %v7703_v31, %v6119_v45 }
 0x8d4   :  { %v7704_v54 = vpop.f32.mrb[140].mxu1 }
 0x8d5   :  { %v7705_v60 = vpop.f32.mrb[141].mxu1 }
 0x8d6   :  { %v7706_v55 = vadd.f32 %v7705_v60, %v7704_v54  ;;  %v7707_v46 = vpop.f32.mrb[142].mxu1 }
 0x8d7   :  { %v7708_v9 = vpop.f32.mrb[143].mxu1 }
 0x8d8   :  { %v7709_v41 = vadd.f32 %v7708_v9, %v7707_v46  ;;  %v6189_v20 = vadd.f32 %v7706_v55, %v6124_v27 }
 0x8da   :  { %v6192_v44 = vadd.f32 %v7709_v41, %v6127_v15 }
 0x8e0   :  { %v6229_v28 = vpop.f32.mrb[128].mxu0 }
 0x8e1   :  { %v6230_v3 = vadd.f32 %v6229_v28, %v6165_v62  ;;  %v6231_v40 = vpop.f32.mrb[129].mxu0 }
 0x8e2   :  { %v6232_v36 = vpop.f32.mrb[130].mxu0 }
 0x8e3   :  { %v6268_v47 = vmul.f32 %v7183_v26, %v6230_v3  ;;  %v6233_v63 = vadd.f32 %v6232_v36, %v6168_v43  ;;  %v6234_v25 = vpop.f32.mrb[131].mxu0 }
 0x8e5   :  { %v6284_v34 = vadd.f32 %v7185_v32, %v6268_v47  ;;  %v6269_v11 = vmul.f32 %v7183_v26, %v6233_v63 }
 0x8e7   :  { %v6292_v58 = vmax.f32 %v6284_v34, 0.0  ;;  %v6285_v7 = vadd.f32 %v7185_v32, %v6269_v11 }
 0x8e8   :  { %v6237_v23 = vpop.f32.mrb[132].mxu0 }
 0x8e9   :  { %v6293_v39 = vmax.f32 %v6285_v7, 0.0  ;;  %v6238_v53 = vadd.f32 %v6237_v23, %v6173_v38  ;;  %v6239_v52 = vpop.f32.mrb[133].mxu0  ;;  %v6300_v37 = vsel %vm58_vm6, %v6292_v58, 0.0 }
 0x8ea   :  { %v6240_v50 = vpop.f32.mrb[134].mxu0 }
 0x8eb   :  { %v6301_v49 = vsel %vm58_vm6, %v6293_v39, 0.0  ;;  %v6270_v5 = vmul.f32 %v7183_v26, %v6238_v53  ;;  %v6241_v62 = vadd.f32 %v6240_v50, %v6176_v61  ;;  %v6242_v59 = vpop.f32.mrb[135].mxu0 }
 0x8ec   :  { %v6302_v56 = vadd.f32 %v6301_v49, %v6300_v37 }
 0x8ed   :  { %v6286_v24 = vadd.f32 %v7185_v32, %v6270_v5  ;;  %v6271_v43 = vmul.f32 %v7183_v26, %v6241_v62  ;;  %v6423_v5 = vld [vmem:[%s10710_s9 + $0x10] sm:$0xff]  ;;  %v6424_v62 = vld [vmem:[%s10710_s9 + $0x18] sm:$0xff] }
 0x8ee   :  { %v7770_v59 = vpack.c.bf16 %v6424_v62, %v6423_v5 }
 0x8ef   :  { %v6294_v22 = vmax.f32 %v6286_v24, 0.0  ;;  %v6287_v13 = vadd.f32 %v7185_v32, %v6271_v43 }
 0x8f0   :  { %v6245_v42 = vpop.f32.mrb[136].mxu0 }
 0x8f1   :  { %v6303_v35 = vsel %vm58_vm6, %v6294_v22, 0.0  ;;  %v6295_v21 = vmax.f32 %v6287_v13, 0.0  ;;  %v6246_v45 = vadd.f32 %v6245_v42, %v6181_v1  ;;  %v6247_v4 = vpop.f32.mrb[137].mxu0 }
 0x8f2   :  { %v6304_v29 = vadd.f32 %v6303_v35, %v6302_v56  ;;  %v6248_v16 = vpop.f32.mrb[138].mxu0  ;;  %v7186_v56 = vld [vmem:[%s10709_s8] ss:$0 sm:$0xff] }
 0x8f3   :  { %v6305_v48 = vsel %vm58_vm6, %v6295_v21, 0.0  ;;  %v6272_v12 = vmul.f32 %v7183_v26, %v6246_v45  ;;  %v6249_v38 = vadd.f32 %v6248_v16, %v6184_v51  ;;  %v6250_v8 = vpop.f32.mrb[139].mxu0 }
 0x8f4   :  { %v6306_v17 = vadd.f32 %v6305_v48, %v6304_v29 }
 0x8f5   :  { %v6288_v10 = vadd.f32 %v7185_v32, %v6272_v12  ;;  %v6273_v61 = vmul.f32 %v7183_v26, %v6249_v38 }
 0x8f6   :  { %v6307_v19 = vrot.slane %v6306_v17, 4 }
 0x8f7   :  { %v6296_v33 = vmax.f32 %v6288_v10, 0.0  ;;  %v6289_v27 = vadd.f32 %v7185_v32, %v6273_v61 }
 0x8f8   :  { %v6253_v6 = vpop.f32.mrb[140].mxu0  ;;  %v6308_v9 = vadd.f32 %v6307_v19, %v6306_v17 }
 0x8f9   :  { %v6297_v14 = vmax.f32 %v6289_v27, 0.0  ;;  %v6254_v0 = vadd.f32 %v6253_v6, %v6189_v20  ;;  %v6255_v15 = vpop.f32.mrb[141].mxu0  ;;  %v6313_v30 = vsel %vm58_vm6, %v6296_v33, 0.0 }
 0x8fa   :  { %v6256_v18 = vpop.f32.mrb[142].mxu0  ;;  %v6309_v20 = vrot.slane %v6308_v9, 2 }
 0x8fb   :  { %v6314_v31 = vsel %vm58_vm6, %v6297_v14, 0.0  ;;  %v6274_v1 = vmul.f32 %v7183_v26, %v6254_v0  ;;  %v6257_v54 = vadd.f32 %v6256_v18, %v6192_v44  ;;  %v6258_v60 = vpop.f32.mrb[143].mxu0 }
 0x8fc   :  { %v6315_v51 = vadd.f32 %v6314_v31, %v6313_v30  ;;  %v6310_v25 = vadd.f32 %v6309_v20, %v6308_v9 }
 0x8fd   :  { %v6290_v55 = vadd.f32 %v7185_v32, %v6274_v1  ;;  %v6275_v46 = vmul.f32 %v7183_v26, %v6257_v54  ;;  %v6421_v26 = vld [vmem:[%s10710_s9] sm:$0xff] }
 0x8fe   :  { %v6311_v58 = vrot.slane %v6310_v25, 1 }
 0x8ff   :  { %v6298_v41 = vmax.f32 %v6290_v55, 0.0  ;;  %v6291_v28 = vadd.f32 %v7185_v32, %v6275_v46  ;;  %v6422_v32 = vld [vmem:[%s10710_s9 + $0x8] sm:$0xff]  ;;  %s8094_s9 = scalar_lea.vmem %s6515_s24, 32 }
 0x900   :  { %v6312_v39 = vadd.f32 %v6311_v58, %v6310_v25  ;;  %v7767_v37 = vpack.c.bf16 %v6422_v32, %v6421_v26  ;;  %p8095_p0 = scmp.ne.s32.totalorder %s6515_s24, %s8094_s9  ;;  %p8100_p2 = scmp.lt.s32.totalorder %s8094_s9, %s8094_s9 }
 0x901   :  { %v6316_v3 = vsel %vm58_vm6, %v6298_v41, 0.0  ;;  %v6299_v40 = vmax.f32 %v6291_v28, 0.0 }
 0x902   :  { %v6317_v36 = vadd.f32 %v6316_v3, %v6315_v51  ;;  %v6327_v52 = vmul.f32 0.03125, %v6312_v39  ;;  %p8101_p3 = por %p8100_p2, %p8099_p1 }
 0x903   :  { %v6318_v47 = vsel %vm58_vm6, %v6299_v40, 0.0 }
 0x904   :  { %v6319_v63 = vadd.f32 %v6318_v47, %v6317_v36  ;;  %p8102_p4 = pnand %p8101_p3, %p8095_p0 }
 0x906   :  { %v6320_v34 = vrot.slane %v6319_v63, 4 }
 0x908   :  { %v6321_v11 = vadd.f32 %v6320_v34, %v6319_v63 }
 0x90a   :  { %v6322_v44 = vrot.slane %v6321_v11, 2 }
 0x90c   :  { %v6323_v7 = vadd.f32 %v6322_v44, %v6321_v11 }
 0x90e   :  { %v6324_v23 = vrot.slane %v6323_v7, 1 }
 0x910   :  { %v6325_v53 = vadd.f32 %v6324_v23, %v6323_v7 }
 0x912   :  { %v6328_v50 = vmul.f32 0.03125, %v6325_v53 }
 0x914   :  { %v6347_v49 = vsel %vm6346_vm15, %v6328_v50, %v6327_v52 }
 0x915   :  { %7741 = vmatmul.mubr.msk.f32.vlgmr.msra.gmra.mrb[144].mxu0 %vm58_vm6, %v6347_v49 }
 0x916   :  { %7768 = vmatpush3.bf16.msra.mxu0 %v7767_v37  ;;  %7751 = vmatprep.mubr.msk.f32.mxu0 %vm8152_vm2, %v8118_v2 }
 0x917   :  { %7769 = vmatprep.subr.bf16.mxu0 %v8151_v57  ;;  %v7188_v57 = vld [vmem:[%s10711_s10] ss:$0 sm:$0xff] }
 0x91a   :  { %7771 = vmatpush3.bf16.msra.mxu0 %v7770_v59 }
 0x9e8   :  { %v6416_v24 = vpop.f32.mrb[144].mxu0 }
 0x9e9   :  { %v6417_v43 = vadd.f32 %v7186_v56, %v6416_v24  ;;  %v7742_v22 = vpop.f32.mrb[145].mxu0 }
 0x9eb   :  { %v6420_v2 = vmax.f32 %v6417_v43, 0.0 }
 0x9ed   :  { %7752 = vmatmul.mubr.msk.f32.vlgmr.msra.gmra.mrb[146].mxu0 %vm6432_vm0, %v6420_v2 }
 0xac0   :  { %v6502_v13 = vpop.f32.mrb[146].mxu0 }
 0xac1   :  { %v6503_v42 = vadd.f32 %v7188_v57, %v6502_v13  ;;  %v7753_v35 = vpop.f32.mrb[147].mxu0 }
 0xac3   :  { %6507 = vst.msk [vmem:[#allocation5] sm:$0x3] %vm6506_vm10, %v6503_v42 }
 0xac4   :  { %8105 = shalt.err (!%p8102_p4)
}
 0xac5   :  { %s8106_s28 = scalar_lea.hbm %s10712_s11, 32 }
 0xac6   :  { %p8107_p5 = scmp.ne.s32.totalorder %s10712_s11, %s8106_s28  ;;  %p8110_p6 = scmp.lt.u32.totalorder %s8106_s28, %s10712_s11 }
 0xac8   :  { %p8112_p7 = pnand %p8110_p6, %p8107_p5 }
 0xaca   :  { %8115 = shalt.err (!%p8112_p7)
}
 0xacb   :  { %6517 = dma.vmem_to_hbm [thread:$0]  %s6515_s24, 32, %s10712_s11, [#allocation6]  }
 0xacc   :  { %8116 = dma.done.wait [#allocation6], 32  }
 0xacd   :  { %8117 = vsyncadd [#allocation6], 4294967264 }
 0xace   :  { %6521 = vsyncpa [#allocation6], 1 }

</bundles_post_ra>
